<compile_context>
chip_gen: v7x
topology: tpu7x:2x2x1
jax: 0.10.0
libtpu: 0.0.40
codegen_flags: <defaults>
</compile_context>

<pallas_src>
import jax
import jax.numpy as jnp
from jax.experimental import pallas as pl
from jax.experimental.pallas import tpu as pltpu

_C = 32                  # hidden channels of every hetero-conv layer
_NUM_RES_LAYERS = 4
_NEG_LARGE = -3.0e38     # finite max-agg sentinel (avoids 0*inf -> NaN issues)
_MAX_CHUNK = 128         # source-chunk width for the running masked max


def _round_up(n, m):
    return ((n + m - 1) // m) * m


def _masked_max(mask, msg, has_nb):
    """Max-aggregate msg (N_src, C) onto destinations selected by 0/1 mask (N_dst, N_src).

    Running max over STATIC source chunks; the live intermediate is
    (N_dst, C, _MAX_CHUNK) with the reduce on the lane axis, instead of a full
    (N_dst, N_src, C) slab.  Destinations with no neighbors get 0 (PyG default).
    """
    n_dst, n_src = mask.shape
    c = msg.shape[-1]
    acc = jnp.full((n_dst, c), _NEG_LARGE, jnp.float32)
    for s0 in range(0, n_src, _MAX_CHUNK):
        blk = min(_MAX_CHUNK, n_src - s0)
        m = mask[:, s0:s0 + blk].astype(jnp.float32) > 0.0            # (n_dst, blk)
        v_t = msg[s0:s0 + blk, :].astype(jnp.float32).T               # (c, blk)
        masked = jnp.where(m[:, None, :], v_t[None, :, :], _NEG_LARGE)  # (n_dst, c, blk)
        acc = jnp.maximum(acc, jnp.max(masked, axis=-1))              # lane reduce
    return jnp.where(has_nb > 0.0, acc, 0.0)


# ----------------------------------------------------------------------------
# Fused Pallas kernel: local_head + 4 residual hetero-conv blocks + final ReLU.
# ----------------------------------------------------------------------------
def _semantic_module_kernel(
    xs_ref,         # (N_s, C_in)   stroke features, f32
    xb_ref,         # (N_b, C_in)   brep features, f32
    a_ss_ref,       # (N_s, 2*N_s)  [A_intersects_mean | A_temp_previous_add], bf16
    m_scop_ref,     # (N_s, N_s)    strokecoplanar 0/1 mask, bf16
    has_s_ref,      # (N_s, 1)      strokecoplanar has-neighbor flag, f32
    a_rb_ref,       # (N_b, N_s)    represented_by mean adjacency (stroke->brep), bf16
    m_bcop_ref,     # (N_b, N_b)    brepcoplanar 0/1 mask, bf16
    has_b_ref,      # (N_b, 1)      brepcoplanar has-neighbor flag, f32
    w0_s_ref,       # (C_in, 4*C)   layer-0 [W_int | W_prev | W_scop | W_rb]
    w0_b_ref,       # (C_in, C)     layer-0 W_bcop
    wres_s_ref,     # (L, C, 4*C)   residual-layer stroke-source weights
    wres_b_ref,     # (L, C, C)     residual-layer brep-source weights
    out_s_ref,      # (N_s, C)
    out_b_ref,      # (N_b, C)
):
    c = out_s_ref.shape[1]

    a_ss = a_ss_ref[...]
    m_scop = m_scop_ref[...]
    has_s = has_s_ref[...]
    a_rb = a_rb_ref[...]
    m_bcop = m_bcop_ref[...]
    has_b = has_b_ref[...]

    def hetero_conv(hs, hb, ws_cat, wb):
        # One fused message matmul for the 4 stroke-sourced relations (4*32 = 128 lanes).
        msg_s = jnp.dot(hs, ws_cat, preferred_element_type=jnp.float32)   # (N_s, 4C)
        msg_b = jnp.dot(hb, wb, preferred_element_type=jnp.float32)       # (N_b, C)

        # --- stroke destination ---------------------------------------------
        # mean(intersects) + add(temp_previous) fused into ONE bf16 adjacency
        # matmul over K = 2*N_s (adjacencies pre-concatenated in the wrapper).
        msg_stack = jnp.concatenate(
            [msg_s[:, 0:c].astype(jnp.bfloat16),
             msg_s[:, c:2 * c].astype(jnp.bfloat16)], axis=0)             # (2*N_s, C)
        agg_mean_add = jnp.dot(a_ss, msg_stack,
                               preferred_element_type=jnp.float32)        # (N_s, C)
        # max(strokecoplanar): chunked running max, no (N,N,C) materialization.
        agg_scop = _masked_max(m_scop, msg_s[:, 2 * c:3 * c], has_s)

        # --- brep destination --------------------------------------------------
        agg_rb = jnp.dot(a_rb, msg_s[:, 3 * c:4 * c].astype(jnp.bfloat16),
                         preferred_element_type=jnp.float32)              # (N_b, C)
        agg_bcop = _masked_max(m_bcop, msg_b, has_b)

        return agg_mean_add + agg_scop, agg_rb + agg_bcop

    # TODO(synk): exact GeneralHeteroConv / ResidualGeneralHeteroConvBlock sources are
    # not provided; assumed per-relation Linear(src, no bias) + {mean,add,max}
    # aggregation + sum over relations per destination type, with residual + ReLU
    # inside the residual blocks and no activation inside local_head.
    hs, hb = hetero_conv(xs_ref[...], xb_ref[...], w0_s_ref[...], w0_b_ref[...])

    for l in range(_NUM_RES_LAYERS):           # unrolled: static weight slabs
        ds, db = hetero_conv(hs, hb, wres_s_ref[l], wres_b_ref[l])
        hs = jax.nn.relu(hs + ds)
        hb = jax.nn.relu(hb + db)

    # final {key: x.relu()} of the module forward (idempotent here, kept for fidelity).
    out_s_ref[...] = jax.nn.relu(hs)
    out_b_ref[...] = jax.nn.relu(hb)


# ----------------------------------------------------------------------------
# Plain-JAX glue: params, dense adjacency construction (data-dependent scatter),
# padding, and the pallas_call wrapper.
# ----------------------------------------------------------------------------
def init_params(key, in_channels=6, channels=_C, num_layers=_NUM_RES_LAYERS):
    ks = jax.random.split(key, 2 + 2 * num_layers)

    def lin_w(k, fan_in, fan_out):
        bound = float(fan_in) ** -0.5
        return jax.random.uniform(k, (fan_in, fan_out), jnp.float32, -bound, bound)

    # stroke-sourced relations concatenated along the output (lane) dimension:
    #   [intersects_mean | temp_previous_add | strokecoplanar_max | represented_by_mean]
    return {
        "w0_s": lin_w(ks[0], in_channels, 4 * channels),
        "w0_b": lin_w(ks[1], in_channels, channels),          # brepcoplanar_max
        "wres_s": jnp.stack([lin_w(ks[2 + 2 * l], channels, 4 * channels)
                             for l in range(num_layers)]),
        "wres_b": jnp.stack([lin_w(ks[3 + 2 * l], channels, channels)
                             for l in range(num_layers)]),
    }


def _dense_adjacency(edges, n_dst_pad, n_src_pad):
    """A[d, s] = multiplicity of edge s -> d (destination-major for left-matmul agg)."""
    src, dst = edges[0], edges[1]
    a = jnp.zeros((n_dst_pad, n_src_pad), jnp.float32)
    return a.at[dst, src].add(1.0)


def _prepare_operands(x_dict, edge_index_dict):
    xs = x_dict["stroke"].astype(jnp.float32)
    xb = x_dict["brep"].astype(jnp.float32)
    n_s, n_b = xs.shape[0], xb.shape[0]
    # Pad node counts to a multiple of 16 (bf16 sublane tile) so every in-kernel
    # sublane slice / concatenation stays tile-aligned.
    n_sp, n_bp = _round_up(n_s, 16), _round_up(n_b, 16)
    xs_p = jnp.pad(xs, ((0, n_sp - n_s), (0, 0)))
    xb_p = jnp.pad(xb, ((0, n_bp - n_b), (0, 0)))

    e_int = edge_index_dict[("stroke", "intersects", "stroke")]
    e_prev = edge_index_dict[("stroke", "temp_previous", "stroke")]
    e_scop = edge_index_dict[("stroke", "strokecoplanar", "stroke")]
    e_rb = edge_index_dict[("stroke", "represented_by", "brep")]
    e_bcop = edge_index_dict[("brep", "brepcoplanar", "brep")]

    a_int = _dense_adjacency(e_int, n_sp, n_sp)
    a_int_mean = a_int / jnp.maximum(a_int.sum(axis=1, keepdims=True), 1.0)
    a_prev_add = _dense_adjacency(e_prev, n_sp, n_sp)
    # mean + add fused: single (N_s, 2*N_s) bf16 adjacency -> one MXU pass in-kernel.
    a_ss = jnp.concatenate([a_int_mean, a_prev_add], axis=1).astype(jnp.bfloat16)

    a_scop = _dense_adjacency(e_scop, n_sp, n_sp)
    m_scop = (a_scop > 0.0).astype(jnp.bfloat16)
    has_s = (a_scop.sum(axis=1, keepdims=True) > 0.0).astype(jnp.float32)

    a_rb = _dense_adjacency(e_rb, n_bp, n_sp)
    a_rb_mean = (a_rb / jnp.maximum(a_rb.sum(axis=1, keepdims=True), 1.0)).astype(jnp.bfloat16)

    a_bcop = _dense_adjacency(e_bcop, n_bp, n_bp)
    m_bcop = (a_bcop > 0.0).astype(jnp.bfloat16)
    has_b = (a_bcop.sum(axis=1, keepdims=True) > 0.0).astype(jnp.float32)

    return (xs_p, xb_p, a_ss, m_scop, has_s, a_rb_mean, m_bcop, has_b), (n_s, n_b, n_sp, n_bp)


def semantic_module_forward(x_dict, edge_index_dict, params):
    graph_ops, (n_s, n_b, n_sp, n_bp) = _prepare_operands(x_dict, edge_index_dict)
    operands = graph_ops + (params["w0_s"], params["w0_b"],
                            params["wres_s"], params["wres_b"])

    c_in = params["w0_s"].shape[0]
    n_layers_total = 1 + _NUM_RES_LAYERS
    flops = int(
        2 * n_sp * c_in * 4 * _C + 2 * n_bp * c_in * _C                    # layer-0 messages
        + _NUM_RES_LAYERS * (2 * n_sp * _C * 4 * _C + 2 * n_bp * _C * _C)  # residual messages
        + n_layers_total * (2 * n_sp * (2 * n_sp) * _C + 2 * n_bp * n_sp * _C)  # adj matmuls
        + n_layers_total * (n_sp * n_sp * _C + n_bp * n_bp * _C)           # max-agg compares
    )
    in_bytes = int(sum(int(x.size) * x.dtype.itemsize for x in operands))
    out_bytes = (n_sp + n_bp) * _C * 4
    # Whole problem is VMEM-resident for this grid-free call; leave headroom but
    # stay within every generation's physical VMEM (v7x = 64 MiB / TC).
    vmem_limit = int(max(32 * 1024 * 1024,
                         min(60 * 1024 * 1024, 2 * (in_bytes + out_bytes) + (1 << 20))))

    vmem = pl.BlockSpec(memory_space=pltpu.MemorySpace.VMEM)
    out_s, out_b = pl.pallas_call(
        _semantic_module_kernel,
        out_shape=(jax.ShapeDtypeStruct((n_sp, _C), jnp.float32),
                   jax.ShapeDtypeStruct((n_bp, _C), jnp.float32)),
        in_specs=[vmem] * len(operands),
        out_specs=(vmem, vmem),
        compiler_params=pltpu.CompilerParams(vmem_limit_bytes=vmem_limit),
        cost_estimate=pl.CostEstimate(flops=flops, transcendentals=0,
                                      bytes_accessed=in_bytes + out_bytes),
    )(*operands)
    return {"stroke": out_s[:n_s], "brep": out_b[:n_b]}


def semantic_module_reference(x_dict, edge_index_dict, params):
    """Plain-JAX reference with identical math (same bf16 graph operands)."""
    (xs_p, xb_p, a_ss, m_scop, has_s, a_rb, m_bcop, has_b), (n_s, n_b, _, _) = \
        _prepare_operands(x_dict, edge_index_dict)
    hi = jax.lax.Precision.HIGHEST

    def conv(hs, hb, ws_cat, wb):
        msg_s = jnp.dot(hs, ws_cat, preferred_element_type=jnp.float32, precision=hi)
        msg_b = jnp.dot(hb, wb, preferred_element_type=jnp.float32, precision=hi)
        stack = jnp.concatenate([msg_s[:, 0:_C].astype(jnp.bfloat16),
                                 msg_s[:, _C:2 * _C].astype(jnp.bfloat16)], axis=0)
        agg_ma = jnp.dot(a_ss, stack, preferred_element_type=jnp.float32)
        agg_scop = _masked_max(m_scop, msg_s[:, 2 * _C:3 * _C], has_s)
        agg_rb = jnp.dot(a_rb, msg_s[:, 3 * _C:4 * _C].astype(jnp.bfloat16),
                         preferred_element_type=jnp.float32)
        agg_bcop = _masked_max(m_bcop, msg_b, has_b)
        return agg_ma + agg_scop, agg_rb + agg_bcop

    hs, hb = conv(xs_p, xb_p, params["w0_s"], params["w0_b"])
    for l in range(_NUM_RES_LAYERS):
        ds, db = conv(hs, hb, params["wres_s"][l], params["wres_b"][l])
        hs = jax.nn.relu(hs + ds)
        hb = jax.nn.relu(hb + db)
    return {"stroke": jax.nn.relu(hs)[:n_s], "brep": jax.nn.relu(hb)[:n_b]}


if __name__ == "__main__":
    key = jax.random.PRNGKey(0)
    k_par, k_xs, k_xb, k_e1, k_e2, k_e3, k_e4 = jax.random.split(key, 7)

    N_STROKE, N_BREP, IN_CH = 16, 8, 6
    params = init_params(k_par, in_channels=IN_CH)

    x_dict = {
        "stroke": jax.random.normal(k_xs, (N_STROKE, IN_CH), jnp.float32),
        "brep": jax.random.normal(k_xb, (N_BREP, IN_CH), jnp.float32),
    }

    def rand_edges(k, n_src, n_dst, n_edges):
        ks, kd = jax.random.split(k)
        src = jax.random.randint(ks, (n_edges,), 0, n_src)
        dst = jax.random.randint(kd, (n_edges,), 0, n_dst)
        return jnp.stack([src, dst], axis=0).astype(jnp.int32)

    edge_index_dict = {
        ("stroke", "intersects", "stroke"): rand_edges(k_e1, N_STROKE, N_STROKE, 40),
        ("stroke", "temp_previous", "stroke"): jnp.stack(
            [jnp.arange(N_STROKE - 1), jnp.arange(1, N_STROKE)], axis=0).astype(jnp.int32),
        ("stroke", "strokecoplanar", "stroke"): rand_edges(k_e2, N_STROKE, N_STROKE, 30),
        ("stroke", "represented_by", "brep"): rand_edges(k_e3, N_STROKE, N_BREP, 10),
        ("brep", "brepcoplanar", "brep"): rand_edges(k_e4, N_BREP, N_BREP, 12),
    }

    out = semantic_module_forward(x_dict, edge_index_dict, params)
    out = jax.block_until_ready(out)

    ref = semantic_module_reference(x_dict, edge_index_dict, params)
    for name in ("stroke", "brep"):
        assert out[name].shape == ref[name].shape
        assert out[name].dtype == jnp.float32
        assert bool(jnp.all(jnp.isfinite(out[name])))
        assert bool(jnp.allclose(out[name], ref[name], rtol=5e-2, atol=5e-2)), name
    print("KERNEL_OK")
</pallas_src>

<mosaic_0001>
module attributes {stable_mosaic.version = 11 : i64} {
  func.func @_semantic_module_kernel(%arg0: memref<16x6xf32, #tpu.memory_space<vmem>>, %arg1: memref<16x6xf32, #tpu.memory_space<vmem>>, %arg2: memref<16x32xbf16, #tpu.memory_space<vmem>>, %arg3: memref<16x16xbf16, #tpu.memory_space<vmem>>, %arg4: memref<16x1xf32, #tpu.memory_space<vmem>>, %arg5: memref<16x16xbf16, #tpu.memory_space<vmem>>, %arg6: memref<16x16xbf16, #tpu.memory_space<vmem>>, %arg7: memref<16x1xf32, #tpu.memory_space<vmem>>, %arg8: memref<6x128xf32, #tpu.memory_space<vmem>>, %arg9: memref<6x32xf32, #tpu.memory_space<vmem>>, %arg10: memref<4x32x128xf32, #tpu.memory_space<vmem>>, %arg11: memref<4x32x32xf32, #tpu.memory_space<vmem>>, %arg12: memref<16x32xf32, #tpu.memory_space<vmem>>, %arg13: memref<16x32xf32, #tpu.memory_space<vmem>>) attributes {dimension_semantics = [], scalar_prefetch = 0 : i64, scratch_operands = 0 : i64, tpu.core_type = #tpu.core_type<tc>} {
    %c0 = arith.constant 0 : index
    %c0_0 = arith.constant 0 : index
    %0 = vector.load %arg2[%c0, %c0_0] : memref<16x32xbf16, #tpu.memory_space<vmem>>, vector<16x32xbf16>
    %c0_1 = arith.constant 0 : index
    %c0_2 = arith.constant 0 : index
    %1 = vector.load %arg3[%c0_1, %c0_2] : memref<16x16xbf16, #tpu.memory_space<vmem>>, vector<16x16xbf16>
    %c0_3 = arith.constant 0 : index
    %c0_4 = arith.constant 0 : index
    %2 = vector.load %arg4[%c0_3, %c0_4] : memref<16x1xf32, #tpu.memory_space<vmem>>, vector<16x1xf32>
    %c0_5 = arith.constant 0 : index
    %c0_6 = arith.constant 0 : index
    %3 = vector.load %arg5[%c0_5, %c0_6] : memref<16x16xbf16, #tpu.memory_space<vmem>>, vector<16x16xbf16>
    %c0_7 = arith.constant 0 : index
    %c0_8 = arith.constant 0 : index
    %4 = vector.load %arg6[%c0_7, %c0_8] : memref<16x16xbf16, #tpu.memory_space<vmem>>, vector<16x16xbf16>
    %c0_9 = arith.constant 0 : index
    %c0_10 = arith.constant 0 : index
    %5 = vector.load %arg7[%c0_9, %c0_10] : memref<16x1xf32, #tpu.memory_space<vmem>>, vector<16x1xf32>
    %c0_11 = arith.constant 0 : index
    %c0_12 = arith.constant 0 : index
    %6 = vector.load %arg0[%c0_11, %c0_12] : memref<16x6xf32, #tpu.memory_space<vmem>>, vector<16x6xf32>
    %c0_13 = arith.constant 0 : index
    %c0_14 = arith.constant 0 : index
    %7 = vector.load %arg1[%c0_13, %c0_14] : memref<16x6xf32, #tpu.memory_space<vmem>>, vector<16x6xf32>
    %c0_15 = arith.constant 0 : index
    %c0_16 = arith.constant 0 : index
    %8 = vector.load %arg8[%c0_15, %c0_16] : memref<6x128xf32, #tpu.memory_space<vmem>>, vector<6x128xf32>
    %c0_17 = arith.constant 0 : index
    %c0_18 = arith.constant 0 : index
    %9 = vector.load %arg9[%c0_17, %c0_18] : memref<6x32xf32, #tpu.memory_space<vmem>>, vector<6x32xf32>
    %cst = arith.constant dense<0.000000e+00> : vector<16x128xf32>
    %10 = tpu.matmul %6, %8, %cst {dimension_numbers = #tpu.dot_dimension_numbers<[1], [0], [0], [1], [0, 0, 1, 1], [], []>} : vector<16x6xf32>, vector<6x128xf32>, vector<16x128xf32> -> vector<16x128xf32>
    %cst_19 = arith.constant dense<0.000000e+00> : vector<16x32xf32>
    %11 = tpu.matmul %7, %9, %cst_19 {dimension_numbers = #tpu.dot_dimension_numbers<[1], [0], [0], [1], [0, 0, 1, 1], [], []>} : vector<16x6xf32>, vector<6x32xf32>, vector<16x32xf32> -> vector<16x32xf32>
    %12 = vector.extract_strided_slice %10 {offsets = [0, 0], sizes = [16, 32], strides = [1, 1]} : vector<16x128xf32> to vector<16x32xf32>
    %13 = arith.truncf %12 : vector<16x32xf32> to vector<16x32xbf16>
    %14 = vector.extract_strided_slice %10 {offsets = [0, 32], sizes = [16, 32], strides = [1, 1]} : vector<16x128xf32> to vector<16x32xf32>
    %15 = arith.truncf %14 : vector<16x32xf32> to vector<16x32xbf16>
    %16 = tpu.concatenate %13, %15 in 0 : vector<16x32xbf16>, vector<16x32xbf16> -> vector<32x32xbf16>
    %cst_20 = arith.constant dense<0.000000e+00> : vector<16x32xf32>
    %17 = tpu.matmul %0, %16, %cst_20 {dimension_numbers = #tpu.dot_dimension_numbers<[1], [0], [0], [1], [0, 0, 1, 1], [], []>} : vector<16x32xbf16>, vector<32x32xbf16>, vector<16x32xf32> -> vector<16x32xf32>
    %18 = vector.extract_strided_slice %10 {offsets = [0, 64], sizes = [16, 32], strides = [1, 1]} : vector<16x128xf32> to vector<16x32xf32>
    %cst_21 = arith.constant -3.000000e+38 : f32
    %19 = vector.broadcast %cst_21 : f32 to vector<16x32xf32>
    %20 = arith.extf %1 : vector<16x16xbf16> to vector<16x16xf32>
    %cst_22 = arith.constant 0.000000e+00 : f32
    %21 = vector.broadcast %cst_22 : f32 to vector<16x16xf32>
    %22 = arith.cmpf ogt, %20, %21 : vector<16x16xf32>
    %23 = tpu.transpose %18, [1, 0] : vector<16x32xf32> -> vector<32x16xf32>
    %24 = vector.shape_cast %22 : vector<16x16xi1> to vector<16x1x16xi1>
    %25 = vector.shape_cast %23 : vector<32x16xf32> to vector<1x32x16xf32>
    %cst_23 = arith.constant -3.000000e+38 : f32
    %26 = vector.shape_cast %24 : vector<16x1x16xi1> to vector<16x1x16xi1>
    %27 = vector.broadcast %26 : vector<16x1x16xi1> to vector<16x32x16xi1>
    %28 = vector.shape_cast %25 : vector<1x32x16xf32> to vector<1x32x16xf32>
    %29 = vector.broadcast %28 : vector<1x32x16xf32> to vector<16x32x16xf32>
    %30 = vector.broadcast %cst_23 : f32 to vector<16x32x16xf32>
    %31 = arith.select %27, %29, %30 : vector<16x32x16xi1>, vector<16x32x16xf32>
    %cst_24 = arith.constant dense<0xFF800000> : vector<16x32xf32>
    %32 = vector.multi_reduction <maximumf>, %31, %cst_24 [2] : vector<16x32x16xf32> to vector<16x32xf32>
    %33 = arith.maximumf %19, %32 : vector<16x32xf32>
    %cst_25 = arith.constant 0.000000e+00 : f32
    %34 = vector.broadcast %cst_25 : f32 to vector<16x1xf32>
    %35 = arith.cmpf ogt, %2, %34 : vector<16x1xf32>
    %cst_26 = arith.constant 0.000000e+00 : f32
    %36 = vector.shape_cast %35 : vector<16x1xi1> to vector<16x1xi1>
    %37 = vector.broadcast %36 : vector<16x1xi1> to vector<16x32xi1>
    %38 = vector.broadcast %cst_26 : f32 to vector<16x32xf32>
    %39 = arith.select %37, %33, %38 : vector<16x32xi1>, vector<16x32xf32>
    %40 = vector.extract_strided_slice %10 {offsets = [0, 96], sizes = [16, 32], strides = [1, 1]} : vector<16x128xf32> to vector<16x32xf32>
    %41 = arith.truncf %40 : vector<16x32xf32> to vector<16x32xbf16>
    %cst_27 = arith.constant dense<0.000000e+00> : vector<16x32xf32>
    %42 = tpu.matmul %3, %41, %cst_27 {dimension_numbers = #tpu.dot_dimension_numbers<[1], [0], [0], [1], [0, 0, 1, 1], [], []>} : vector<16x16xbf16>, vector<16x32xbf16>, vector<16x32xf32> -> vector<16x32xf32>
    %cst_28 = arith.constant -3.000000e+38 : f32
    %43 = vector.broadcast %cst_28 : f32 to vector<16x32xf32>
    %44 = arith.extf %4 : vector<16x16xbf16> to vector<16x16xf32>
    %cst_29 = arith.constant 0.000000e+00 : f32
    %45 = vector.broadcast %cst_29 : f32 to vector<16x16xf32>
    %46 = arith.cmpf ogt, %44, %45 : vector<16x16xf32>
    %47 = tpu.transpose %11, [1, 0] : vector<16x32xf32> -> vector<32x16xf32>
    %48 = vector.shape_cast %46 : vector<16x16xi1> to vector<16x1x16xi1>
    %49 = vector.shape_cast %47 : vector<32x16xf32> to vector<1x32x16xf32>
    %cst_30 = arith.constant -3.000000e+38 : f32
    %50 = vector.shape_cast %48 : vector<16x1x16xi1> to vector<16x1x16xi1>
    %51 = vector.broadcast %50 : vector<16x1x16xi1> to vector<16x32x16xi1>
    %52 = vector.shape_cast %49 : vector<1x32x16xf32> to vector<1x32x16xf32>
    %53 = vector.broadcast %52 : vector<1x32x16xf32> to vector<16x32x16xf32>
    %54 = vector.broadcast %cst_30 : f32 to vector<16x32x16xf32>
    %55 = arith.select %51, %53, %54 : vector<16x32x16xi1>, vector<16x32x16xf32>
    %cst_31 = arith.constant dense<0xFF800000> : vector<16x32xf32>
    %56 = vector.multi_reduction <maximumf>, %55, %cst_31 [2] : vector<16x32x16xf32> to vector<16x32xf32>
    %57 = arith.maximumf %43, %56 : vector<16x32xf32>
    %cst_32 = arith.constant 0.000000e+00 : f32
    %58 = vector.broadcast %cst_32 : f32 to vector<16x1xf32>
    %59 = arith.cmpf ogt, %5, %58 : vector<16x1xf32>
    %cst_33 = arith.constant 0.000000e+00 : f32
    %60 = vector.shape_cast %59 : vector<16x1xi1> to vector<16x1xi1>
    %61 = vector.broadcast %60 : vector<16x1xi1> to vector<16x32xi1>
    %62 = vector.broadcast %cst_33 : f32 to vector<16x32xf32>
    %63 = arith.select %61, %57, %62 : vector<16x32xi1>, vector<16x32xf32>
    %64 = arith.addf %17, %39 : vector<16x32xf32>
    %65 = arith.addf %42, %63 : vector<16x32xf32>
    %c0_34 = arith.constant 0 : index
    %c0_35 = arith.constant 0 : index
    %c0_36 = arith.constant 0 : index
    %66 = vector.load %arg10[%c0_34, %c0_35, %c0_36] : memref<4x32x128xf32, #tpu.memory_space<vmem>>, vector<1x32x128xf32>
    %67 = vector.shape_cast %66 : vector<1x32x128xf32> to vector<32x128xf32>
    %c0_37 = arith.constant 0 : index
    %c0_38 = arith.constant 0 : index
    %c0_39 = arith.constant 0 : index
    %68 = vector.load %arg11[%c0_37, %c0_38, %c0_39] : memref<4x32x32xf32, #tpu.memory_space<vmem>>, vector<1x32x32xf32>
    %69 = vector.shape_cast %68 : vector<1x32x32xf32> to vector<32x32xf32>
    %cst_40 = arith.constant dense<0.000000e+00> : vector<16x128xf32>
    %70 = tpu.matmul %64, %67, %cst_40 {dimension_numbers = #tpu.dot_dimension_numbers<[1], [0], [0], [1], [0, 0, 1, 1], [], []>} : vector<16x32xf32>, vector<32x128xf32>, vector<16x128xf32> -> vector<16x128xf32>
    %cst_41 = arith.constant dense<0.000000e+00> : vector<16x32xf32>
    %71 = tpu.matmul %65, %69, %cst_41 {dimension_numbers = #tpu.dot_dimension_numbers<[1], [0], [0], [1], [0, 0, 1, 1], [], []>} : vector<16x32xf32>, vector<32x32xf32>, vector<16x32xf32> -> vector<16x32xf32>
    %72 = vector.extract_strided_slice %70 {offsets = [0, 0], sizes = [16, 32], strides = [1, 1]} : vector<16x128xf32> to vector<16x32xf32>
    %73 = arith.truncf %72 : vector<16x32xf32> to vector<16x32xbf16>
    %74 = vector.extract_strided_slice %70 {offsets = [0, 32], sizes = [16, 32], strides = [1, 1]} : vector<16x128xf32> to vector<16x32xf32>
    %75 = arith.truncf %74 : vector<16x32xf32> to vector<16x32xbf16>
    %76 = tpu.concatenate %73, %75 in 0 : vector<16x32xbf16>, vector<16x32xbf16> -> vector<32x32xbf16>
    %cst_42 = arith.constant dense<0.000000e+00> : vector<16x32xf32>
    %77 = tpu.matmul %0, %76, %cst_42 {dimension_numbers = #tpu.dot_dimension_numbers<[1], [0], [0], [1], [0, 0, 1, 1], [], []>} : vector<16x32xbf16>, vector<32x32xbf16>, vector<16x32xf32> -> vector<16x32xf32>
    %78 = vector.extract_strided_slice %70 {offsets = [0, 64], sizes = [16, 32], strides = [1, 1]} : vector<16x128xf32> to vector<16x32xf32>
    %cst_43 = arith.constant -3.000000e+38 : f32
    %79 = vector.broadcast %cst_43 : f32 to vector<16x32xf32>
    %80 = arith.extf %1 : vector<16x16xbf16> to vector<16x16xf32>
    %cst_44 = arith.constant 0.000000e+00 : f32
    %81 = vector.broadcast %cst_44 : f32 to vector<16x16xf32>
    %82 = arith.cmpf ogt, %80, %81 : vector<16x16xf32>
    %83 = tpu.transpose %78, [1, 0] : vector<16x32xf32> -> vector<32x16xf32>
    %84 = vector.shape_cast %82 : vector<16x16xi1> to vector<16x1x16xi1>
    %85 = vector.shape_cast %83 : vector<32x16xf32> to vector<1x32x16xf32>
    %cst_45 = arith.constant -3.000000e+38 : f32
    %86 = vector.shape_cast %84 : vector<16x1x16xi1> to vector<16x1x16xi1>
    %87 = vector.broadcast %86 : vector<16x1x16xi1> to vector<16x32x16xi1>
    %88 = vector.shape_cast %85 : vector<1x32x16xf32> to vector<1x32x16xf32>
    %89 = vector.broadcast %88 : vector<1x32x16xf32> to vector<16x32x16xf32>
    %90 = vector.broadcast %cst_45 : f32 to vector<16x32x16xf32>
    %91 = arith.select %87, %89, %90 : vector<16x32x16xi1>, vector<16x32x16xf32>
    %cst_46 = arith.constant dense<0xFF800000> : vector<16x32xf32>
    %92 = vector.multi_reduction <maximumf>, %91, %cst_46 [2] : vector<16x32x16xf32> to vector<16x32xf32>
    %93 = arith.maximumf %79, %92 : vector<16x32xf32>
    %cst_47 = arith.constant 0.000000e+00 : f32
    %94 = vector.broadcast %cst_47 : f32 to vector<16x1xf32>
    %95 = arith.cmpf ogt, %2, %94 : vector<16x1xf32>
    %cst_48 = arith.constant 0.000000e+00 : f32
    %96 = vector.shape_cast %95 : vector<16x1xi1> to vector<16x1xi1>
    %97 = vector.broadcast %96 : vector<16x1xi1> to vector<16x32xi1>
    %98 = vector.broadcast %cst_48 : f32 to vector<16x32xf32>
    %99 = arith.select %97, %93, %98 : vector<16x32xi1>, vector<16x32xf32>
    %100 = vector.extract_strided_slice %70 {offsets = [0, 96], sizes = [16, 32], strides = [1, 1]} : vector<16x128xf32> to vector<16x32xf32>
    %101 = arith.truncf %100 : vector<16x32xf32> to vector<16x32xbf16>
    %cst_49 = arith.constant dense<0.000000e+00> : vector<16x32xf32>
    %102 = tpu.matmul %3, %101, %cst_49 {dimension_numbers = #tpu.dot_dimension_numbers<[1], [0], [0], [1], [0, 0, 1, 1], [], []>} : vector<16x16xbf16>, vector<16x32xbf16>, vector<16x32xf32> -> vector<16x32xf32>
    %cst_50 = arith.constant -3.000000e+38 : f32
    %103 = vector.broadcast %cst_50 : f32 to vector<16x32xf32>
    %104 = arith.extf %4 : vector<16x16xbf16> to vector<16x16xf32>
    %cst_51 = arith.constant 0.000000e+00 : f32
    %105 = vector.broadcast %cst_51 : f32 to vector<16x16xf32>
    %106 = arith.cmpf ogt, %104, %105 : vector<16x16xf32>
    %107 = tpu.transpose %71, [1, 0] : vector<16x32xf32> -> vector<32x16xf32>
    %108 = vector.shape_cast %106 : vector<16x16xi1> to vector<16x1x16xi1>
    %109 = vector.shape_cast %107 : vector<32x16xf32> to vector<1x32x16xf32>
    %cst_52 = arith.constant -3.000000e+38 : f32
    %110 = vector.shape_cast %108 : vector<16x1x16xi1> to vector<16x1x16xi1>
    %111 = vector.broadcast %110 : vector<16x1x16xi1> to vector<16x32x16xi1>
    %112 = vector.shape_cast %109 : vector<1x32x16xf32> to vector<1x32x16xf32>
    %113 = vector.broadcast %112 : vector<1x32x16xf32> to vector<16x32x16xf32>
    %114 = vector.broadcast %cst_52 : f32 to vector<16x32x16xf32>
    %115 = arith.select %111, %113, %114 : vector<16x32x16xi1>, vector<16x32x16xf32>
    %cst_53 = arith.constant dense<0xFF800000> : vector<16x32xf32>
    %116 = vector.multi_reduction <maximumf>, %115, %cst_53 [2] : vector<16x32x16xf32> to vector<16x32xf32>
    %117 = arith.maximumf %103, %116 : vector<16x32xf32>
    %cst_54 = arith.constant 0.000000e+00 : f32
    %118 = vector.broadcast %cst_54 : f32 to vector<16x1xf32>
    %119 = arith.cmpf ogt, %5, %118 : vector<16x1xf32>
    %cst_55 = arith.constant 0.000000e+00 : f32
    %120 = vector.shape_cast %119 : vector<16x1xi1> to vector<16x1xi1>
    %121 = vector.broadcast %120 : vector<16x1xi1> to vector<16x32xi1>
    %122 = vector.broadcast %cst_55 : f32 to vector<16x32xf32>
    %123 = arith.select %121, %117, %122 : vector<16x32xi1>, vector<16x32xf32>
    %124 = arith.addf %77, %99 : vector<16x32xf32>
    %125 = arith.addf %102, %123 : vector<16x32xf32>
    %126 = arith.addf %64, %124 : vector<16x32xf32>
    %cst_56 = arith.constant 0.000000e+00 : f32
    %127 = vector.broadcast %cst_56 : f32 to vector<16x32xf32>
    %128 = arith.maximumf %126, %127 : vector<16x32xf32>
    %129 = arith.addf %65, %125 : vector<16x32xf32>
    %cst_57 = arith.constant 0.000000e+00 : f32
    %130 = vector.broadcast %cst_57 : f32 to vector<16x32xf32>
    %131 = arith.maximumf %129, %130 : vector<16x32xf32>
    %c1 = arith.constant 1 : index
    %c0_58 = arith.constant 0 : index
    %c0_59 = arith.constant 0 : index
    %132 = vector.load %arg10[%c1, %c0_58, %c0_59] : memref<4x32x128xf32, #tpu.memory_space<vmem>>, vector<1x32x128xf32>
    %133 = vector.shape_cast %132 : vector<1x32x128xf32> to vector<32x128xf32>
    %c1_60 = arith.constant 1 : index
    %c0_61 = arith.constant 0 : index
    %c0_62 = arith.constant 0 : index
    %134 = vector.load %arg11[%c1_60, %c0_61, %c0_62] : memref<4x32x32xf32, #tpu.memory_space<vmem>>, vector<1x32x32xf32>
    %135 = vector.shape_cast %134 : vector<1x32x32xf32> to vector<32x32xf32>
    %cst_63 = arith.constant dense<0.000000e+00> : vector<16x128xf32>
    %136 = tpu.matmul %128, %133, %cst_63 {dimension_numbers = #tpu.dot_dimension_numbers<[1], [0], [0], [1], [0, 0, 1, 1], [], []>} : vector<16x32xf32>, vector<32x128xf32>, vector<16x128xf32> -> vector<16x128xf32>
    %cst_64 = arith.constant dense<0.000000e+00> : vector<16x32xf32>
    %137 = tpu.matmul %131, %135, %cst_64 {dimension_numbers = #tpu.dot_dimension_numbers<[1], [0], [0], [1], [0, 0, 1, 1], [], []>} : vector<16x32xf32>, vector<32x32xf32>, vector<16x32xf32> -> vector<16x32xf32>
    %138 = vector.extract_strided_slice %136 {offsets = [0, 0], sizes = [16, 32], strides = [1, 1]} : vector<16x128xf32> to vector<16x32xf32>
    %139 = arith.truncf %138 : vector<16x32xf32> to vector<16x32xbf16>
    %140 = vector.extract_strided_slice %136 {offsets = [0, 32], sizes = [16, 32], strides = [1, 1]} : vector<16x128xf32> to vector<16x32xf32>
    %141 = arith.truncf %140 : vector<16x32xf32> to vector<16x32xbf16>
    %142 = tpu.concatenate %139, %141 in 0 : vector<16x32xbf16>, vector<16x32xbf16> -> vector<32x32xbf16>
    %cst_65 = arith.constant dense<0.000000e+00> : vector<16x32xf32>
    %143 = tpu.matmul %0, %142, %cst_65 {dimension_numbers = #tpu.dot_dimension_numbers<[1], [0], [0], [1], [0, 0, 1, 1], [], []>} : vector<16x32xbf16>, vector<32x32xbf16>, vector<16x32xf32> -> vector<16x32xf32>
    %144 = vector.extract_strided_slice %136 {offsets = [0, 64], sizes = [16, 32], strides = [1, 1]} : vector<16x128xf32> to vector<16x32xf32>
    %cst_66 = arith.constant -3.000000e+38 : f32
    %145 = vector.broadcast %cst_66 : f32 to vector<16x32xf32>
    %146 = arith.extf %1 : vector<16x16xbf16> to vector<16x16xf32>
    %cst_67 = arith.constant 0.000000e+00 : f32
    %147 = vector.broadcast %cst_67 : f32 to vector<16x16xf32>
    %148 = arith.cmpf ogt, %146, %147 : vector<16x16xf32>
    %149 = tpu.transpose %144, [1, 0] : vector<16x32xf32> -> vector<32x16xf32>
    %150 = vector.shape_cast %148 : vector<16x16xi1> to vector<16x1x16xi1>
    %151 = vector.shape_cast %149 : vector<32x16xf32> to vector<1x32x16xf32>
    %cst_68 = arith.constant -3.000000e+38 : f32
    %152 = vector.shape_cast %150 : vector<16x1x16xi1> to vector<16x1x16xi1>
    %153 = vector.broadcast %152 : vector<16x1x16xi1> to vector<16x32x16xi1>
    %154 = vector.shape_cast %151 : vector<1x32x16xf32> to vector<1x32x16xf32>
    %155 = vector.broadcast %154 : vector<1x32x16xf32> to vector<16x32x16xf32>
    %156 = vector.broadcast %cst_68 : f32 to vector<16x32x16xf32>
    %157 = arith.select %153, %155, %156 : vector<16x32x16xi1>, vector<16x32x16xf32>
    %cst_69 = arith.constant dense<0xFF800000> : vector<16x32xf32>
    %158 = vector.multi_reduction <maximumf>, %157, %cst_69 [2] : vector<16x32x16xf32> to vector<16x32xf32>
    %159 = arith.maximumf %145, %158 : vector<16x32xf32>
    %cst_70 = arith.constant 0.000000e+00 : f32
    %160 = vector.broadcast %cst_70 : f32 to vector<16x1xf32>
    %161 = arith.cmpf ogt, %2, %160 : vector<16x1xf32>
    %cst_71 = arith.constant 0.000000e+00 : f32
    %162 = vector.shape_cast %161 : vector<16x1xi1> to vector<16x1xi1>
    %163 = vector.broadcast %162 : vector<16x1xi1> to vector<16x32xi1>
    %164 = vector.broadcast %cst_71 : f32 to vector<16x32xf32>
    %165 = arith.select %163, %159, %164 : vector<16x32xi1>, vector<16x32xf32>
    %166 = vector.extract_strided_slice %136 {offsets = [0, 96], sizes = [16, 32], strides = [1, 1]} : vector<16x128xf32> to vector<16x32xf32>
    %167 = arith.truncf %166 : vector<16x32xf32> to vector<16x32xbf16>
    %cst_72 = arith.constant dense<0.000000e+00> : vector<16x32xf32>
    %168 = tpu.matmul %3, %167, %cst_72 {dimension_numbers = #tpu.dot_dimension_numbers<[1], [0], [0], [1], [0, 0, 1, 1], [], []>} : vector<16x16xbf16>, vector<16x32xbf16>, vector<16x32xf32> -> vector<16x32xf32>
    %cst_73 = arith.constant -3.000000e+38 : f32
    %169 = vector.broadcast %cst_73 : f32 to vector<16x32xf32>
    %170 = arith.extf %4 : vector<16x16xbf16> to vector<16x16xf32>
    %cst_74 = arith.constant 0.000000e+00 : f32
    %171 = vector.broadcast %cst_74 : f32 to vector<16x16xf32>
    %172 = arith.cmpf ogt, %170, %171 : vector<16x16xf32>
    %173 = tpu.transpose %137, [1, 0] : vector<16x32xf32> -> vector<32x16xf32>
    %174 = vector.shape_cast %172 : vector<16x16xi1> to vector<16x1x16xi1>
    %175 = vector.shape_cast %173 : vector<32x16xf32> to vector<1x32x16xf32>
    %cst_75 = arith.constant -3.000000e+38 : f32
    %176 = vector.shape_cast %174 : vector<16x1x16xi1> to vector<16x1x16xi1>
    %177 = vector.broadcast %176 : vector<16x1x16xi1> to vector<16x32x16xi1>
    %178 = vector.shape_cast %175 : vector<1x32x16xf32> to vector<1x32x16xf32>
    %179 = vector.broadcast %178 : vector<1x32x16xf32> to vector<16x32x16xf32>
    %180 = vector.broadcast %cst_75 : f32 to vector<16x32x16xf32>
    %181 = arith.select %177, %179, %180 : vector<16x32x16xi1>, vector<16x32x16xf32>
    %cst_76 = arith.constant dense<0xFF800000> : vector<16x32xf32>
    %182 = vector.multi_reduction <maximumf>, %181, %cst_76 [2] : vector<16x32x16xf32> to vector<16x32xf32>
    %183 = arith.maximumf %169, %182 : vector<16x32xf32>
    %cst_77 = arith.constant 0.000000e+00 : f32
    %184 = vector.broadcast %cst_77 : f32 to vector<16x1xf32>
    %185 = arith.cmpf ogt, %5, %184 : vector<16x1xf32>
    %cst_78 = arith.constant 0.000000e+00 : f32
    %186 = vector.shape_cast %185 : vector<16x1xi1> to vector<16x1xi1>
    %187 = vector.broadcast %186 : vector<16x1xi1> to vector<16x32xi1>
    %188 = vector.broadcast %cst_78 : f32 to vector<16x32xf32>
    %189 = arith.select %187, %183, %188 : vector<16x32xi1>, vector<16x32xf32>
    %190 = arith.addf %143, %165 : vector<16x32xf32>
    %191 = arith.addf %168, %189 : vector<16x32xf32>
    %192 = arith.addf %128, %190 : vector<16x32xf32>
    %cst_79 = arith.constant 0.000000e+00 : f32
    %193 = vector.broadcast %cst_79 : f32 to vector<16x32xf32>
    %194 = arith.maximumf %192, %193 : vector<16x32xf32>
    %195 = arith.addf %131, %191 : vector<16x32xf32>
    %cst_80 = arith.constant 0.000000e+00 : f32
    %196 = vector.broadcast %cst_80 : f32 to vector<16x32xf32>
    %197 = arith.maximumf %195, %196 : vector<16x32xf32>
    %c2 = arith.constant 2 : index
    %c0_81 = arith.constant 0 : index
    %c0_82 = arith.constant 0 : index
    %198 = vector.load %arg10[%c2, %c0_81, %c0_82] : memref<4x32x128xf32, #tpu.memory_space<vmem>>, vector<1x32x128xf32>
    %199 = vector.shape_cast %198 : vector<1x32x128xf32> to vector<32x128xf32>
    %c2_83 = arith.constant 2 : index
    %c0_84 = arith.constant 0 : index
    %c0_85 = arith.constant 0 : index
    %200 = vector.load %arg11[%c2_83, %c0_84, %c0_85] : memref<4x32x32xf32, #tpu.memory_space<vmem>>, vector<1x32x32xf32>
    %201 = vector.shape_cast %200 : vector<1x32x32xf32> to vector<32x32xf32>
    %cst_86 = arith.constant dense<0.000000e+00> : vector<16x128xf32>
    %202 = tpu.matmul %194, %199, %cst_86 {dimension_numbers = #tpu.dot_dimension_numbers<[1], [0], [0], [1], [0, 0, 1, 1], [], []>} : vector<16x32xf32>, vector<32x128xf32>, vector<16x128xf32> -> vector<16x128xf32>
    %cst_87 = arith.constant dense<0.000000e+00> : vector<16x32xf32>
    %203 = tpu.matmul %197, %201, %cst_87 {dimension_numbers = #tpu.dot_dimension_numbers<[1], [0], [0], [1], [0, 0, 1, 1], [], []>} : vector<16x32xf32>, vector<32x32xf32>, vector<16x32xf32> -> vector<16x32xf32>
    %204 = vector.extract_strided_slice %202 {offsets = [0, 0], sizes = [16, 32], strides = [1, 1]} : vector<16x128xf32> to vector<16x32xf32>
    %205 = arith.truncf %204 : vector<16x32xf32> to vector<16x32xbf16>
    %206 = vector.extract_strided_slice %202 {offsets = [0, 32], sizes = [16, 32], strides = [1, 1]} : vector<16x128xf32> to vector<16x32xf32>
    %207 = arith.truncf %206 : vector<16x32xf32> to vector<16x32xbf16>
    %208 = tpu.concatenate %205, %207 in 0 : vector<16x32xbf16>, vector<16x32xbf16> -> vector<32x32xbf16>
    %cst_88 = arith.constant dense<0.000000e+00> : vector<16x32xf32>
    %209 = tpu.matmul %0, %208, %cst_88 {dimension_numbers = #tpu.dot_dimension_numbers<[1], [0], [0], [1], [0, 0, 1, 1], [], []>} : vector<16x32xbf16>, vector<32x32xbf16>, vector<16x32xf32> -> vector<16x32xf32>
    %210 = vector.extract_strided_slice %202 {offsets = [0, 64], sizes = [16, 32], strides = [1, 1]} : vector<16x128xf32> to vector<16x32xf32>
    %cst_89 = arith.constant -3.000000e+38 : f32
    %211 = vector.broadcast %cst_89 : f32 to vector<16x32xf32>
    %212 = arith.extf %1 : vector<16x16xbf16> to vector<16x16xf32>
    %cst_90 = arith.constant 0.000000e+00 : f32
    %213 = vector.broadcast %cst_90 : f32 to vector<16x16xf32>
    %214 = arith.cmpf ogt, %212, %213 : vector<16x16xf32>
    %215 = tpu.transpose %210, [1, 0] : vector<16x32xf32> -> vector<32x16xf32>
    %216 = vector.shape_cast %214 : vector<16x16xi1> to vector<16x1x16xi1>
    %217 = vector.shape_cast %215 : vector<32x16xf32> to vector<1x32x16xf32>
    %cst_91 = arith.constant -3.000000e+38 : f32
    %218 = vector.shape_cast %216 : vector<16x1x16xi1> to vector<16x1x16xi1>
    %219 = vector.broadcast %218 : vector<16x1x16xi1> to vector<16x32x16xi1>
    %220 = vector.shape_cast %217 : vector<1x32x16xf32> to vector<1x32x16xf32>
    %221 = vector.broadcast %220 : vector<1x32x16xf32> to vector<16x32x16xf32>
    %222 = vector.broadcast %cst_91 : f32 to vector<16x32x16xf32>
    %223 = arith.select %219, %221, %222 : vector<16x32x16xi1>, vector<16x32x16xf32>
    %cst_92 = arith.constant dense<0xFF800000> : vector<16x32xf32>
    %224 = vector.multi_reduction <maximumf>, %223, %cst_92 [2] : vector<16x32x16xf32> to vector<16x32xf32>
    %225 = arith.maximumf %211, %224 : vector<16x32xf32>
    %cst_93 = arith.constant 0.000000e+00 : f32
    %226 = vector.broadcast %cst_93 : f32 to vector<16x1xf32>
    %227 = arith.cmpf ogt, %2, %226 : vector<16x1xf32>
    %cst_94 = arith.constant 0.000000e+00 : f32
    %228 = vector.shape_cast %227 : vector<16x1xi1> to vector<16x1xi1>
    %229 = vector.broadcast %228 : vector<16x1xi1> to vector<16x32xi1>
    %230 = vector.broadcast %cst_94 : f32 to vector<16x32xf32>
    %231 = arith.select %229, %225, %230 : vector<16x32xi1>, vector<16x32xf32>
    %232 = vector.extract_strided_slice %202 {offsets = [0, 96], sizes = [16, 32], strides = [1, 1]} : vector<16x128xf32> to vector<16x32xf32>
    %233 = arith.truncf %232 : vector<16x32xf32> to vector<16x32xbf16>
    %cst_95 = arith.constant dense<0.000000e+00> : vector<16x32xf32>
    %234 = tpu.matmul %3, %233, %cst_95 {dimension_numbers = #tpu.dot_dimension_numbers<[1], [0], [0], [1], [0, 0, 1, 1], [], []>} : vector<16x16xbf16>, vector<16x32xbf16>, vector<16x32xf32> -> vector<16x32xf32>
    %cst_96 = arith.constant -3.000000e+38 : f32
    %235 = vector.broadcast %cst_96 : f32 to vector<16x32xf32>
    %236 = arith.extf %4 : vector<16x16xbf16> to vector<16x16xf32>
    %cst_97 = arith.constant 0.000000e+00 : f32
    %237 = vector.broadcast %cst_97 : f32 to vector<16x16xf32>
    %238 = arith.cmpf ogt, %236, %237 : vector<16x16xf32>
    %239 = tpu.transpose %203, [1, 0] : vector<16x32xf32> -> vector<32x16xf32>
    %240 = vector.shape_cast %238 : vector<16x16xi1> to vector<16x1x16xi1>
    %241 = vector.shape_cast %239 : vector<32x16xf32> to vector<1x32x16xf32>
    %cst_98 = arith.constant -3.000000e+38 : f32
    %242 = vector.shape_cast %240 : vector<16x1x16xi1> to vector<16x1x16xi1>
    %243 = vector.broadcast %242 : vector<16x1x16xi1> to vector<16x32x16xi1>
    %244 = vector.shape_cast %241 : vector<1x32x16xf32> to vector<1x32x16xf32>
    %245 = vector.broadcast %244 : vector<1x32x16xf32> to vector<16x32x16xf32>
    %246 = vector.broadcast %cst_98 : f32 to vector<16x32x16xf32>
    %247 = arith.select %243, %245, %246 : vector<16x32x16xi1>, vector<16x32x16xf32>
    %cst_99 = arith.constant dense<0xFF800000> : vector<16x32xf32>
    %248 = vector.multi_reduction <maximumf>, %247, %cst_99 [2] : vector<16x32x16xf32> to vector<16x32xf32>
    %249 = arith.maximumf %235, %248 : vector<16x32xf32>
    %cst_100 = arith.constant 0.000000e+00 : f32
    %250 = vector.broadcast %cst_100 : f32 to vector<16x1xf32>
    %251 = arith.cmpf ogt, %5, %250 : vector<16x1xf32>
    %cst_101 = arith.constant 0.000000e+00 : f32
    %252 = vector.shape_cast %251 : vector<16x1xi1> to vector<16x1xi1>
    %253 = vector.broadcast %252 : vector<16x1xi1> to vector<16x32xi1>
    %254 = vector.broadcast %cst_101 : f32 to vector<16x32xf32>
    %255 = arith.select %253, %249, %254 : vector<16x32xi1>, vector<16x32xf32>
    %256 = arith.addf %209, %231 : vector<16x32xf32>
    %257 = arith.addf %234, %255 : vector<16x32xf32>
    %258 = arith.addf %194, %256 : vector<16x32xf32>
    %cst_102 = arith.constant 0.000000e+00 : f32
    %259 = vector.broadcast %cst_102 : f32 to vector<16x32xf32>
    %260 = arith.maximumf %258, %259 : vector<16x32xf32>
    %261 = arith.addf %197, %257 : vector<16x32xf32>
    %cst_103 = arith.constant 0.000000e+00 : f32
    %262 = vector.broadcast %cst_103 : f32 to vector<16x32xf32>
    %263 = arith.maximumf %261, %262 : vector<16x32xf32>
    %c3 = arith.constant 3 : index
    %c0_104 = arith.constant 0 : index
    %c0_105 = arith.constant 0 : index
    %264 = vector.load %arg10[%c3, %c0_104, %c0_105] : memref<4x32x128xf32, #tpu.memory_space<vmem>>, vector<1x32x128xf32>
    %265 = vector.shape_cast %264 : vector<1x32x128xf32> to vector<32x128xf32>
    %c3_106 = arith.constant 3 : index
    %c0_107 = arith.constant 0 : index
    %c0_108 = arith.constant 0 : index
    %266 = vector.load %arg11[%c3_106, %c0_107, %c0_108] : memref<4x32x32xf32, #tpu.memory_space<vmem>>, vector<1x32x32xf32>
    %267 = vector.shape_cast %266 : vector<1x32x32xf32> to vector<32x32xf32>
    %cst_109 = arith.constant dense<0.000000e+00> : vector<16x128xf32>
    %268 = tpu.matmul %260, %265, %cst_109 {dimension_numbers = #tpu.dot_dimension_numbers<[1], [0], [0], [1], [0, 0, 1, 1], [], []>} : vector<16x32xf32>, vector<32x128xf32>, vector<16x128xf32> -> vector<16x128xf32>
    %cst_110 = arith.constant dense<0.000000e+00> : vector<16x32xf32>
    %269 = tpu.matmul %263, %267, %cst_110 {dimension_numbers = #tpu.dot_dimension_numbers<[1], [0], [0], [1], [0, 0, 1, 1], [], []>} : vector<16x32xf32>, vector<32x32xf32>, vector<16x32xf32> -> vector<16x32xf32>
    %270 = vector.extract_strided_slice %268 {offsets = [0, 0], sizes = [16, 32], strides = [1, 1]} : vector<16x128xf32> to vector<16x32xf32>
    %271 = arith.truncf %270 : vector<16x32xf32> to vector<16x32xbf16>
    %272 = vector.extract_strided_slice %268 {offsets = [0, 32], sizes = [16, 32], strides = [1, 1]} : vector<16x128xf32> to vector<16x32xf32>
    %273 = arith.truncf %272 : vector<16x32xf32> to vector<16x32xbf16>
    %274 = tpu.concatenate %271, %273 in 0 : vector<16x32xbf16>, vector<16x32xbf16> -> vector<32x32xbf16>
    %cst_111 = arith.constant dense<0.000000e+00> : vector<16x32xf32>
    %275 = tpu.matmul %0, %274, %cst_111 {dimension_numbers = #tpu.dot_dimension_numbers<[1], [0], [0], [1], [0, 0, 1, 1], [], []>} : vector<16x32xbf16>, vector<32x32xbf16>, vector<16x32xf32> -> vector<16x32xf32>
    %276 = vector.extract_strided_slice %268 {offsets = [0, 64], sizes = [16, 32], strides = [1, 1]} : vector<16x128xf32> to vector<16x32xf32>
    %cst_112 = arith.constant -3.000000e+38 : f32
    %277 = vector.broadcast %cst_112 : f32 to vector<16x32xf32>
    %278 = arith.extf %1 : vector<16x16xbf16> to vector<16x16xf32>
    %cst_113 = arith.constant 0.000000e+00 : f32
    %279 = vector.broadcast %cst_113 : f32 to vector<16x16xf32>
    %280 = arith.cmpf ogt, %278, %279 : vector<16x16xf32>
    %281 = tpu.transpose %276, [1, 0] : vector<16x32xf32> -> vector<32x16xf32>
    %282 = vector.shape_cast %280 : vector<16x16xi1> to vector<16x1x16xi1>
    %283 = vector.shape_cast %281 : vector<32x16xf32> to vector<1x32x16xf32>
    %cst_114 = arith.constant -3.000000e+38 : f32
    %284 = vector.shape_cast %282 : vector<16x1x16xi1> to vector<16x1x16xi1>
    %285 = vector.broadcast %284 : vector<16x1x16xi1> to vector<16x32x16xi1>
    %286 = vector.shape_cast %283 : vector<1x32x16xf32> to vector<1x32x16xf32>
    %287 = vector.broadcast %286 : vector<1x32x16xf32> to vector<16x32x16xf32>
    %288 = vector.broadcast %cst_114 : f32 to vector<16x32x16xf32>
    %289 = arith.select %285, %287, %288 : vector<16x32x16xi1>, vector<16x32x16xf32>
    %cst_115 = arith.constant dense<0xFF800000> : vector<16x32xf32>
    %290 = vector.multi_reduction <maximumf>, %289, %cst_115 [2] : vector<16x32x16xf32> to vector<16x32xf32>
    %291 = arith.maximumf %277, %290 : vector<16x32xf32>
    %cst_116 = arith.constant 0.000000e+00 : f32
    %292 = vector.broadcast %cst_116 : f32 to vector<16x1xf32>
    %293 = arith.cmpf ogt, %2, %292 : vector<16x1xf32>
    %cst_117 = arith.constant 0.000000e+00 : f32
    %294 = vector.shape_cast %293 : vector<16x1xi1> to vector<16x1xi1>
    %295 = vector.broadcast %294 : vector<16x1xi1> to vector<16x32xi1>
    %296 = vector.broadcast %cst_117 : f32 to vector<16x32xf32>
    %297 = arith.select %295, %291, %296 : vector<16x32xi1>, vector<16x32xf32>
    %298 = vector.extract_strided_slice %268 {offsets = [0, 96], sizes = [16, 32], strides = [1, 1]} : vector<16x128xf32> to vector<16x32xf32>
    %299 = arith.truncf %298 : vector<16x32xf32> to vector<16x32xbf16>
    %cst_118 = arith.constant dense<0.000000e+00> : vector<16x32xf32>
    %300 = tpu.matmul %3, %299, %cst_118 {dimension_numbers = #tpu.dot_dimension_numbers<[1], [0], [0], [1], [0, 0, 1, 1], [], []>} : vector<16x16xbf16>, vector<16x32xbf16>, vector<16x32xf32> -> vector<16x32xf32>
    %cst_119 = arith.constant -3.000000e+38 : f32
    %301 = vector.broadcast %cst_119 : f32 to vector<16x32xf32>
    %302 = arith.extf %4 : vector<16x16xbf16> to vector<16x16xf32>
    %cst_120 = arith.constant 0.000000e+00 : f32
    %303 = vector.broadcast %cst_120 : f32 to vector<16x16xf32>
    %304 = arith.cmpf ogt, %302, %303 : vector<16x16xf32>
    %305 = tpu.transpose %269, [1, 0] : vector<16x32xf32> -> vector<32x16xf32>
    %306 = vector.shape_cast %304 : vector<16x16xi1> to vector<16x1x16xi1>
    %307 = vector.shape_cast %305 : vector<32x16xf32> to vector<1x32x16xf32>
    %cst_121 = arith.constant -3.000000e+38 : f32
    %308 = vector.shape_cast %306 : vector<16x1x16xi1> to vector<16x1x16xi1>
    %309 = vector.broadcast %308 : vector<16x1x16xi1> to vector<16x32x16xi1>
    %310 = vector.shape_cast %307 : vector<1x32x16xf32> to vector<1x32x16xf32>
    %311 = vector.broadcast %310 : vector<1x32x16xf32> to vector<16x32x16xf32>
    %312 = vector.broadcast %cst_121 : f32 to vector<16x32x16xf32>
    %313 = arith.select %309, %311, %312 : vector<16x32x16xi1>, vector<16x32x16xf32>
    %cst_122 = arith.constant dense<0xFF800000> : vector<16x32xf32>
    %314 = vector.multi_reduction <maximumf>, %313, %cst_122 [2] : vector<16x32x16xf32> to vector<16x32xf32>
    %315 = arith.maximumf %301, %314 : vector<16x32xf32>
    %cst_123 = arith.constant 0.000000e+00 : f32
    %316 = vector.broadcast %cst_123 : f32 to vector<16x1xf32>
    %317 = arith.cmpf ogt, %5, %316 : vector<16x1xf32>
    %cst_124 = arith.constant 0.000000e+00 : f32
    %318 = vector.shape_cast %317 : vector<16x1xi1> to vector<16x1xi1>
    %319 = vector.broadcast %318 : vector<16x1xi1> to vector<16x32xi1>
    %320 = vector.broadcast %cst_124 : f32 to vector<16x32xf32>
    %321 = arith.select %319, %315, %320 : vector<16x32xi1>, vector<16x32xf32>
    %322 = arith.addf %275, %297 : vector<16x32xf32>
    %323 = arith.addf %300, %321 : vector<16x32xf32>
    %324 = arith.addf %260, %322 : vector<16x32xf32>
    %cst_125 = arith.constant 0.000000e+00 : f32
    %325 = vector.broadcast %cst_125 : f32 to vector<16x32xf32>
    %326 = arith.maximumf %324, %325 : vector<16x32xf32>
    %327 = arith.addf %263, %323 : vector<16x32xf32>
    %cst_126 = arith.constant 0.000000e+00 : f32
    %328 = vector.broadcast %cst_126 : f32 to vector<16x32xf32>
    %329 = arith.maximumf %327, %328 : vector<16x32xf32>
    %cst_127 = arith.constant 0.000000e+00 : f32
    %330 = vector.broadcast %cst_127 : f32 to vector<16x32xf32>
    %331 = arith.maximumf %326, %330 : vector<16x32xf32>
    %c0_128 = arith.constant 0 : index
    %c0_129 = arith.constant 0 : index
    %332 = vector.load %arg12[%c0_128, %c0_129] : memref<16x32xf32, #tpu.memory_space<vmem>>, vector<16x32xf32>
    tpu.vector_store %arg12[%c0_128, %c0_129], %331 {strides = array<i32>} : memref<16x32xf32, #tpu.memory_space<vmem>>, vector<16x32xf32>,
    %cst_130 = arith.constant 0.000000e+00 : f32
    %333 = vector.broadcast %cst_130 : f32 to vector<16x32xf32>
    %334 = arith.maximumf %329, %333 : vector<16x32xf32>
    %c0_131 = arith.constant 0 : index
    %c0_132 = arith.constant 0 : index
    %335 = vector.load %arg13[%c0_131, %c0_132] : memref<16x32xf32, #tpu.memory_space<vmem>>, vector<16x32xf32>
    tpu.vector_store %arg13[%c0_131, %c0_132], %334 {strides = array<i32>} : memref<16x32xf32, #tpu.memory_space<vmem>>, vector<16x32xf32>,
    return
  }
}

</mosaic_0001>

<bundles_post_ra>
// kernel: tpu_custom_call.1
= control target key start
LH: loop header
LB: loop body
LE: loop exit
PB: predicated region body
PF: predicated region fallthrough
CT: control target
= control target key end

     0   :  { %19 = vsyncpa [#allocation3], 0  ;;  %s16321_s0 = inlined_call_operand.vmem [shape: f32[16,6], index: 0, kind: input, shape index: {}]   ;;  %s16322_s1 = inlined_call_operand.vmem [shape: f32[16,6], index: 1, kind: input, shape index: {}]   ;;  %s16323_s2 = inlined_call_operand.vmem [shape: bf16[16,32], index: 2, kind: input, shape index: {}]   ;;  %s16324_s3 = inlined_call_operand.vmem [shape: bf16[16,16], index: 3, kind: input, shape index: {}]   ;;  %s16325_s4 = inlined_call_operand.vmem [shape: f32[16,1], index: 4, kind: input, shape index: {}]   ;;  %s16326_s5 = inlined_call_operand.vmem [shape: bf16[16,16], index: 5, kind: input, shape index: {}]   ;;  %s16327_s6 = inlined_call_operand.vmem [shape: bf16[16,16], index: 6, kind: input, shape index: {}]   ;;  %s16328_s7 = inlined_call_operand.vmem [shape: f32[16,1], index: 7, kind: input, shape index: {}]   ;;  %s16329_s8 = inlined_call_operand.vmem [shape: f32[6,128], index: 8, kind: input, shape index: {}]   ;;  %s16330_s9 = inlined_call_operand.vmem [shape: f32[6,32], index: 9, kind: input, shape index: {}]   ;;  %s16331_s10 = inlined_call_operand.hbm [shape: f32[4,32,128], index: 10, kind: input, shape index: {}]   ;;  %s16332_s11 = inlined_call_operand.hbm [shape: f32[4,32,32], index: 11, kind: input, shape index: {}]   ;;  %s16333_s12 = inlined_call_operand.hbm [shape: f32[16,32], index: 12, kind: output, shape index: {0}]   ;;  %s16334_s13 = inlined_call_operand.hbm [shape: f32[16,32], index: 13, kind: output, shape index: {1}]  }
   0x1   :  { %20 = vsyncpa [#allocation6], 0 }
   0x2   :  { %21 = vsyncpa [#allocation4], 0 }
   0x3   :  { %22 = vsyncpa [#allocation9], 0  ;;  %s9854_s25 = smov [#allocation2]   ;;  %s9758_s29 = scalar_lea.hbm %s16331_s10, 2048 }
   0x4   :  { %s48_s26 = sshll.u32 %s9854_s25, 4  ;;  %p9759_p0 = scmp.ne.s32.totalorder %s16331_s10, %s9758_s29  ;;  %s49_s26 = int_to_ptr.vmem [resolvable:$true] %s48_s26 }
   0x5   :  { %p9762_p1 = scmp.lt.u32.totalorder %s9758_s29, %s16331_s10 }
   0x7   :  { %p9764_p2 = pnand %p9762_p1, %p9759_p0 }
   0x9   :  { %9767 = shalt.err (!%p9764_p2)
}
   0xa   :  { %s9768_s17 = scalar_lea.vmem %s49_s26, 2048  ;;  %p9773_p4 = scmp.lt.s32.totalorder %s49_s26, %s49_s26 }
   0xb   :  { %p9769_p3 = scmp.ne.s32.totalorder %s49_s26, %s9768_s17  ;;  %p9774_p5 = scmp.lt.s32.totalorder %s9768_s17, %s9768_s17 }
   0xd   :  { %p9775_p6 = por %p9774_p5, %p9773_p4 }
   0xf   :  { %p9776_p7 = pnand %p9775_p6, %p9769_p3 }
  0x11   :  { %9779 = shalt.err (!%p9776_p7)
}
  0x12   :  { %s9855_s18 = smov 128   ;;  %s9856_s19 = smov 8  }
  0x13   :  { %54 = dma.hbm_to_vmem [thread:$0]  %s16331_s10, 2048, %s49_s26, [#allocation3], %s9855_s18, %s9855_s18, %s9856_s19  }
  0x14   :  { %s9857_s22 = smov [#allocation5]   ;;  %s9780_s27 = scalar_lea.hbm %s16332_s11, 2048 }
  0x15   :  { %s60_s23 = sshll.u32 %s9857_s22, 4  ;;  %p9781_p8 = scmp.ne.s32.totalorder %s16332_s11, %s9780_s27  ;;  %s61_s23 = int_to_ptr.vmem [resolvable:$true] %s60_s23 }
  0x16   :  { %p9784_p9 = scmp.lt.u32.totalorder %s9780_s27, %s16332_s11 }
  0x18   :  { %p9786_p10 = pnand %p9784_p9, %p9781_p8 }
  0x1a   :  { %9789 = shalt.err (!%p9786_p10)
}
  0x1b   :  { %s9790_s15 = scalar_lea.vmem %s61_s23, 2048  ;;  %p9795_p12 = scmp.lt.s32.totalorder %s61_s23, %s61_s23 }
  0x1c   :  { %p9791_p11 = scmp.ne.s32.totalorder %s61_s23, %s9790_s15  ;;  %p9796_p13 = scmp.lt.s32.totalorder %s9790_s15, %s9790_s15 }
  0x1e   :  { %p9797_p0 = por %p9796_p13, %p9795_p12 }
  0x20   :  { %p9798_p1 = pnand %p9797_p0, %p9791_p11 }
  0x22   :  { %9801 = shalt.err (!%p9798_p1)
}
  0x23   :  { %66 = dma.hbm_to_vmem [thread:$0]  %s16332_s11, 2048, %s61_s23, [#allocation6], %s9855_s18, %s9855_s18, %s9856_s19  }
  0x24   :  { %9846 = dma.done.wait [#allocation3], 2048  }
  0x25   :  { %9847 = vsyncadd [#allocation3], 4294965248 }
  0x26   :  { %9848 = dma.done.wait [#allocation6], 2048  }
  0x27   :  { %9849 = vsyncadd [#allocation6], 4294965248  ;;  %vm99_vm0 = vcmask 1045504   ;;  %vm92_vm1 = vcmask 48128   ;;  %v90_v0 = vld [vmem:[%s16329_s8] sm:$0x3f]  ;;  %v317_v12 = vlaneseq }
  0x28   :  { %v86_v1 = vld [vmem:[%s16321_s0] sm:$0xff]  ;;  %v87_v2 = vld [vmem:[%s16321_s0 + $0x8] sm:$0xff]  ;;  %9502 = vmatprep.subr.msk.mxu0 %vm99_vm0, %v90_v0  ;;  %v16347_v3 = vmov 0.0   ;;  %s9859_s28 = smov 64   ;;  %v16345_v10 = vmov 0   ;;  %vm16335_vm2 = vmmov 0  }
  0x29   :  { %9504 = vmatprep.mubr.msk.f32.mxu0 %vm92_vm1, %v86_v1  ;;  %9503 = vmatpush3.msk.msra.mxu0 %vm99_vm0, %v90_v0  ;;  %v91_v4 = vld [vmem:[%s16330_s9] sm:$0x3f]  ;;  %v89_v6 = vld [vmem:[%s16322_s1 + $0x8] sm:$0xff]  ;;  %s9860_s9 = smov 96   ;;  %v318_v14 = vshrl.u32 %v317_v12, 7  ;;  %v921_v15 = vand.u32 127, %v317_v12 }
  0x2a   :  { %9505 = vmatmul.mubr.msk.f32.vlgmr.msra.gmra.mrb[0].mxu0 %vm92_vm1, %v87_v2  ;;  %9512 = vmatprep.subr.bf16.mxu0 %v16347_v3  ;;  %v88_v5 = vld [vmem:[%s16322_s1] sm:$0xff]  ;;  %vm16337_vm3 = vcmask 261120   ;;  %v9863_v25 = vmov 1966171168   ;;  %v16733_v62 = vmov 0  ;;  %v16736_v63 = vmov 0 }
  0x2b   :  { %9507 = vmatprep.subr.msk.mxu1 %vm99_vm0, %v91_v4  ;;  %9509 = vmatprep.mubr.msk.f32.mxu1 %vm92_vm1, %v88_v5  ;;  %v10004_v17 = vsub.s32 %v921_v15, %v318_v14  ;;  %v926_v18 = vadd.s32 4294967288, %v921_v15  ;;  %v933_v19 = vadd.s32 4294967280, %v921_v15  ;;  %v940_v20 = vadd.s32 4294967272, %v921_v15  ;;  %v9749_v24 = vld [vmem:[%s16323_s2] sm:$0xff]   ;;  %s9864_s10 = smov 32  }
  0x2c   :  { %9508 = vmatpush3.msk.msra.mxu1 %vm99_vm0, %v91_v4  ;;  %9747 = vset.pattern.permute.xlu0 %v16345_v10  ;;  %v315_v26 = vunpack.c.l.s4 %v9863_v25  ;;  %v9416_v27 = vld [vmem:[%s16324_s3] sm:$0xff]   ;;  %v10038_v47 = vsub.s32 0, %v318_v14  ;;  %vm16344_vm0 = vcmask 130048   ;;  %v16739_v4 = vmov 0 }
  0x2d   :  { %9510 = vmatmul.mubr.msk.f32.vlgmr.msra.gmra.mrb[0].mxu1 %vm92_vm1, %v89_v6  ;;  %9520 = vmatprep.subr.bf16.mxu1 %v16347_v3  ;;  %v10006_v21 = vsub.s32 %v926_v18, %v318_v14  ;;  %v10008_v22 = vsub.s32 %v933_v19, %v318_v14  ;;  %v10010_v23 = vsub.s32 %v940_v20, %v318_v14  ;;  %v9418_v28 = vunpack.c.h.bf16 %v9416_v27 }
  0x2e   :  { %9516 = vmatprep.mubr.msk.bf16.mxu0 %vm16335_vm2, %v16347_v3  ;;  %9522 = vmatprep.mubr.msk.bf16.mxu1 %vm16335_vm2, %v16347_v3  ;;  %v316_v29 = vunpack.c.0.s8 %v315_v26  ;;  %v9417_v30 = vunpack.c.l.bf16 %v9416_v27  ;;  %16732 = vst [vmem:[#allocation15_spill] sm:$0xff] %v10038_v47  ;;  %v16742_v5 = vmov 0  ;;  %v16745_v20 = vmov 0 }
  0x2f   :  { %vm270_vm4 = vcmp.gt.f32.partialorder %v9418_v28, 0.0  ;;  %v16748_v26 = vmov 0 }
  0x30   :  { %v10024_v31 = vsub.s32 %v316_v29, %v318_v14  ;;  %vm269_vm5 = vcmp.gt.f32.partialorder %v9417_v30, 0.0  ;;  %v312_v32 = vsel %vm270_vm4, 1, %v16345_v10 }
  0x31   :  { %v311_v34 = vsel %vm269_vm5, 1, %v16345_v10  ;;  %v362_v56 = vcombine.high %v312_v32, %v312_v32 }
  0x32   :  { %16731 = vst [vmem:[#allocation14_spill] sm:$0xff] %v10024_v31  ;;  %v369_v33 = vrot.slane %v312_v32, %v10024_v31  ;;  %v320_v36 = vrot.slane %v311_v34, %v10024_v31  ;;  %v313_v37 = vcombine.high %v311_v34, %v311_v34 }
  0x33   :  { %v376_v1 = vrot.slane %v362_v56, %v10024_v31 }
  0x34   :  { %v385_v35 = vrot.slane %v369_v33, %v10024_v31  ;;  %v377_v38 = vcombine.high %v369_v33, %v369_v33  ;;  %v328_v40 = vcombine.high %v320_v36, %v320_v36  ;;  %v336_v41 = vrot.slane %v320_v36, %v10024_v31 }
  0x35   :  { %v327_v42 = vrot.slane %v313_v37, %v10024_v31  ;;  %v378_v34 = vcombine.high %v376_v1, %v376_v1  ;;  %v16751_v36 = vmov 0 }
  0x36   :  { %v407_v39 = vcombine.high %v385_v35, %v385_v35  ;;  %v399_v43 = vrot.slane %v377_v38, %v10024_v31  ;;  %vm411_vm7 = vcmp.ne.s32.totalorder %v336_v41, 0  ;;  %v350_v44 = vrot.slane %v328_v40, %v10024_v31 }
  0x37   :  { %v10036_v45 = vrot.slane %v327_v42, %v10024_v31  ;;  %v358_v46 = vcombine.high %v336_v41, %v336_v41  ;;  %v427_v50 = vsel %vm411_vm7, 1, %v16345_v10  ;;  %v329_v51 = vcombine.high %v327_v42, %v327_v42 }
  0x38   :  { %vm421_vm6 = vcmp.ne.s32.totalorder %v407_v39, 0  ;;  %vm412_vm8 = vcmp.ne.s32.totalorder %v350_v44, 0  ;;  %v409_v48 = vcombine.high %v399_v43, %v399_v43  ;;  %v446_v55 = vrot.slane %v427_v50, %v10038_v47 }
  0x39   :  { %vm415_vm9 = vcmp.ne.s32.totalorder %v10036_v45, 0  ;;  %v437_v49 = vsel %vm421_vm6, 1, %v16345_v10  ;;  %v428_v52 = vsel %vm412_vm8, 1, %v16345_v10  ;;  %vm413_vm10 = vcmp.ne.s32.totalorder %v358_v46, 0 }
  0x3a   :  { %v431_v53 = vsel %vm415_vm9, 1, %v16345_v10  ;;  %v486_v54 = vrot.slane %v437_v49, %v10038_v47  ;;  %vm422_vm11 = vcmp.ne.s32.totalorder %v409_v48, 0  ;;  %v450_v57 = vrot.slane %v428_v52, %v10038_v47 }
  0x3b   :  { %v462_v58 = vrot.slane %v431_v53, %v10038_v47  ;;  %v429_v59 = vsel %vm413_vm10, 1, %v16345_v10  ;;  %v10051_v60 = vrot.slane %v329_v51, %v10024_v31  ;;  %v438_v61 = vsel %vm422_vm11, 1, %v16345_v10 }
  0x3c   :  { %vm419_vm12 = vcmp.ne.s32.totalorder %v385_v35, 0  ;;  %vm10054_vm13 = vcmp.eq.s32.totalorder %v486_v54, 1  ;;  %vm10058_vm14 = vcmp.eq.s32.totalorder %v446_v55, 1  ;;  %v454_v0 = vrot.slane %v429_v59, %v10038_v47 }
  0x3d   :  { %v16734_v62 = vsel %vm10054_vm13, 4294967295, %v16733_v62  ;;  %v16737_v63 = vsel %vm10058_vm14, 4294967295, %v16736_v63  ;;  %vm416_vm15 = vcmp.ne.s32.totalorder %v10051_v60, 0  ;;  %vm10067_vm1 = vcmp.eq.s32.totalorder %v450_v57, 1 }
  0x3e   :  { %16735 = vst [vmem:[#allocation16_spill] sm:$0xff] %v16734_v62  ;;  %16738 = vst [vmem:[#allocation17_spill] sm:$0xff] %v16737_v63  ;;  %v16740_v4 = vsel %vm10067_vm1, 4294967295, %v16739_v4  ;;  %vm10071_vm4 = vcmp.eq.s32.totalorder %v462_v58, 1  ;;  %v490_v6 = vrot.slane %v438_v61, %v10038_v47  ;;  %v432_v12 = vsel %vm416_vm15, 1, %v16345_v10 }
  0x3f   :  { %16741 = vst [vmem:[#allocation18_spill] sm:$0xff] %v16740_v4  ;;  %v16743_v5 = vsel %vm10071_vm4, 4294967295, %v16742_v5  ;;  %vm420_vm5 = vcmp.ne.s32.totalorder %v399_v43, 0  ;;  %vm10095_vm6 = vcmp.eq.s32.totalorder %v454_v0, 1  ;;  %v466_v27 = vrot.slane %v432_v12, %v10038_v47  ;;  %v2328_v4 = vld [vmem:[#allocation2 + $0x18] sm:$0xff] }
  0x40   :  { %16744 = vst [vmem:[#allocation19_spill] sm:$0xff] %v16743_v5  ;;  %v16746_v20 = vsel %vm10095_vm6, 4294967295, %v16745_v20  ;;  %vm10102_vm7 = vcmp.eq.s32.totalorder %v490_v6, 1  ;;  %v359_v28 = vcombine.high %v10036_v45, %v10036_v45  ;;  %v436_v30 = vsel %vm420_vm5, 1, %v16345_v10  ;;  %v2325_v5 = vld [vmem:[#allocation2] sm:$0xff] }
  0x41   :  { %16747 = vst [vmem:[#allocation20_spill] sm:$0xff] %v16746_v20  ;;  %v16749_v26 = vsel %vm10102_vm7, 4294967295, %v16748_v26  ;;  %vm10125_vm11 = vcmp.eq.s32.totalorder %v466_v27, 1  ;;  %v16754_v39 = vmov 0  ;;  %v482_v40 = vrot.slane %v436_v30, %v10038_v47  ;;  %v9750_v20 = vld [vmem:[%s16326_s5] sm:$0xff]  }
  0x42   :  { %16750 = vst [vmem:[#allocation21_spill] sm:$0xff] %v16749_v26  ;;  %v16755_v39 = vsel %vm10125_vm11, 4294967295, %v16754_v39  ;;  %v406_v45 = vrot.slane %v378_v34, %v10024_v31  ;;  %v361_v49 = vcombine.high %v10051_v60, %v10051_v60  ;;  %v16757_v51 = vmov 0 }
  0x43   :  { %16756 = vst [vmem:[#allocation23_spill] sm:$0xff] %v16755_v39  ;;  %vm10144_vm15 = vcmp.eq.s32.totalorder %v482_v40, 1  ;;  %v16760_v54 = vmov 0  ;;  %v16763_v59 = vmov 0  ;;  %v2326_v39 = vld [vmem:[#allocation2 + $0x8] sm:$0xff] }
  0x44   :  { %v16758_v51 = vsel %vm10144_vm15, 4294967295, %v16757_v51  ;;  %vm424_vm5 = vcmp.ne.s32.totalorder %v406_v45, 0  ;;  %v410_v12 = vcombine.high %v406_v45, %v406_v45  ;;  %v16778_v45 = vmov 0 }
  0x45   :  { %16759 = vst [vmem:[#allocation24_spill] sm:$0xff] %v16758_v51  ;;  %v440_v58 = vsel %vm424_vm5, 1, %v16345_v10  ;;  %v2327_v51 = vld [vmem:[#allocation2 + $0x10] sm:$0xff] }
  0x46   :  { %v498_v6 = vrot.slane %v440_v58, %v10038_v47 }
  0xfd   :  { %v9506_v7 = vpop.f32.mrb[0].mxu0 }
  0xfe   :  { %275 = vrot.lane.b32.xlu1 %v9506_v7, %s9859_s28  ;;  %v169_v8 = vpop.f32.mrb[1].mxu0 }
  0xff   :  { %v9994_v9 = vpack.c.bf16 %v9506_v7, %v169_v8  ;;  %v435_v7 = vsel %vm419_vm12, 1, %v16345_v10  ;;  %vm417_vm12 = vcmp.ne.s32.totalorder %v359_v28, 0 }
 0x100   :  { %v433_v48 = vsel %vm417_vm12, 1, %v16345_v10  ;;  %vm418_vm12 = vcmp.ne.s32.totalorder %v361_v49, 0 }
 0x101   :  { %264 = vrot.lane.b32.xlu0 %v9994_v9, %s9860_s9  ;;  %9513 = vmatpush3.bf16.msra.mxu0 %v9994_v9  ;;  %v470_v55 = vrot.slane %v433_v48, %v10038_v47 }
 0x102   :  { %9514 = vmatprep.subr.bf16.mxu0 %v16347_v3 }
 0x103   :  { %vm10170_vm2 = vcmp.eq.s32.totalorder %v470_v55, 1 }
 0x105   :  { %273 = vrot.lane.b32.xlu0 %v169_v8, %s9859_s28 }
 0x170   :  { %v276_v16 = vpop.permute.xlu1 %275 }
 0x173   :  { %v265_v11 = vpop.permute.xlu0 %264 }
 0x174   :  { %9515 = vmatpush3.bf16.msra.mxu0 %v265_v11 }
 0x177   :  { %v274_v13 = vpop.permute.xlu0 %273  ;;  %9517 = vmatmul.mubr.msk.bf16.vlgmr.msra.gmra.mrb[4].mxu0 %vm16337_vm3, %v9749_v24  ;;  %v478_v24 = vrot.slane %v435_v7, %v10038_v47  ;;  %vm10184_vm3 = vcmp.eq.s32.totalorder %v498_v6, 1 }
 0x178   :  { %279 = vxpose.xlu1.b32.start [1/2] (short) (narrow) %v274_v13, 32  ;;  %v10085_v13 = vrot.slane %v376_v1, %v10024_v31  ;;  %v16766_v1 = vmov 0 }
 0x179   :  { %vm10119_vm10 = vcmp.eq.s32.totalorder %v478_v24, 1  ;;  %v16767_v1 = vsel %vm10170_vm2, 4294967295, %v16766_v1 }
 0x17a   :  { %vm423_vm8 = vcmp.ne.s32.totalorder %v10085_v13, 0  ;;  %v16752_v36 = vsel %vm10119_vm10, 4294967295, %v16751_v36  ;;  %v408_v60 = vcombine.high %v10085_v13, %v10085_v13  ;;  %16768 = vst [vmem:[#allocation27_spill] sm:$0xff] %v16767_v1 }
 0x17b   :  { %16753 = vst [vmem:[#allocation22_spill] sm:$0xff] %v16752_v36  ;;  %v439_v37 = vsel %vm423_vm8, 1, %v16345_v10 }
 0x17c   :  { %280 = vxpose.xlu1.b32.end [2/2] (short) (narrow) %v276_v16, 32  ;;  %v360_v16 = vcombine.high %v350_v44, %v350_v44  ;;  %v494_v44 = vrot.slane %v439_v37, %v10038_v47  ;;  %vm425_vm5 = vcmp.ne.s32.totalorder %v408_v60, 0 }
 0x17d   :  { %v441_v24 = vsel %vm425_vm5, 1, %v16345_v10 }
 0x17e   :  { %vm414_vm9 = vcmp.ne.s32.totalorder %v360_v16, 0  ;;  %vm10150_vm8 = vcmp.eq.s32.totalorder %v494_v44, 1  ;;  %v502_v30 = vrot.slane %v441_v24, %v10038_v47 }
 0x17f   :  { %v430_v42 = vsel %vm414_vm9, 1, %v16345_v10  ;;  %v16761_v54 = vsel %vm10150_vm8, 4294967295, %v16760_v54 }
 0x180   :  { %v458_v52 = vrot.slane %v430_v42, %v10038_v47  ;;  %16762 = vst [vmem:[#allocation25_spill] sm:$0xff] %v16761_v54  ;;  %vm10212_vm5 = vcmp.eq.s32.totalorder %v502_v30, 1 }
 0x182   :  { %vm10162_vm9 = vcmp.eq.s32.totalorder %v458_v52, 1 }
 0x183   :  { %v16764_v59 = vsel %vm10162_vm9, 4294967295, %v16763_v59 }
 0x184   :  { %16765 = vst [vmem:[#allocation26_spill] sm:$0xff] %v16764_v59 }
 0x19a   :  { %9748 = vset.pattern.permute.xlu1 %v16345_v10 }
 0x1f8   :  { %v10065_v2 = vpop.trf.xlu1 }
 0x1f9   :  { %v563_v8 = vsel %vm10054_vm13, %v10065_v2, -3e+38  ;;  %v523_v11 = vsel %vm10058_vm14, %v10065_v2, -3e+38  ;;  %v527_v18 = vsel %vm10067_vm1, %v10065_v2, -3e+38 }
 0x1fa   :  { %v708_v14 = vsel %vm16344_vm0, %v563_v8, -inf  ;;  %v588_v15 = vsel %vm16344_vm0, %v523_v11, -inf  ;;  %v539_v19 = vsel %vm10071_vm4, %v10065_v2, -3e+38  ;;  %v600_v32 = vsel %vm16344_vm0, %v527_v18, -inf }
 0x1fb   :  { %709 = vmax.xlane.f32.xlu1 %v708_v14  ;;  %589 = vmax.xlane.f32.xlu0 %v588_v15  ;;  %v636_v33 = vsel %vm16344_vm0, %v539_v19, -inf  ;;  %v531_v35 = vsel %vm10095_vm6, %v10065_v2, -3e+38  ;;  %v555_v46 = vsel %vm10119_vm10, %v10065_v2, -3e+38  ;;  %v434_v11 = vsel %vm418_vm12, 1, %v16345_v10 }
 0x1fc   :  { %v10100_v25 = vpop.trf.xlu1  ;;  %v612_v43 = vsel %vm16344_vm0, %v531_v35, -inf  ;;  %v684_v53 = vsel %vm16344_vm0, %v555_v46, -inf  ;;  %v559_v56 = vsel %vm10144_vm15, %v10065_v2, -3e+38  ;;  %v535_v7 = vsel %vm10162_vm9, %v10065_v2, -3e+38 }
 0x1fd   :  { %v568_v29 = vsel %vm10102_vm7, %v10100_v25, -3e+38  ;;  %v544_v41 = vsel %vm10125_vm11, %v10100_v25, -3e+38  ;;  %v572_v57 = vsel %vm10150_vm8, %v10100_v25, -3e+38  ;;  %v474_v16 = vrot.slane %v434_v11, %v10038_v47 }
 0x1fe   :  { %v723_v38 = vsel %vm16344_vm0, %v568_v29, -inf  ;;  %v651_v50 = vsel %vm16344_vm0, %v544_v41, -inf  ;;  %v696_v61 = vsel %vm16344_vm0, %v559_v56, -inf  ;;  %v735_v0 = vsel %vm16344_vm0, %v572_v57, -inf }
 0x1ff   :  { %601 = vmax.xlane.f32.xlu0 %v600_v32  ;;  %637 = vmax.xlane.f32.xlu1 %v636_v33  ;;  %v548_v8 = vsel %vm10170_vm2, %v10100_v25, -3e+38  ;;  %v624_v13 = vsel %vm16344_vm0, %v535_v7, -inf  ;;  %v16769_v15 = vmov 0  ;;  %v567_v18 = vsel %vm10102_vm7, %v10065_v2, -3e+38 }
 0x200   :  { %v663_v14 = vsel %vm16344_vm0, %v548_v8, -inf  ;;  %v16770_v15 = vsel %vm10184_vm3, 4294967295, %v16769_v15  ;;  %v576_v19 = vsel %vm10184_vm3, %v10100_v25, -3e+38  ;;  %vm426_vm12 = vcmp.ne.s32.totalorder %v410_v12, 0  ;;  %v10229_v46 = vpop.trf.xlu1 }
 0x201   :  { %16771 = vst [vmem:[#allocation28_spill] sm:$0xff] %v16770_v15  ;;  %v720_v27 = vsel %vm16344_vm0, %v567_v18, -inf  ;;  %v747_v28 = vsel %vm16344_vm0, %v576_v19, -inf  ;;  %vm10198_vm9 = vcmp.eq.s32.totalorder %v474_v16, 1  ;;  %v16772_v29 = vmov 0 }
 0x202   :  { %v16773_v29 = vsel %vm10198_vm9, 4294967295, %v16772_v29  ;;  %v543_v32 = vsel %vm10125_vm11, %v10065_v2, -3e+38  ;;  %v552_v33 = vsel %vm10198_vm9, %v10100_v25, -3e+38  ;;  %v442_v34 = vsel %vm426_vm12, 1, %v16345_v10 }
 0x203   :  { %613 = vmax.xlane.f32.xlu0 %v612_v43  ;;  %724 = vmax.xlane.f32.xlu1 %v723_v38  ;;  %16774 = vst [vmem:[#allocation29_spill] sm:$0xff] %v16773_v29  ;;  %v648_v35 = vsel %vm16344_vm0, %v543_v32, -inf  ;;  %v675_v37 = vsel %vm16344_vm0, %v552_v33, -inf  ;;  %v16775_v38 = vmov 0  ;;  %v506_v40 = vrot.slane %v442_v34, %v10038_v47 }
 0x204   :  { %v16776_v38 = vsel %vm10212_vm5, 4294967295, %v16775_v38  ;;  %v571_v41 = vsel %vm10150_vm8, %v10065_v2, -3e+38  ;;  %v580_v42 = vsel %vm10212_vm5, %v10100_v25, -3e+38  ;;  %v9674_v47 = vpack.c.bf16 %v2328_v4, %v2327_v51 }
 0x205   :  { %16777 = vst [vmem:[#allocation30_spill] sm:$0xff] %v16776_v38  ;;  %v732_v43 = vsel %vm16344_vm0, %v571_v41, -inf  ;;  %v759_v44 = vsel %vm16344_vm0, %v580_v42, -inf  ;;  %vm10225_vm12 = vcmp.eq.s32.totalorder %v506_v40, 1  ;;  %v547_v48 = vsel %vm10170_vm2, %v10065_v2, -3e+38 }
 0x206   :  { %v16779_v45 = vsel %vm10225_vm12, 4294967295, %v16778_v45  ;;  %v584_v49 = vsel %vm10225_vm12, %v10100_v25, -3e+38  ;;  %v660_v52 = vsel %vm16344_vm0, %v547_v48, -inf  ;;  %v575_v55 = vsel %vm10184_vm3, %v10065_v2, -3e+38 }
 0x207   :  { %685 = vmax.xlane.f32.xlu0 %v684_v53  ;;  %652 = vmax.xlane.f32.xlu1 %v651_v50  ;;  %16780 = vst [vmem:[#allocation31_spill] sm:$0xff] %v16779_v45  ;;  %v525_v50 = vsel %vm10058_vm14, %v10229_v46, -3e+38  ;;  %v771_v53 = vsel %vm16344_vm0, %v584_v49, -inf  ;;  %v557_v57 = vsel %vm10119_vm10, %v10229_v46, -3e+38 }
 0x208   :  { %v594_v56 = vsel %vm16344_vm0, %v525_v50, -inf  ;;  %v744_v58 = vsel %vm16344_vm0, %v575_v55, -inf  ;;  %v551_v60 = vsel %vm10198_vm9, %v10065_v2, -3e+38  ;;  %v565_v6 = vsel %vm10054_vm13, %v10229_v46, -3e+38 }
 0x209   :  { %v579_v7 = vsel %vm10212_vm5, %v10065_v2, -3e+38  ;;  %v714_v8 = vsel %vm16344_vm0, %v565_v6, -inf  ;;  %v541_v12 = vsel %vm10071_vm4, %v10229_v46, -3e+38  ;;  %v10317_v55 = vpop.f32.mrb[0].mxu1 }
 0x20a   :  { %v756_v11 = vsel %vm16344_vm0, %v579_v7, -inf  ;;  %v569_v18 = vsel %vm10102_vm7, %v10229_v46, -3e+38  ;;  %v524_v19 = vsel %vm10058_vm14, %v10100_v25, -3e+38 }
 0x20b   :  { %697 = vmax.xlane.f32.xlu0 %v696_v61  ;;  %736 = vmax.xlane.f32.xlu1 %v735_v0  ;;  %v690_v61 = vsel %vm16344_vm0, %v557_v57, -inf  ;;  %v672_v0 = vsel %vm16344_vm0, %v551_v60, -inf  ;;  %v726_v24 = vsel %vm16344_vm0, %v569_v18, -inf  ;;  %v573_v33 = vsel %vm10150_vm8, %v10229_v46, -3e+38  ;;  %v10323_v60 = vpop.f32.mrb[1].mxu1 }
 0x20c   :  { %v532_v34 = vsel %vm10095_vm6, %v10100_v25, -3e+38  ;;  %v549_v40 = vsel %vm10170_vm2, %v10229_v46, -3e+38  ;;  %v556_v41 = vsel %vm10119_vm10, %v10100_v25, -3e+38  ;;  %vm16781_vm2 = vnez %v16764_v59 }
 0x20d   :  { %v666_v42 = vsel %vm16344_vm0, %v549_v40, -inf  ;;  %v560_v48 = vsel %vm10144_vm15, %v10100_v25, -3e+38  ;;  %v9670_v59 = vpack.c.bf16 %v2326_v39, %v2325_v5  ;;  %v16789_v5 = vmov 0.0  }
 0x20e   :  { %v699_v50 = vsel %vm16344_vm0, %v560_v48, -inf }
 0x20f   :  { %625 = vmax.xlane.f32.xlu0 %v624_v13  ;;  %664 = vmax.xlane.f32.xlu1 %v663_v14  ;;  %v583_v13 = vsel %vm10225_vm12, %v10065_v2, -3e+38  ;;  %v642_v14 = vsel %vm16344_vm0, %v541_v12, -inf  ;;  %v545_v2 = vsel %vm10125_vm11, %v10229_v46, -3e+38 }
 0x210   :  { %v768_v16 = vsel %vm16344_vm0, %v583_v13, -inf  ;;  %v654_v30 = vsel %vm16344_vm0, %v545_v2, -inf }
 0x213   :  { %721 = vmax.xlane.f32.xlu0 %v720_v27  ;;  %748 = vmax.xlane.f32.xlu1 %v747_v28  ;;  %v591_v27 = vsel %vm16344_vm0, %v524_v19, -inf  ;;  %v528_v28 = vsel %vm10067_vm1, %v10100_v25, -3e+38 }
 0x214   :  { %v603_v32 = vsel %vm16344_vm0, %v528_v28, -inf  ;;  %v537_v28 = vsel %vm16781_vm2, %v10229_v46, -3e+38 }
 0x217   :  { %649 = vmax.xlane.f32.xlu0 %v648_v35  ;;  %676 = vmax.xlane.f32.xlu1 %v675_v37  ;;  %v738_v35 = vsel %vm16344_vm0, %v573_v33, -inf  ;;  %v615_v37 = vsel %vm16344_vm0, %v532_v34, -inf  ;;  %v585_v33 = vsel %vm10225_vm12, %v10229_v46, -3e+38 }
 0x21b   :  { %733 = vmax.xlane.f32.xlu0 %v732_v43  ;;  %760 = vmax.xlane.f32.xlu1 %v759_v44  ;;  %v687_v43 = vsel %vm16344_vm0, %v556_v41, -inf  ;;  %v577_v44 = vsel %vm10184_vm3, %v10229_v46, -3e+38 }
 0x21c   :  { %v750_v49 = vsel %vm16344_vm0, %v577_v44, -inf }
 0x21f   :  { %661 = vmax.xlane.f32.xlu0 %v660_v52  ;;  %772 = vmax.xlane.f32.xlu1 %v771_v53  ;;  %v553_v52 = vsel %vm10198_vm9, %v10229_v46, -3e+38  ;;  %v536_v53 = vsel %vm16781_vm2, %v10100_v25, -3e+38 }
 0x220   :  { %v627_v57 = vsel %vm16344_vm0, %v536_v53, -inf }
 0x223   :  { %745 = vmax.xlane.f32.xlu0 %v744_v58  ;;  %595 = vmax.xlane.f32.xlu1 %v594_v56  ;;  %v678_v56 = vsel %vm16344_vm0, %v553_v52, -inf  ;;  %v10321_v58 = vpop.trf.xlu1 }
 0x224   :  { %v534_v6 = vsel %vm10095_vm6, %v10321_v58, -3e+38  ;;  %v558_v13 = vsel %vm10119_vm10, %v10321_v58, -3e+38  ;;  %v530_v41 = vsel %vm10067_vm1, %v10321_v58, -3e+38 }
 0x225   :  { %v621_v12 = vsel %vm16344_vm0, %v534_v6, -inf  ;;  %v693_v18 = vsel %vm16344_vm0, %v558_v13, -inf  ;;  %v538_v44 = vsel %vm16781_vm2, %v10321_v58, -3e+38  ;;  %v570_v53 = vsel %vm10102_vm7, %v10321_v58, -3e+38 }
 0x226   :  { %v633_v48 = vsel %vm16344_vm0, %v538_v44, -inf  ;;  %vm16837_vm7 = vcmask 1042434  }
 0x227   :  { %691 = vmax.xlane.f32.xlu1 %v690_v61  ;;  %673 = vmax.xlane.f32.xlu0 %v672_v0  ;;  %v581_v61 = vsel %vm10212_vm5, %v10229_v46, -3e+38  ;;  %v564_v0 = vsel %vm10054_vm13, %v10100_v25, -3e+38 }
 0x228   :  { %v762_v7 = vsel %vm16344_vm0, %v581_v61, -inf }
 0x22b   :  { %715 = vmax.xlane.f32.xlu1 %v714_v8  ;;  %757 = vmax.xlane.f32.xlu0 %v756_v11  ;;  %v711_v8 = vsel %vm16344_vm0, %v564_v0, -inf  ;;  %v540_v11 = vsel %vm10071_vm4, %v10100_v25, -3e+38  ;;  %v533_v25 = vsel %vm10095_vm6, %v10229_v46, -3e+38 }
 0x22c   :  { %v574_v0 = vsel %vm10150_vm8, %v10321_v58, -3e+38 }
 0x22d   :  { %v741_v6 = vsel %vm16344_vm0, %v574_v0, -inf }
 0x22f   :  { %643 = vmax.xlane.f32.xlu1 %v642_v14  ;;  %769 = vmax.xlane.f32.xlu0 %v768_v16  ;;  %v639_v14 = vsel %vm16344_vm0, %v540_v11, -inf  ;;  %v529_v16 = vsel %vm10067_vm1, %v10229_v46, -3e+38 }
 0x230   :  { %v606_v19 = vsel %vm16344_vm0, %v529_v16, -inf  ;;  %v578_v16 = vsel %vm10184_vm3, %v10321_v58, -3e+38 }
 0x233   :  { %727 = vmax.xlane.f32.xlu1 %v726_v24  ;;  %592 = vmax.xlane.f32.xlu0 %v591_v27  ;;  %v618_v24 = vsel %vm16344_vm0, %v533_v25, -inf  ;;  %v561_v27 = vsel %vm10144_vm15, %v10229_v46, -3e+38  ;;  %v609_v46 = vsel %vm16344_vm0, %v530_v41, -inf  ;;  %v586_v25 = vsel %vm10225_vm12, %v10321_v58, -3e+38 }
 0x234   :  { %v702_v2 = vsel %vm16344_vm0, %v561_v27, -inf  ;;  %v777_v27 = vsel %vm16344_vm0, %v586_v25, -inf }
 0x237   :  { %655 = vmax.xlane.f32.xlu1 %v654_v30  ;;  %604 = vmax.xlane.f32.xlu0 %v603_v32  ;;  %v79_v30 = vld [vmem:[%s16325_s4 + $0x8] sm:$0xff]  ;;  %v630_v32 = vsel %vm16344_vm0, %v537_v28, -inf }
 0x238   :  { %vm845_vm10 = vcmp.gt.f32.partialorder %v79_v30, 0.0 }
 0x239   :  { %v847_v34 = vsel %vm845_vm10, 1, %v16345_v10  ;;  %vm16782_vm10 = vnez %v16767_v1 }
 0x23b   :  { %739 = vmax.xlane.f32.xlu1 %v738_v35  ;;  %616 = vmax.xlane.f32.xlu0 %v615_v37  ;;  %v774_v35 = vsel %vm16344_vm0, %v585_v33, -inf  ;;  %v526_v37 = vsel %vm10058_vm14, %v10321_v58, -3e+38 }
 0x23c   :  { %v597_v40 = vsel %vm16344_vm0, %v526_v37, -inf }
 0x23f   :  { %667 = vmax.xlane.f32.xlu1 %v666_v42  ;;  %688 = vmax.xlane.f32.xlu0 %v687_v43  ;;  %v562_v42 = vsel %vm10144_vm15, %v10321_v58, -3e+38 }
 0x240   :  { %v705_v43 = vsel %vm16344_vm0, %v562_v42, -inf  ;;  %v78_v42 = vld [vmem:[%s16325_s4] sm:$0xff] }
 0x243   :  { %751 = vmax.xlane.f32.xlu1 %v750_v49  ;;  %700 = vmax.xlane.f32.xlu0 %v699_v50  ;;  %v542_v50 = vsel %vm10071_vm4, %v10321_v58, -3e+38 }
 0x244   :  { %v645_v52 = vsel %vm16344_vm0, %v542_v50, -inf }
 0x247   :  { %679 = vmax.xlane.f32.xlu1 %v678_v56  ;;  %628 = vmax.xlane.f32.xlu0 %v627_v57  ;;  %v729_v56 = vsel %vm16344_vm0, %v570_v53, -inf  ;;  %v546_v57 = vsel %vm10125_vm11, %v10321_v58, -3e+38 }
 0x248   :  { %v657_v61 = vsel %vm16344_vm0, %v546_v57, -inf }
 0x24b   :  { %763 = vmax.xlane.f32.xlu1 %v762_v7  ;;  %712 = vmax.xlane.f32.xlu0 %v711_v8  ;;  %v550_v7 = vsel %vm16782_vm10, %v10321_v58, -3e+38  ;;  %vm16812_vm10 = vcmask 195712  }
 0x24c   :  { %v669_v13 = vsel %vm16344_vm0, %v550_v7, -inf }
 0x24f   :  { %622 = vmax.xlane.f32.xlu1 %v621_v12  ;;  %640 = vmax.xlane.f32.xlu0 %v639_v14  ;;  %v582_v12 = vsel %vm10212_vm5, %v10321_v58, -3e+38  ;;  %vm16792_vm5 = vcmask 130112  }
 0x250   :  { %v765_v14 = vsel %vm16344_vm0, %v582_v12, -inf  ;;  %vm16793_vm12 = vmmov %vm16792_vm5 }
 0x253   :  { %694 = vmax.xlane.f32.xlu1 %v693_v18  ;;  %607 = vmax.xlane.f32.xlu0 %v606_v19 }
 0x257   :  { %619 = vmax.xlane.f32.xlu0 %v618_v24  ;;  %v753_v24 = vsel %vm16344_vm0, %v578_v16, -inf }
 0x25b   :  { %703 = vmax.xlane.f32.xlu0 %v702_v2  ;;  %v554_v2 = vsel %vm10198_vm9, %v10321_v58, -3e+38 }
 0x25f   :  { %631 = vmax.xlane.f32.xlu0 %v630_v32  ;;  %v681_v32 = vsel %vm16344_vm0, %v554_v2, -inf }
 0x263   :  { %775 = vmax.xlane.f32.xlu0 %v774_v35 }
 0x264   :  { %852 = vperm.xlu1 %9748, %v847_v34  }
 0x267   :  { %598 = vmax.xlane.f32.xlu0 %v597_v40 }
 0x268   :  { %2278 = vrot.lane.b32.xlu1 %v9994_v9, %s9864_s10  ;;  %v566_v9 = vsel %vm10054_vm13, %v10321_v58, -3e+38  ;;  %vm16835_vm13 = vcmask 1046534  }
 0x269   :  { %v717_v49 = vsel %vm16344_vm0, %v566_v9, -inf  ;;  %vm844_vm0 = vcmp.gt.f32.partialorder %v78_v42, 0.0 }
 0x26a   :  { %v846_v9 = vsel %vm844_vm0, 1, %v16345_v10  ;;  %vm16787_vm0 = vcmask 130048  }
 0x26b   :  { %610 = vmax.xlane.f32.xlu0 %v609_v46 }
 0x26f   :  { %706 = vmax.xlane.f32.xlu0 %v705_v43 }
 0x273   :  { %634 = vmax.xlane.f32.xlu0 %v633_v48  ;;  %v10462_v48 = vpop.f32.mrb[4].mxu0 }
 0x274   :  { %16783 = vst [vmem:[#allocation32_spill] sm:$0xff] %v10462_v48 }
 0x277   :  { %718 = vmax.xlane.f32.xlu0 %v717_v49  ;;  %v9518_v49 = vpop.f32.mrb[5].mxu0 }
 0x278   :  { %v10465_v50 = vpop.f32.mrb[6].mxu0 }
 0x279   :  { %16784 = vst [vmem:[#allocation33_spill] sm:$0xff] %v10465_v50 }
 0x27b   :  { %646 = vmax.xlane.f32.xlu0 %v645_v52 }
 0x27f   :  { %730 = vmax.xlane.f32.xlu0 %v729_v56  ;;  %v9519_v56 = vpop.f32.mrb[7].mxu0 }
 0x283   :  { %658 = vmax.xlane.f32.xlu0 %v657_v61 }
 0x287   :  { %742 = vmax.xlane.f32.xlu0 %v741_v6 }
 0x288   :  { %v10410_v8 = vpop.xlane.xlu1 %709  ;;  %v10412_v11 = vpop.xlane.xlu0 %589 }
 0x289   :  { %v820_v50 = vmax.f32 %v10410_v8, -3e+38 }
 0x28b   :  { %670 = vmax.xlane.f32.xlu0 %v669_v13 }
 0x28c   :  { %v10422_v18 = vpop.xlane.xlu0 %601  ;;  %v10424_v19 = vpop.xlane.xlu1 %637  ;;  %766 = vmax.xlane.f32.xlu1 %v765_v14 }
 0x28d   :  { %v784_v4 = vmax.f32 %v10422_v18, -3e+38  ;;  %v796_v51 = vmax.f32 %v10424_v19, -3e+38  ;;  %v10550_v18 = vrot.slane %v820_v50, %v10004_v17 }
 0x28f   :  { %754 = vmax.xlane.f32.xlu0 %v753_v24 }
 0x290   :  { %v10434_v28 = vpop.xlane.xlu0 %613  ;;  %v10436_v30 = vpop.xlane.xlu1 %724  ;;  %778 = vmax.xlane.f32.xlu1 %v777_v27 }
 0x293   :  { %682 = vmax.xlane.f32.xlu0 %v681_v32 }
 0x294   :  { %v10439_v33 = vpop.xlane.xlu0 %685  ;;  %v10441_v34 = vpop.xlane.xlu1 %652 }
 0x298   :  { %v10443_v35 = vpop.xlane.xlu0 %697  ;;  %v10445_v37 = vpop.xlane.xlu1 %736 }
 0x29c   :  { %v10447_v40 = vpop.xlane.xlu0 %625  ;;  %v10449_v41 = vpop.xlane.xlu1 %664 }
 0x2a0   :  { %v10451_v58 = vpop.xlane.xlu0 %721  ;;  %v10453_v46 = vpop.xlane.xlu1 %748 }
 0x2a4   :  { %v10458_v43 = vpop.xlane.xlu0 %649  ;;  %v10460_v44 = vpop.xlane.xlu1 %676 }
 0x2a8   :  { %v10467_v52 = vpop.xlane.xlu0 %733  ;;  %v10469_v53 = vpop.xlane.xlu1 %760 }
 0x2a9   :  { %849 = vperm.xlu0 %9747, %v846_v9  }
 0x2ac   :  { %v10471_v57 = vpop.xlane.xlu0 %661  ;;  %v10473_v61 = vpop.xlane.xlu1 %772 }
 0x2b0   :  { %v10475_v0 = vpop.xlane.xlu0 %745  ;;  %v10477_v6 = vpop.xlane.xlu1 %595 }
 0x2b4   :  { %v10479_v7 = vpop.xlane.xlu1 %691  ;;  %v10481_v12 = vpop.xlane.xlu0 %673 }
 0x2b8   :  { %v10483_v13 = vpop.xlane.xlu1 %715  ;;  %v10485_v14 = vpop.xlane.xlu0 %757 }
 0x2bc   :  { %v10487_v16 = vpop.xlane.xlu1 %643  ;;  %v10489_v25 = vpop.xlane.xlu0 %769 }
 0x2c0   :  { %v10491_v24 = vpop.xlane.xlu1 %727  ;;  %v10493_v27 = vpop.xlane.xlu0 %592 }
 0x2c3   :  { %1261 = vxpose.xlu1.b32.start [1/2] (short) (narrow) %v10323_v60, 32 }
 0x2c4   :  { %v10496_v2 = vpop.xlane.xlu1 %655  ;;  %v10498_v32 = vpop.xlane.xlu0 %604 }
 0x2c7   :  { %1262 = vxpose.xlu1.b32.end [2/2] (short) (narrow) %v10317_v55, 32 }
 0x2c8   :  { %v10501_v42 = vpop.xlane.xlu1 %739  ;;  %v10503_v9 = vpop.xlane.xlu0 %616 }
 0x2cc   :  { %v10505_v49 = vpop.xlane.xlu1 %667  ;;  %v689_v56 = vpop.xlane.xlu0 %688 }
 0x2d0   :  { %v10507_v10 = vpop.xlane.xlu1 %751  ;;  %v701_v3 = vpop.xlane.xlu0 %700 }
 0x2d4   :  { %v10509_v45 = vpop.xlane.xlu1 %679  ;;  %v10511_v38 = vpop.xlane.xlu0 %628 }
 0x2d8   :  { %v10513_v60 = vpop.xlane.xlu1 %763  ;;  %v10515_v29 = vpop.xlane.xlu0 %712 }
 0x2dc   :  { %v10517_v15 = vpop.xlane.xlu1 %622  ;;  %v10519_v55 = vpop.xlane.xlu0 %640 }
 0x2dd   :  { %16785 = vst [vmem:[#allocation34_spill] sm:$0xff] %v10517_v15  ;;  %v817_v15 = vmax.f32 %v701_v3, -3e+38  ;;  %v814_v3 = vmax.f32 %v10479_v7, -3e+38 }
 0x2e0   :  { %v695_v1 = vpop.xlane.xlu1 %694  ;;  %v10521_v54 = vpop.xlane.xlu0 %607 }
 0x2e4   :  { %v10523_v62 = vpop.permute.xlu1 %852  ;;  %v10525_v26 = vpop.xlane.xlu0 %619 }
 0x2e5   :  { %16786 = vst [vmem:[#allocation35_spill] sm:$0xff] %v10523_v62  ;;  %v813_v62 = vmax.f32 %v689_v56, -3e+38  ;;  %v824_v56 = vmax.f32 %v10451_v58, -3e+38 }
 0x2e7   :  { %v1087_v8 = vrot.slane %v813_v62, %v10006_v21  ;;  %v1106_v62 = vrot.slane %v817_v15, %v10006_v21  ;;  %v829_v15 = vmax.f32 %v10445_v37, -3e+38 }
 0x2e8   :  { %v2279_v36 = vpop.permute.xlu1 %2278  ;;  %v704_v63 = vpop.xlane.xlu0 %703 }
 0x2e9   :  { %9521 = vmatpush3.bf16.msra.mxu1 %v2279_v36  ;;  %v780_v36 = vmax.f32 %v10412_v11, -3e+38  ;;  %v815_v11 = vmax.f32 %v695_v1, -3e+38 }
 0x2ea   :  { %9671 = vmatprep.subr.bf16.mxu1 %v9670_v59 }
 0x2eb   :  { %v10553_v19 = vrot.slane %v780_v36, %v10004_v17 }
 0x2ec   :  { %v10530_v31 = vpop.xlane.xlu0 %631  ;;  %9523 = vmatmul.mubr.msk.bf16.vlgmr.msra.gmra.mrb[4].mxu1 %vm16787_vm0, %v9750_v20  ;;  %v788_v20 = vmax.f32 %v10434_v28, -3e+38  ;;  %vm16394_vm0 = vcmask 195712   ;;  %v10557_v28 = vrot.slane %v784_v4, %v10004_v17  ;;  %v1097_v4 = vrot.slane %v815_v11, %v10010_v23 }
 0x2ed   :  { %9673 = vmatpush3.bf16.msra.mxu1 %v9670_v59  ;;  %v812_v59 = vmax.f32 %v10439_v33, -3e+38  ;;  %v833_v11 = vmax.f32 %v10453_v46, -3e+38  ;;  %v804_v46 = vmax.f32 %v10471_v57, -3e+38 }
 0x2ee   :  { %9675 = vmatprep.subr.bf16.mxu1 %v9674_v47  ;;  %v10565_v1 = vrot.slane %v788_v20, %v10004_v17  ;;  %v800_v20 = vmax.f32 %v10458_v43, -3e+38  ;;  %v1140_v43 = vrot.slane %v824_v56, %v10004_v17  ;;  %v781_v57 = vmax.f32 %v10493_v27, -3e+38 }
 0x2f0   :  { %v10533_v48 = vpop.xlane.xlu0 %775 }
 0x2f1   :  { %16788 = vst [vmem:[#allocation36_spill] sm:$0xff] %v10533_v48  ;;  %9677 = vmatpush3.bf16.msra.mxu1 %v9674_v47  ;;  %v825_v47 = vmax.f32 %v10436_v30, -3e+38  ;;  %v1083_v30 = vrot.slane %v812_v59, %v10004_v17  ;;  %v801_v59 = vmax.f32 %v10441_v34, -3e+38 }
 0x2f2   :  { %9548 = vmatprep.subr.bf16.mxu1 %v16789_v5  ;;  %v816_v5 = vmax.f32 %v10443_v35, -3e+38 }
 0x2f3   :  { %v1144_v33 = vrot.slane %v825_v47, %v10006_v21  ;;  %v1088_v36 = vsel %vm16792_vm5, %v1087_v8, %v1083_v30  ;;  %v1092_v47 = vrot.slane %v814_v3, %v10008_v22  ;;  %v805_v8 = vmax.f32 %v10449_v41, -3e+38 }
 0x2f4   :  { %v10536_v39 = vpop.xlane.xlu0 %598  ;;  %v1102_v35 = vrot.slane %v816_v5, %v10004_v17  ;;  %v792_v5 = vmax.f32 %v10447_v40, -3e+38  ;;  %v809_v40 = vmax.f32 %v10460_v44, -3e+38  ;;  %vm16794_vm5 = vcmask 261312  }
 0x2f5   :  { %16790 = vst [vmem:[#allocation37_spill] sm:$0xff] %v10536_v39  ;;  %v818_v39 = vmax.f32 %v704_v63, -3e+38  ;;  %v10560_v63 = vrot.slane %v796_v51, %v10004_v17  ;;  %v1093_v34 = vsel %vm16394_vm0, %v1092_v47, %v1088_v36  ;;  %vm16795_vm9 = vmmov %vm16794_vm5  ;;  %v1026_v41 = vrot.slane %v800_v20, %v10004_v17 }
 0x2f6   :  { %v832_v44 = vmax.f32 %v10475_v0, -3e+38  ;;  %v10602_v56 = vrot.slane %v792_v5, %v10004_v17  ;;  %v1049_v36 = vrot.slane %v805_v8, %v10006_v21  ;;  %v1068_v20 = vrot.slane %v809_v40, %v10006_v21 }
 0x2f7   :  { %16791 = vst [vmem:[#allocation38_spill] sm:$0xff] %v10560_v63  ;;  %v1111_v50 = vrot.slane %v818_v39, %v10008_v22  ;;  %v828_v39 = vmax.f32 %v10467_v52, -3e+38  ;;  %v1107_v63 = vsel %vm16793_vm12, %v1106_v62, %v1102_v35  ;;  %v1098_v52 = vsel %vm16794_vm5, %v1097_v4, %v1093_v34 }
 0x2f8   :  { %v10546_v48 = vpop.xlane.xlu0 %610  ;;  %v1030_v62 = vrot.slane %v801_v59, %v10006_v21  ;;  %vm16796_vm12 = vcmask 1041409   ;;  %v808_v4 = vmax.f32 %v10481_v12, -3e+38  ;;  %v1045_v47 = vrot.slane %v804_v46, %v10004_v17 }
 0x2f9   :  { %v1112_v37 = vsel %vm16394_vm0, %v1111_v50, %v1107_v63  ;;  %v1163_v63 = vrot.slane %v829_v15, %v10006_v21  ;;  %v1159_v50 = vrot.slane %v828_v39, %v10004_v17  ;;  %v1182_v15 = vrot.slane %v833_v11, %v10006_v21 }
 0x2fa   :  { %v782_v5 = vmax.f32 %v10477_v6, -3e+38  ;;  %v836_v12 = vmax.f32 %v10485_v14, -3e+38  ;;  %v1064_v8 = vrot.slane %v808_v4, %v10004_v17  ;;  %v826_v11 = vmax.f32 %v10491_v24, -3e+38 }
 0x2fb   :  { %v930_v34 = vrot.slane %v781_v57, %v10006_v21  ;;  %v802_v14 = vmax.f32 %v10496_v2, -3e+38  ;;  %v830_v40 = vmax.f32 %v10501_v42, -3e+38  ;;  %v789_v24 = vmax.f32 %v10503_v9, -3e+38 }
 0x2fc   :  { %v707_v7 = vpop.xlane.xlu0 %706  ;;  %v806_v2 = vmax.f32 %v10505_v49, -3e+38  ;;  %v1149_v46 = vrot.slane %v826_v11, %v10008_v22  ;;  %v10653_v49 = vld [vmem:[%s16327_s6] sm:$0xff]   ;;  %v821_v57 = vmax.f32 %v10515_v29, -3e+38 }
 0x2fd   :  { %v819_v51 = vmax.f32 %v707_v7, -3e+38  ;;  %v837_v7 = vmax.f32 %v10469_v53, -3e+38  ;;  %v841_v53 = vmax.f32 %v10473_v61, -3e+38  ;;  %v1035_v9 = vrot.slane %v802_v14, %v10008_v22 }
 0x2fe   :  { %v822_v61 = vmax.f32 %v10483_v13, -3e+38  ;;  %v1197_v13 = vrot.slane %v836_v12, %v10004_v17  ;;  %v973_v4 = vrot.slane %v789_v24, %v10006_v21  ;;  %v9421_v29 = vunpack.c.l.bf16 %v10653_v49 }
 0x2ff   :  { %v1116_v58 = vrot.slane %v819_v51, %v10010_v23  ;;  %v1201_v39 = vrot.slane %v837_v7, %v10006_v21  ;;  %v1220_v6 = vrot.slane %v841_v53, %v10006_v21  ;;  %v797_v53 = vmax.f32 %v10519_v55, -3e+38 }
 0x300   :  { %v10585_v30 = vpop.xlane.xlu0 %634  ;;  %v1130_v42 = vrot.slane %v822_v61, %v10008_v22  ;;  %v1125_v61 = vrot.slane %v821_v57, %v10006_v21 }
 0x301   :  { %v1117_v3 = vsel %vm16795_vm9, %v1116_v58, %v1112_v37  ;;  %vm16797_vm9 = vcmask 130112   ;;  %v840_v58 = vmax.f32 %v10489_v25, -3e+38  ;;  %v1011_v11 = vrot.slane %v797_v53, %v10006_v21 }
 0x302   :  { %v10595_v35 = vsel %vm16796_vm12, %v1117_v3, %v1098_v52  ;;  %v1145_v59 = vsel %vm16797_vm9, %v1144_v33, %v1140_v43  ;;  %vm16798_vm5 = vmmov %vm16797_vm9  ;;  %v1178_v33 = vrot.slane %v832_v44, %v10004_v17  ;;  %v785_v43 = vmax.f32 %v10498_v32, -3e+38 }
 0x303   :  { %v1031_v0 = vsel %vm16798_vm5, %v1030_v62, %v1026_v41  ;;  %vm16799_vm12 = vmmov %vm16798_vm5  ;;  %v937_v52 = vrot.slane %v782_v5, %v10008_v22  ;;  %v798_v62 = vmax.f32 %v10487_v16, -3e+38  ;;  %v1216_v41 = vrot.slane %v840_v58, %v10004_v17 }
 0x304   :  { %v10607_v51 = vpop.xlane.xlu0 %718  ;;  %v1164_v27 = vsel %vm16799_vm12, %v1163_v63, %v1159_v50  ;;  %vm16800_vm9 = vmmov %vm16798_vm5  ;;  %v1183_v3 = vsel %vm16798_vm5, %v1182_v15, %v1178_v33  ;;  %v954_v7 = vrot.slane %v785_v43, %v10006_v21  ;;  %v1168_v16 = vrot.slane %v830_v40, %v10008_v22 }
 0x305   :  { %v1050_v25 = vsel %vm16800_vm9, %v1049_v36, %v1045_v47  ;;  %vm16801_vm12 = vmmov %vm16798_vm5  ;;  %v834_v44 = vmax.f32 %v10507_v10, -3e+38  ;;  %v1202_v36 = vsel %vm16798_vm5, %v1201_v39, %v1197_v13  ;;  %v1016_v15 = vrot.slane %v798_v62, %v10008_v22 }
 0x306   :  { %v10640_v32 = vsel %vm16801_vm12, %v1068_v20, %v1064_v8  ;;  %vm16802_vm9 = vmmov %vm16798_vm5  ;;  %v1054_v10 = vrot.slane %v806_v2, %v10008_v22  ;;  %v10666_v47 = vsel %vm16394_vm0, %v1149_v46, %v1145_v59  ;;  %v838_v5 = vmax.f32 %v10513_v60, -3e+38 }
 0x307   :  { %v932_v63 = vsel %vm16802_vm9, %v930_v34, %v10553_v19  ;;  %v793_v19 = vmax.f32 %v10511_v38, -3e+38  ;;  %vm16803_vm12 = vmmov %vm16798_vm5  ;;  %v10676_v39 = vsel %vm16394_vm0, %v1035_v9, %v1031_v0  ;;  %v10681_v55 = vsel %vm16394_vm0, %v1168_v16, %v1164_v27 }
 0x308   :  { %v10625_v37 = vpop.xlane.xlu0 %646  ;;  %v10661_v20 = vsel %vm16803_vm12, %v1220_v6, %v1216_v41  ;;  %v10670_v12 = vsel %vm16394_vm0, %v937_v52, %v932_v63  ;;  %vm16804_vm9 = vmmov %vm16798_vm5  ;;  %v1187_v59 = vrot.slane %v834_v44, %v10008_v22  ;;  %v974_v60 = vsel %vm16798_vm5, %v973_v4, %v10565_v1  ;;  %v16805_v1 = vld [vmem:[#allocation36_spill] sm:$0xff]  ;;  %v16806_v52 = vld [vmem:[#allocation34_spill] sm:$0xff] }
 0x309   :  { %v955_v33 = vsel %vm16804_vm9, %v954_v7, %v10557_v28  ;;  %v810_v58 = vmax.f32 %v10509_v45, -3e+38  ;;  %v992_v8 = vrot.slane %v793_v19, %v10006_v21  ;;  %v10690_v0 = vsel %vm16394_vm0, %v1054_v10, %v1050_v25  ;;  %vm16807_vm12 = vmmov %vm16798_vm5 }
 0x30a   :  { %v786_v28 = vmax.f32 %v10521_v54, -3e+38  ;;  %v790_v27 = vmax.f32 %v10525_v26, -3e+38  ;;  %v1206_v34 = vrot.slane %v838_v5, %v10008_v22  ;;  %v794_v6 = vmax.f32 %v10530_v31, -3e+38  ;;  %vm16808_vm9 = vmmov %vm16798_vm5 }
 0x30b   :  { %v842_v14 = vmax.f32 %v16805_v1, -3e+38  ;;  %v823_v45 = vmax.f32 %v10607_v51, -3e+38  ;;  %v1188_v40 = vsel %vm16394_vm0, %v1187_v59, %v1183_v3  ;;  %v791_v25 = vmax.f32 %v16806_v52, -3e+38  ;;  %vm16810_vm3 = vmmov %vm16798_vm5 }
 0x30c   :  { %v731_v50 = vpop.xlane.xlu0 %730  ;;  %v787_v13 = vmax.f32 %v10546_v48, -3e+38  ;;  %v10703_v54 = vrot.slane %v810_v58, %v10008_v22  ;;  %v993_v26 = vsel %vm16807_vm12, %v992_v8, %v10602_v56  ;;  %v1126_v31 = vsel %vm16808_vm9, %v1125_v61, %v10550_v18  ;;  %v16809_v51 = vld [vmem:[#allocation38_spill] sm:$0xff]  ;;  %v16811_v48 = vld [vmem:[#allocation37_spill] sm:$0xff] }
 0x30d   :  { %v827_v24 = vmax.f32 %v731_v50, -3e+38  ;;  %v1012_v41 = vsel %vm16810_vm3, %v1011_v11, %v16809_v51  ;;  %v959_v3 = vrot.slane %v786_v28, %v10008_v22  ;;  %v978_v2 = vrot.slane %v790_v27, %v10008_v22  ;;  %vm16813_vm3 = vmmov %vm16812_vm10 }
 0x30e   :  { %v783_v46 = vmax.f32 %v16811_v48, -3e+38  ;;  %v1207_v63 = vsel %vm16812_vm10, %v1206_v34, %v1202_v36  ;;  %v997_v50 = vrot.slane %v794_v6, %v10008_v22  ;;  %v1225_v56 = vrot.slane %v842_v14, %v10008_v22  ;;  %vm16814_vm10 = vmmov %vm16813_vm3 }
 0x30f   :  { %v1135_v18 = vrot.slane %v823_v45, %v10010_v23  ;;  %v983_v7 = vrot.slane %v791_v25, %v10010_v23  ;;  %v964_v16 = vrot.slane %v787_v13, %v10010_v23  ;;  %v1131_v44 = vsel %vm16813_vm3, %v1130_v42, %v1126_v31  ;;  %vm16815_vm12 = vmmov %vm16813_vm3 }
 0x310   :  { %v10672_v38 = vpop.xlane.xlu0 %658  ;;  %v1154_v4 = vrot.slane %v827_v24, %v10010_v23  ;;  %v795_v36 = vmax.f32 %v10585_v30, -3e+38  ;;  %v1017_v57 = vsel %vm16814_vm10, %v1016_v15, %v1012_v41  ;;  %v960_v5 = vsel %vm16815_vm12, %v959_v3, %v955_v33  ;;  %vm16816_vm8 = vmmov %vm16813_vm3 }
 0x311   :  { %v979_v59 = vsel %vm16816_vm8, %v978_v2, %v974_v60  ;;  %v944_v58 = vrot.slane %v783_v46, %v10010_v23  ;;  %v799_v42 = vmax.f32 %v10625_v37, -3e+38  ;;  %v998_v8 = vsel %vm16813_vm3, %v997_v50, %v993_v26  ;;  %vm16818_vm10 = vmmov %vm16813_vm3  ;;  %v16858_v37 = vld [vmem:[#allocation15_spill] sm:$0xff] }
 0x312   :  { %vm16817_vm9 = vcmask 261312   ;;  %v803_v30 = vmax.f32 %v10672_v38, -3e+38  ;;  %v1226_v15 = vsel %vm16818_vm10, %v1225_v56, %v10661_v20  ;;  %vm10739_vm8 = vcmp.gt.f32.partialorder %v9421_v29, 0.0 }
 0x313   :  { %v1136_v61 = vsel %vm16817_vm9, %v1135_v18, %v1131_v44  ;;  %vm16819_vm0 = vmmov %vm16817_vm9  ;;  %v1002_v38 = vrot.slane %v795_v36, %v10010_v23  ;;  %vm16824_vm3 = vcmask 1042434   ;;  %v1021_v45 = vrot.slane %v799_v42, %v10010_v23 }
 0x314   :  { %v743_v43 = vpop.xlane.xlu0 %742  ;;  %v965_v28 = vsel %vm16819_vm0, %v964_v16, %v960_v5  ;;  %vm16820_vm12 = vmmov %vm16819_vm0  ;;  %v1247_v14 = vsel %vm16824_vm3, %v1136_v61, %v10595_v35  ;;  %vm16825_vm10 = vcmask 1041409   ;;  %v1040_v25 = vrot.slane %v803_v30, %v10010_v23  ;;  %v16851_v5 = vld [vmem:[#allocation32_spill] sm:$0xff] }
 0x315   :  { %v831_v62 = vmax.f32 %v743_v43, -3e+38  ;;  %v1155_v33 = vsel %vm16820_vm12, %v1154_v4, %v10666_v47  ;;  %vm16823_vm9 = vmmov %vm16819_vm0  ;;  %v946_v47 = vsel %vm16819_vm0, %v944_v58, %v10670_v12  ;;  %vm16826_vm12 = vcmask 1043459   ;;  %v16853_v58 = vld [vmem:[#allocation14_spill] sm:$0xff] }
 0x316   :  { %v1233_v43 = vsel %vm16825_vm10, %v965_v28, %v946_v47  ;;  %v1248_v52 = vsel %vm16826_vm12, %v1155_v33, %v1247_v14  ;;  %vm16832_vm10 = vcmask 1045509   ;;  %v9422_v61 = vunpack.c.h.bf16 %v10653_v49 }
 0x317   :  { %v1173_v10 = vrot.slane %v831_v62, %v10010_v23  ;;  %v16856_v30 = vmov 0.0   ;;  %v16859_v14 = vmov 0 }
 0x318   :  { %v671_v9 = vpop.xlane.xlu0 %670 }
 0x319   :  { %v767_v19 = vpop.xlane.xlu1 %766  ;;  %v807_v60 = vmax.f32 %v671_v9, -3e+38  ;;  %v1174_v6 = vsel %vm16823_vm9, %v1173_v10, %v10681_v55  ;;  %vm16827_vm9 = vmmov %vm16819_vm0  ;;  %vm16828_vm0 = vcmask 1044484  }
 0x31a   :  { %v839_v53 = vmax.f32 %v767_v19, -3e+38  ;;  %v1249_v35 = vsel %vm16828_vm0, %v1174_v6, %v1248_v52  ;;  %vm16829_vm3 = vmmov %vm16827_vm9  ;;  %v16845_v19 = vld [vmem:[#allocation33_spill] sm:$0xff] }
 0x31b   :  { %v1059_v24 = vrot.slane %v807_v60, %v10010_v23  ;;  %v1003_v31 = vsel %vm16829_vm3, %v1002_v38, %v998_v8  ;;  %vm16830_vm5 = vmmov %vm16829_vm3 }
 0x31c   :  { %v755_v11 = vpop.xlane.xlu0 %754  ;;  %v1211_v20 = vrot.slane %v839_v53, %v10010_v23  ;;  %vm16831_vm4 = vmmov %vm16829_vm3 }
 0x31d   :  { %v835_v27 = vmax.f32 %v755_v11, -3e+38  ;;  %v779_v34 = vpop.xlane.xlu1 %778  ;;  %vm16833_vm12 = vmmov %vm16829_vm3 }
 0x31e   :  { %v843_v1 = vmax.f32 %v779_v34, -3e+38  ;;  %v1212_v62 = vsel %vm16830_vm5, %v1211_v20, %v1207_v63  ;;  %v984_v3 = vsel %vm16833_vm12, %v983_v7, %v979_v59  ;;  %vm16834_vm11 = vmmov %vm16829_vm3  ;;  %vm16839_vm5 = vcmask 1047559  }
 0x31f   :  { %v1192_v29 = vrot.slane %v835_v27, %v10010_v23  ;;  %v1022_v2 = vsel %vm16834_vm11, %v1021_v45, %v1017_v57  ;;  %v1235_v50 = vsel %vm16837_vm7, %v984_v3, %v1233_v43  ;;  %vm16838_vm0 = vmmov %vm16829_vm3  ;;  %vm16841_vm3 = vcmask 1043459  }
 0x320   :  { %v1230_v55 = vrot.slane %v843_v1, %v10010_v23  ;;  %v683_v13 = vpop.xlane.xlu0 %682  ;;  %v1041_v56 = vsel %vm16838_vm0, %v1040_v25, %v10676_v39  ;;  %v1237_v9 = vsel %vm16841_vm3, %v1003_v31, %v1235_v50  ;;  %vm16842_vm11 = vmmov %vm16838_vm0  ;;  %vm16847_vm12 = vcmask 1046534  }
 0x321   :  { %v1193_v12 = vsel %vm16827_vm9, %v1192_v29, %v1188_v40  ;;  %v811_v26 = vmax.f32 %v683_v13, -3e+38  ;;  %v16836_v40 = vld [vmem:[#allocation35_spill] sm:$0xff]  ;;  %v1060_v7 = vsel %vm16842_vm11, %v1059_v24, %v10690_v0  ;;  %vm16844_vm7 = vmmov %vm16838_vm0  ;;  %vm1260_vm11 = vcmp.gt.f32.partialorder %v9422_v61, 0.0 }
 0x322   :  { %v1231_v51 = vsel %vm16831_vm4, %v1230_v55, %v1226_v15  ;;  %v1250_v41 = vsel %vm16832_vm10, %v1193_v12, %v1249_v35  ;;  %vm16405_vm9 = vcmp.eq.s32.totalorder %v16836_v40, 1  ;;  %vm16840_vm4 = vcmask 195712   ;;  %vm16850_vm0 = vmmov %vm16839_vm5 }
 0x323   :  { %v1078_v48 = vrot.slane %v811_v26, %v10010_v23  ;;  %v1251_v46 = vsel %vm16835_vm13, %v1212_v62, %v1250_v41  ;;  %v1074_v18 = vsel %vm16840_vm4, %v10703_v54, %v10640_v32  ;;  %vm16843_vm13 = vcmask 1044484  }
 0x324   :  { %v1252_v63 = vsel %vm16839_vm5, %v1231_v51, %v1251_v46  ;;  %v1239_v44 = vsel %vm16843_vm13, %v1022_v2, %v1237_v9  ;;  %v16849_v54 = vmov 0   ;;  %vm16854_vm4 = vcmask 261120  }
 0x325   :  { %v1256_v16 = vsel %vm16405_vm9, %v1252_v63, 0.0  ;;  %v1079_v4 = vsel %vm16844_vm7, %v1078_v48, %v1074_v18  ;;  %v1241_v36 = vsel %vm16832_vm10, %v1041_v56, %v1239_v44  ;;  %v1293_v0 = vsel %vm10739_vm8, 1, %v16849_v54  ;;  %vm16855_vm3 = vmmov %vm16854_vm4 }
 0x326   :  { %v10784_v39 = vadd.f32 %v16845_v19, %v1256_v16  ;;  %v1243_v57 = vsel %vm16847_vm12, %v1060_v7, %v1241_v36  ;;  %v1302_v42 = vrot.slane %v1293_v0, %v16853_v58  ;;  %vm16857_vm8 = vmmov 0  }
 0x327   :  { %v1245_v10 = vsel %vm16850_vm0, %v1079_v4, %v1243_v57  ;;  %v10811_v28 = vsel %vm1260_vm11, 1, %v16849_v54  ;;  %v16862_v45 = vmov 0  ;;  %v1295_v26 = vcombine.high %v1293_v0, %v1293_v0 }
 0x328   :  { %16846 = vst [vmem:[#allocation36_spill] sm:$0xff] %v10784_v39  ;;  %v10788_v32 = vpop.permute.xlu0 %849  ;;  %v1310_v8 = vcombine.high %v1302_v42, %v1302_v42  ;;  %v1318_v11 = vrot.slane %v1302_v42, %v16853_v58  ;;  %v1351_v33 = vrot.slane %v10811_v28, %v16853_v58  ;;  %v16867_v62 = vmov 0 }
 0x329   :  { %16848 = vst [vmem:[#allocation34_spill] sm:$0xff] %v10788_v32  ;;  %vm16406_vm5 = vcmp.eq.s32.totalorder %v10788_v32, 1  ;;  %v16872_v18 = vmov 0  ;;  %v1309_v9 = vrot.slane %v1295_v26, %v16853_v58 }
 0x32a   :  { %v1255_v53 = vsel %vm16406_vm5, %v1245_v10, 0.0  ;;  %v1332_v15 = vrot.slane %v1310_v8, %v16853_v58  ;;  %vm1393_vm13 = vcmp.ne.s32.totalorder %v1318_v11, 0  ;;  %v1359_v34 = vcombine.high %v1351_v33, %v1351_v33 }
 0x32b   :  { %v10798_v59 = vadd.f32 %v16851_v5, %v1255_v53  ;;  %v1409_v27 = vsel %vm1393_vm13, 1, %v16849_v54  ;;  %v1367_v1 = vrot.slane %v1351_v33, %v16853_v58  ;;  %v1340_v12 = vcombine.high %v1318_v11, %v1318_v11 }
 0x32c   :  { %vm1394_vm7 = vcmp.ne.s32.totalorder %v1332_v15, 0  ;;  %v1342_v60 = vcombine.high %v1332_v15, %v1332_v15  ;;  %v1428_v38 = vrot.slane %v1409_v27, %v16858_v37  ;;  %v1381_v20 = vrot.slane %v1359_v34, %v16853_v58 }
 0x32d   :  { %16852 = vst [vmem:[#allocation38_spill] sm:$0xff] %v10798_v59  ;;  %9534 = vmatprep.mubr.msk.f32.mxu1 %vm16854_vm4, %v10798_v59  ;;  %v1410_v49 = vsel %vm1394_vm7, 1, %v16849_v54  ;;  %v1389_v52 = vcombine.high %v1367_v1, %v1367_v1  ;;  %v10878_v19 = vrot.slane %v1309_v9, %v16853_v58  ;;  %v16877_v53 = vmov 0 }
 0x32e   :  { %9535 = vmatmul.mubr.msk.f32.vlgmr.msra.gmra.mrb[2].mxu1 %vm16855_vm3, %v10784_v39  ;;  %v1432_v6 = vrot.slane %v1410_v49, %v16858_v37  ;;  %vm1396_vm10 = vcmp.ne.s32.totalorder %v1342_v60, 0  ;;  %vm10822_vm12 = vcmp.eq.s32.totalorder %v1428_v38, 1  ;;  %vm1402_vm4 = vcmp.ne.s32.totalorder %v1381_v20, 0 }
 0x32f   :  { %9552 = vmatprep.mubr.msk.bf16.mxu1 %vm16857_vm8, %v16856_v30  ;;  %v1412_v47 = vsel %vm1396_vm10, 1, %v16849_v54  ;;  %v16860_v14 = vsel %vm10822_vm12, 4294967295, %v16859_v14  ;;  %v1418_v13 = vsel %vm1402_vm4, 1, %v16849_v54  ;;  %vm16865_vm3 = vcmask 130048  }
 0x330   :  { %16861 = vst [vmem:[#allocation37_spill] sm:$0xff] %v16860_v14  ;;  %vm10826_vm0 = vcmp.eq.s32.totalorder %v1432_v6, 1  ;;  %v1440_v43 = vrot.slane %v1412_v47, %v16858_v37  ;;  %vm16866_vm11 = vmmov %vm16865_vm3  ;;  %v1464_v51 = vrot.slane %v1418_v13, %v16858_v37  ;;  %vm1403_vm7 = vcmp.ne.s32.totalorder %v1389_v52, 0 }
 0x331   :  { %v16863_v45 = vsel %vm10826_vm0, 4294967295, %v16862_v45  ;;  %vm16870_vm10 = vmmov %vm16865_vm3  ;;  %vm1395_vm4 = vcmp.ne.s32.totalorder %v1340_v12, 0  ;;  %v1419_v46 = vsel %vm1403_vm7, 1, %v16849_v54  ;;  %v1391_v5 = vcombine.high %v1381_v20, %v1381_v20 }
 0x332   :  { %16864 = vst [vmem:[#allocation33_spill] sm:$0xff] %v16863_v45  ;;  %vm10844_vm13 = vcmp.eq.s32.totalorder %v1440_v43, 1  ;;  %vm10864_vm9 = vcmp.eq.s32.totalorder %v1464_v51, 1  ;;  %v1411_v44 = vsel %vm1395_vm4, 1, %v16849_v54  ;;  %v1468_v4 = vrot.slane %v1419_v46, %v16858_v37  ;;  %vm16875_vm7 = vmmov %vm16865_vm3 }
 0x333   :  { %v16868_v62 = vsel %vm10844_vm13, 4294967295, %v16867_v62  ;;  %v16873_v18 = vsel %vm10864_vm9, 4294967295, %v16872_v18  ;;  %v1436_v0 = vrot.slane %v1411_v44, %v16858_v37  ;;  %v16880_v11 = vmov 0  ;;  %vm16883_vm5 = vmmov %vm16875_vm7 }
 0x334   :  { %16869 = vst [vmem:[#allocation32_spill] sm:$0xff] %v16868_v62  ;;  %16874 = vst [vmem:[#allocation14_spill] sm:$0xff] %v16873_v18  ;;  %vm10887_vm4 = vcmp.eq.s32.totalorder %v1468_v4, 1  ;;  %vm1404_vm8 = vcmp.ne.s32.totalorder %v1391_v5, 0  ;;  %v1311_v38 = vcombine.high %v1309_v9, %v1309_v9  ;;  %v16886_v47 = vmov 0 }
 0x335   :  { %v16878_v53 = vsel %vm10887_vm4, 4294967295, %v16877_v53  ;;  %v1420_v6 = vsel %vm1404_vm8, 1, %v16849_v54  ;;  %v1344_v51 = vcombine.high %v10811_v28, %v10811_v28 }
 0x336   :  { %16879 = vst [vmem:[#allocation15_spill] sm:$0xff] %v16878_v53  ;;  %v1472_v13 = vrot.slane %v1420_v6, %v16858_v37 }
 0x338   :  { %vm10945_vm15 = vcmp.eq.s32.totalorder %v1472_v13, 1 }
 0x343   :  { %v10830_v29 = vpop.trf.xlu1 }
 0x344   :  { %v1505_v25 = vsel %vm10822_vm12, %v10830_v29, -3e+38  ;;  %v1509_v55 = vsel %vm10826_vm0, %v10830_v29, -3e+38 }
 0x345   :  { %v1569_v24 = vsel %vm16865_vm3, %v1505_v25, -inf  ;;  %v1581_v31 = vsel %vm16866_vm11, %v1509_v55, -inf  ;;  %vm16871_vm11 = vmmov %vm16865_vm3  ;;  %v16889_v55 = vmov 0 }
 0x346   :  { %1570 = vmax.xlane.f32.xlu0 %v1569_v24  ;;  %v10931_v24 = vrot.slane %v1311_v38, %v16853_v58  ;;  %v16907_v38 = vmov 0 }
 0x347   :  { %v10841_v35 = vpop.trf.xlu1 }
 0x348   :  { %v1506_v41 = vsel %vm10822_vm12, %v10841_v35, -3e+38  ;;  %v1510_v3 = vsel %vm10826_vm0, %v10841_v35, -3e+38  ;;  %v1518_v2 = vsel %vm10844_vm13, %v10841_v35, -3e+38 }
 0x349   :  { %v1572_v48 = vsel %vm16870_vm10, %v1506_v41, -inf  ;;  %v1584_v50 = vsel %vm16865_vm3, %v1510_v3, -inf  ;;  %v1608_v56 = vsel %vm16871_vm11, %v1518_v2, -inf  ;;  %vm16876_vm10 = vmmov %vm16865_vm3  ;;  %vm1397_vm3 = vcmp.ne.s32.totalorder %v10878_v19, 0 }
 0x34a   :  { %1573 = vmax.xlane.f32.xlu1 %v1572_v48  ;;  %1582 = vmax.xlane.f32.xlu0 %v1581_v31  ;;  %vm1401_vm11 = vcmp.ne.s32.totalorder %v1367_v1, 0  ;;  %v1546_v42 = vsel %vm10887_vm4, %v10841_v35, -3e+38  ;;  %v1413_v8 = vsel %vm1397_vm3, 1, %v16849_v54  ;;  %vm16884_vm3 = vmmov %vm16883_vm5  ;;  %v16894_v2 = vmov 0 }
 0x34b   :  { %v10862_v63 = vpop.trf.xlu1  ;;  %v1417_v15 = vsel %vm1401_vm11, 1, %v16849_v54  ;;  %v1692_v33 = vsel %vm16883_vm5, %v1546_v42, -inf  ;;  %v1444_v60 = vrot.slane %v1413_v8, %v16858_v37  ;;  %vm16885_vm5 = vmmov %vm16884_vm3  ;;  %v16895_v2 = vsel %vm10945_vm15, 4294967295, %v16894_v2 }
 0x34c   :  { %v1507_v7 = vsel %vm10822_vm12, %v10862_v63, -3e+38  ;;  %v1543_v16 = vsel %vm10864_vm9, %v10862_v63, -3e+38  ;;  %v1511_v10 = vsel %vm10826_vm0, %v10862_v63, -3e+38  ;;  %v1460_v34 = vrot.slane %v1417_v15, %v16858_v37  ;;  %vm16893_vm2 = vmmov %vm16884_vm3 }
 0x34d   :  { %v1575_v36 = vsel %vm16875_vm7, %v1507_v7, -inf  ;;  %v1683_v57 = vsel %vm16876_vm10, %v1543_v16, -inf  ;;  %v1587_v61 = vsel %vm16875_vm7, %v1511_v10, -inf  ;;  %vm10896_vm10 = vcmp.eq.s32.totalorder %v1436_v0, 1  ;;  %vm16892_vm7 = vmmov %vm16884_vm3  ;;  %16896 = vst [vmem:[#allocation42_spill] sm:$0xff] %v16895_v2 }
 0x34e   :  { %1585 = vmax.xlane.f32.xlu1 %v1584_v50  ;;  %1609 = vmax.xlane.f32.xlu0 %v1608_v56  ;;  %v16881_v11 = vsel %vm10896_vm10, 4294967295, %v16880_v11  ;;  %v1513_v27 = vsel %vm10896_vm10, %v10830_v29, -3e+38  ;;  %v1519_v49 = vsel %vm10844_vm13, %v10862_v63, -3e+38  ;;  %vm10913_vm11 = vcmp.eq.s32.totalorder %v1444_v60, 1  ;;  %vm16903_vm14 = vmmov %vm16893_vm2 }
 0x34f   :  { %16882 = vst [vmem:[#allocation39_spill] sm:$0xff] %v16881_v11  ;;  %v1593_v20 = vsel %vm16884_vm3, %v1513_v27, -inf  ;;  %v1611_v1 = vsel %vm16885_vm5, %v1519_v49, -inf  ;;  %v16887_v47 = vsel %vm10913_vm11, 4294967295, %v16886_v47  ;;  %v10917_v43 = vpop.trf.xlu1  ;;  %v1514_v52 = vsel %vm10896_vm10, %v10841_v35, -3e+38 }
 0x350   :  { %16888 = vst [vmem:[#allocation40_spill] sm:$0xff] %v16887_v47  ;;  %v1522_v25 = vsel %vm10913_vm11, %v10841_v35, -3e+38  ;;  %vm10925_vm8 = vcmp.eq.s32.totalorder %v1460_v34, 1  ;;  %v1544_v12 = vsel %vm10864_vm9, %v10917_v43, -3e+38  ;;  %v1358_v50 = vrot.slane %v1344_v51, %v16853_v58 }
 0x351   :  { %v16890_v55 = vsel %vm10925_vm8, 4294967295, %v16889_v55  ;;  %v1596_v26 = vsel %vm16892_vm7, %v1514_v52, -inf  ;;  %v1620_v31 = vsel %vm16884_vm3, %v1522_v25, -inf  ;;  %vm1398_vm5 = vcmp.ne.s32.totalorder %v10931_v24, 0  ;;  %vm16897_vm7 = vmmov %vm16893_vm2 }
 0x352   :  { %1576 = vmax.xlane.f32.xlu1 %v1575_v36  ;;  %1684 = vmax.xlane.f32.xlu0 %v1683_v57  ;;  %16891 = vst [vmem:[#allocation41_spill] sm:$0xff] %v16890_v55  ;;  %v1537_v41 = vsel %vm10925_vm8, %v10830_v29, -3e+38  ;;  %v1686_v3 = vsel %vm16893_vm2, %v1544_v12, -inf  ;;  %v1414_v48 = vsel %vm1398_vm5, 1, %v16849_v54  ;;  %v10960_v7 = vrot.slane %v1358_v50, %v16853_v58  ;;  %vm16898_vm3 = vmmov %vm16893_vm2 }
 0x353   :  { %v1665_v46 = vsel %vm16897_vm7, %v1537_v41, -inf  ;;  %v1538_v28 = vsel %vm10925_vm8, %v10841_v35, -3e+38  ;;  %v1549_v56 = vsel %vm10945_vm15, %v10830_v29, -3e+38  ;;  %v1448_v9 = vrot.slane %v1414_v48, %v16858_v37  ;;  %vm16899_vm7 = vmmov %vm16893_vm2 }
 0x354   :  { %v1520_v16 = vsel %vm10844_vm13, %v10917_v43, -3e+38  ;;  %v1668_v44 = vsel %vm16893_vm2, %v1538_v28, -inf  ;;  %v1701_v4 = vsel %vm16898_vm3, %v1549_v56, -inf  ;;  %vm1405_vm5 = vcmp.ne.s32.totalorder %v10960_v7, 0 }
 0x355   :  { %v1541_v36 = vsel %vm10864_vm9, %v10830_v29, -3e+38  ;;  %v1614_v57 = vsel %vm16899_vm7, %v1520_v16, -inf  ;;  %vm10972_vm1 = vcmp.eq.s32.totalorder %v1448_v9, 1  ;;  %v16900_v0 = vmov 0  ;;  %vm16906_vm7 = vmmov %vm16893_vm2 }
 0x356   :  { %1588 = vmax.xlane.f32.xlu1 %v1587_v61  ;;  %1693 = vmax.xlane.f32.xlu0 %v1692_v33  ;;  %v16901_v0 = vsel %vm10972_vm1, 4294967295, %v16900_v0  ;;  %v1421_v10 = vsel %vm1405_vm5, 1, %v16849_v54  ;;  %v1677_v5 = vsel %vm16903_vm14, %v1541_v36, -inf  ;;  %v1341_v42 = vcombine.high %v10878_v19, %v10878_v19  ;;  %vm16904_vm14 = vmmov %vm16893_vm2 }
 0x357   :  { %16902 = vst [vmem:[#allocation43_spill] sm:$0xff] %v16901_v0  ;;  %v1542_v8 = vsel %vm10864_vm9, %v10841_v35, -3e+38  ;;  %v1525_v61 = vsel %vm10972_vm1, %v10830_v29, -3e+38  ;;  %v1476_v15 = vrot.slane %v1421_v10, %v16858_v37  ;;  %vm16905_vm5 = vmmov %vm16893_vm2  ;;  %v1360_v6 = vcombine.high %v1358_v50, %v1358_v50 }
 0x358   :  { %v1508_v33 = vsel %vm10822_vm12, %v10917_v43, -3e+38  ;;  %v1548_v19 = vsel %vm10887_vm4, %v10917_v43, -3e+38  ;;  %v1680_v60 = vsel %vm16904_vm14, %v1542_v8, -inf  ;;  %v1629_v27 = vsel %vm16893_vm2, %v1525_v61, -inf  ;;  %vm16910_vm14 = vmmov %vm16893_vm2 }
 0x359   :  { %vm1399_vm3 = vcmp.ne.s32.totalorder %v1341_v42, 0  ;;  %v1578_v49 = vsel %vm16905_vm5, %v1508_v33, -inf  ;;  %v1698_v34 = vsel %vm16906_vm7, %v1548_v19, -inf  ;;  %vm10997_vm9 = vcmp.eq.s32.totalorder %v1476_v15, 1  ;;  %vm16914_vm7 = vmmov %vm16893_vm2 }
 0x35a   :  { %1594 = vmax.xlane.f32.xlu1 %v1593_v20  ;;  %1612 = vmax.xlane.f32.xlu0 %v1611_v1  ;;  %v16908_v38 = vsel %vm10997_vm9, 4294967295, %v16907_v38  ;;  %v1512_v20 = vsel %vm10826_vm0, %v10917_v43, -3e+38  ;;  %v1415_v1 = vsel %vm1399_vm3, 1, %v16849_v54  ;;  %v1553_v52 = vsel %vm10997_vm9, %v10830_v29, -3e+38  ;;  %vm16927_vm12 = vmmov %vm16893_vm2 }
 0x35b   :  { %16909 = vst [vmem:[#allocation44_spill] sm:$0xff] %v16908_v38  ;;  %v1590_v25 = vsel %vm16910_vm14, %v1512_v20, -inf  ;;  %v1452_v13 = vrot.slane %v1415_v1, %v16858_v37  ;;  %v1388_v12 = vrot.slane %v1360_v6, %v16853_v58  ;;  %v1524_v51 = vsel %vm10913_vm11, %v10917_v43, -3e+38  ;;  %vm16915_vm14 = vmmov %vm16893_vm2 }
 0x35c   :  { %v16911_v41 = vmov 0  ;;  %v1626_v48 = vsel %vm16915_vm14, %v1524_v51, -inf  ;;  %v1517_v50 = vsel %vm10844_vm13, %v10830_v29, -3e+38  ;;  %v1545_v42 = vsel %vm10887_vm4, %v10830_v29, -3e+38 }
 0x35d   :  { %vm1406_vm5 = vcmp.ne.s32.totalorder %v1388_v12, 0  ;;  %vm11018_vm3 = vcmp.eq.s32.totalorder %v1452_v13, 1  ;;  %v1605_v9 = vsel %vm16893_vm2, %v1517_v50, -inf  ;;  %v1528_v19 = vsel %vm10972_vm1, %v10917_v43, -3e+38 }
 0x35e   :  { %1597 = vmax.xlane.f32.xlu1 %v1596_v26  ;;  %1621 = vmax.xlane.f32.xlu0 %v1620_v31  ;;  %v1713_v26 = vsel %vm16893_vm2, %v1553_v52, -inf  ;;  %v1515_v31 = vsel %vm10896_vm10, %v10862_v63, -3e+38  ;;  %v16912_v41 = vsel %vm11018_vm3, 4294967295, %v16911_v41  ;;  %v1529_v28 = vsel %vm11018_vm3, %v10830_v29, -3e+38 }
 0x35f   :  { %16913 = vst [vmem:[#allocation45_spill] sm:$0xff] %v16912_v41  ;;  %v1599_v58 = vsel %vm16914_vm7, %v1515_v31, -inf  ;;  %v1521_v6 = vsel %vm10913_vm11, %v10830_v29, -3e+38  ;;  %v1392_v13 = vcombine.high %v1388_v12, %v1388_v12  ;;  %v1556_v31 = vsel %vm10997_vm9, %v10917_v43, -3e+38 }
 0x360   :  { %v16928_v51 = vmov 0  ;;  %v1547_v12 = vsel %vm10887_vm4, %v10862_v63, -3e+38 }
 0x361   :  { %v1695_v50 = vsel %vm16893_vm2, %v1547_v12, -inf }
 0x362   :  { %1666 = vmax.xlane.f32.xlu1 %v1665_v46  ;;  %1687 = vmax.xlane.f32.xlu0 %v1686_v3  ;;  %v1422_v3 = vsel %vm1406_vm5, 1, %v16849_v54  ;;  %v1343_v46 = vcombine.high %v10931_v24, %v10931_v24  ;;  %vm16916_vm5 = vmmov %vm16893_vm2  ;;  %v1539_v24 = vsel %vm10925_vm8, %v10862_v63, -3e+38 }
 0x363   :  { %v1480_v56 = vrot.slane %v1422_v3, %v16858_v37  ;;  %v1641_v16 = vsel %vm16916_vm5, %v1529_v28, -inf  ;;  %vm16920_vm5 = vmmov %vm16893_vm2 }
 0x364   :  { %vm1400_vm7 = vcmp.ne.s32.totalorder %v1343_v46, 0 }
 0x365   :  { %vm11042_vm14 = vcmp.eq.s32.totalorder %v1480_v56, 1  ;;  %v1416_v36 = vsel %vm1400_vm7, 1, %v16849_v54  ;;  %vm16921_vm7 = vmmov %vm16893_vm2  ;;  %v1550_v56 = vsel %vm10945_vm15, %v10841_v35, -3e+38 }
 0x366   :  { %1669 = vmax.xlane.f32.xlu1 %v1668_v44  ;;  %1702 = vmax.xlane.f32.xlu0 %v1701_v4  ;;  %v1552_v44 = vsel %vm10945_vm15, %v10917_v43, -3e+38  ;;  %v16917_v4 = vmov 0  ;;  %v1557_v8 = vsel %vm11042_vm14, %v10830_v29, -3e+38  ;;  %v1456_v61 = vrot.slane %v1416_v36, %v16858_v37 }
 0x367   :  { %v16918_v4 = vsel %vm11042_vm14, 4294967295, %v16917_v4  ;;  %v1710_v10 = vsel %vm16920_vm5, %v1552_v44, -inf  ;;  %v1689_v15 = vsel %vm16921_vm7, %v1545_v42, -inf  ;;  %v1725_v33 = vsel %vm16893_vm2, %v1557_v8, -inf  ;;  %vm16925_vm7 = vmmov %vm16893_vm2 }
 0x368   :  { %16919 = vst [vmem:[#allocation46_spill] sm:$0xff] %v16918_v4  ;;  %vm11066_vm13 = vcmp.eq.s32.totalorder %v1456_v61, 1  ;;  %v1523_v36 = vsel %vm10913_vm11, %v10862_v63, -3e+38  ;;  %v1526_v42 = vsel %vm10972_vm1, %v10841_v35, -3e+38 }
 0x369   :  { %v1533_v20 = vsel %vm11066_vm13, %v10830_v29, -3e+38 }
 0x36a   :  { %1678 = vmax.xlane.f32.xlu1 %v1677_v5  ;;  %1615 = vmax.xlane.f32.xlu0 %v1614_v57  ;;  %v1671_v57 = vsel %vm16893_vm2, %v1539_v24, -inf  ;;  %v1390_v5 = vcombine.high %v10960_v7, %v10960_v7  ;;  %v1516_v7 = vsel %vm10896_vm10, %v10917_v43, -3e+38  ;;  %vm16926_vm10 = vmmov %vm16893_vm2 }
 0x36b   :  { %v1617_v52 = vsel %vm16926_vm10, %v1521_v6, -inf  ;;  %vm16932_vm10 = vmmov %vm16893_vm2 }
 0x36c   :  { %vm1407_vm5 = vcmp.ne.s32.totalorder %v1390_v5, 0 }
 0x36e   :  { %1681 = vmax.xlane.f32.xlu1 %v1680_v60  ;;  %1630 = vmax.xlane.f32.xlu0 %v1629_v27  ;;  %v16922_v60 = vmov 0  ;;  %v1423_v27 = vsel %vm1407_vm5, 1, %v16849_v54 }
 0x36f   :  { %v16923_v60 = vsel %vm11066_vm13, 4294967295, %v16922_v60  ;;  %v1484_v1 = vrot.slane %v1423_v27, %v16858_v37 }
 0x370   :  { %16924 = vst [vmem:[#allocation47_spill] sm:$0xff] %v16923_v60 }
 0x371   :  { %vm11088_vm5 = vcmp.eq.s32.totalorder %v1484_v1, 1 }
 0x372   :  { %1579 = vmax.xlane.f32.xlu1 %v1578_v49  ;;  %1699 = vmax.xlane.f32.xlu0 %v1698_v34  ;;  %v1602_v49 = vsel %vm16925_vm7, %v1516_v7, -inf  ;;  %v1638_v34 = vsel %vm16893_vm2, %v1528_v19, -inf  ;;  %v16929_v51 = vsel %vm11088_vm5, 4294967295, %v16928_v51  ;;  %vm16931_vm7 = vmmov %vm16893_vm2  ;;  %v1536_v7 = vsel %vm11066_vm13, %v10917_v43, -3e+38 }
 0x373   :  { %16930 = vst [vmem:[#allocation48_spill] sm:$0xff] %v16929_v51  ;;  %v1662_v27 = vsel %vm16893_vm2, %v1536_v7, -inf }
 0x376   :  { %1591 = vmax.xlane.f32.xlu1 %v1590_v25  ;;  %1714 = vmax.xlane.f32.xlu0 %v1713_v26  ;;  %v1653_v25 = vsel %vm16927_vm12, %v1533_v20, -inf  ;;  %v1540_v26 = vsel %vm10925_vm8, %v10917_v43, -3e+38  ;;  %vm1408_vm12 = vcmp.ne.s32.totalorder %v1392_v13, 0  ;;  %vm16933_vm8 = vmmov %vm16893_vm2  ;;  %v1527_v20 = vsel %vm10972_vm1, %v10862_v63, -3e+38 }
 0x377   :  { %v1674_v3 = vsel %vm16931_vm7, %v1540_v26, -inf  ;;  %v1424_v46 = vsel %vm1408_vm12, 1, %v16849_v54  ;;  %vm16934_vm7 = vmmov %vm16893_vm2  ;;  %v1555_v13 = vsel %vm10997_vm9, %v10862_v63, -3e+38 }
 0x378   :  { %v1704_v24 = vsel %vm16934_vm7, %v1550_v56, -inf  ;;  %vm16939_vm12 = vmmov %vm16893_vm2 }
 0x379   :  { %vm16940_vm7 = vmmov %vm16893_vm2 }
 0x37a   :  { %1600 = vmax.xlane.f32.xlu1 %v1599_v58  ;;  %1627 = vmax.xlane.f32.xlu0 %v1626_v48  ;;  %v1722_v58 = vsel %vm16932_vm10, %v1556_v31, -inf  ;;  %v1561_v48 = vsel %vm11088_vm5, %v10830_v29, -3e+38  ;;  %vm16935_vm10 = vmmov %vm16893_vm2  ;;  %v1632_v61 = vsel %vm16940_vm7, %v1526_v42, -inf  ;;  %v1558_v31 = vsel %vm11042_vm14, %v10841_v35, -3e+38 }
 0x37b   :  { %v1737_v28 = vsel %vm16933_vm8, %v1561_v48, -inf  ;;  %vm16943_vm7 = vmmov %vm16893_vm2  ;;  %v1534_v48 = vsel %vm11066_vm13, %v10841_v35, -3e+38 }
 0x37e   :  { %1606 = vmax.xlane.f32.xlu1 %v1605_v9  ;;  %1642 = vmax.xlane.f32.xlu0 %v1641_v16  ;;  %v1532_v9 = vsel %vm11018_vm3, %v10917_v43, -3e+38  ;;  %v1488_v16 = vrot.slane %v1424_v46, %v16858_v37  ;;  %v1623_v37 = vsel %vm16939_vm12, %v1523_v36, -inf  ;;  %vm16942_vm12 = vmmov %vm16893_vm2 }
 0x37f   :  { %v1650_v44 = vsel %vm16935_vm10, %v1532_v9, -inf  ;;  %vm16941_vm10 = vmmov %vm16893_vm2  ;;  %v1559_v9 = vsel %vm11042_vm14, %v10862_v63, -3e+38 }
 0x380   :  { %vm11118_vm8 = vcmp.eq.s32.totalorder %v1488_v16, 1 }
 0x381   :  { %v1565_v8 = vsel %vm11118_vm8, %v10830_v29, -3e+38  ;;  %v1554_v29 = vsel %vm10997_vm9, %v10841_v35, -3e+38 }
 0x382   :  { %1672 = vmax.xlane.f32.xlu1 %v1671_v57  ;;  %1711 = vmax.xlane.f32.xlu0 %v1710_v10  ;;  %v1560_v57 = vsel %vm11042_vm14, %v10917_v43, -3e+38  ;;  %v16936_v10 = vmov 0  ;;  %vm16983_vm14 = vcmask 195712  }
 0x383   :  { %v16937_v10 = vsel %vm11118_vm8, 4294967295, %v16936_v10  ;;  %v1734_v5 = vsel %vm16893_vm2, %v1560_v57, -inf  ;;  %v1535_v57 = vsel %vm11066_vm13, %v10862_v63, -3e+38 }
 0x384   :  { %16938 = vst [vmem:[#allocation49_spill] sm:$0xff] %v16937_v10 }
 0x386   :  { %1690 = vmax.xlane.f32.xlu1 %v1689_v15  ;;  %1726 = vmax.xlane.f32.xlu0 %v1725_v33  ;;  %v1749_v15 = vsel %vm16941_vm10, %v1565_v8, -inf  ;;  %v1551_v33 = vsel %vm10945_vm15, %v10862_v63, -3e+38  ;;  %vm16944_vm10 = vmmov %vm16893_vm2  ;;  %v1566_v8 = vsel %vm11118_vm8, %v10841_v35, -3e+38 }
 0x387   :  { %v1707_v19 = vsel %vm16942_vm12, %v1551_v33, -inf  ;;  %vm16945_vm12 = vmmov %vm16893_vm2  ;;  %v1564_v33 = vsel %vm11088_vm5, %v10917_v43, -3e+38 }
 0x388   :  { %v1635_v1 = vsel %vm16945_vm12, %v1527_v20, -inf  ;;  %vm16948_vm12 = vmmov %vm16893_vm2 }
 0x38a   :  { %1603 = vmax.xlane.f32.xlu1 %v1602_v49  ;;  %1639 = vmax.xlane.f32.xlu0 %v1638_v34  ;;  %v1567_v49 = vsel %vm11118_vm8, %v10862_v63, -3e+38  ;;  %v1716_v34 = vsel %vm16943_vm7, %v1554_v29, -inf  ;;  %vm16946_vm7 = vmmov %vm16893_vm2 }
 0x38b   :  { %v1755_v6 = vsel %vm16944_vm10, %v1567_v49, -inf  ;;  %v1719_v26 = vsel %vm16946_vm7, %v1555_v13, -inf  ;;  %vm16947_vm10 = vmmov %vm16893_vm2 }
 0x38c   :  { %vm16951_vm7 = vmmov %vm16893_vm2 }
 0x38e   :  { %1618 = vmax.xlane.f32.xlu1 %v1617_v52  ;;  %1654 = vmax.xlane.f32.xlu0 %v1653_v25  ;;  %v1530_v52 = vsel %vm11018_vm3, %v10841_v35, -3e+38 }
 0x38f   :  { %v1644_v25 = vsel %vm16893_vm2, %v1530_v52, -inf }
 0x392   :  { %1675 = vmax.xlane.f32.xlu1 %v1674_v3  ;;  %1723 = vmax.xlane.f32.xlu0 %v1722_v58  ;;  %v1728_v3 = vsel %vm16947_vm10, %v1558_v31, -inf  ;;  %v1531_v58 = vsel %vm11018_vm3, %v10862_v63, -3e+38  ;;  %vm16952_vm10 = vmmov %vm16893_vm2 }
 0x393   :  { %v1647_v12 = vsel %vm16948_vm12, %v1531_v58, -inf  ;;  %vm16953_vm12 = vmmov %vm16893_vm2 }
 0x396   :  { %1696 = vmax.xlane.f32.xlu1 %v1695_v50  ;;  %1738 = vmax.xlane.f32.xlu0 %v1737_v28  ;;  %v1656_v28 = vsel %vm16893_vm2, %v1534_v48, -inf }
 0x39a   :  { %1705 = vmax.xlane.f32.xlu1 %v1704_v24  ;;  %1651 = vmax.xlane.f32.xlu0 %v1650_v44  ;;  %v1731_v24 = vsel %vm16951_vm7, %v1559_v9, -inf  ;;  %v1562_v44 = vsel %vm11088_vm5, %v10841_v35, -3e+38  ;;  %vm16954_vm7 = vmmov %vm16893_vm2  ;;  %v1568_v35 = vsel %vm11118_vm8, %v10917_v43, -3e+38 }
 0x39b   :  { %v1740_v36 = vsel %vm16952_vm10, %v1562_v44, -inf  ;;  %vm16955_vm10 = vmmov %vm16893_vm2 }
 0x39e   :  { %1624 = vmax.xlane.f32.xlu1 %v1623_v37  ;;  %1735 = vmax.xlane.f32.xlu0 %v1734_v5  ;;  %v1659_v37 = vsel %vm16953_vm12, %v1535_v57, -inf  ;;  %v1563_v5 = vsel %vm11088_vm5, %v10862_v63, -3e+38  ;;  %v1746_v63 = vsel %vm16955_vm10, %v1564_v33, -inf  ;;  %vm16956_vm12 = vmmov %vm16893_vm2  ;;  %vm16967_vm10 = vcmask 195712  }
 0x39f   :  { %v1743_v42 = vsel %vm16893_vm2, %v1563_v5, -inf  ;;  %v1758_v49 = vsel %vm16956_vm12, %v1568_v35, -inf  ;;  %vm16965_vm2 = vcmask 130112  }
 0x3a0   :  { %vm16968_vm12 = vmmov %vm16965_vm2 }
 0x3a2   :  { %1633 = vmax.xlane.f32.xlu1 %v1632_v61  ;;  %1750 = vmax.xlane.f32.xlu0 %v1749_v15  ;;  %v1752_v15 = vsel %vm16954_vm7, %v1566_v8, -inf  ;;  %vm16966_vm7 = vmmov %vm16965_vm2 }
 0x3a3   :  { %vm16972_vm13 = vmmov %vm16966_vm7 }
 0x3a6   :  { %1708 = vmax.xlane.f32.xlu1 %v1707_v19  ;;  %1663 = vmax.xlane.f32.xlu0 %v1662_v27 }
 0x3aa   :  { %1717 = vmax.xlane.f32.xlu1 %v1716_v34  ;;  %1756 = vmax.xlane.f32.xlu0 %v1755_v6 }
 0x3ae   :  { %1636 = vmax.xlane.f32.xlu1 %v1635_v1 }
 0x3b2   :  { %1645 = vmax.xlane.f32.xlu1 %v1644_v25 }
 0x3b6   :  { %1720 = vmax.xlane.f32.xlu1 %v1719_v26 }
 0x3ba   :  { %1729 = vmax.xlane.f32.xlu1 %v1728_v3 }
 0x3be   :  { %1648 = vmax.xlane.f32.xlu1 %v1647_v12 }
 0x3bf   :  { %v11171_v46 = vpop.f32.mrb[4].mxu1 }
 0x3c0   :  { %16949 = vst [vmem:[#allocation50_spill] sm:$0xff] %v11171_v46  ;;  %v9524_v50 = vpop.f32.mrb[5].mxu1 }
 0x3c1   :  { %v11174_v56 = vpop.f32.mrb[6].mxu1 }
 0x3c2   :  { %16950 = vst [vmem:[#allocation51_spill] sm:$0xff] %v11174_v56  ;;  %1657 = vmax.xlane.f32.xlu1 %v1656_v28  ;;  %v9525_v16 = vpop.f32.mrb[7].mxu1 }
 0x3c6   :  { %1732 = vmax.xlane.f32.xlu1 %v1731_v24 }
 0x3ca   :  { %1741 = vmax.xlane.f32.xlu1 %v1740_v36 }
 0x3ce   :  { %1660 = vmax.xlane.f32.xlu1 %v1659_v37 }
 0x3d2   :  { %1744 = vmax.xlane.f32.xlu1 %v1743_v42 }
 0x3d3   :  { %v11195_v61 = vpop.xlane.xlu0 %1570 }
 0x3d6   :  { %1753 = vmax.xlane.f32.xlu1 %v1752_v15 }
 0x3d7   :  { %v11201_v7 = vpop.xlane.xlu1 %1573  ;;  %v11203_v19 = vpop.xlane.xlu0 %1582 }
 0x3da   :  { %1747 = vmax.xlane.f32.xlu1 %v1746_v63 }
 0x3db   :  { %v11209_v27 = vpop.xlane.xlu1 %1585  ;;  %v11211_v29 = vpop.xlane.xlu0 %1609 }
 0x3de   :  { %1759 = vmax.xlane.f32.xlu1 %v1758_v49 }
 0x3df   :  { %v11214_v34 = vpop.xlane.xlu1 %1576  ;;  %v1685_v6 = vpop.xlane.xlu0 %1684 }
 0x3e0   :  { %v1799_v47 = vmax.f32 %v1685_v6, -3e+38 }
 0x3e2   :  { %v2084_v56 = vrot.slane %v1799_v47, %v10008_v22 }
 0x3e3   :  { %v11216_v20 = vpop.xlane.xlu1 %1588  ;;  %v1694_v1 = vpop.xlane.xlu0 %1693 }
 0x3e4   :  { %v1802_v45 = vmax.f32 %v1694_v1, -3e+38 }
 0x3e7   :  { %v11218_v52 = vpop.xlane.xlu1 %1594  ;;  %v11220_v25 = vpop.xlane.xlu0 %1612 }
 0x3eb   :  { %v11222_v13 = vpop.xlane.xlu1 %1597  ;;  %v11224_v26 = vpop.xlane.xlu0 %1621 }
 0x3ef   :  { %v1667_v43 = vpop.xlane.xlu1 %1666  ;;  %v11228_v3 = vpop.xlane.xlu0 %1687 }
 0x3f0   :  { %v1793_v40 = vmax.f32 %v1667_v43, -3e+38 }
 0x3f2   :  { %v2056_v43 = vrot.slane %v1793_v40, %v10004_v17 }
 0x3f3   :  { %v11226_v31 = vpop.xlane.xlu1 %1669  ;;  %v11232_v48 = vpop.xlane.xlu0 %1702 }
 0x3f4   :  { %v1794_v59 = vmax.f32 %v11226_v31, -3e+38 }
 0x3f6   :  { %v2060_v47 = vrot.slane %v1794_v59, %v10006_v21 }
 0x3f7   :  { %v11230_v58 = vpop.xlane.xlu1 %1678  ;;  %v11236_v9 = vpop.xlane.xlu0 %1615 }
 0x3f8   :  { %v1797_v32 = vmax.f32 %v11230_v58, -3e+38 }
 0x3fb   :  { %v1682_v12 = vpop.xlane.xlu1 %1681  ;;  %v11248_v57 = vpop.xlane.xlu0 %1630 }
 0x3fc   :  { %v1798_v39 = vmax.f32 %v1682_v12, -3e+38 }
 0x3fe   :  { %v2079_v6 = vrot.slane %v1798_v39, %v10006_v21 }
 0x3ff   :  { %v11234_v50 = vpop.xlane.xlu1 %1579  ;;  %v11254_v5 = vpop.xlane.xlu0 %1699 }
 0x401   :  { %v9536_v28 = vpop.f32.mrb[2].mxu1 }
 0x402   :  { %2504 = vrot.lane.b32.xlu1 %v9536_v28, %s9859_s28  ;;  %v2405_v16 = vpop.f32.mrb[3].mxu1 }
 0x403   :  { %v11239_v24 = vpack.c.bf16 %v9536_v28, %v2405_v16  ;;  %v11241_v44 = vpop.xlane.xlu1 %1591  ;;  %v11256_v15 = vpop.xlane.xlu0 %1714 }
 0x405   :  { %9549 = vmatpush3.bf16.msra.mxu1 %v11239_v24 }
 0x406   :  { %2502 = vrot.lane.b32.xlu1 %v2405_v16, %s9859_s28  ;;  %9550 = vmatprep.subr.bf16.mxu1 %v16856_v30 }
 0x407   :  { %v11246_v36 = vpop.xlane.xlu1 %1600  ;;  %v11260_v63 = vpop.xlane.xlu0 %1627 }
 0x40a   :  { %2497 = vrot.lane.b32.xlu1 %v11239_v24, %s9860_s9 }
 0x40b   :  { %v11252_v37 = vpop.xlane.xlu1 %1606  ;;  %v11264_v28 = vpop.xlane.xlu0 %1642 }
 0x40f   :  { %v1673_v42 = vpop.xlane.xlu1 %1672  ;;  %v11266_v10 = vpop.xlane.xlu0 %1711 }
 0x410   :  { %v1795_v12 = vmax.f32 %v1673_v42, -3e+38 }
 0x413   :  { %v1691_v8 = vpop.xlane.xlu1 %1690  ;;  %v11270_v4 = vpop.xlane.xlu0 %1726 }
 0x417   :  { %v11258_v33 = vpop.xlane.xlu1 %1603  ;;  %v11274_v2 = vpop.xlane.xlu0 %1639 }
 0x418   :  { %16960 = vst [vmem:[#allocation55_spill] sm:$0xff] %v11274_v2 }
 0x41b   :  { %v11262_v35 = vpop.xlane.xlu1 %1618  ;;  %v11276_v18 = vpop.xlane.xlu0 %1654 }
 0x41c   :  { %16957 = vst [vmem:[#allocation52_spill] sm:$0xff] %v11262_v35  ;;  %16961 = vst [vmem:[#allocation56_spill] sm:$0xff] %v11276_v18 }
 0x41f   :  { %v1676_v49 = vpop.xlane.xlu1 %1675  ;;  %v11280_v11 = vpop.xlane.xlu0 %1723 }
 0x420   :  { %v1796_v2 = vmax.f32 %v1676_v49, -3e+38 }
 0x423   :  { %v1697_v16 = vpop.xlane.xlu1 %1696  ;;  %v11284_v14 = vpop.xlane.xlu0 %1738 }
 0x424   :  { %v1803_v18 = vmax.f32 %v1697_v16, -3e+38 }
 0x426   :  { %v2103_v59 = vrot.slane %v1803_v18, %v10008_v22 }
 0x427   :  { %v1706_v60 = vpop.xlane.xlu1 %1705  ;;  %v11294_v31 = vpop.xlane.xlu0 %1651 }
 0x428   :  { %v1806_v1 = vmax.f32 %v1706_v60, -3e+38  ;;  %16964 = vst [vmem:[#allocation59_spill] sm:$0xff] %v11294_v31  ;;  %v1809_v60 = vmax.f32 %v11256_v15, -3e+38  ;;  %v2061_v15 = vsel %vm16966_vm7, %v2060_v47, %v2056_v43 }
 0x429   :  { %v1813_v43 = vmax.f32 %v11270_v4, -3e+38 }
 0x42b   :  { %v11268_v51 = vpop.xlane.xlu1 %1624 }
 0x42c   :  { %16958 = vst [vmem:[#allocation53_spill] sm:$0xff] %v11268_v51  ;;  %v1801_v51 = vmax.f32 %v1691_v8, -3e+38 }
 0x42e   :  { %v2094_v40 = vrot.slane %v1801_v51, %v10004_v17  ;;  %v2070_v51 = vrot.slane %v1796_v2, %v10010_v23 }
 0x42f   :  { %v11272_v38 = vpop.xlane.xlu1 %1633 }
 0x430   :  { %16959 = vst [vmem:[#allocation54_spill] sm:$0xff] %v11272_v38  ;;  %v1805_v38 = vmax.f32 %v11232_v48, -3e+38 }
 0x432   :  { %v2113_v39 = vrot.slane %v1805_v38, %v10004_v17 }
 0x433   :  { %v1709_v62 = vpop.xlane.xlu1 %1708 }
 0x434   :  { %v1807_v58 = vmax.f32 %v1709_v62, -3e+38  ;;  %v1804_v62 = vmax.f32 %v11254_v5, -3e+38 }
 0x437   :  { %v1718_v53 = vpop.xlane.xlu1 %1717 }
 0x438   :  { %v1810_v35 = vmax.f32 %v1718_v53, -3e+38  ;;  %v2065_v53 = vrot.slane %v1795_v12, %v10008_v22  ;;  %v1736_v12 = vpop.xlane.xlu0 %1735 }
 0x43a   :  { %v2136_v38 = vrot.slane %v1810_v35, %v10006_v21  ;;  %v2108_v35 = vrot.slane %v1804_v62, %v10010_v23  ;;  %v2151_v62 = vrot.slane %v1813_v43, %v10004_v17 }
 0x43b   :  { %v11278_v55 = vpop.xlane.xlu1 %1636 }
 0x43c   :  { %16962 = vst [vmem:[#allocation57_spill] sm:$0xff] %v11278_v55  ;;  %v1800_v55 = vmax.f32 %v11228_v3, -3e+38  ;;  %v2075_v3 = vrot.slane %v1797_v32, %v10004_v17  ;;  %v2117_v32 = vrot.slane %v1806_v1, %v10006_v21 }
 0x43e   :  { %v2080_v42 = vsel %vm16965_vm2, %v2079_v6, %v2075_v3  ;;  %v2132_v6 = vrot.slane %v1809_v60, %v10004_v17  ;;  %vm16969_vm2 = vmmov %vm16967_vm10 }
 0x43f   :  { %v11282_v41 = vpop.xlane.xlu1 %1645  ;;  %v2085_v18 = vsel %vm16967_vm10, %v2084_v56, %v2080_v42  ;;  %vm16970_vm8 = vmmov %vm16969_vm2 }
 0x440   :  { %16963 = vst [vmem:[#allocation58_spill] sm:$0xff] %v11282_v41  ;;  %v2098_v41 = vrot.slane %v1802_v45, %v10006_v21  ;;  %v2089_v45 = vrot.slane %v1800_v55, %v10010_v23  ;;  %v2122_v55 = vrot.slane %v1807_v58, %v10008_v22  ;;  %v2118_v58 = vsel %vm16966_vm7, %v2117_v32, %v2113_v39  ;;  %vm16971_vm10 = vmmov %vm16969_vm2 }
 0x441   :  { %v2137_v3 = vsel %vm16972_vm13, %v2136_v38, %v2132_v6  ;;  %vm16974_vm5 = vmmov %vm16969_vm2  ;;  %vm16978_vm13 = vcmask 1041409  }
 0x442   :  { %v2099_v1 = vsel %vm16968_vm12, %v2098_v41, %v2094_v40  ;;  %v2123_v56 = vsel %vm16971_vm10, %v2122_v55, %v2118_v58  ;;  %vm16973_vm12 = vcmask 261312  }
 0x443   :  { %v1721_v0 = vpop.xlane.xlu1 %1720  ;;  %v2104_v2 = vsel %vm16969_vm2, %v2103_v59, %v2099_v1  ;;  %vm16975_vm2 = vmmov %vm16973_vm12 }
 0x444   :  { %v1811_v48 = vmax.f32 %v1721_v0, -3e+38  ;;  %v1808_v0 = vmax.f32 %v11266_v10, -3e+38  ;;  %v1812_v10 = vmax.f32 %v11280_v11, -3e+38  ;;  %v2109_v39 = vsel %vm16975_vm2, %v2108_v35, %v2104_v2  ;;  %vm16977_vm7 = vmmov %vm16975_vm2 }
 0x445   :  { %v1816_v11 = vmax.f32 %v1736_v12, -3e+38  ;;  %vm16979_vm10 = vmmov %vm16975_vm2 }
 0x446   :  { %v2141_v49 = vrot.slane %v1811_v48, %v10008_v22  ;;  %v2127_v47 = vrot.slane %v1808_v0, %v10010_v23  ;;  %v2146_v40 = vrot.slane %v1812_v10, %v10010_v23 }
 0x447   :  { %v1730_v46 = vpop.xlane.xlu1 %1729 }
 0x448   :  { %v1814_v16 = vmax.f32 %v1730_v46, -3e+38  ;;  %v2066_v46 = vsel %vm16970_vm8, %v2065_v53, %v2061_v15  ;;  %v2142_v48 = vsel %vm16974_vm5, %v2141_v49, %v2137_v3  ;;  %vm16976_vm8 = vmmov %vm16975_vm2  ;;  %v2128_v32 = vsel %vm16977_vm7, %v2127_v47, %v2123_v56  ;;  %v9751_v56 = vld [vmem:[%s16323_s2] sm:$0xff]   ;;  %v11366_v3 = vpop.xlane.xlu0 %1750 }
 0x449   :  { %v2071_v41 = vsel %vm16973_vm12, %v2070_v51, %v2066_v46  ;;  %v2090_v59 = vsel %vm16976_vm8, %v2089_v45, %v2085_v18  ;;  %v2147_v0 = vsel %vm16979_vm10, %v2146_v40, %v2142_v48  ;;  %vm16980_vm5 = vcmask 1042434   ;;  %v16991_v40 = vld [vmem:[#allocation17_spill] sm:$0xff] }
 0x44a   :  { %v2155_v60 = vrot.slane %v1814_v16, %v10006_v21  ;;  %v2212_v53 = vsel %vm16978_vm13, %v2090_v59, %v2071_v41  ;;  %v2165_v15 = vrot.slane %v1816_v11, %v10010_v23  ;;  %vm16981_vm12 = vcmask 130112   ;;  %v16995_v59 = vld [vmem:[#allocation22_spill] sm:$0xff] }
 0x44b   :  { %v11298_v8 = vpop.xlane.xlu1 %1648  ;;  %v2213_v38 = vsel %vm16980_vm5, %v2109_v39, %v2212_v53  ;;  %vm16982_vm2 = vcmask 1043459   ;;  %vm16984_vm8 = vcmask 1044484   ;;  %vm16985_vm13 = vcmask 1045509   ;;  %v16997_v53 = vld [vmem:[#allocation18_spill] sm:$0xff] }
 0x44c   :  { %v2156_v51 = vsel %vm16981_vm12, %v2155_v60, %v2151_v62  ;;  %v2214_v16 = vsel %vm16982_vm2, %v2128_v32, %v2213_v38  ;;  %v11368_v41 = vpop.xlane.xlu0 %1663  ;;  %v16990_v60 = vld [vmem:[#allocation20_spill] sm:$0xff]  ;;  %vm16992_vm10 = vnez %v16991_v40  ;;  %vm16993_vm5 = vcmask 130048  }
 0x44d   :  { %v2215_v18 = vsel %vm16984_vm8, %v2147_v0, %v2214_v16  ;;  %16989 = vst [vmem:[#allocation62_spill] sm:$0xff] %v11368_v41  ;;  %vm16994_vm12 = vmmov %vm16993_vm5  ;;  %vm16996_vm2 = vnez %v16995_v59  ;;  %vm16998_vm8 = vnez %v16997_v53  ;;  %v17003_v16 = vld [vmem:[#allocation26_spill] sm:$0xff] }
 0x44f   :  { %v11315_v5 = vpop.xlane.xlu1 %1657 }
 0x450   :  { %v11370_v11 = vpop.xlane.xlu0 %1756 }
 0x453   :  { %v1733_v4 = vpop.xlane.xlu1 %1732 }
 0x454   :  { %v1815_v42 = vmax.f32 %v1733_v4, -3e+38 }
 0x456   :  { %v2160_v55 = vrot.slane %v1815_v42, %v10008_v22 }
 0x457   :  { %v11343_v49 = vpop.xlane.xlu1 %1741 }
 0x458   :  { %v2161_v45 = vsel %vm16983_vm14, %v2160_v55, %v2156_v51  ;;  %vm16988_vm14 = vcmask 261120  }
 0x459   :  { %v2166_v6 = vsel %vm16977_vm7, %v2165_v15, %v2161_v45  ;;  %vm16999_vm7 = vmmov %vm16993_vm5  ;;  %v17001_v15 = vld [vmem:[#allocation24_spill] sm:$0xff] }
 0x45a   :  { %v11350_v1 = vsel %vm16985_vm13, %v2166_v6, %v2215_v18  ;;  %vm17000_vm13 = vmmov %vm16993_vm5 }
 0x45b   :  { %16986 = vst [vmem:[#allocation60_spill] sm:$0xff] %v11350_v1  ;;  %v11352_v10 = vpop.xlane.xlu1 %1660  ;;  %vm17006_vm9 = vmmov %vm16999_vm7  ;;  %v17031_v1 = vld [vmem:[#allocation29_spill] sm:$0xff] }
 0x45c   :  { %16987 = vst [vmem:[#allocation61_spill] sm:$0xff] %v11352_v10  ;;  %vm17011_vm15 = vmmov %vm17006_vm9 }
 0x45d   :  { %vm17012_vm4 = vmmov %vm17006_vm9 }
 0x45e   :  { %vm17017_vm3 = vmmov %vm17012_vm4 }
 0x45f   :  { %v11354_v12 = vpop.xlane.xlu1 %1744  ;;  %vm17021_vm1 = vmmov %vm17017_vm3 }
 0x460   :  { %vm17022_vm11 = vmmov %vm17021_vm1 }
 0x461   :  { %vm17026_vm0 = vmmov %vm17021_vm1 }
 0x463   :  { %v11356_v35 = vpop.xlane.xlu1 %1753 }
 0x467   :  { %v11358_v43 = vpop.xlane.xlu1 %1747 }
 0x46b   :  { %v11360_v2 = vpop.xlane.xlu1 %1759 }
 0x474   :  { %v2505_v58 = vpop.permute.xlu1 %2504 }
 0x478   :  { %v2503_v46 = vpop.permute.xlu1 %2502 }
 0x479   :  { %2508 = vxpose.xlu0.b32.start [1/2] (short) (narrow) %v2503_v46, 32 }
 0x47c   :  { %v2498_v47 = vpop.permute.xlu1 %2497 }
 0x47d   :  { %2509 = vxpose.xlu0.b32.end [2/2] (short) (narrow) %v2505_v58, 32  ;;  %9551 = vmatpush3.bf16.msra.mxu1 %v2498_v47  ;;  %v17007_v58 = vld [vmem:[#allocation21_spill] sm:$0xff]  ;;  %v17009_v47 = vld [vmem:[#allocation16_spill] sm:$0xff] }
 0x480   :  { %9553 = vmatmul.mubr.msk.bf16.vlgmr.msra.gmra.mrb[8].mxu1 %vm16988_vm14, %v9751_v56  ;;  %vm17002_vm14 = vnez %v17001_v15 }
 0x4f9   :  { %v11372_v48 = vpop.trf.xlu0 }
 0x4fa   :  { %v2548_v4 = vsel %vm10095_vm6, %v11372_v48, -3e+38  ;;  %v2540_v39 = vsel %vm16992_vm10, %v11372_v48, -3e+38  ;;  %v2572_v32 = vsel %vm16996_vm2, %v11372_v48, -3e+38 }
 0x4fb   :  { %v2628_v42 = vsel %vm16993_vm5, %v2548_v4, -inf  ;;  %v2604_v62 = vsel %vm16994_vm12, %v2540_v39, -inf  ;;  %v2544_v0 = vsel %vm16998_vm8, %v11372_v48, -3e+38  ;;  %v2700_v55 = vsel %vm16999_vm7, %v2572_v32, -inf  ;;  %vm17005_vm12 = vmmov %vm16999_vm7 }
 0x4fc   :  { %2629 = vmax.xlane.f32.xlu0 %v2628_v42  ;;  %2605 = vmax.xlane.f32.xlu1 %v2604_v62  ;;  %v2616_v38 = vsel %vm17000_vm13, %v2544_v0, -inf  ;;  %v2576_v51 = vsel %vm17002_vm14, %v11372_v48, -3e+38  ;;  %vm17004_vm5 = vnez %v17003_v16  ;;  %vm17008_vm7 = vnez %v17007_v58  ;;  %v17013_v62 = vld [vmem:[#allocation23_spill] sm:$0xff]  ;;  %v2332_v16 = vld [vmem:[#allocation5 + $0x18] sm:$0xff] }
 0x4fd   :  { %v2552_v45 = vsel %vm17004_vm5, %v11372_v48, -3e+38  ;;  %v2712_v18 = vsel %vm17005_vm12, %v2576_v51, -inf  ;;  %v2584_v46 = vsel %vm17008_vm7, %v11372_v48, -3e+38  ;;  %vm17010_vm13 = vnez %v17009_v47  ;;  %v11406_v42 = vpop.trf.xlu0  ;;  %v17015_v0 = vld [vmem:[#allocation19_spill] sm:$0xff] }
 0x4fe   :  { %v2640_v6 = vsel %vm17006_vm9, %v2552_v45, -inf  ;;  %v2580_v56 = vsel %vm17010_vm13, %v11372_v48, -3e+38  ;;  %v2736_v4 = vsel %vm17011_vm15, %v2584_v46, -inf  ;;  %vm17014_vm9 = vnez %v17013_v62  ;;  %vm17018_vm15 = vmmov %vm17017_vm3 }
 0x4ff   :  { %v2724_v39 = vsel %vm17012_vm4, %v2580_v56, -inf  ;;  %v2560_v32 = vsel %vm17014_vm9, %v11372_v48, -3e+38  ;;  %vm17016_vm12 = vnez %v17015_v0  ;;  %v2573_v56 = vsel %vm16996_vm2, %v11406_v42, -3e+38  ;;  %vm17030_vm2 = vmmov %vm17026_vm0 }
 0x500   :  { %2701 = vmax.xlane.f32.xlu0 %v2700_v55  ;;  %2617 = vmax.xlane.f32.xlu1 %v2616_v38  ;;  %v2556_v55 = vsel %vm17016_vm12, %v11372_v48, -3e+38  ;;  %v2549_v38 = vsel %vm10095_vm6, %v11406_v42, -3e+38  ;;  %v2664_v51 = vsel %vm17017_vm3, %v2560_v32, -inf }
 0x501   :  { %v2652_v45 = vsel %vm17018_vm15, %v2556_v55, -inf  ;;  %v2631_v46 = vsel %vm17021_vm1, %v2549_v38, -inf  ;;  %vm17025_vm15 = vmmov %vm17021_vm1 }
 0x502   :  { %v2703_v55 = vsel %vm17025_vm15, %v2573_v56, -inf  ;;  %vm17032_vm15 = vnez %v17031_v1 }
 0x504   :  { %2713 = vmax.xlane.f32.xlu0 %v2712_v18  ;;  %2641 = vmax.xlane.f32.xlu1 %v2640_v6  ;;  %v17019_v18 = vld [vmem:[#allocation25_spill] sm:$0xff] }
 0x505   :  { %vm17020_vm4 = vnez %v17019_v18 }
 0x506   :  { %v2588_v6 = vsel %vm17020_vm4, %v11372_v48, -3e+38 }
 0x508   :  { %2737 = vmax.xlane.f32.xlu0 %v2736_v4  ;;  %2725 = vmax.xlane.f32.xlu1 %v2724_v39  ;;  %v2748_v4 = vsel %vm17022_vm11, %v2588_v6, -inf  ;;  %v17023_v39 = vld [vmem:[#allocation27_spill] sm:$0xff]  ;;  %vm17029_vm11 = vmmov %vm17026_vm0 }
 0x509   :  { %vm17024_vm3 = vnez %v17023_v39 }
 0x50a   :  { %v2564_v32 = vsel %vm17024_vm3, %v11372_v48, -3e+38 }
 0x50b   :  { %v2676_v38 = vsel %vm17026_vm0, %v2564_v32, -inf  ;;  %v2568_v32 = vsel %vm17032_vm15, %v11372_v48, -3e+38 }
 0x50c   :  { %2665 = vmax.xlane.f32.xlu0 %v2664_v51  ;;  %2653 = vmax.xlane.f32.xlu1 %v2652_v45  ;;  %v2577_v51 = vsel %vm17002_vm14, %v11406_v42, -3e+38  ;;  %v17027_v45 = vld [vmem:[#allocation28_spill] sm:$0xff]  ;;  %vm17033_vm14 = vmmov %vm17026_vm0 }
 0x50d   :  { %vm17028_vm1 = vnez %v17027_v45 }
 0x50e   :  { %v2592_v6 = vsel %vm17028_vm1, %v11372_v48, -3e+38 }
 0x50f   :  { %v2760_v56 = vsel %vm17030_vm2, %v2592_v6, -inf  ;;  %v2561_v6 = vsel %vm17014_vm9, %v11406_v42, -3e+38  ;;  %vm17036_vm2 = vmmov %vm17026_vm0 }
 0x510   :  { %2749 = vmax.xlane.f32.xlu0 %v2748_v4  ;;  %2632 = vmax.xlane.f32.xlu1 %v2631_v46  ;;  %v2715_v46 = vsel %vm17029_vm11, %v2577_v51, -inf  ;;  %v2585_v4 = vsel %vm17008_vm7, %v11406_v42, -3e+38  ;;  %v17034_v51 = vld [vmem:[#allocation30_spill] sm:$0xff]  ;;  %vm17037_vm7 = vmmov %vm17026_vm0 }
 0x511   :  { %vm17035_vm11 = vnez %v17034_v51  ;;  %vm17041_vm6 = vmmov %vm17036_vm2 }
 0x512   :  { %v2596_v41 = vsel %vm17035_vm11, %v11372_v48, -3e+38 }
 0x514   :  { %2677 = vmax.xlane.f32.xlu0 %v2676_v38  ;;  %2704 = vmax.xlane.f32.xlu1 %v2703_v55  ;;  %v2739_v55 = vsel %vm17026_vm0, %v2585_v4, -inf  ;;  %v2688_v38 = vsel %vm17033_vm14, %v2568_v32, -inf  ;;  %v17038_v4 = vld [vmem:[#allocation31_spill] sm:$0xff]  ;;  %vm17040_vm14 = vmmov %vm17036_vm2 }
 0x515   :  { %vm17039_vm0 = vnez %v17038_v4 }
 0x516   :  { %v2600_v32 = vsel %vm17039_vm0, %v11372_v48, -3e+38 }
 0x518   :  { %2761 = vmax.xlane.f32.xlu0 %v2760_v56  ;;  %2716 = vmax.xlane.f32.xlu1 %v2715_v46  ;;  %v2772_v46 = vsel %vm17036_vm2, %v2596_v41, -inf  ;;  %v2667_v56 = vsel %vm17037_vm7, %v2561_v6, -inf  ;;  %v2541_v41 = vsel %vm16992_vm10, %v11406_v42, -3e+38  ;;  %v2565_v6 = vsel %vm17024_vm3, %v11406_v42, -3e+38  ;;  %vm17042_vm7 = vmmov %vm17036_vm2 }
 0x519   :  { %v2607_v48 = vsel %vm17042_vm7, %v2541_v41, -inf  ;;  %v2569_v41 = vsel %vm17032_vm15, %v11406_v42, -3e+38  ;;  %vm17045_vm7 = vmmov %vm17036_vm2  ;;  %vm17052_vm15 = vnez %v16995_v59 }
 0x51c   :  { %2689 = vmax.xlane.f32.xlu0 %v2688_v38  ;;  %2740 = vmax.xlane.f32.xlu1 %v2739_v55  ;;  %v2589_v55 = vsel %vm17020_vm4, %v11406_v42, -3e+38  ;;  %v2784_v38 = vsel %vm17040_vm14, %v2600_v32, -inf  ;;  %vm17044_vm14 = vmmov %vm17036_vm2 }
 0x51d   :  { %v2751_v31 = vsel %vm17041_vm6, %v2589_v55, -inf  ;;  %vm17043_vm6 = vmmov %vm17036_vm2 }
 0x520   :  { %2773 = vmax.xlane.f32.xlu0 %v2772_v46  ;;  %2668 = vmax.xlane.f32.xlu1 %v2667_v56  ;;  %v2679_v46 = vsel %vm17036_vm2, %v2565_v6, -inf  ;;  %v2545_v56 = vsel %vm16998_vm8, %v11406_v42, -3e+38 }
 0x521   :  { %v2619_v32 = vsel %vm17043_vm6, %v2545_v56, -inf  ;;  %v2597_v56 = vsel %vm17035_vm11, %v11406_v42, -3e+38  ;;  %vm17046_vm6 = vmmov %vm17036_vm2  ;;  %vm17051_vm11 = vnez %v16990_v60 }
 0x524   :  { %2785 = vmax.xlane.f32.xlu0 %v2784_v38  ;;  %2752 = vmax.xlane.f32.xlu1 %v2751_v31  ;;  %v2593_v31 = vsel %vm17028_vm1, %v11406_v42, -3e+38  ;;  %v2553_v38 = vsel %vm17004_vm5, %v11406_v42, -3e+38 }
 0x525   :  { %v2763_v55 = vsel %vm17044_vm14, %v2593_v31, -inf  ;;  %v2643_v6 = vsel %vm17045_vm7, %v2553_v38, -inf  ;;  %vm17047_vm14 = vmmov %vm17036_vm2  ;;  %v2557_v38 = vsel %vm17016_vm12, %v11406_v42, -3e+38 }
 0x526   :  { %vm17048_vm7 = vmmov %vm17036_vm2 }
 0x528   :  { %2608 = vmax.xlane.f32.xlu0 %v2607_v48  ;;  %2680 = vmax.xlane.f32.xlu1 %v2679_v46  ;;  %v2691_v48 = vsel %vm17036_vm2, %v2569_v41, -inf  ;;  %v2581_v46 = vsel %vm17010_vm13, %v11406_v42, -3e+38  ;;  %v2601_v41 = vsel %vm17039_vm0, %v11406_v42, -3e+38 }
 0x529   :  { %v2727_v31 = vsel %vm17046_vm6, %v2581_v46, -inf  ;;  %v2655_v46 = vsel %vm17048_vm7, %v2557_v38, -inf  ;;  %vm17049_vm6 = vmmov %vm17036_vm2 }
 0x52a   :  { %vm17054_vm7 = vmmov %vm17036_vm2 }
 0x52c   :  { %2620 = vmax.xlane.f32.xlu0 %v2619_v32  ;;  %2764 = vmax.xlane.f32.xlu1 %v2763_v55  ;;  %v2775_v32 = vsel %vm17047_vm14, %v2597_v56, -inf  ;;  %v11496_v55 = vpop.trf.xlu0  ;;  %v2787_v56 = vsel %vm17036_vm2, %v2601_v41, -inf  ;;  %vm17050_vm14 = vmmov %vm17036_vm2 }
 0x52d   :  { %v2550_v42 = vsel %vm17051_vm11, %v11496_v55, -3e+38  ;;  %v2574_v10 = vsel %vm17052_vm15, %v11496_v55, -3e+38 }
 0x52e   :  { %v2706_v41 = vsel %vm17054_vm7, %v2574_v10, -inf  ;;  %v2554_v10 = vsel %vm17004_vm5, %v11496_v55, -3e+38  ;;  %vm17058_vm7 = vmmov %vm17049_vm6 }
 0x530   :  { %2644 = vmax.xlane.f32.xlu0 %v2643_v6  ;;  %2692 = vmax.xlane.f32.xlu1 %v2691_v48  ;;  %v2542_v6 = vsel %vm16992_vm10, %v11496_v55, -3e+38  ;;  %v2546_v48 = vsel %vm16998_vm8, %v11496_v55, -3e+38  ;;  %vm17053_vm8 = vmmov %vm17036_vm2  ;;  %vm17055_vm2 = vnez %v17001_v15 }
 0x531   :  { %v2634_v38 = vsel %vm17053_vm8, %v2550_v42, -inf  ;;  %vm17057_vm8 = vmmov %vm17049_vm6 }
 0x534   :  { %2728 = vmax.xlane.f32.xlu0 %v2727_v31  ;;  %2776 = vmax.xlane.f32.xlu1 %v2775_v32  ;;  %v2610_v31 = vsel %vm17049_vm6, %v2542_v6, -inf  ;;  %v2622_v32 = vsel %vm17050_vm14, %v2546_v48, -inf  ;;  %v2578_v6 = vsel %vm17055_vm2, %v11496_v55, -3e+38  ;;  %v2582_v48 = vsel %vm17010_vm13, %v11496_v55, -3e+38  ;;  %vm17056_vm14 = vmmov %vm17049_vm6 }
 0x538   :  { %2656 = vmax.xlane.f32.xlu0 %v2655_v46  ;;  %2788 = vmax.xlane.f32.xlu1 %v2787_v56  ;;  %v2718_v46 = vsel %vm17049_vm6, %v2578_v6, -inf  ;;  %v2730_v56 = vsel %vm17056_vm14, %v2582_v48, -inf  ;;  %vm17059_vm6 = vnez %v17007_v58  ;;  %vm17060_vm14 = vmmov %vm17058_vm7 }
 0x539   :  { %v2586_v6 = vsel %vm17059_vm6, %v11496_v55, -3e+38 }
 0x53c   :  { %2611 = vmax.xlane.f32.xlu0 %v2610_v31  ;;  %2623 = vmax.xlane.f32.xlu1 %v2622_v32  ;;  %v2558_v31 = vsel %vm17016_vm12, %v11496_v55, -3e+38  ;;  %v2646_v32 = vsel %vm17057_vm8, %v2554_v10, -inf  ;;  %vm17061_vm8 = vmmov %vm17058_vm7  ;;  %v2562_v10 = vsel %vm17014_vm9, %v11496_v55, -3e+38 }
 0x53d   :  { %v2658_v42 = vsel %vm17058_vm7, %v2558_v31, -inf }
 0x540   :  { %2635 = vmax.xlane.f32.xlu0 %v2634_v38  ;;  %2707 = vmax.xlane.f32.xlu1 %v2706_v41  ;;  %v11538_v38 = vpop.trf.xlu0  ;;  %v2602_v41 = vsel %vm17039_vm0, %v11496_v55, -3e+38  ;;  %vm17062_vm0 = vmmov %vm17058_vm7 }
 0x541   :  { %v2543_v48 = vsel %vm16992_vm10, %v11538_v38, -3e+38 }
 0x542   :  { %v2613_v31 = vsel %vm17058_vm7, %v2543_v48, -inf  ;;  %v2555_v48 = vsel %vm17004_vm5, %v11538_v38, -3e+38  ;;  %vm17065_vm7 = vmmov %vm17062_vm0 }
 0x543   :  { %vm17074_vm5 = vmmov %vm17065_vm7 }
 0x544   :  { %2719 = vmax.xlane.f32.xlu0 %v2718_v46  ;;  %2731 = vmax.xlane.f32.xlu1 %v2730_v56  ;;  %v2790_v46 = vsel %vm17060_vm14, %v2602_v41, -inf  ;;  %v2742_v56 = vsel %vm17061_vm8, %v2586_v6, -inf  ;;  %v2590_v41 = vsel %vm17020_vm4, %v11496_v55, -3e+38  ;;  %vm17063_vm14 = vmmov %vm17062_vm0 }
 0x545   :  { %vm17064_vm8 = vmmov %vm17062_vm0 }
 0x548   :  { %2647 = vmax.xlane.f32.xlu0 %v2646_v32  ;;  %2659 = vmax.xlane.f32.xlu1 %v2658_v42  ;;  %v2670_v32 = vsel %vm17062_vm0, %v2562_v10, -inf  ;;  %v2579_v42 = vsel %vm17055_vm2, %v11538_v38, -3e+38  ;;  %v2649_v10 = vsel %vm17062_vm0, %v2555_v48, -inf  ;;  %vm17156_vm2 = vcmask 1042434  }
 0x549   :  { %v2721_v6 = vsel %vm17063_vm14, %v2579_v42, -inf  ;;  %v2594_v42 = vsel %vm17028_vm1, %v11496_v55, -3e+38  ;;  %vm17066_vm14 = vmmov %vm17062_vm0 }
 0x54c   :  { %2791 = vmax.xlane.f32.xlu0 %v2790_v46  ;;  %2743 = vmax.xlane.f32.xlu1 %v2742_v56  ;;  %v2754_v46 = vsel %vm17064_vm8, %v2590_v41, -inf  ;;  %v2566_v56 = vsel %vm17024_vm3, %v11496_v55, -3e+38  ;;  %vm17067_vm8 = vmmov %vm17062_vm0  ;;  %vm17068_vm0 = vnez %v17031_v1  ;;  %v2331_v1 = vld [vmem:[#allocation5 + $0x10] sm:$0xff] }
 0x54d   :  { %v2570_v48 = vsel %vm17068_vm0, %v11496_v55, -3e+38  ;;  %v9682_v45 = vpack.c.bf16 %v2332_v16, %v2331_v1 }
 0x550   :  { %2614 = vmax.xlane.f32.xlu0 %v2613_v31  ;;  %2671 = vmax.xlane.f32.xlu1 %v2670_v32  ;;  %v2682_v31 = vsel %vm17065_vm7, %v2566_v56, -inf  ;;  %v2583_v32 = vsel %vm17010_vm13, %v11538_v38, -3e+38  ;;  %vm17069_vm13 = vmmov %vm17065_vm7 }
 0x551   :  { %v2733_v41 = vsel %vm17066_vm14, %v2583_v32, -inf  ;;  %vm17070_vm14 = vnez %v17034_v51 }
 0x552   :  { %v2598_v32 = vsel %vm17070_vm14, %v11496_v55, -3e+38  ;;  %v2591_v55 = vsel %vm17020_vm4, %v11538_v38, -3e+38  ;;  %v2599_v1 = vsel %vm17070_vm14, %v11538_v38, -3e+38 }
 0x554   :  { %2722 = vmax.xlane.f32.xlu0 %v2721_v6  ;;  %2755 = vmax.xlane.f32.xlu1 %v2754_v46  ;;  %v2766_v6 = vsel %vm17067_vm8, %v2594_v42, -inf  ;;  %v2559_v46 = vsel %vm17016_vm12, %v11538_v38, -3e+38  ;;  %vm17071_vm8 = vmmov %vm17065_vm7 }
 0x555   :  { %v2661_v56 = vsel %vm17065_vm7, %v2559_v46, -inf  ;;  %vm17072_vm12 = vmmov %vm17065_vm7 }
 0x558   :  { %2650 = vmax.xlane.f32.xlu0 %v2649_v10  ;;  %2683 = vmax.xlane.f32.xlu1 %v2682_v31  ;;  %v2694_v10 = vsel %vm17069_vm13, %v2570_v48, -inf  ;;  %v2587_v31 = vsel %vm17059_vm6, %v11538_v38, -3e+38  ;;  %vm17073_vm13 = vnez %v16997_v53 }
 0x559   :  { %v2745_v42 = vsel %vm17071_vm8, %v2587_v31, -inf  ;;  %v2547_v46 = vsel %vm17073_vm13, %v11538_v38, -3e+38  ;;  %vm17076_vm8 = vmmov %vm17074_vm5 }
 0x55c   :  { %2734 = vmax.xlane.f32.xlu0 %v2733_v41  ;;  %2767 = vmax.xlane.f32.xlu1 %v2766_v6  ;;  %v2778_v41 = vsel %vm17072_vm12, %v2598_v32, -inf  ;;  %v2563_v6 = vsel %vm17014_vm9, %v11538_v38, -3e+38  ;;  %vm17075_vm12 = vmmov %vm17074_vm5 }
 0x55d   :  { %v2673_v48 = vsel %vm17065_vm7, %v2563_v6, -inf  ;;  %v2757_v31 = vsel %vm17075_vm12, %v2591_v55, -inf  ;;  %vm17077_vm7 = vmmov %vm17074_vm5  ;;  %v2571_v55 = vsel %vm17068_vm0, %v11538_v38, -3e+38 }
 0x55e   :  { %vm17078_vm12 = vmmov %vm17074_vm5 }
 0x560   :  { %2662 = vmax.xlane.f32.xlu0 %v2661_v56  ;;  %2695 = vmax.xlane.f32.xlu1 %v2694_v10  ;;  %v2625_v56 = vsel %vm17074_vm5, %v2547_v46, -inf  ;;  %v2551_v10 = vsel %vm17051_vm11, %v11538_v38, -3e+38 }
 0x561   :  { %v2637_v32 = vsel %vm17076_vm8, %v2551_v10, -inf  ;;  %vm17079_vm8 = vmmov %vm17074_vm5 }
 0x562   :  { %v2697_v10 = vsel %vm17079_vm8, %v2571_v55, -inf }
 0x564   :  { %2746 = vmax.xlane.f32.xlu0 %v2745_v42  ;;  %2779 = vmax.xlane.f32.xlu1 %v2778_v41  ;;  %v2567_v42 = vsel %vm17024_vm3, %v11538_v38, -3e+38  ;;  %v2575_v41 = vsel %vm17052_vm15, %v11538_v38, -3e+38  ;;  %vm17233_vm3 = vcmask 1045509  }
 0x565   :  { %v2685_v6 = vsel %vm17074_vm5, %v2567_v42, -inf  ;;  %v2709_v46 = vsel %vm17077_vm7, %v2575_v41, -inf  ;;  %v84_v42 = vld [vmem:[%s16328_s7] sm:$0xff]  ;;  %v2329_v41 = vld [vmem:[#allocation5] sm:$0xff] }
 0x566   :  { %vm1825_vm7 = vcmp.gt.f32.partialorder %v84_v42, 0.0 }
 0x567   :  { %v1827_v55 = vsel %vm1825_vm7, 1, %v16849_v54  ;;  %vm17117_vm7 = vcmask 130112  }
 0x568   :  { %2674 = vmax.xlane.f32.xlu0 %v2673_v48  ;;  %2626 = vmax.xlane.f32.xlu1 %v2625_v56  ;;  %v2595_v48 = vsel %vm17028_vm1, %v11538_v38, -3e+38 }
 0x569   :  { %v2769_v56 = vsel %vm17078_vm12, %v2595_v48, -inf  ;;  %vm17081_vm12 = vmmov %vm17079_vm8  ;;  %vm17082_vm8 = vnez %v17038_v4 }
 0x56a   :  { %v2781_v16 = vsel %vm17081_vm12, %v2599_v1, -inf  ;;  %v2603_v18 = vsel %vm17082_vm8, %v11538_v38, -3e+38  ;;  %vm17121_vm8 = vcmask 261312  }
 0x56c   :  { %2758 = vmax.xlane.f32.xlu0 %v2757_v31  ;;  %2638 = vmax.xlane.f32.xlu1 %v2637_v32  ;;  %v85_v31 = vld [vmem:[%s16328_s7 + $0x8] sm:$0xff] }
 0x56d   :  { %vm1826_vm5 = vcmp.gt.f32.partialorder %v85_v31, 0.0 }
 0x56e   :  { %v1828_v32 = vsel %vm1826_vm5, 1, %v16849_v54  ;;  %vm17083_vm5 = vmmov %vm17081_vm12 }
 0x56f   :  { %v2793_v60 = vsel %vm17083_vm5, %v2603_v18, -inf  ;;  %vm17118_vm12 = vmmov %vm17117_vm7  ;;  %vm17119_vm5 = vcmask 195712  }
 0x570   :  { %2686 = vmax.xlane.f32.xlu0 %v2685_v6  ;;  %2710 = vmax.xlane.f32.xlu1 %v2709_v46  ;;  %v2330_v6 = vld [vmem:[#allocation5 + $0x8] sm:$0xff] }
 0x574   :  { %2770 = vmax.xlane.f32.xlu0 %v2769_v56  ;;  %v9678_v56 = vpack.c.bf16 %v2330_v6, %v2329_v41 }
 0x576   :  { %9679 = vmatprep.subr.bf16.mxu0 %v9678_v56 }
 0x577   :  { %9681 = vmatpush3.bf16.msra.mxu0 %v9678_v56 }
 0x578   :  { %2698 = vmax.xlane.f32.xlu0 %v2697_v10  ;;  %v11640_v10 = vpop.f32.mrb[8].mxu1  ;;  %9683 = vmatprep.subr.bf16.mxu0 %v9682_v45 }
 0x579   :  { %17080 = vst [vmem:[#allocation63_spill] sm:$0xff] %v11640_v10  ;;  %v9554_v0 = vpop.f32.mrb[9].mxu1 }
 0x57b   :  { %9685 = vmatpush3.bf16.msra.mxu0 %v9682_v45 }
 0x57c   :  { %9556 = vmatprep.subr.bf16.mxu0 %v16856_v30  ;;  %v11705_v30 = vpop.f32.mrb[10].mxu1 }
 0x57d   :  { %17093 = vst [vmem:[#allocation73_spill] sm:$0xff] %v11705_v30 }
 0x581   :  { %1833 = vperm.xlu1 %9748, %v1828_v32  }
 0x589   :  { %v11635_v46 = vpop.xlane.xlu0 %2629  ;;  %v11637_v48 = vpop.xlane.xlu1 %2605 }
 0x58d   :  { %v11642_v31 = vpop.xlane.xlu0 %2701  ;;  %v11644_v32 = vpop.xlane.xlu1 %2617 }
 0x58e   :  { %1830 = vperm.xlu0 %9747, %v1827_v55  }
 0x591   :  { %v11646_v42 = vpop.xlane.xlu0 %2713  ;;  %v11648_v47 = vpop.xlane.xlu1 %2641 }
 0x595   :  { %v11650_v41 = vpop.xlane.xlu0 %2737  ;;  %v11652_v54 = vpop.xlane.xlu1 %2725 }
 0x599   :  { %v11655_v6 = vpop.xlane.xlu0 %2665  ;;  %v11657_v56 = vpop.xlane.xlu1 %2653 }
 0x59d   :  { %v11659_v0 = vpop.xlane.xlu0 %2749  ;;  %v11661_v55 = vpop.xlane.xlu1 %2632 }
 0x5a1   :  { %v11663_v15 = vpop.xlane.xlu0 %2677  ;;  %v11665_v39 = vpop.xlane.xlu1 %2704 }
 0x5a5   :  { %v11671_v45 = vpop.xlane.xlu0 %2761  ;;  %2782 = vmax.xlane.f32.xlu1 %v2781_v16  ;;  %v11673_v59 = vpop.xlane.xlu1 %2716 }
 0x5a9   :  { %v11679_v62 = vpop.xlane.xlu0 %2689  ;;  %2794 = vmax.xlane.f32.xlu1 %v2793_v60  ;;  %v11681_v58 = vpop.xlane.xlu1 %2740 }
 0x5ad   :  { %v11683_v51 = vpop.xlane.xlu0 %2773  ;;  %v11685_v53 = vpop.xlane.xlu1 %2668 }
 0x5ae   :  { %17084 = vst [vmem:[#allocation64_spill] sm:$0xff] %v11683_v51 }
 0x5b1   :  { %v11687_v1 = vpop.xlane.xlu0 %2785  ;;  %v11689_v16 = vpop.xlane.xlu1 %2752 }
 0x5b2   :  { %17085 = vst [vmem:[#allocation65_spill] sm:$0xff] %v11687_v1  ;;  %17086 = vst [vmem:[#allocation66_spill] sm:$0xff] %v11689_v16  ;;  %v9555_v1 = vpop.f32.mrb[11].mxu1 }
 0x5b5   :  { %v11691_v40 = vpop.xlane.xlu0 %2608  ;;  %v11693_v10 = vpop.xlane.xlu1 %2680 }
 0x5b6   :  { %17087 = vst [vmem:[#allocation67_spill] sm:$0xff] %v11691_v40  ;;  %17088 = vst [vmem:[#allocation68_spill] sm:$0xff] %v11693_v10 }
 0x5b9   :  { %v11695_v38 = vpop.xlane.xlu0 %2620  ;;  %v11697_v18 = vpop.xlane.xlu1 %2764 }
 0x5ba   :  { %17089 = vst [vmem:[#allocation69_spill] sm:$0xff] %v11695_v38  ;;  %17090 = vst [vmem:[#allocation70_spill] sm:$0xff] %v11697_v18  ;;  %4025 = vrot.lane.b32.xlu1 %v11239_v24, %s9864_s10 }
 0x5bd   :  { %v11701_v60 = vpop.xlane.xlu0 %2644  ;;  %v11703_v4 = vpop.xlane.xlu1 %2692 }
 0x5be   :  { %17091 = vst [vmem:[#allocation71_spill] sm:$0xff] %v11701_v60  ;;  %17092 = vst [vmem:[#allocation72_spill] sm:$0xff] %v11703_v4 }
 0x5c1   :  { %v11707_v51 = vpop.xlane.xlu0 %2728  ;;  %v11709_v16 = vpop.xlane.xlu1 %2776 }
 0x5c2   :  { %17094 = vst [vmem:[#allocation74_spill] sm:$0xff] %v11707_v51  ;;  %17095 = vst [vmem:[#allocation75_spill] sm:$0xff] %v11709_v16 }
 0x5c5   :  { %v11711_v40 = vpop.xlane.xlu0 %2656  ;;  %v11713_v10 = vpop.xlane.xlu1 %2788 }
 0x5c6   :  { %17096 = vst [vmem:[#allocation76_spill] sm:$0xff] %v11711_v40  ;;  %17097 = vst [vmem:[#allocation77_spill] sm:$0xff] %v11713_v10 }
 0x5c9   :  { %v11715_v38 = vpop.xlane.xlu0 %2611  ;;  %v11717_v18 = vpop.xlane.xlu1 %2623 }
 0x5ca   :  { %17098 = vst [vmem:[#allocation78_spill] sm:$0xff] %v11715_v38  ;;  %17099 = vst [vmem:[#allocation79_spill] sm:$0xff] %v11717_v18 }
 0x5cd   :  { %v11719_v24 = vpop.xlane.xlu0 %2635  ;;  %v11721_v60 = vpop.xlane.xlu1 %2707 }
 0x5ce   :  { %17100 = vst [vmem:[#allocation80_spill] sm:$0xff] %v11719_v24  ;;  %17101 = vst [vmem:[#allocation81_spill] sm:$0xff] %v11721_v60 }
 0x5d1   :  { %v11723_v4 = vpop.xlane.xlu0 %2719  ;;  %v11725_v30 = vpop.xlane.xlu1 %2731 }
 0x5d2   :  { %17102 = vst [vmem:[#allocation82_spill] sm:$0xff] %v11723_v4  ;;  %17103 = vst [vmem:[#allocation83_spill] sm:$0xff] %v11725_v30  ;;  %v1761_v30 = vmax.f32 %v11195_v61, -3e+38 }
 0x5d5   :  { %v11727_v1 = vpop.xlane.xlu0 %2647  ;;  %v11729_v51 = vpop.xlane.xlu1 %2659 }
 0x5d6   :  { %17104 = vst [vmem:[#allocation84_spill] sm:$0xff] %v11727_v1  ;;  %17105 = vst [vmem:[#allocation85_spill] sm:$0xff] %v11729_v51  ;;  %v1762_v51 = vmax.f32 %v11201_v7, -3e+38  ;;  %v1765_v1 = vmax.f32 %v11203_v19, -3e+38 }
 0x5d7   :  { %v1770_v7 = vmax.f32 %v11222_v13, -3e+38  ;;  %v1764_v19 = vmax.f32 %v11234_v50, -3e+38  ;;  %v1771_v13 = vmax.f32 %v11246_v36, -3e+38 }
 0x5d8   :  { %v1908_v61 = vrot.slane %v1762_v51, %v10006_v21  ;;  %v1775_v50 = vmax.f32 %v11220_v25, -3e+38  ;;  %v1781_v25 = vmax.f32 %v11248_v57, -3e+38  ;;  %v1785_v57 = vmax.f32 %v11264_v28, -3e+38 }
 0x5d9   :  { %v11731_v16 = vpop.xlane.xlu0 %2791  ;;  %v11733_v40 = vpop.xlane.xlu1 %2743 }
 0x5da   :  { %17106 = vst [vmem:[#allocation86_spill] sm:$0xff] %v11731_v16  ;;  %17107 = vst [vmem:[#allocation87_spill] sm:$0xff] %v11733_v40  ;;  %v1766_v16 = vmax.f32 %v11209_v27, -3e+38  ;;  %v1767_v40 = vmax.f32 %v11216_v20, -3e+38 }
 0x5db   :  { %v1774_v20 = vmax.f32 %v11211_v29, -3e+38 }
 0x5dc   :  { %v1927_v27 = vrot.slane %v1766_v16, %v10006_v21 }
 0x5dd   :  { %v11735_v10 = vpop.xlane.xlu0 %2614  ;;  %v11737_v38 = vpop.xlane.xlu1 %2671 }
 0x5de   :  { %17108 = vst [vmem:[#allocation88_spill] sm:$0xff] %v11735_v10  ;;  %17109 = vst [vmem:[#allocation89_spill] sm:$0xff] %v11737_v38  ;;  %v1763_v38 = vmax.f32 %v11214_v34, -3e+38  ;;  %v1773_v34 = vmax.f32 %v11252_v37, -3e+38  ;;  %v1946_v37 = vrot.slane %v1770_v7, %v10006_v21 }
 0x5df   :  { %v1780_v7 = vmax.f32 %v11260_v63, -3e+38  ;;  %v1822_v63 = vmax.f32 %v11356_v35, -3e+38 }
 0x5e0   :  { %v1961_v36 = vrot.slane %v1773_v34, %v10004_v17 }
 0x5e1   :  { %v11739_v18 = vpop.xlane.xlu0 %2722  ;;  %v11741_v24 = vpop.xlane.xlu1 %2755 }
 0x5e2   :  { %17110 = vst [vmem:[#allocation90_spill] sm:$0xff] %v11739_v18  ;;  %17111 = vst [vmem:[#allocation91_spill] sm:$0xff] %v11741_v24  ;;  %v1768_v18 = vmax.f32 %v11241_v44, -3e+38  ;;  %v1932_v44 = vrot.slane %v1767_v40, %v10008_v22 }
 0x5e4   :  { %v1937_v51 = vrot.slane %v1768_v18, %v10010_v23  ;;  %v1918_v18 = vrot.slane %v1764_v19, %v10010_v23  ;;  %v1970_v19 = vrot.slane %v1775_v50, %v10008_v22  ;;  %v11813_v50 = vrot.slane %v1780_v7, %v10010_v23 }
 0x5e5   :  { %v11743_v60 = vpop.xlane.xlu0 %2650  ;;  %v11745_v4 = vpop.xlane.xlu1 %2683  ;;  %v1823_v7 = vmax.f32 %v11370_v11, -3e+38 }
 0x5e6   :  { %17112 = vst [vmem:[#allocation92_spill] sm:$0xff] %v11743_v60  ;;  %17113 = vst [vmem:[#allocation93_spill] sm:$0xff] %v11745_v4  ;;  %v1904_v4 = vrot.slane %v1761_v30, %v10004_v17  ;;  %v1913_v30 = vrot.slane %v1763_v38, %v10008_v22  ;;  %v1965_v38 = vrot.slane %v1774_v20, %v10006_v21 }
 0x5e8   :  { %v1909_v29 = vsel %vm17117_vm7, %v1908_v61, %v1904_v4  ;;  %v1776_v4 = vmax.f32 %v11236_v9, -3e+38  ;;  %vm17120_vm7 = vmmov %vm17119_vm5 }
 0x5e9   :  { %v11754_v10 = vpop.xlane.xlu0 %2734  ;;  %v11756_v24 = vpop.xlane.xlu1 %2767  ;;  %v1914_v61 = vsel %vm17120_vm7, %v1913_v30, %v1909_v29  ;;  %vm17125_vm7 = vmmov %vm17118_vm12  ;;  %v1772_v30 = vmax.f32 %v11258_v33, -3e+38  ;;  %v1819_v33 = vmax.f32 %v11354_v12, -3e+38  ;;  %v1824_v12 = vmax.f32 %v11360_v2, -3e+38 }
 0x5ea   :  { %17114 = vst [vmem:[#allocation94_spill] sm:$0xff] %v11754_v10  ;;  %17115 = vst [vmem:[#allocation95_spill] sm:$0xff] %v11756_v24  ;;  %v1769_v10 = vmax.f32 %v11218_v52, -3e+38  ;;  %v1923_v24 = vrot.slane %v1765_v1, %v10004_v17  ;;  %v1778_v52 = vmax.f32 %v11224_v26, -3e+38 }
 0x5ec   :  { %v1928_v40 = vsel %vm17118_vm12, %v1927_v27, %v1923_v24  ;;  %v1951_v24 = vrot.slane %v1771_v13, %v10008_v22  ;;  %v1984_v9 = vrot.slane %v1778_v52, %v10006_v21  ;;  %v1999_v13 = vrot.slane %v1781_v25, %v10004_v17  ;;  %v17131_v25 = vld [vmem:[#allocation52_spill] sm:$0xff] }
 0x5ed   :  { %v11771_v60 = vpop.xlane.xlu0 %2662  ;;  %v11773_v16 = vpop.xlane.xlu1 %2695  ;;  %v1933_v1 = vsel %vm17119_vm5, %v1932_v44, %v1928_v40  ;;  %vm17124_vm5 = vmmov %vm17121_vm8  ;;  %v1966_v44 = vsel %vm17125_vm7, %v1965_v38, %v1961_v36  ;;  %v2018_v38 = vrot.slane %v1785_v57, %v10004_v17  ;;  %v1956_v36 = vrot.slane %v1772_v30, %v10010_v23  ;;  %v17134_v57 = vld [vmem:[#allocation54_spill] sm:$0xff] }
 0x5ee   :  { %17116 = vst [vmem:[#allocation96_spill] sm:$0xff] %v11773_v16  ;;  %v1942_v16 = vrot.slane %v1769_v10, %v10004_v17  ;;  %v1938_v26 = vsel %vm17121_vm8, %v1937_v51, %v1933_v1  ;;  %v1919_v34 = vsel %vm17124_vm5, %v1918_v18, %v1914_v61  ;;  %v11804_v51 = vrot.slane %v1776_v4, %v10010_v23  ;;  %v17130_v1 = vld [vmem:[#allocation55_spill] sm:$0xff] }
 0x5ef   :  { %vm17126_vm8 = vcmask 1041409   ;;  %v1820_v18 = vmax.f32 %v11358_v43, -3e+38  ;;  %v1784_v4 = vmax.f32 %v17130_v1, -3e+38  ;;  %v17136_v1 = vld [vmem:[#allocation57_spill] sm:$0xff] }
 0x5f0   :  { %v1947_v10 = vsel %vm17118_vm12, %v1946_v37, %v1942_v16  ;;  %v11808_v29 = vsel %vm17126_vm8, %v1938_v26, %v1919_v34  ;;  %v1818_v16 = vmax.f32 %v11343_v49, -3e+38  ;;  %vm17127_vm12 = vcmask 195712   ;;  %v17132_v26 = vld [vmem:[#allocation56_spill] sm:$0xff]  ;;  %vm17138_vm8 = vmmov %vm17125_vm7 }
 0x5f1   :  { %v11791_v27 = vpop.xlane.xlu0 %2746  ;;  %v11793_v20 = vpop.xlane.xlu1 %2779  ;;  %v1952_v28 = vsel %vm17127_vm12, %v1951_v24, %v1947_v10  ;;  %v1821_v37 = vmax.f32 %v11366_v3, -3e+38  ;;  %vm17129_vm5 = vmmov %vm17127_vm12  ;;  %v1817_v49 = vmax.f32 %v11284_v14, -3e+38  ;;  %v2193_v3 = vrot.slane %v1822_v63, %v10006_v21  ;;  %v17133_v10 = vld [vmem:[#allocation53_spill] sm:$0xff] }
 0x5f2   :  { %17122 = vst [vmem:[#allocation97_spill] sm:$0xff] %v11791_v27  ;;  %17123 = vst [vmem:[#allocation98_spill] sm:$0xff] %v11793_v20  ;;  %v11822_v40 = vsel %vm17129_vm5, %v1970_v19, %v1966_v44  ;;  %v1777_v61 = vmax.f32 %v17131_v25, -3e+38  ;;  %v1789_v24 = vmax.f32 %v17132_v26, -3e+38  ;;  %v2174_v19 = vrot.slane %v1818_v16, %v10006_v21 }
 0x5f3   :  { %v1779_v14 = vmax.f32 %v17133_v10, -3e+38  ;;  %v1782_v43 = vmax.f32 %v17134_v57, -3e+38  ;;  %v2189_v34 = vrot.slane %v1821_v37, %v10004_v17  ;;  %v2179_v44 = vrot.slane %v1819_v33, %v10008_v22  ;;  %v17137_v26 = vld [vmem:[#allocation58_spill] sm:$0xff]  ;;  %v17139_v27 = vld [vmem:[#allocation61_spill] sm:$0xff]  ;;  %vm17140_vm12 = vmmov %vm17129_vm5 }
 0x5f4   :  { %v2170_v2 = vrot.slane %v1817_v49, %v10004_v17  ;;  %v1783_v25 = vmax.f32 %v17136_v1, -3e+38  ;;  %v1786_v11 = vmax.f32 %v17137_v26, -3e+38  ;;  %v2184_v16 = vrot.slane %v1820_v18, %v10010_v23 }
 0x5f5   :  { %v11817_v35 = vpop.xlane.xlu0 %2674  ;;  %v11819_v52 = vpop.xlane.xlu1 %2626  ;;  %v1787_v10 = vmax.f32 %v11298_v8, -3e+38  ;;  %v1790_v57 = vmax.f32 %v11315_v5, -3e+38  ;;  %v2194_v37 = vsel %vm17125_vm7, %v2193_v3, %v2189_v34  ;;  %v2203_v33 = vrot.slane %v1824_v12, %v10010_v23  ;;  %vm17142_vm7 = vmmov %vm17140_vm12 }
 0x5f6   :  { %17128 = vst [vmem:[#allocation99_spill] sm:$0xff] %v11817_v35  ;;  %v1980_v20 = vrot.slane %v1777_v61, %v10004_v17  ;;  %v2175_v49 = vsel %vm17138_vm8, %v2174_v19, %v2170_v2  ;;  %v1791_v1 = vmax.f32 %v17139_v27, -3e+38  ;;  %v2013_v26 = vrot.slane %v1784_v4, %v10010_v23  ;;  %v17146_v2 = vld [vmem:[#allocation59_spill] sm:$0xff]  ;;  %vm17147_vm0 = vmmov %vm17142_vm7 }
 0x5f7   :  { %v1989_v18 = vrot.slane %v1779_v14, %v10008_v22  ;;  %v2003_v8 = vrot.slane %v1782_v43, %v10006_v21  ;;  %v2180_v5 = vsel %vm17140_vm12, %v2179_v44, %v2175_v49  ;;  %v2008_v12 = vrot.slane %v1783_v25, %v10008_v22 }
 0x5f8   :  { %v2022_v61 = vrot.slane %v1786_v11, %v10006_v21  ;;  %vm17141_vm5 = vcmask 261312   ;;  %v2027_v19 = vrot.slane %v1787_v10, %v10008_v22  ;;  %v2041_v14 = vrot.slane %v1790_v57, %v10006_v21 }
 0x5f9   :  { %v11839_v30 = vpop.xlane.xlu0 %2758  ;;  %v11841_v63 = vpop.xlane.xlu1 %2638  ;;  %vm17143_vm8 = vmmov %vm17141_vm5  ;;  %vm17145_vm12 = vcmask 130112   ;;  %v2037_v44 = vrot.slane %v1789_v24, %v10004_v17  ;;  %v1788_v25 = vmax.f32 %v17146_v2, -3e+38  ;;  %v2046_v11 = vrot.slane %v1791_v1, %v10008_v22 }
 0x5fa   :  { %17135 = vst [vmem:[#allocation55_spill] sm:$0xff] %v11839_v30  ;;  %v2198_v30 = vrot.slane %v1823_v7, %v10008_v22  ;;  %v2185_v7 = vsel %vm17141_vm5, %v2184_v16, %v2180_v5  ;;  %v1957_v4 = vsel %vm17143_vm8, %v1956_v36, %v1952_v28  ;;  %vm17144_vm14 = vmmov %vm17141_vm5  ;;  %v1985_v34 = vsel %vm17145_vm12, %v1984_v9, %v1980_v20  ;;  %v17150_v36 = vld [vmem:[#allocation60_spill] sm:$0xff] }
 0x5fb   :  { %v1990_v16 = vsel %vm17147_vm0, %v1989_v18, %v1985_v34  ;;  %vm17148_vm5 = vmmov %vm17145_vm12  ;;  %vm17155_vm12 = vcmask 1047559   ;;  %v2206_v24 = vsel %vm17156_vm2, %v1957_v4, %v11808_v29  ;;  %v2796_v34 = vmax.f32 %v11637_v48, -3e+38 }
 0x5fc   :  { %v2199_v27 = vsel %vm17142_vm7, %v2198_v30, %v2194_v37  ;;  %v2004_v30 = vsel %vm17148_vm5, %v2003_v8, %v1999_v13  ;;  %v17149_v37 = vld [vmem:[#allocation62_spill] sm:$0xff]  ;;  %vm17151_vm7 = vcmask 1046534   ;;  %vm17154_vm8 = vmmov %vm17148_vm5  ;;  %v2042_v49 = vsel %vm17148_vm5, %v2041_v14, %v2037_v44 }
 0x5fd   :  { %v11859_v35 = vpop.xlane.xlu0 %2686  ;;  %v11861_v3 = vpop.xlane.xlu1 %2710  ;;  %v2204_v43 = vsel %vm17144_vm14, %v2203_v33, %v2199_v27  ;;  %v1792_v28 = vmax.f32 %v17149_v37, -3e+38  ;;  %v2217_v10 = vsel %vm17151_vm7, %v2185_v7, %v17150_v36  ;;  %vm17153_vm14 = vmmov %vm17147_vm0  ;;  %v2023_v20 = vsel %vm17154_vm8, %v2022_v61, %v2018_v38 }
 0x5fe   :  { %v2009_v33 = vsel %vm17153_vm14, %v2008_v12, %v2004_v30  ;;  %v2218_v9 = vsel %vm17155_vm12, %v2204_v43, %v2217_v10  ;;  %v2028_v13 = vsel %vm17147_vm0, %v2027_v19, %v2023_v20  ;;  %v2032_v8 = vrot.slane %v1788_v25, %v10010_v23  ;;  %vm17158_vm14 = vmmov %vm17147_vm0  ;;  %v17159_v12 = vld [vmem:[#allocation51_spill] sm:$0xff] }
 0x5ff   :  { %vm17157_vm7 = vcmask 261312   ;;  %v2047_v5 = vsel %vm17158_vm14, %v2046_v11, %v2042_v49  ;;  %v2051_v7 = vrot.slane %v1792_v28, %v10010_v23  ;;  %vm17162_vm12 = vcmask 1043459   ;;  %v17170_v49 = vld [vmem:[#allocation50_spill] sm:$0xff] }
 0x600   :  { %v1995_v38 = vsel %vm17157_vm7, %v11813_v50, %v1990_v16  ;;  %vm17160_vm2 = vmmov %vm17157_vm7  ;;  %vm17164_vm5 = vcmask 1044484   ;;  %v2804_v43 = vmax.f32 %v11635_v46, -3e+38  ;;  %vm17166_vm14 = vcmask 1045509  }
 0x601   :  { %v11880_v57 = vpop.permute.xlu1 %1833  ;;  %v11890_v1 = vpop.xlane.xlu0 %2770  ;;  %v1976_v29 = vsel %vm17160_vm2, %v11804_v51, %v11822_v40  ;;  %vm17161_vm8 = vmmov %vm17160_vm2  ;;  %v2828_v51 = vmax.f32 %v11642_v31, -3e+38  ;;  %v2800_v40 = vmax.f32 %v11644_v32, -3e+38  ;;  %v2808_v2 = vmax.f32 %v11648_v47, -3e+38 }
 0x602   :  { %17152 = vst [vmem:[#allocation52_spill] sm:$0xff] %v11880_v57  ;;  %vm16520_vm1 = vcmp.eq.s32.totalorder %v11880_v57, 1  ;;  %v2014_v27 = vsel %vm17161_vm8, %v2013_v26, %v2009_v33  ;;  %v2207_v4 = vsel %vm17162_vm12, %v1976_v29, %v2206_v24  ;;  %vm17163_vm0 = vmmov %vm17160_vm2  ;;  %v2832_v26 = vmax.f32 %v11646_v42, -3e+38 }
 0x603   :  { %v2222_v18 = vsel %vm16520_vm1, %v2218_v9, 0.0  ;;  %v2033_v19 = vsel %vm17163_vm0, %v2032_v8, %v2028_v13  ;;  %v2208_v14 = vsel %vm17164_vm5, %v1995_v38, %v2207_v4  ;;  %vm17165_vm7 = vmmov %vm17163_vm0  ;;  %vm17167_vm2 = vcmask 1046534   ;;  %v17171_v38 = vld [vmem:[#allocation67_spill] sm:$0xff] }
 0x604   :  { %v11899_v61 = vadd.f32 %v17159_v12, %v2222_v18  ;;  %v2052_v50 = vsel %vm17165_vm7, %v2051_v7, %v2047_v5  ;;  %v2209_v44 = vsel %vm17166_vm14, %v2014_v27, %v2208_v14  ;;  %v2805_v16 = vmax.f32 %v11661_v55, -3e+38 }
 0x605   :  { %v11917_v25 = vpop.xlane.xlu0 %2698  ;;  %v2210_v11 = vsel %vm17167_vm2, %v2033_v19, %v2209_v44  ;;  %vm17168_vm8 = vcmask 1047559   ;;  %v2965_v48 = vrot.slane %v2804_v43, %v10004_v17  ;;  %v2927_v30 = vrot.slane %v2796_v34, %v10004_v17  ;;  %v17176_v19 = vld [vmem:[#allocation69_spill] sm:$0xff]  ;;  %v17179_v34 = vld [vmem:[#allocation64_spill] sm:$0xff] }
 0x606   :  { %v2211_v46 = vsel %vm17168_vm8, %v2052_v50, %v2210_v11  ;;  %v2840_v31 = vmax.f32 %v11650_v41, -3e+38  ;;  %v2829_v32 = vmax.f32 %v11665_v39, -3e+38  ;;  %v3079_v42 = vrot.slane %v2828_v51, %v10004_v17  ;;  %v17182_v11 = vld [vmem:[#allocation71_spill] sm:$0xff] }
 0x607   :  { %v11928_v47 = vrot.slane %v2800_v40, %v10004_v17  ;;  %v3098_v37 = vrot.slane %v2832_v26, %v10004_v17  ;;  %v2833_v28 = vmax.f32 %v11673_v59, -3e+38  ;;  %v11933_v55 = vrot.slane %v2808_v2, %v10004_v17 }
 0x608   :  { %v2836_v36 = vmax.f32 %v11652_v54, -3e+38  ;;  %v2816_v10 = vmax.f32 %v11655_v6, -3e+38  ;;  %v2812_v41 = vmax.f32 %v11657_v56, -3e+38  ;;  %v2969_v20 = vrot.slane %v2805_v16, %v10006_v21 }
 0x609   :  { %v2844_v39 = vmax.f32 %v11659_v0, -3e+38  ;;  %v2841_v9 = vmax.f32 %v11681_v58, -3e+38  ;;  %v3136_v59 = vrot.slane %v2840_v31, %v10004_v17  ;;  %v2820_v24 = vmax.f32 %v11663_v15, -3e+38 }
 0x60a   :  { %v3083_v54 = vrot.slane %v2829_v32, %v10006_v21  ;;  %v2848_v56 = vmax.f32 %v11671_v45, -3e+38  ;;  %v3102_v13 = vrot.slane %v2833_v28, %v10006_v21  ;;  %v2817_v0 = vmax.f32 %v11685_v53, -3e+38  ;;  %v17184_v32 = vld [vmem:[#allocation72_spill] sm:$0xff] }
 0x60b   :  { %v11956_v58 = vrot.slane %v2836_v36, %v10004_v17  ;;  %v3022_v8 = vrot.slane %v2816_v10, %v10004_v17  ;;  %v2824_v15 = vmax.f32 %v11679_v62, -3e+38  ;;  %v2797_v5 = vmax.f32 %v17171_v38, -3e+38  ;;  %v17175_v62 = vld [vmem:[#allocation68_spill] sm:$0xff] }
 0x60c   :  { %v11962_v12 = vrot.slane %v2812_v41, %v10004_v17  ;;  %v11965_v45 = vrot.slane %v2844_v39, %v10004_v17  ;;  %vm17172_vm0 = vcmask 130112   ;;  %v3140_v29 = vrot.slane %v2841_v9, %v10006_v21  ;;  %v17186_v39 = vld [vmem:[#allocation78_spill] sm:$0xff] }
 0x60d   :  { %v11938_v33 = vpop.permute.xlu0 %1830  ;;  %v2970_v53 = vsel %vm17172_vm0, %v2969_v20, %v2965_v48  ;;  %vm17173_vm5 = vcmask 261120   ;;  %v3041_v7 = vrot.slane %v2820_v24, %v10004_v17  ;;  %vm17174_vm7 = vmmov %vm17172_vm0  ;;  %v2821_v4 = vmax.f32 %v17175_v62, -3e+38 }
 0x60e   :  { %17169 = vst [vmem:[#allocation56_spill] sm:$0xff] %v11938_v33  ;;  %vm16521_vm12 = vcmp.eq.s32.totalorder %v11938_v33, 1  ;;  %v11973_v27 = vsel %vm17174_vm7, %v3083_v54, %v3079_v42  ;;  %v2801_v14 = vmax.f32 %v17176_v19, -3e+38  ;;  %vm17177_vm14 = vmmov %vm17173_vm5  ;;  %v11980_v50 = vrot.slane %v2848_v56, %v10004_v17  ;;  %v17188_v54 = vld [vmem:[#allocation65_spill] sm:$0xff]  ;;  %v17189_v56 = vld [vmem:[#allocation88_spill] sm:$0xff] }
 0x60f   :  { %v2221_v6 = vsel %vm16521_vm12, %v2211_v46, 0.0  ;;  %vm17178_vm2 = vmmov %vm17172_vm0  ;;  %v2852_v44 = vmax.f32 %v17179_v34, -3e+38  ;;  %v3026_v51 = vrot.slane %v2817_v0, %v10006_v21  ;;  %v17180_v40 = vmov 0.0   ;;  %v17183_v46 = vld [vmem:[#allocation79_spill] sm:$0xff]  ;;  %v17190_v0 = vld [vmem:[#allocation66_spill] sm:$0xff] }
 0x610   :  { %v11953_v18 = vadd.f32 %v17170_v49, %v2221_v6  ;;  %v11983_v43 = vsel %vm17178_vm2, %v3102_v13, %v3098_v37  ;;  %vm17181_vm8 = vmmov 0   ;;  %v3060_v26 = vrot.slane %v2824_v15, %v10004_v17  ;;  %v17185_v37 = vld [vmem:[#allocation80_spill] sm:$0xff]  ;;  %vm17191_vm7 = vmmov %vm17172_vm0  ;;  %v17195_v34 = vld [vmem:[#allocation74_spill] sm:$0xff] }
 0x611   :  { %v2931_v2 = vrot.slane %v2797_v5, %v10006_v21  ;;  %v2809_v16 = vmax.f32 %v17182_v11, -3e+38  ;;  %v2802_v48 = vmax.f32 %v17183_v46, -3e+38  ;;  %v11994_v31 = vsel %vm17172_vm0, %v3140_v29, %v3136_v59  ;;  %v17192_v29 = vld [vmem:[#allocation84_spill] sm:$0xff]  ;;  %vm17194_vm2 = vmmov %vm17172_vm0 }
 0x612   :  { %9545 = vmatprep.mubr.msk.f32.mxu0 %vm17173_vm5, %v11953_v18  ;;  %v2825_v42 = vmax.f32 %v17184_v32, -3e+38  ;;  %v2806_v28 = vmax.f32 %v17185_v37, -3e+38  ;;  %v2803_v36 = vmax.f32 %v11819_v52, -3e+38  ;;  %v3045_v10 = vrot.slane %v2821_v4, %v10006_v21  ;;  %vm17187_vm5 = vmmov %vm17172_vm0 }
 0x613   :  { %9546 = vmatmul.mubr.msk.f32.vlgmr.msra.gmra.mrb[2].mxu0 %vm17177_vm14, %v11899_v61  ;;  %v2950_v41 = vrot.slane %v2801_v14, %v10006_v21  ;;  %v2798_v20 = vmax.f32 %v17186_v39, -3e+38  ;;  %v2807_v9 = vmax.f32 %v11841_v63, -3e+38  ;;  %v12004_v24 = vrot.slane %v2852_v44, %v10004_v17  ;;  %vm17193_vm14 = vmmov %vm17172_vm0  ;;  %v17204_v39 = vld [vmem:[#allocation75_spill] sm:$0xff] }
 0x614   :  { %9558 = vmatprep.mubr.msk.bf16.mxu0 %vm17181_vm8, %v17180_v40  ;;  %v12007_v59 = vsel %vm17187_vm5, %v3026_v51, %v3022_v8  ;;  %v2856_v6 = vmax.f32 %v17188_v54, -3e+38  ;;  %v2799_v13 = vmax.f32 %v17189_v56, -3e+38  ;;  %v2845_v52 = vmax.f32 %v17190_v0, -3e+38 }
 0x615   :  { %v2932_v49 = vsel %vm17191_vm7, %v2931_v2, %v2927_v30  ;;  %v2988_v15 = vrot.slane %v2809_v16, %v10006_v21  ;;  %v2955_v38 = vrot.slane %v2802_v48, %v10008_v22  ;;  %v3064_v63 = vrot.slane %v2825_v42, %v10006_v21  ;;  %v17196_v51 = vld [vmem:[#allocation76_spill] sm:$0xff]  ;;  %v17198_v48 = vld [vmem:[#allocation70_spill] sm:$0xff]  ;;  %vm17201_vm7 = vmmov %vm17172_vm0 }
 0x616   :  { %v2974_v5 = vrot.slane %v2806_v28, %v10008_v22  ;;  %v2810_v62 = vmax.f32 %v17192_v29, -3e+38  ;;  %v2960_v8 = vrot.slane %v2803_v36, %v10010_v23  ;;  %v3046_v4 = vsel %vm17193_vm14, %v3045_v10, %v3041_v7  ;;  %v17197_v16 = vld [vmem:[#allocation92_spill] sm:$0xff]  ;;  %v17209_v29 = vld [vmem:[#allocation89_spill] sm:$0xff] }
 0x617   :  { %v2951_v19 = vsel %vm17194_vm2, %v2950_v41, %v11928_v47  ;;  %v2936_v14 = vrot.slane %v2798_v20, %v10008_v22  ;;  %v2979_v30 = vrot.slane %v2807_v9, %v10010_v23  ;;  %v2837_v44 = vmax.f32 %v17195_v34, -3e+38  ;;  %v17200_v47 = vld [vmem:[#allocation85_spill] sm:$0xff] }
 0x618   :  { %v2813_v2 = vmax.f32 %v17196_v51, -3e+38  ;;  %v2941_v11 = vrot.slane %v2799_v13, %v10010_v23  ;;  %v2811_v46 = vmax.f32 %v17197_v16, -3e+38  ;;  %v2849_v32 = vmax.f32 %v17198_v48, -3e+38 }
 0x619   :  { %v2989_v7 = vsel %vm17172_vm0, %v2988_v15, %v11933_v55  ;;  %vm17199_vm5 = vcmask 195712   ;;  %v2814_v37 = vmax.f32 %v17200_v47, -3e+38  ;;  %v3065_v28 = vsel %vm17201_vm7, %v3064_v63, %v3060_v26  ;;  %v17214_v51 = vld [vmem:[#allocation96_spill] sm:$0xff] }
 0x61a   :  { %v2956_v42 = vsel %vm17199_vm5, %v2955_v38, %v2951_v19  ;;  %vm17202_vm14 = vmmov %vm17199_vm5  ;;  %v2993_v10 = vrot.slane %v2810_v62, %v10008_v22  ;;  %vm17203_vm2 = vcmask 261312   ;;  %v2853_v20 = vmax.f32 %v17204_v39, -3e+38  ;;  %v17208_v38 = vld [vmem:[#allocation81_spill] sm:$0xff] }
 0x61b   :  { %v2975_v36 = vsel %vm17202_vm14, %v2974_v5, %v2970_v53  ;;  %v2961_v41 = vsel %vm17203_vm2, %v2960_v8, %v2956_v42  ;;  %vm17205_vm1 = vmmov %vm17199_vm5  ;;  %v2815_v56 = vmax.f32 %v11771_v60, -3e+38  ;;  %v3121_v13 = vrot.slane %v2837_v44, %v10006_v21  ;;  %v17211_v8 = vld [vmem:[#allocation93_spill] sm:$0xff]  ;;  %v17215_v42 = vld [vmem:[#allocation82_spill] sm:$0xff] }
 0x61c   :  { %v2937_v9 = vsel %vm17205_vm1, %v2936_v14, %v2932_v49  ;;  %vm17206_vm12 = vmmov %vm17203_vm2  ;;  %v3007_v15 = vrot.slane %v2813_v2, %v10006_v21  ;;  %v2998_v53 = vrot.slane %v2811_v46, %v10010_v23  ;;  %v2830_v63 = vmax.f32 %v17208_v38, -3e+38  ;;  %v17212_v14 = vld [vmem:[#allocation99_spill] sm:$0xff] }
 0x61d   :  { %v2980_v55 = vsel %vm17206_vm12, %v2979_v30, %v2975_v36  ;;  %vm17207_vm0 = vmmov %vm17203_vm2  ;;  %v3012_v5 = vrot.slane %v2814_v37, %v10008_v22  ;;  %v2818_v62 = vmax.f32 %v17209_v29, -3e+38  ;;  %vm17210_vm5 = vcmask 1041409   ;;  %v17217_v36 = vld [vmem:[#allocation83_spill] sm:$0xff] }
 0x61e   :  { %v2942_v26 = vsel %vm17207_vm0, %v2941_v11, %v2937_v9  ;;  %v2994_v60 = vsel %vm17205_vm1, %v2993_v10, %v2989_v7  ;;  %v2822_v19 = vmax.f32 %v17211_v8, -3e+38  ;;  %v2819_v30 = vmax.f32 %v17212_v14, -3e+38  ;;  %vm17216_vm14 = vmmov %vm17207_vm0  ;;  %v17218_v9 = vld [vmem:[#allocation90_spill] sm:$0xff]  ;;  %v17224_v8 = vld [vmem:[#allocation87_spill] sm:$0xff] }
 0x61f   :  { %v3228_v49 = vsel %vm17210_vm5, %v2961_v41, %v2942_v26  ;;  %vm17213_vm12 = vcmask 1042434   ;;  %v3017_v44 = vrot.slane %v2815_v56, %v10010_v23  ;;  %v2826_v2 = vmax.f32 %v17214_v51, -3e+38  ;;  %vm17220_vm0 = vmmov %vm17205_vm1  ;;  %v17228_v51 = vld [vmem:[#allocation97_spill] sm:$0xff] }
 0x620   :  { %v3229_v34 = vsel %vm17213_vm12, %v2980_v55, %v3228_v49  ;;  %v2823_v11 = vmax.f32 %v11859_v35, -3e+38  ;;  %v2831_v16 = vmax.f32 %v11861_v3, -3e+38  ;;  %v3008_v46 = vsel %vm17201_vm7, %v3007_v15, %v11962_v12  ;;  %vm17221_vm5 = vmmov %vm17216_vm14 }
 0x621   :  { %v2834_v47 = vmax.f32 %v17215_v42, -3e+38  ;;  %v2999_v7 = vsel %vm17216_vm14, %v2998_v53, %v2994_v60  ;;  %v2827_v37 = vmax.f32 %v11917_v25, -3e+38  ;;  %v2838_v10 = vmax.f32 %v17217_v36, -3e+38  ;;  %vm17225_vm12 = vmmov %vm17220_vm0 }
 0x622   :  { %v3031_v41 = vrot.slane %v2818_v62, %v10008_v22  ;;  %v2835_v56 = vmax.f32 %v17218_v9, -3e+38  ;;  %vm17219_vm2 = vcmask 1043459   ;;  %v3088_v35 = vrot.slane %v2830_v63, %v10008_v22  ;;  %v17222_v62 = vld [vmem:[#allocation94_spill] sm:$0xff]  ;;  %vm17226_vm7 = vmmov %vm17220_vm0  ;;  %v17240_v9 = vld [vmem:[#allocation95_spill] sm:$0xff] }
 0x623   :  { %v3230_v55 = vsel %vm17219_vm2, %v2999_v7, %v3229_v34  ;;  %v3013_v3 = vsel %vm17220_vm0, %v3012_v5, %v3008_v46  ;;  %v3050_v12 = vrot.slane %v2822_v19, %v10008_v22  ;;  %v3036_v15 = vrot.slane %v2819_v30, %v10010_v23  ;;  %vm17227_vm14 = vmmov %vm17220_vm0 }
 0x624   :  { %v3018_v26 = vsel %vm17221_vm5, %v3017_v44, %v3013_v3  ;;  %v3069_v25 = vrot.slane %v2826_v2, %v10008_v22  ;;  %v3055_v53 = vrot.slane %v2823_v11, %v10010_v23  ;;  %v3093_v38 = vrot.slane %v2831_v16, %v10010_v23  ;;  %vm17229_vm2 = vmmov %vm17221_vm5  ;;  %v17244_v3 = vld [vmem:[#allocation98_spill] sm:$0xff] }
 0x625   :  { %v3107_v29 = vrot.slane %v2834_v47, %v10008_v22  ;;  %v2839_v49 = vmax.f32 %v17222_v62, -3e+38  ;;  %v3074_v63 = vrot.slane %v2827_v37, %v10010_v23  ;;  %vm17223_vm1 = vcmask 1044484   ;;  %vm17230_vm0 = vmmov %vm17229_vm2  ;;  %v17247_v62 = vld [vmem:[#allocation77_spill] sm:$0xff] }
 0x626   :  { %v3231_v5 = vsel %vm17223_vm1, %v3018_v26, %v3230_v55  ;;  %v3126_v60 = vrot.slane %v2838_v10, %v10008_v22  ;;  %v2842_v19 = vmax.f32 %v17224_v8, -3e+38  ;;  %v3032_v14 = vsel %vm17225_vm12, %v3031_v41, %v12007_v59  ;;  %vm17231_vm5 = vmmov %vm17230_vm0  ;;  %v17239_v41 = vld [vmem:[#allocation91_spill] sm:$0xff] }
 0x627   :  { %v3112_v30 = vrot.slane %v2835_v56, %v10010_v23  ;;  %v3089_v34 = vsel %vm17226_vm7, %v3088_v35, %v11973_v27  ;;  %v3051_v44 = vsel %vm17227_vm14, %v3050_v12, %v3046_v4  ;;  %v2843_v2 = vmax.f32 %v17228_v51, -3e+38  ;;  %vm17232_vm1 = vmmov %vm17226_vm7  ;;  %v17241_v55 = vld [vmem:[#allocation55_spill] sm:$0xff] }
 0x628   :  { %v3037_v11 = vsel %vm17229_vm2, %v3036_v15, %v3032_v14  ;;  %v3094_v16 = vsel %vm17230_vm0, %v3093_v38, %v3089_v34  ;;  %v3056_v46 = vsel %vm17231_vm5, %v3055_v53, %v3051_v44  ;;  %v3070_v42 = vsel %vm17232_vm1, %v3069_v25, %v3065_v28  ;;  %vm17235_vm15 = vmmov %vm17232_vm1 }
 0x629   :  { %v3232_v47 = vsel %vm17233_vm3, %v3037_v11, %v3231_v5  ;;  %vm17234_vm12 = vcmask 130112   ;;  %v3108_v27 = vsel %vm17235_vm15, %v3107_v29, %v11983_v43  ;;  %v3131_v4 = vrot.slane %v2839_v49, %v10010_v23  ;;  %vm17236_vm7 = vmmov %vm17230_vm0 }
 0x62a   :  { %v3122_v59 = vsel %vm17234_vm12, %v3121_v13, %v11956_v58  ;;  %v3075_v7 = vsel %vm17236_vm7, %v3074_v63, %v3070_v42  ;;  %vm17237_vm14 = vmmov %vm17232_vm1  ;;  %v3145_v36 = vrot.slane %v2842_v19, %v10008_v22  ;;  %v2846_v28 = vmax.f32 %v17239_v41, -3e+38  ;;  %v17248_v63 = vld [vmem:[#allocation86_spill] sm:$0xff] }
 0x62b   :  { %v3127_v37 = vsel %vm17237_vm14, %v3126_v60, %v3122_v59  ;;  %vm17238_vm2 = vmmov %vm17230_vm0  ;;  %v2850_v56 = vmax.f32 %v17240_v9, -3e+38  ;;  %v2847_v35 = vmax.f32 %v17241_v55, -3e+38  ;;  %vm17242_vm3 = vcmask 1041409   ;;  %v4079_v59 = vld [vmem:[#allocation2 + $0x28] sm:$0xff] }
 0x62c   :  { %v3113_v10 = vsel %vm17238_vm2, %v3112_v30, %v3108_v27  ;;  %vm17243_vm0 = vcmask 1046534   ;;  %v3150_v13 = vrot.slane %v2843_v2, %v10010_v23  ;;  %v2854_v12 = vmax.f32 %v17244_v3, -3e+38  ;;  %vm17246_vm5 = vmmov %vm17238_vm2  ;;  %v4080_v55 = vld [vmem:[#allocation2 + $0x30] sm:$0xff] }
 0x62d   :  { %v3235_v58 = vsel %vm17242_vm3, %v3113_v10, %v3094_v16  ;;  %v3233_v43 = vsel %vm17243_vm0, %v3056_v46, %v3232_v47  ;;  %v2851_v15 = vmax.f32 %v11890_v1, -3e+38  ;;  %vm17245_vm15 = vcmask 1047559   ;;  %vm17250_vm12 = vmmov %vm17237_vm14  ;;  %v17258_v16 = vld [vmem:[#allocation63_spill] sm:$0xff]  ;;  %v4078_v47 = vld [vmem:[#allocation2 + $0x20] sm:$0xff] }
 0x62e   :  { %v3234_v26 = vsel %vm17245_vm15, %v3075_v7, %v3233_v43  ;;  %v3159_v25 = vrot.slane %v2845_v52, %v10006_v21  ;;  %v3178_v53 = vrot.slane %v2849_v32, %v10006_v21  ;;  %v3197_v38 = vrot.slane %v2853_v20, %v10006_v21  ;;  %v17251_v32 = vld [vmem:[#allocation34_spill] sm:$0xff]  ;;  %vm17253_vm14 = vmmov %vm17238_vm2 }
 0x62f   :  { %v3132_v29 = vsel %vm17246_vm5, %v3131_v4, %v3127_v37  ;;  %v2857_v49 = vmax.f32 %v17247_v62, -3e+38  ;;  %v2858_v1 = vmax.f32 %v17248_v63, -3e+38  ;;  %v3164_v5 = vrot.slane %v2846_v28, %v10008_v22  ;;  %vm17257_vm15 = vmmov %vm17250_vm12  ;;  %v17279_v63 = vld [vmem:[#allocation36_spill] sm:$0xff] }
 0x630   :  { %vm17249_vm1 = vcmask 1042434   ;;  %v3146_v0 = vsel %vm17250_vm12, %v3145_v36, %v11994_v31  ;;  %v3183_v52 = vrot.slane %v2850_v56, %v10008_v22  ;;  %v3169_v48 = vrot.slane %v2847_v35, %v10010_v23  ;;  %v4081_v35 = vld [vmem:[#allocation2 + $0x38] sm:$0xff] }
 0x631   :  { %v3236_v60 = vsel %vm17249_vm1, %v3132_v29, %v3235_v58  ;;  %vm17252_vm7 = vcmp.eq.s32.totalorder %v17251_v32, 1  ;;  %v3151_v8 = vsel %vm17253_vm14, %v3150_v13, %v3146_v0  ;;  %v3202_v19 = vrot.slane %v2854_v12, %v10008_v22  ;;  %vm17260_vm1 = vmmov %vm17250_vm12  ;;  %v17276_v29 = vld [vmem:[#allocation73_spill] sm:$0xff] }
 0x632   :  { %v3244_v39 = vsel %vm17252_vm7, %v3234_v26, 0.0  ;;  %v2783_v20 = vpop.xlane.xlu1 %2782  ;;  %v3188_v14 = vrot.slane %v2851_v15, %v10010_v23  ;;  %v3212_v34 = vrot.slane %v2856_v6, %v10004_v17  ;;  %vm17254_vm2 = vcmask 130112   ;;  %vm17261_vm12 = vmmov %vm17253_vm14 }
 0x633   :  { %v2855_v30 = vmax.f32 %v2783_v20, -3e+38  ;;  %v3160_v31 = vsel %vm17254_vm2, %v3159_v25, %v11965_v45  ;;  %vm17255_vm3 = vmmov %vm17254_vm2  ;;  %vm17256_vm0 = vcmask 1043459   ;;  %v3216_v2 = vrot.slane %v2857_v49, %v10006_v21  ;;  %v9752_v49 = vld [vmem:[%s16326_s5] sm:$0xff]  }
 0x634   :  { %v3179_v44 = vsel %vm17255_vm3, %v3178_v53, %v11980_v50  ;;  %v3237_v51 = vsel %vm17256_vm0, %v3151_v8, %v3236_v60  ;;  %v3165_v11 = vsel %vm17257_vm15, %v3164_v5, %v3160_v31  ;;  %v4019_v46 = vadd.f32 %v17258_v16, %v3244_v39  ;;  %vm17259_vm5 = vmmov %vm17254_vm2  ;;  %v17274_v53 = vld [vmem:[#allocation35_spill] sm:$0xff] }
 0x635   :  { %v3207_v42 = vrot.slane %v2855_v30, %v10010_v23  ;;  %v3198_v54 = vsel %vm17259_vm5, %v3197_v38, %v12004_v24  ;;  %v3221_v45 = vrot.slane %v2858_v1, %v10008_v22  ;;  %v3184_v6 = vsel %vm17260_vm1, %v3183_v52, %v3179_v44  ;;  %vm17262_vm7 = vmmov %vm17260_vm1  ;;  %v17267_v24 = vld [vmem:[#allocation38_spill] sm:$0xff]  ;;  %v17284_v44 = vld [vmem:[#allocation37_spill] sm:$0xff] }
 0x636   :  { %v3170_v50 = vsel %vm17261_vm12, %v3169_v48, %v3165_v11  ;;  %v2795_v27 = vpop.xlane.xlu1 %2794  ;;  %v3203_v4 = vsel %vm17262_vm7, %v3202_v19, %v3198_v54  ;;  %vm17263_vm14 = vmmov %vm17261_vm12  ;;  %vm17264_vm2 = vcmask 1044484   ;;  %v9686_v41 = vpack.c.bf16 %v4079_v59, %v4078_v47 }
 0x637   :  { %v3189_v7 = vsel %vm17263_vm14, %v3188_v14, %v3184_v6  ;;  %v2859_v37 = vmax.f32 %v2795_v27, -3e+38  ;;  %v3238_v36 = vsel %vm17264_vm2, %v3170_v50, %v3237_v51  ;;  %vm17265_vm3 = vmmov %vm17261_vm12  ;;  %v12156_v9 = vadd.f32 %v4019_v46, %v17267_v24  ;;  %v17288_v46 = vld [vmem:[#allocation40_spill] sm:$0xff] }
 0x638   :  { %v3208_v10 = vsel %vm17265_vm3, %v3207_v42, %v3203_v4  ;;  %vm17266_vm0 = vmmov %vm17259_vm5  ;;  %vm17270_vm5 = vcmask 1045509   ;;  %vm17272_vm12 = vcmask 1046534   ;;  %vm17273_vm7 = vcmask 1047559  }
 0x639   :  { %v3217_v28 = vsel %vm17266_vm0, %v3216_v2, %v3212_v34  ;;  %17268 = vst [vmem:[#allocation53_spill] sm:$0xff] %v12156_v9  ;;  %v3226_v56 = vrot.slane %v2859_v37, %v10010_v23  ;;  %vm17269_vm15 = vmmov %vm17260_vm1  ;;  %v3239_v13 = vsel %vm17270_vm5, %v3189_v7, %v3238_v36  ;;  %v9690_v26 = vpack.c.bf16 %v4081_v35, %v4080_v55  ;;  %v17282_v34 = vld [vmem:[#allocation33_spill] sm:$0xff] }
 0x63a   :  { %v4026_v58 = vpop.permute.xlu1 %4025  ;;  %v3222_v43 = vsel %vm17269_vm15, %v3221_v45, %v3217_v28  ;;  %vm17271_vm1 = vmmov %vm17265_vm3  ;;  %v3240_v12 = vsel %vm17272_vm12, %v3208_v10, %v3239_v13  ;;  %v16536_v25 = vmax.f32 %v12156_v9, 0.0  ;;  %vm17275_vm14 = vcmp.eq.s32.totalorder %v17274_v53, 1  ;;  %v17295_v10 = vld [vmem:[#allocation43_spill] sm:$0xff]  ;;  %v17300_v13 = vld [vmem:[#allocation45_spill] sm:$0xff] }
 0x63b   :  { %9557 = vmatpush3.bf16.msra.mxu0 %v4026_v58  ;;  %v3227_v3 = vsel %vm17271_vm1, %v3226_v56, %v3222_v43  ;;  %vm17277_vm2 = vcmask 130048   ;;  %vm17278_vm3 = vcmask 261120   ;;  %vm17283_vm15 = vnez %v17282_v34 }
 0x63c   :  { %v3241_v15 = vsel %vm17273_vm7, %v3227_v3, %v3240_v12  ;;  %9687 = vmatprep.subr.bf16.mxu0 %v9686_v41  ;;  %vm17281_vm0 = vmmov %vm17278_vm3  ;;  %vm17285_vm5 = vnez %v17284_v44  ;;  %vm17289_vm7 = vnez %v17288_v46 }
 0x63d   :  { %v3245_v38 = vsel %vm17275_vm14, %v3241_v15, 0.0  ;;  %vm17286_vm1 = vmmov %vm17277_vm2 }
 0x63e   :  { %v4022_v62 = vadd.f32 %v17276_v29, %v3245_v38  ;;  %9559 = vmatmul.mubr.msk.bf16.vlgmr.msra.gmra.mrb[8].mxu0 %vm17277_vm2, %v9752_v49  ;;  %vm17287_vm12 = vmmov %vm17286_vm1  ;;  %v17304_v29 = vld [vmem:[#allocation39_spill] sm:$0xff] }
 0x63f   :  { %9689 = vmatpush3.bf16.msra.mxu0 %v9686_v41  ;;  %9570 = vmatprep.mubr.msk.f32.mxu0 %vm17278_vm3, %v16536_v25  ;;  %vm17290_vm14 = vmmov %vm17286_vm1 }
 0x640   :  { %v12176_v1 = vadd.f32 %v4022_v62, %v17279_v63  ;;  %9691 = vmatprep.subr.bf16.mxu0 %v9690_v26  ;;  %vm17291_vm2 = vmmov %vm17286_vm1 }
 0x641   :  { %vm17292_vm3 = vmmov %vm17286_vm1 }
 0x642   :  { %17280 = vst [vmem:[#allocation54_spill] sm:$0xff] %v12176_v1  ;;  %v16535_v5 = vmax.f32 %v12176_v1, 0.0 }
 0x643   :  { %9693 = vmatpush3.bf16.msra.mxu0 %v9690_v26 }
 0x644   :  { %9584 = vmatprep.subr.bf16.mxu0 %v17180_v40 }
 0x646   :  { %9571 = vmatmul.mubr.msk.f32.vlgmr.msra.gmra.mrb[12].mxu0 %vm17281_vm0, %v16535_v5  ;;  %vm17293_vm0 = vmmov %vm17286_vm1 }
 0x647   :  { %9588 = vmatprep.mubr.msk.bf16.mxu0 %vm17181_vm8, %v17180_v40 }
 0x6e6   :  { %v9547_v60 = vpop.f32.mrb[2].mxu0 }
 0x6e7   :  { %v2486_v0 = vpop.f32.mrb[3].mxu0 }
 0x6e8   :  { %3246 = vxpose.xlu1.b32.start [1/2] (short) (narrow) %v2486_v0, 32 }
 0x6ec   :  { %3247 = vxpose.xlu1.b32.end [2/2] (short) (narrow) %v9547_v60, 32  ;;  %v17307_v60 = vld [vmem:[#allocation41_spill] sm:$0xff] }
 0x711   :  { %v12185_v52 = vpop.f32.mrb[8].mxu0 }
 0x712   :  { %v9560_v48 = vpop.f32.mrb[9].mxu0 }
 0x713   :  { %v12187_v39 = vpop.f32.mrb[10].mxu0 }
 0x714   :  { %v9561_v20 = vpop.f32.mrb[11].mxu0 }
 0x719   :  { %v12189_v8 = vpop.f32.mrb[12].mxu0 }
 0x71a   :  { %v12191_v19 = vpop.f32.mrb[13].mxu0 }
 0x71b   :  { %v12195_v14 = vpack.c.bf16 %v12189_v8, %v12191_v19 }
 0x71d   :  { %9585 = vmatpush3.bf16.msra.mxu0 %v12195_v14 }
 0x71e   :  { %9586 = vmatprep.subr.bf16.mxu0 %v17180_v40 }
 0x768   :  { %v12199_v30 = vpop.trf.xlu1 }
 0x769   :  { %v3282_v31 = vsel %vm17283_vm15, %v12199_v30, -3e+38  ;;  %v3278_v51 = vsel %vm17285_vm5, %v12199_v30, -3e+38 }
 0x76a   :  { %v3354_v2 = vsel %vm17286_vm1, %v3282_v31, -inf  ;;  %v3342_v11 = vsel %vm17287_vm12, %v3278_v51, -inf  ;;  %vm17294_vm1 = vmmov %vm17293_vm0  ;;  %vm17296_vm12 = vnez %v17295_v10  ;;  %v17311_v51 = vld [vmem:[#allocation14_spill] sm:$0xff] }
 0x76b   :  { %3355 = vmax.xlane.f32.xlu1 %v3354_v2  ;;  %3343 = vmax.xlane.f32.xlu0 %v3342_v11  ;;  %v3298_v41 = vsel %vm17296_vm12, %v12199_v30, -3e+38 }
 0x76c   :  { %v12209_v16 = vpop.trf.xlu1 }
 0x76d   :  { %v3295_v42 = vsel %vm17289_vm7, %v12209_v16, -3e+38  ;;  %v3279_v47 = vsel %vm17285_vm5, %v12209_v16, -3e+38  ;;  %v3283_v28 = vsel %vm17283_vm15, %v12209_v16, -3e+38 }
 0x76e   :  { %v3393_v59 = vsel %vm17290_vm14, %v3295_v42, -inf  ;;  %v3345_v54 = vsel %vm17291_vm2, %v3279_v47, -inf  ;;  %vm17297_vm14 = vmmov %vm17293_vm0 }
 0x76f   :  { %3394 = vmax.xlane.f32.xlu1 %v3393_v59  ;;  %3346 = vmax.xlane.f32.xlu0 %v3345_v54  ;;  %v3402_v24 = vsel %vm17297_vm14, %v3298_v41, -inf  ;;  %vm17298_vm2 = vmmov %vm17293_vm0 }
 0x770   :  { %v12219_v45 = vpop.trf.xlu1  ;;  %v3357_v56 = vsel %vm17298_vm2, %v3283_v28, -inf  ;;  %vm17302_vm14 = vmmov %vm17293_vm0 }
 0x771   :  { %v3280_v6 = vsel %vm17285_vm5, %v12219_v45, -3e+38  ;;  %v3284_v35 = vsel %vm17283_vm15, %v12219_v45, -3e+38  ;;  %vm17303_vm2 = vmmov %vm17293_vm0 }
 0x772   :  { %v3348_v50 = vsel %vm17292_vm3, %v3280_v6, -inf  ;;  %vm17299_vm3 = vmmov %vm17293_vm0  ;;  %v3360_v43 = vsel %vm17293_vm0, %v3284_v35, -inf }
 0x773   :  { %3349 = vmax.xlane.f32.xlu0 %v3348_v50 }
 0x774   :  { %v12225_v27 = vpop.trf.xlu1 }
 0x775   :  { %v3297_v4 = vsel %vm17289_vm7, %v12225_v27, -3e+38  ;;  %v3281_v7 = vsel %vm17285_vm5, %v12225_v27, -3e+38  ;;  %v3301_v55 = vsel %vm17296_vm12, %v12225_v27, -3e+38  ;;  %vm17306_vm5 = vmmov %vm17293_vm0 }
 0x776   :  { %v3399_v37 = vsel %vm17293_vm0, %v3297_v4, -inf  ;;  %v3351_v36 = vsel %vm17294_vm1, %v3281_v7, -inf  ;;  %v3411_v58 = vsel %vm17299_vm3, %v3301_v55, -inf  ;;  %vm17301_vm1 = vnez %v17300_v13  ;;  %v17316_v4 = vld [vmem:[#allocation15_spill] sm:$0xff] }
 0x777   :  { %3400 = vmax.xlane.f32.xlu1 %v3399_v37  ;;  %3352 = vmax.xlane.f32.xlu0 %v3351_v36  ;;  %v3303_v3 = vsel %vm17301_vm1, %v12209_v16, -3e+38  ;;  %v3285_v12 = vsel %vm17283_vm15, %v12225_v27, -3e+38  ;;  %v3305_v38 = vsel %vm17301_vm1, %v12225_v27, -3e+38  ;;  %vm17305_vm3 = vnez %v17304_v29  ;;  %vm17310_vm15 = vmmov %vm17293_vm0 }
 0x778   :  { %v3417_v15 = vsel %vm17302_vm14, %v3303_v3, -inf  ;;  %v3363_v26 = vsel %vm17303_vm2, %v3285_v12, -inf  ;;  %v3286_v62 = vsel %vm17305_vm3, %v12199_v30, -3e+38  ;;  %v3423_v49 = vsel %vm17293_vm0, %v3305_v38, -inf  ;;  %vm17309_vm2 = vmmov %vm17293_vm0  ;;  %v17318_v37 = vld [vmem:[#allocation32_spill] sm:$0xff] }
 0x779   :  { %v3366_v63 = vsel %vm17306_vm5, %v3286_v62, -inf  ;;  %vm17308_vm14 = vnez %v17307_v60  ;;  %v3287_v48 = vsel %vm17305_vm3, %v12209_v16, -3e+38  ;;  %vm17312_vm0 = vnez %v17311_v51  ;;  %vm17313_vm5 = vmmov %vm17309_vm2 }
 0x77a   :  { %v3310_v0 = vsel %vm17308_vm14, %v12199_v30, -3e+38  ;;  %v3369_v31 = vsel %vm17310_vm15, %v3287_v48, -inf  ;;  %v3314_v2 = vsel %vm17312_vm0, %v12199_v30, -3e+38  ;;  %vm17314_vm4 = vmmov %vm17309_vm2 }
 0x77b   :  { %3403 = vmax.xlane.f32.xlu1 %v3402_v24  ;;  %3358 = vmax.xlane.f32.xlu0 %v3357_v56  ;;  %v3438_v20 = vsel %vm17309_vm2, %v3310_v0, -inf  ;;  %v3288_v11 = vsel %vm17305_vm3, %v12219_v45, -3e+38  ;;  %v3450_v42 = vsel %vm17313_vm5, %v3314_v2, -inf  ;;  %v3312_v59 = vsel %vm17308_vm14, %v12219_v45, -3e+38  ;;  %vm17315_vm15 = vmmov %vm17309_vm2 }
 0x77c   :  { %v3372_v47 = vsel %vm17314_vm4, %v3288_v11, -inf  ;;  %v3289_v54 = vsel %vm17305_vm3, %v12225_v27, -3e+38  ;;  %v3444_v6 = vsel %vm17315_vm15, %v3312_v59, -inf  ;;  %vm17317_vm5 = vnez %v17316_v4  ;;  %vm17320_vm11 = vmmov %vm17309_vm2 }
 0x77d   :  { %v3375_v50 = vsel %vm17309_vm2, %v3289_v54, -inf  ;;  %v3318_v7 = vsel %vm17317_vm5, %v12199_v30, -3e+38  ;;  %vm17319_vm4 = vnez %v17318_v37  ;;  %vm17321_vm9 = vmmov %vm17309_vm2  ;;  %v3313_v24 = vsel %vm17308_vm14, %v12225_v27, -3e+38 }
 0x77e   :  { %v3290_v36 = vsel %vm17319_vm4, %v12199_v30, -3e+38  ;;  %v3462_v41 = vsel %vm17320_vm11, %v3318_v7, -inf  ;;  %v3291_v56 = vsel %vm17319_vm4, %v12209_v16, -3e+38  ;;  %vm17322_vm15 = vmmov %vm17309_vm2  ;;  %v17335_v7 = vld [vmem:[#allocation46_spill] sm:$0xff] }
 0x77f   :  { %3412 = vmax.xlane.f32.xlu1 %v3411_v58  ;;  %3361 = vmax.xlane.f32.xlu0 %v3360_v43  ;;  %v3378_v28 = vsel %vm17321_vm9, %v3290_v36, -inf  ;;  %v3447_v55 = vsel %vm17322_vm15, %v3313_v24, -inf  ;;  %v3381_v35 = vsel %vm17309_vm2, %v3291_v56, -inf  ;;  %v3320_v58 = vsel %vm17317_vm5, %v12219_v45, -3e+38  ;;  %vm17323_vm9 = vmmov %vm17309_vm2 }
 0x780   :  { %v3292_v43 = vsel %vm17319_vm4, %v12219_v45, -3e+38  ;;  %v3468_v3 = vsel %vm17323_vm9, %v3320_v58, -inf  ;;  %vm17324_vm11 = vmmov %vm17309_vm2  ;;  %v3293_v38 = vsel %vm17319_vm4, %v12225_v27, -3e+38 }
 0x781   :  { %v3384_v12 = vsel %vm17324_vm11, %v3292_v43, -inf  ;;  %vm17327_vm3 = vmmov %vm17309_vm2  ;;  %v3294_v0 = vsel %vm17289_vm7, %v12199_v30, -3e+38  ;;  %v3296_v11 = vsel %vm17289_vm7, %v12219_v45, -3e+38  ;;  %v17340_v43 = vld [vmem:[#allocation48_spill] sm:$0xff] }
 0x782   :  { %vm17328_vm9 = vmmov %vm17309_vm2  ;;  %v3299_v54 = vsel %vm17296_vm12, %v12209_v16, -3e+38 }
 0x783   :  { %3418 = vmax.xlane.f32.xlu1 %v3417_v15  ;;  %3364 = vmax.xlane.f32.xlu0 %v3363_v26  ;;  %v17325_v15 = vld [vmem:[#allocation42_spill] sm:$0xff]  ;;  %vm17329_vm11 = vmmov %vm17309_vm2 }
 0x784   :  { %vm17326_vm15 = vnez %v17325_v15  ;;  %vm17332_vm4 = vmmov %vm17327_vm3 }
 0x785   :  { %v3323_v26 = vsel %vm17326_vm15, %v12209_v16, -3e+38  ;;  %vm17337_vm7 = vmmov %vm17332_vm4 }
 0x786   :  { %v3477_v62 = vsel %vm17309_vm2, %v3323_v26, -inf  ;;  %vm17346_vm6 = vmmov %vm17337_vm7 }
 0x787   :  { %3424 = vmax.xlane.f32.xlu1 %v3423_v49  ;;  %3367 = vmax.xlane.f32.xlu0 %v3366_v63  ;;  %v3387_v49 = vsel %vm17327_vm3, %v3293_v38, -inf  ;;  %v3324_v63 = vsel %vm17326_vm15, %v12219_v45, -3e+38 }
 0x788   :  { %v3480_v48 = vsel %vm17328_vm9, %v3324_v63, -inf  ;;  %vm17333_vm9 = vmmov %vm17327_vm3 }
 0x78b   :  { %3439 = vmax.xlane.f32.xlu1 %v3438_v20  ;;  %3370 = vmax.xlane.f32.xlu0 %v3369_v31  ;;  %v3390_v20 = vsel %vm17329_vm11, %v3294_v0, -inf  ;;  %v17330_v31 = vld [vmem:[#allocation44_spill] sm:$0xff]  ;;  %vm17334_vm11 = vmmov %vm17327_vm3 }
 0x78c   :  { %vm17331_vm2 = vnez %v17330_v31 }
 0x78d   :  { %v3327_v2 = vsel %vm17331_vm2, %v12209_v16, -3e+38  ;;  %v3328_v59 = vsel %vm17331_vm2, %v12219_v45, -3e+38  ;;  %v3329_v56 = vsel %vm17331_vm2, %v12225_v27, -3e+38 }
 0x78f   :  { %3451 = vmax.xlane.f32.xlu1 %v3450_v42  ;;  %3373 = vmax.xlane.f32.xlu0 %v3372_v47  ;;  %v3489_v42 = vsel %vm17327_vm3, %v3327_v2, -inf  ;;  %v3396_v47 = vsel %vm17332_vm4, %v3296_v11, -inf  ;;  %vm17336_vm3 = vnez %v17335_v7  ;;  %v3311_v2 = vsel %vm17308_vm14, %v12209_v16, -3e+38 }
 0x790   :  { %v3331_v36 = vsel %vm17336_vm3, %v12209_v16, -3e+38 }
 0x793   :  { %3445 = vmax.xlane.f32.xlu1 %v3444_v6  ;;  %3376 = vmax.xlane.f32.xlu0 %v3375_v50  ;;  %v3492_v6 = vsel %vm17333_vm9, %v3328_v59, -inf  ;;  %v3405_v50 = vsel %vm17334_vm11, %v3299_v54, -inf  ;;  %vm17338_vm9 = vmmov %vm17332_vm4  ;;  %v3315_v54 = vsel %vm17312_vm0, %v12209_v16, -3e+38 }
 0x794   :  { %vm17339_vm11 = vmmov %vm17332_vm4 }
 0x797   :  { %3463 = vmax.xlane.f32.xlu1 %v3462_v41  ;;  %3379 = vmax.xlane.f32.xlu0 %v3378_v28  ;;  %v3300_v41 = vsel %vm17296_vm12, %v12219_v45, -3e+38  ;;  %v3501_v28 = vsel %vm17332_vm4, %v3331_v36, -inf  ;;  %vm17341_vm4 = vnez %v17340_v43  ;;  %vm17342_vm12 = vmmov %vm17337_vm7 }
 0x798   :  { %v3408_v24 = vsel %vm17337_vm7, %v3300_v41, -inf  ;;  %v3337_v36 = vsel %vm17341_vm4, %v12225_v27, -3e+38  ;;  %v3316_v41 = vsel %vm17312_vm0, %v12219_v45, -3e+38 }
 0x79b   :  { %3448 = vmax.xlane.f32.xlu1 %v3447_v55  ;;  %3382 = vmax.xlane.f32.xlu0 %v3381_v35  ;;  %v3302_v55 = vsel %vm17301_vm1, %v12199_v30, -3e+38  ;;  %v3495_v35 = vsel %vm17338_vm9, %v3329_v56, -inf  ;;  %v3319_v56 = vsel %vm17317_vm5, %v12209_v16, -3e+38 }
 0x79c   :  { %v3414_v58 = vsel %vm17339_vm11, %v3302_v55, -inf  ;;  %vm17345_vm11 = vmmov %vm17337_vm7 }
 0x79f   :  { %3469 = vmax.xlane.f32.xlu1 %v3468_v3  ;;  %3385 = vmax.xlane.f32.xlu0 %v3384_v12  ;;  %v3334_v3 = vsel %vm17341_vm4, %v12199_v30, -3e+38  ;;  %v3304_v12 = vsel %vm17301_vm1, %v12219_v45, -3e+38  ;;  %vm17351_vm1 = vmmov %vm17346_vm6 }
 0x7a0   :  { %v3510_v26 = vsel %vm17337_vm7, %v3334_v3, -inf  ;;  %v3420_v38 = vsel %vm17342_vm12, %v3304_v12, -inf  ;;  %vm17347_vm12 = vmmov %vm17346_vm6  ;;  %v3465_v55 = vsel %vm17351_vm1, %v3319_v56, -inf  ;;  %v3322_v3 = vsel %vm17326_vm15, %v12199_v30, -3e+38 }
 0x7a1   :  { %vm17348_vm7 = vmmov %vm17346_vm6 }
 0x7a3   :  { %3478 = vmax.xlane.f32.xlu1 %v3477_v62  ;;  %3388 = vmax.xlane.f32.xlu0 %v3387_v49  ;;  %v17343_v62 = vld [vmem:[#allocation47_spill] sm:$0xff] }
 0x7a4   :  { %vm17344_vm9 = vnez %v17343_v62 }
 0x7a5   :  { %v3308_v49 = vsel %vm17344_vm9, %v12219_v45, -3e+38  ;;  %v3306_v63 = vsel %vm17344_vm9, %v12199_v30, -3e+38 }
 0x7a6   :  { %v3432_v0 = vsel %vm17345_vm11, %v3308_v49, -inf  ;;  %v3326_v49 = vsel %vm17331_vm2, %v12199_v30, -3e+38 }
 0x7a7   :  { %3481 = vmax.xlane.f32.xlu1 %v3480_v48  ;;  %3391 = vmax.xlane.f32.xlu0 %v3390_v20  ;;  %v3426_v48 = vsel %vm17346_vm6, %v3306_v63, -inf  ;;  %v3336_v20 = vsel %vm17341_vm4, %v12219_v45, -3e+38  ;;  %v3486_v63 = vsel %vm17351_vm1, %v3326_v49, -inf }
 0x7a8   :  { %v3516_v11 = vsel %vm17347_vm12, %v3336_v20, -inf  ;;  %vm17352_vm12 = vmmov %vm17351_vm1  ;;  %v3330_v20 = vsel %vm17336_vm3, %v12199_v30, -3e+38 }
 0x7ab   :  { %3490 = vmax.xlane.f32.xlu1 %v3489_v42  ;;  %3397 = vmax.xlane.f32.xlu0 %v3396_v47  ;;  %v3441_v42 = vsel %vm17348_vm7, %v3311_v2, -inf  ;;  %v17349_v47 = vld [vmem:[#allocation49_spill] sm:$0xff]  ;;  %vm17353_vm7 = vmmov %vm17351_vm1 }
 0x7ac   :  { %vm17350_vm11 = vnez %v17349_v47 }
 0x7ad   :  { %v3339_v59 = vsel %vm17350_vm11, %v12209_v16, -3e+38 }
 0x7af   :  { %3493 = vmax.xlane.f32.xlu1 %v3492_v6  ;;  %3406 = vmax.xlane.f32.xlu0 %v3405_v50  ;;  %v3525_v6 = vsel %vm17346_vm6, %v3339_v59, -inf  ;;  %v3453_v50 = vsel %vm17351_vm1, %v3315_v54, -inf  ;;  %vm17354_vm6 = vmmov %vm17351_vm1  ;;  %v3335_v54 = vsel %vm17341_vm4, %v12209_v16, -3e+38 }
 0x7b3   :  { %3502 = vmax.xlane.f32.xlu1 %v3501_v28  ;;  %3409 = vmax.xlane.f32.xlu0 %v3408_v24  ;;  %v3519_v28 = vsel %vm17352_vm12, %v3337_v36, -inf  ;;  %v3456_v24 = vsel %vm17353_vm7, %v3316_v41, -inf  ;;  %vm17355_vm12 = vmmov %vm17351_vm1  ;;  %v3338_v41 = vsel %vm17350_vm11, %v12199_v30, -3e+38 }
 0x7b4   :  { %v3474_v12 = vsel %vm17355_vm12, %v3322_v3, -inf  ;;  %vm17356_vm7 = vmmov %vm17351_vm1 }
 0x7b5   :  { %vm17358_vm12 = vmmov %vm17351_vm1 }
 0x7b6   :  { %v3498_v2 = vsel %vm17358_vm12, %v3330_v20, -inf  ;;  %vm17361_vm12 = vmmov %vm17351_vm1 }
 0x7b7   :  { %3496 = vmax.xlane.f32.xlu1 %v3495_v35  ;;  %3415 = vmax.xlane.f32.xlu0 %v3414_v58  ;;  %v3317_v35 = vsel %vm17312_vm0, %v12225_v27, -3e+38 }
 0x7b8   :  { %v3459_v58 = vsel %vm17354_vm6, %v3317_v35, -inf  ;;  %vm17357_vm6 = vmmov %vm17351_vm1 }
 0x7bb   :  { %3511 = vmax.xlane.f32.xlu1 %v3510_v26  ;;  %3421 = vmax.xlane.f32.xlu0 %v3420_v38  ;;  %v3321_v26 = vsel %vm17317_vm5, %v12225_v27, -3e+38 }
 0x7bc   :  { %v3471_v38 = vsel %vm17356_vm7, %v3321_v26, -inf  ;;  %vm17359_vm7 = vmmov %vm17351_vm1 }
 0x7bf   :  { %3433 = vmax.xlane.f32.xlu1 %v3432_v0  ;;  %3427 = vmax.xlane.f32.xlu0 %v3426_v48  ;;  %v3325_v0 = vsel %vm17326_vm15, %v12225_v27, -3e+38 }
 0x7c0   :  { %v3483_v48 = vsel %vm17357_vm6, %v3325_v0, -inf  ;;  %vm17360_vm6 = vmmov %vm17351_vm1 }
 0x7c3   :  { %3517 = vmax.xlane.f32.xlu1 %v3516_v11  ;;  %3442 = vmax.xlane.f32.xlu0 %v3441_v42  ;;  %v3332_v42 = vsel %vm17336_vm3, %v12219_v45, -3e+38 }
 0x7c4   :  { %v3504_v59 = vsel %vm17351_vm1, %v3332_v42, -inf }
 0x7c7   :  { %3526 = vmax.xlane.f32.xlu1 %v3525_v6  ;;  %3454 = vmax.xlane.f32.xlu0 %v3453_v50  ;;  %v3513_v6 = vsel %vm17360_vm6, %v3335_v54, -inf  ;;  %v3333_v50 = vsel %vm17336_vm3, %v12225_v27, -3e+38  ;;  %vm17363_vm6 = vmmov %vm17351_vm1 }
 0x7c8   :  { %v3507_v36 = vsel %vm17361_vm12, %v3333_v50, -inf  ;;  %vm17364_vm12 = vmmov %vm17351_vm1 }
 0x7cb   :  { %3520 = vmax.xlane.f32.xlu1 %v3519_v28  ;;  %3457 = vmax.xlane.f32.xlu0 %v3456_v24 }
 0x7cf   :  { %3466 = vmax.xlane.f32.xlu0 %v3465_v55  ;;  %v3341_v55 = vsel %vm17350_vm11, %v12225_v27, -3e+38 }
 0x7d3   :  { %3460 = vmax.xlane.f32.xlu0 %v3459_v58  ;;  %v3531_v58 = vsel %vm17363_vm6, %v3341_v55, -inf }
 0x7d7   :  { %3475 = vmax.xlane.f32.xlu0 %v3474_v12 }
 0x7db   :  { %3472 = vmax.xlane.f32.xlu0 %v3471_v38 }
 0x7dc   :  { %4258 = vrot.lane.b32.xlu1 %v12189_v8, %s9859_s28  ;;  %v3307_v8 = vsel %vm17344_vm9, %v12209_v16, -3e+38  ;;  %v3309_v16 = vsel %vm17344_vm9, %v12225_v27, -3e+38 }
 0x7dd   :  { %v3429_v11 = vsel %vm17359_vm7, %v3307_v8, -inf  ;;  %vm17362_vm7 = vmmov %vm17351_vm1  ;;  %v3435_v35 = vsel %vm17351_vm1, %v3309_v16, -inf  ;;  %vm17366_vm1 = vcmask 195712  }
 0x7de   :  { %v3522_v24 = vsel %vm17362_vm7, %v3338_v41, -inf  ;;  %vm17365_vm7 = vcmask 130112  }
 0x7df   :  { %3487 = vmax.xlane.f32.xlu0 %v3486_v63  ;;  %vm17367_vm6 = vmmov %vm17365_vm7 }
 0x7e3   :  { %3484 = vmax.xlane.f32.xlu0 %v3483_v48 }
 0x7e7   :  { %3499 = vmax.xlane.f32.xlu0 %v3498_v2 }
 0x7eb   :  { %3430 = vmax.xlane.f32.xlu0 %v3429_v11 }
 0x7ef   :  { %3505 = vmax.xlane.f32.xlu0 %v3504_v59 }
 0x7f3   :  { %3514 = vmax.xlane.f32.xlu0 %v3513_v6 }
 0x7f7   :  { %3508 = vmax.xlane.f32.xlu0 %v3507_v36 }
 0x7f8   :  { %v3344_v28 = vpop.xlane.xlu0 %3343  ;;  %v3356_v12 = vpop.xlane.xlu1 %3355 }
 0x7f9   :  { %v3538_v55 = vmax.f32 %v3356_v12, -3e+38 }
 0x7fb   :  { %3523 = vmax.xlane.f32.xlu0 %v3522_v24  ;;  %v3534_v24 = vmax.f32 %v3344_v28, -3e+38  ;;  %v3684_v28 = vrot.slane %v3538_v55, %v10004_v17 }
 0x7fc   :  { %v3347_v56 = vpop.xlane.xlu0 %3346  ;;  %v3395_v38 = vpop.xlane.xlu1 %3394 }
 0x7fd   :  { %v3665_v13 = vrot.slane %v3534_v24, %v10004_v17 }
 0x7ff   :  { %3436 = vmax.xlane.f32.xlu0 %v3435_v35  ;;  %v3551_v35 = vmax.f32 %v3395_v38, -3e+38 }
 0x800   :  { %v3350_v3 = vpop.xlane.xlu0 %3349  ;;  %3532 = vmax.xlane.f32.xlu1 %v3531_v58  ;;  %v3340_v58 = vsel %vm17350_vm11, %v12219_v45, -3e+38 }
 0x801   :  { %v3536_v16 = vmax.f32 %v3350_v3, -3e+38  ;;  %v3745_v3 = vrot.slane %v3551_v35, %v10006_v21 }
 0x803   :  { %v3674_v7 = vrot.slane %v3536_v16, %v10008_v22 }
 0x804   :  { %v3353_v30 = vpop.xlane.xlu0 %3352  ;;  %v12461_v63 = vpop.xlane.xlu1 %3400 }
 0x805   :  { %v3537_v12 = vmax.f32 %v3353_v30, -3e+38  ;;  %v3553_v30 = vmax.f32 %v12461_v63, -3e+38 }
 0x808   :  { %v3359_v26 = vpop.xlane.xlu0 %3358  ;;  %v12465_v27 = vpop.xlane.xlu1 %3403 }
 0x809   :  { %v3539_v25 = vmax.f32 %v3359_v26, -3e+38 }
 0x80b   :  { %v3688_v31 = vrot.slane %v3539_v25, %v10006_v21  ;;  %v3679_v25 = vrot.slane %v3537_v12, %v10010_v23 }
 0x80c   :  { %v3362_v49 = vpop.xlane.xlu0 %3361  ;;  %v12469_v2 = vpop.xlane.xlu1 %3412 }
 0x80d   :  { %v3540_v38 = vmax.f32 %v3362_v49, -3e+38 }
 0x80f   :  { %v3693_v49 = vrot.slane %v3540_v38, %v10008_v22 }
 0x810   :  { %v3365_v0 = vpop.xlane.xlu0 %3364  ;;  %v12471_v42 = vpop.xlane.xlu1 %3418 }
 0x811   :  { %v3541_v47 = vmax.f32 %v3365_v0, -3e+38 }
 0x813   :  { %v3698_v0 = vrot.slane %v3541_v47, %v10010_v23 }
 0x814   :  { %v3368_v48 = vpop.xlane.xlu0 %3367  ;;  %v12473_v54 = vpop.xlane.xlu1 %3424 }
 0x815   :  { %4256 = vrot.lane.b32.xlu0 %v12191_v19, %s9859_s28  ;;  %v3535_v19 = vmax.f32 %v3347_v56, -3e+38  ;;  %v3528_v56 = vsel %vm17364_vm12, %v3340_v58, -inf  ;;  %v3542_v15 = vmax.f32 %v3368_v48, -3e+38  ;;  %vm17368_vm12 = vmmov %vm17366_vm1 }
 0x816   :  { %vm17372_vm11 = vmmov %vm17368_vm12  ;;  %v3561_v4 = vmax.f32 %v12473_v54, -3e+38 }
 0x817   :  { %v3669_v5 = vrot.slane %v3535_v19, %v10006_v21  ;;  %vm17374_vm9 = vmmov %vm17372_vm11 }
 0x818   :  { %v3371_v20 = vpop.xlane.xlu0 %3370  ;;  %v12475_v36 = vpop.xlane.xlu1 %3439 }
 0x819   :  { %4251 = vrot.lane.b32.xlu0 %v12195_v14, %s9860_s9  ;;  %v3670_v45 = vsel %vm17365_vm7, %v3669_v5, %v3665_v13  ;;  %v3543_v19 = vmax.f32 %v3371_v20, -3e+38  ;;  %vm17369_vm7 = vcmask 261312  }
 0x81a   :  { %v3675_v16 = vsel %vm17366_vm1, %v3674_v7, %v3670_v45  ;;  %v3689_v7 = vsel %vm17367_vm6, %v3688_v31, %v3684_v28  ;;  %vm17370_vm1 = vmmov %vm17367_vm6 }
 0x81b   :  { %v3707_v48 = vrot.slane %v3543_v19, %v10006_v21  ;;  %v3694_v35 = vsel %vm17368_vm12, %v3693_v49, %v3689_v7  ;;  %vm17371_vm6 = vmmov %vm17370_vm1 }
 0x81c   :  { %v3374_v8 = vpop.xlane.xlu0 %3373  ;;  %v12481_v43 = vpop.xlane.xlu1 %3451  ;;  %vm17373_vm4 = vmmov %vm17370_vm1 }
 0x81d   :  { %v3544_v1 = vmax.f32 %v3374_v8, -3e+38  ;;  %vm17375_vm12 = vmmov %vm17369_vm7 }
 0x820   :  { %v3377_v11 = vpop.xlane.xlu0 %3376  ;;  %v12493_v5 = vpop.xlane.xlu1 %3445 }
 0x821   :  { %v3545_v58 = vmax.f32 %v3377_v11, -3e+38 }
 0x824   :  { %v3380_v59 = vpop.xlane.xlu0 %3379  ;;  %v12515_v38 = vpop.xlane.xlu1 %3463 }
 0x825   :  { %v3546_v13 = vmax.f32 %v3380_v59, -3e+38  ;;  %v3703_v59 = vrot.slane %v3542_v15, %v10004_v17 }
 0x827   :  { %v3722_v31 = vrot.slane %v3546_v13, %v10004_v17  ;;  %v3708_v28 = vsel %vm17370_vm1, %v3707_v48, %v3703_v59  ;;  %vm17377_vm1 = vmmov %vm17375_vm12 }
 0x828   :  { %v3383_v6 = vpop.xlane.xlu0 %3382 }
 0x829   :  { %v3547_v24 = vmax.f32 %v3383_v6, -3e+38  ;;  %v3717_v6 = vrot.slane %v3545_v58, %v10010_v23 }
 0x82b   :  { %v3726_v63 = vrot.slane %v3547_v24, %v10006_v21  ;;  %v3755_v24 = vrot.slane %v3553_v30, %v10010_v23 }
 0x82c   :  { %v3386_v50 = vpop.xlane.xlu0 %3385 }
 0x82d   :  { %v3548_v55 = vmax.f32 %v3386_v50, -3e+38 }
 0x82f   :  { %v3731_v50 = vrot.slane %v3548_v55, %v10008_v22 }
 0x830   :  { %v3389_v41 = vpop.xlane.xlu0 %3388 }
 0x834   :  { %v3392_v62 = vpop.xlane.xlu0 %3391 }
 0x835   :  { %v3550_v26 = vmax.f32 %v3392_v62, -3e+38  ;;  %v3549_v62 = vmax.f32 %v3389_v41, -3e+38  ;;  %v3554_v41 = vmax.f32 %v12465_v27, -3e+38  ;;  %v3727_v27 = vsel %vm17373_vm4, %v3726_v63, %v3722_v31  ;;  %vm17380_vm4 = vmmov %vm17377_vm1 }
 0x837   :  { %v3741_v20 = vrot.slane %v3550_v26, %v10004_v17  ;;  %v3760_v49 = vrot.slane %v3554_v41, %v10004_v17  ;;  %v4083_v41 = vld [vmem:[#allocation5 + $0x20] sm:$0xff] }
 0x838   :  { %v3398_v9 = vpop.xlane.xlu0 %3397  ;;  %3529 = vmax.xlane.f32.xlu0 %v3528_v56  ;;  %v3557_v56 = vmax.f32 %v12469_v2, -3e+38 }
 0x839   :  { %v3552_v32 = vmax.f32 %v3398_v9, -3e+38  ;;  %v3712_v9 = vrot.slane %v3544_v1, %v10008_v22  ;;  %v3736_v1 = vrot.slane %v3549_v62, %v10010_v23  ;;  %v3746_v15 = vsel %vm17371_vm6, %v3745_v3, %v3741_v20 }
 0x83a   :  { %v3680_v3 = vsel %vm17377_vm1, %v3679_v25, %v3675_v16  ;;  %vm17379_vm6 = vcmask 1041409   ;;  %v3774_v20 = vrot.slane %v3557_v56, %v10010_v23  ;;  %v12534_v25 = vpop.xlane.xlu1 %3448  ;;  %v4086_v56 = vld [vmem:[#allocation5 + $0x38] sm:$0xff] }
 0x83b   :  { %v3750_v8 = vrot.slane %v3552_v32, %v10008_v22  ;;  %v3699_v32 = vsel %vm17369_vm7, %v3698_v0, %v3694_v35  ;;  %v3713_v12 = vsel %vm17372_vm11, %v3712_v9, %v3708_v28  ;;  %vm17376_vm7 = vmmov %vm17374_vm9  ;;  %v4084_v35 = vld [vmem:[#allocation5 + $0x28] sm:$0xff] }
 0x83c   :  { %v3407_v11 = vpop.xlane.xlu0 %3406  ;;  %v3718_v2 = vsel %vm17375_vm12, %v3717_v6, %v3713_v12  ;;  %v3732_v58 = vsel %vm17376_vm7, %v3731_v50, %v3727_v27  ;;  %vm17378_vm11 = vmmov %vm17377_vm1  ;;  %v3966_v62 = vsel %vm17379_vm6, %v3699_v32, %v3680_v3  ;;  %vm17382_vm12 = vcmask 130112  }
 0x83d   :  { %v3555_v47 = vmax.f32 %v3407_v11, -3e+38  ;;  %v3751_v45 = vsel %vm17374_vm9, %v3750_v8, %v3746_v15  ;;  %v3737_v13 = vsel %vm17378_vm11, %v3736_v1, %v3732_v58  ;;  %vm17381_vm9 = vcmask 1042434   ;;  %vm17386_vm6 = vmmov %vm17380_vm4  ;;  %v4085_v1 = vld [vmem:[#allocation5 + $0x30] sm:$0xff] }
 0x83e   :  { %v3756_v0 = vsel %vm17380_vm4, %v3755_v24, %v3751_v45  ;;  %v3967_v30 = vsel %vm17381_vm9, %v3718_v2, %v3966_v62  ;;  %vm17383_vm7 = vcmask 1043459   ;;  %vm17384_vm1 = vcmask 195712   ;;  %v12541_v50 = vpop.xlane.xlu1 %3469  ;;  %vm17388_vm9 = vmmov %vm17382_vm12 }
 0x83f   :  { %v3764_v19 = vrot.slane %v3555_v47, %v10006_v21  ;;  %v3968_v63 = vsel %vm17383_vm7, %v3737_v13, %v3967_v30  ;;  %vm17385_vm11 = vcmask 1044484   ;;  %vm17387_vm4 = vcmask 1045509   ;;  %vm17390_vm7 = vmmov %vm17388_vm9 }
 0x840   :  { %v3410_v26 = vpop.xlane.xlu0 %3409  ;;  %v3969_v8 = vsel %vm17385_vm11, %v3756_v0, %v3968_v63  ;;  %v9694_v31 = vpack.c.bf16 %v4084_v35, %v4083_v41  ;;  %v9698_v32 = vpack.c.bf16 %v4086_v56, %v4085_v1  ;;  %v3559_v41 = vmax.f32 %v12471_v42, -3e+38 }
 0x841   :  { %v3556_v55 = vmax.f32 %v3410_v26, -3e+38  ;;  %v3765_v7 = vsel %vm17382_vm12, %v3764_v19, %v3760_v49  ;;  %vm17389_vm12 = vmmov %vm17384_vm1 }
 0x842   :  { %9695 = vmatprep.subr.bf16.mxu1 %v9694_v31  ;;  %v12545_v15 = vpop.xlane.xlu1 %3478  ;;  %v3783_v53 = vrot.slane %v3559_v41, %v10006_v21  ;;  %vm17392_vm11 = vmmov %vm17389_vm12 }
 0x843   :  { %v3769_v48 = vrot.slane %v3556_v55, %v10008_v22  ;;  %9697 = vmatpush3.bf16.msra.mxu1 %v9694_v31 }
 0x844   :  { %v3416_v9 = vpop.xlane.xlu0 %3415  ;;  %9699 = vmatprep.subr.bf16.mxu1 %v9698_v32 }
 0x845   :  { %v3770_v16 = vsel %vm17384_vm1, %v3769_v48, %v3765_v7  ;;  %vm17391_vm1 = vmmov %vm17386_vm6 }
 0x846   :  { %v3775_v11 = vsel %vm17386_vm6, %v3774_v20, %v3770_v16  ;;  %v12550_v27 = vpop.xlane.xlu1 %3481  ;;  %v3558_v16 = vmax.f32 %v3416_v9, -3e+38  ;;  %vm17393_vm6 = vmmov %vm17391_vm1 }
 0x847   :  { %v12539_v59 = vsel %vm17387_vm4, %v3775_v11, %v3969_v8  ;;  %9701 = vmatpush3.bf16.msra.mxu1 %v9698_v32  ;;  %vm17394_vm4 = vcmask 1046534  }
 0x848   :  { %v3422_v6 = vpop.xlane.xlu0 %3421  ;;  %9592 = vmatprep.subr.bf16.mxu1 %v17180_v40  ;;  %v3779_v1 = vrot.slane %v3558_v16, %v10004_v17 }
 0x849   :  { %v3560_v11 = vmax.f32 %v3422_v6, -3e+38 }
 0x84a   :  { %v12556_v26 = vpop.xlane.xlu1 %3490  ;;  %v3784_v42 = vsel %vm17388_vm9, %v3783_v53, %v3779_v1  ;;  %vm17395_vm9 = vcmask 1047559  }
 0x84b   :  { %v3788_v56 = vrot.slane %v3560_v11, %v10008_v22  ;;  %v3793_v11 = vrot.slane %v3561_v4, %v10010_v23 }
 0x84c   :  { %v3428_v47 = vpop.xlane.xlu0 %3427 }
 0x84d   :  { %v3562_v32 = vmax.f32 %v3428_v47, -3e+38 }
 0x84e   :  { %v12560_v2 = vpop.xlane.xlu1 %3493 }
 0x84f   :  { %v3798_v16 = vrot.slane %v3562_v32, %v10004_v17 }
 0x850   :  { %v12543_v28 = vpop.xlane.xlu0 %3442 }
 0x852   :  { %v12566_v3 = vpop.xlane.xlu1 %3502 }
 0x854   :  { %v12547_v12 = vpop.xlane.xlu0 %3454 }
 0x856   :  { %v12570_v13 = vpop.xlane.xlu1 %3496 }
 0x858   :  { %v12552_v45 = vpop.xlane.xlu0 %3457 }
 0x85a   :  { %v12576_v48 = vpop.xlane.xlu1 %3511 }
 0x85c   :  { %v12554_v19 = vpop.xlane.xlu0 %3466 }
 0x85e   :  { %v3434_v30 = vpop.xlane.xlu1 %3433 }
 0x85f   :  { %v3564_v29 = vmax.f32 %v3434_v30, -3e+38 }
 0x860   :  { %v12558_v24 = vpop.xlane.xlu0 %3460 }
 0x861   :  { %v3807_v10 = vrot.slane %v3564_v29, %v10008_v22 }
 0x862   :  { %v12582_v8 = vpop.xlane.xlu1 %3517 }
 0x864   :  { %v12562_v58 = vpop.xlane.xlu0 %3475 }
 0x866   :  { %v12591_v51 = vpop.xlane.xlu1 %3526 }
 0x868   :  { %v12564_v55 = vpop.xlane.xlu0 %3472 }
 0x86a   :  { %v12603_v46 = vpop.xlane.xlu1 %3520 }
 0x86c   :  { %v12568_v49 = vpop.xlane.xlu0 %3487 }
 0x870   :  { %v12572_v62 = vpop.xlane.xlu0 %3484 }
 0x874   :  { %v12574_v0 = vpop.xlane.xlu0 %3499 }
 0x878   :  { %v3431_v20 = vpop.xlane.xlu0 %3430 }
 0x879   :  { %v3563_v31 = vmax.f32 %v3431_v20, -3e+38  ;;  %v3789_v20 = vsel %vm17389_vm12, %v3788_v56, %v3784_v42  ;;  %vm17396_vm12 = vcmp.eq.s32.totalorder %v11938_v33, 1 }
 0x87a   :  { %v3794_v54 = vsel %vm17391_vm1, %v3793_v11, %v3789_v20  ;;  %v3566_v20 = vmax.f32 %v12475_v36, -3e+38  ;;  %v3567_v11 = vmax.f32 %v12543_v28, -3e+38  ;;  %v3580_v28 = vmax.f32 %v12550_v27, -3e+38 }
 0x87b   :  { %v3802_v6 = vrot.slane %v3563_v31, %v10006_v21  ;;  %v3971_v4 = vsel %vm17394_vm4, %v3794_v54, %v12539_v59  ;;  %v9753_v59 = vld [vmem:[%s16323_s2] sm:$0xff]   ;;  %v3575_v54 = vmax.f32 %v12554_v19, -3e+38  ;;  %v3584_v19 = vmax.f32 %v12560_v2, -3e+38 }
 0x87c   :  { %v12578_v7 = vpop.xlane.xlu0 %3505  ;;  %v3577_v2 = vmax.f32 %v12564_v55, -3e+38 }
 0x87d   :  { %v3803_v41 = vsel %vm17390_vm7, %v3802_v6, %v3798_v16  ;;  %v4259_v6 = vpop.permute.xlu1 %4258  ;;  %vm17398_vm7 = vcmask 261120   ;;  %v3568_v16 = vmax.f32 %v12493_v5, -3e+38  ;;  %v3579_v5 = vmax.f32 %v12545_v15, -3e+38 }
 0x87e   :  { %v3808_v53 = vsel %vm17392_vm11, %v3807_v10, %v3803_v41  ;;  %vm17399_vm1 = vmmov %vm17398_vm7  ;;  %v3569_v41 = vmax.f32 %v12534_v25, -3e+38  ;;  %v3571_v25 = vmax.f32 %v12547_v12, -3e+38  ;;  %v3859_v15 = vrot.slane %v3575_v54, %v10006_v21 }
 0x87f   :  { %v3826_v36 = vrot.slane %v3568_v16, %v10008_v22  ;;  %v3878_v12 = vrot.slane %v3579_v5, %v10006_v21  ;;  %vm17400_vm11 = vcmask 130112   ;;  %v3586_v16 = vmax.f32 %v12574_v0, -3e+38 }
 0x880   :  { %v12580_v63 = vpop.xlane.xlu0 %3514  ;;  %v3590_v5 = vmax.f32 %v12576_v48, -3e+38 }
 0x884   :  { %v12585_v35 = vpop.xlane.xlu0 %3508 }
 0x888   :  { %v12593_v9 = vpop.xlane.xlu0 %3523 }
 0x88c   :  { %v3437_v47 = vpop.xlane.xlu0 %3436 }
 0x88d   :  { %v3565_v60 = vmax.f32 %v3437_v47, -3e+38  ;;  %v3817_v47 = vrot.slane %v3566_v20, %v10004_v17 }
 0x88f   :  { %v3812_v31 = vrot.slane %v3565_v60, %v10010_v23 }
 0x890   :  { %v4257_v30 = vpop.permute.xlu0 %4256 }
 0x891   :  { %v3813_v1 = vsel %vm17393_vm6, %v3812_v31, %v3808_v53  ;;  %4262 = vxpose.xlu0.b32.start [1/2] (short) (narrow) %v4257_v30, 32  ;;  %v3578_v31 = vmax.f32 %v12562_v58, -3e+38  ;;  %v3583_v30 = vmax.f32 %v12556_v26, -3e+38  ;;  %vm17401_vm6 = vmmov %vm17400_vm11 }
 0x892   :  { %v3972_v56 = vsel %vm17395_vm9, %v3813_v1, %v3971_v4  ;;  %v3587_v58 = vmax.f32 %v12566_v3, -3e+38  ;;  %v3821_v1 = vrot.slane %v3567_v11, %v10006_v21  ;;  %v3572_v4 = vmax.f32 %v12552_v45, -3e+38  ;;  %vm17402_vm4 = vmmov %vm17401_vm6 }
 0x893   :  { %v3982_v32 = vsel %vm17396_vm12, %v3972_v56, 0.0  ;;  %v3573_v56 = vmax.f32 %v12558_v24, -3e+38  ;;  %v3874_v27 = vrot.slane %v3578_v31, %v10004_v17  ;;  %v3582_v3 = vmax.f32 %v12568_v49, -3e+38  ;;  %vm17403_vm9 = vmmov %vm17402_vm4 }
 0x894   :  { %v4252_v29 = vpop.permute.xlu0 %4251  ;;  %v4063_v42 = vadd.f32 %v12185_v52, %v3982_v32  ;;  %v3570_v52 = vmax.f32 %v12481_v43, -3e+38  ;;  %v3576_v43 = vmax.f32 %v12541_v50, -3e+38  ;;  %v3831_v50 = vrot.slane %v3569_v41, %v10010_v23 }
 0x895   :  { %4263 = vxpose.xlu0.b32.end [2/2] (short) (narrow) %v4259_v6, 32  ;;  %9587 = vmatpush3.bf16.msra.mxu0 %v4252_v29  ;;  %v3883_v32 = vrot.slane %v3580_v28, %v10008_v22  ;;  %v3897_v45 = vrot.slane %v3583_v30, %v10006_v21  ;;  %v3840_v6 = vrot.slane %v3571_v25, %v10006_v21  ;;  %v3581_v29 = vmax.f32 %v12572_v62, -3e+38 }
 0x896   :  { %v12615_v10 = vadd.f32 %v4063_v42, %v11953_v18  ;;  %v3574_v18 = vmax.f32 %v12515_v38, -3e+38  ;;  %v3836_v53 = vrot.slane %v3570_v52, %v10004_v17  ;;  %v3864_v26 = vrot.slane %v3576_v43, %v10008_v22 }
 0x897   :  { %v3902_v24 = vrot.slane %v3584_v19, %v10008_v22  ;;  %v3916_v42 = vrot.slane %v3587_v58, %v10006_v21  ;;  %v3845_v20 = vrot.slane %v3572_v4, %v10008_v22  ;;  %v3850_v49 = vrot.slane %v3573_v56, %v10010_v23  ;;  %v3533_v56 = vpop.xlane.xlu1 %3532 }
 0x898   :  { %17397 = vst [vmem:[#allocation57_spill] sm:$0xff] %v12615_v10  ;;  %v16569_v60 = vmax.f32 %v12615_v10, 0.0  ;;  %9589 = vmatmul.mubr.msk.bf16.vlgmr.msra.gmra.mrb[16].mxu0 %vm17398_vm7, %v9753_v59  ;;  %v3855_v38 = vrot.slane %v3574_v18, %v10004_v17  ;;  %v3822_v59 = vsel %vm17400_vm11, %v3821_v1, %v3817_v47  ;;  %v3879_v52 = vsel %vm17402_vm4, %v3878_v12, %v3874_v27 }
 0x899   :  { %v3869_v18 = vrot.slane %v3577_v2, %v10010_v23  ;;  %v3893_v62 = vrot.slane %v3582_v3, %v10004_v17  ;;  %v3588_v11 = vmax.f32 %v12578_v7, -3e+38  ;;  %v3591_v41 = vmax.f32 %v12580_v63, -3e+38 }
 0x89a   :  { %9581 = vmatprep.mubr.msk.f32.mxu1 %vm17399_vm1, %v16569_v60  ;;  %v3860_v55 = vsel %vm17401_vm6, %v3859_v15, %v3855_v38  ;;  %v3585_v47 = vmax.f32 %v12570_v13, -3e+38  ;;  %v3841_v54 = vsel %vm17403_vm9, %v3840_v6, %v3836_v53  ;;  %v3888_v31 = vrot.slane %v3581_v29, %v10010_v23 }
 0x89b   :  { %v3589_v43 = vmax.f32 %v12585_v35, -3e+38  ;;  %vm17404_vm12 = vcmask 195712   ;;  %v3592_v38 = vmax.f32 %v12582_v8, -3e+38  ;;  %vm17406_vm1 = vcmask 261312  }
 0x89c   :  { %v3827_v0 = vsel %vm17404_vm12, %v3826_v36, %v3822_v59  ;;  %vm17405_vm7 = vmmov %vm17404_vm12  ;;  %v3912_v53 = vrot.slane %v3586_v16, %v10004_v17  ;;  %v3898_v35 = vsel %vm17403_vm9, %v3897_v45, %v3893_v62  ;;  %v3921_v48 = vrot.slane %v3588_v11, %v10008_v22 }
 0x89d   :  { %v3846_v28 = vsel %vm17405_vm7, %v3845_v20, %v3841_v54  ;;  %vm17407_vm11 = vmmov %vm17405_vm7  ;;  %v3935_v36 = vrot.slane %v3591_v41, %v10006_v21  ;;  %v3926_v19 = vrot.slane %v3589_v43, %v10010_v23  ;;  %v3594_v58 = vmax.f32 %v12593_v9, -3e+38 }
 0x89e   :  { %v3851_v7 = vsel %vm17406_vm1, %v3850_v49, %v3846_v28  ;;  %v3865_v63 = vsel %vm17407_vm11, %v3864_v26, %v3860_v55  ;;  %vm17408_vm6 = vmmov %vm17405_vm7  ;;  %v3907_v1 = vrot.slane %v3585_v47, %v10010_v23  ;;  %v3931_v4 = vrot.slane %v3590_v5, %v10004_v17 }
 0x89f   :  { %v3884_v13 = vsel %vm17408_vm6, %v3883_v32, %v3879_v52  ;;  %vm17409_vm4 = vmmov %vm17406_vm1  ;;  %vm17412_vm7 = vcmask 1041409   ;;  %v3595_v27 = vmax.f32 %v12591_v51, -3e+38  ;;  %v3593_v2 = vmax.f32 %v12603_v46, -3e+38 }
 0x8a0   :  { %v3870_v30 = vsel %vm17409_vm4, %v3869_v18, %v3865_v63  ;;  %vm17410_vm12 = vmmov %vm17406_vm1  ;;  %v3940_v45 = vrot.slane %v3592_v38, %v10008_v22  ;;  %v3950_v51 = vrot.slane %v3594_v58, %v10004_v17  ;;  %v3597_v29 = vmax.f32 %v3533_v56, -3e+38 }
 0x8a1   :  { %v3832_v8 = vsel %vm17410_vm12, %v3831_v50, %v3827_v0  ;;  %vm17411_vm3 = vmmov %vm17406_vm1  ;;  %vm17413_vm1 = vcmask 1042434   ;;  %v3945_v49 = vrot.slane %v3593_v2, %v10010_v23 }
 0x8a2   :  { %v3889_v25 = vsel %vm17411_vm3, %v3888_v31, %v3884_v13  ;;  %v3973_v15 = vsel %vm17412_vm7, %v3851_v7, %v3832_v8  ;;  %vm17414_vm11 = vmmov %vm17408_vm6  ;;  %vm17416_vm3 = vcmask 1043459   ;;  %v3964_v62 = vrot.slane %v3597_v29, %v10010_v23 }
 0x8a3   :  { %v3974_v26 = vsel %vm17413_vm1, %v3870_v30, %v3973_v15  ;;  %v3903_v12 = vsel %vm17414_vm11, %v3902_v24, %v3898_v35  ;;  %vm17415_vm6 = vmmov %vm17403_vm9  ;;  %v17435_v30 = vld [vmem:[#allocation21_spill] sm:$0xff] }
 0x8a4   :  { %v3917_v50 = vsel %vm17415_vm6, %v3916_v42, %v3912_v53  ;;  %v3975_v3 = vsel %vm17416_vm3, %v3889_v25, %v3974_v26  ;;  %vm17417_vm4 = vmmov %vm17414_vm11  ;;  %v3954_v42 = vrot.slane %v3595_v27, %v10006_v21  ;;  %vm17421_vm11 = vcmask 1044484   ;;  %v17446_v27 = vld [vmem:[#allocation22_spill] sm:$0xff] }
 0x8a5   :  { %v3922_v9 = vsel %vm17417_vm4, %v3921_v48, %v3917_v50  ;;  %vm17418_vm9 = vmmov %vm17415_vm6  ;;  %vm17422_vm6 = vcmask 1045509   ;;  %v17437_v48 = vld [vmem:[#allocation23_spill] sm:$0xff] }
 0x8a6   :  { %v3936_v32 = vsel %vm17418_vm9, %v3935_v36, %v3931_v4  ;;  %v3927_v6 = vsel %vm17410_vm12, %v3926_v19, %v3922_v9  ;;  %vm17419_vm7 = vmmov %vm17410_vm12  ;;  %vm17426_vm12 = vcmask 1046534   ;;  %v17441_v19 = vld [vmem:[#allocation20_spill] sm:$0xff]  ;;  %v17444_v4 = vld [vmem:[#allocation25_spill] sm:$0xff] }
 0x8a7   :  { %v3908_v24 = vsel %vm17419_vm7, %v3907_v1, %v3903_v12  ;;  %vm17420_vm1 = vmmov %vm17417_vm4  ;;  %v17449_v50 = vld [vmem:[#allocation27_spill] sm:$0xff]  ;;  %v17452_v9 = vld [vmem:[#allocation24_spill] sm:$0xff] }
 0x8a8   :  { %v3941_v46 = vsel %vm17420_vm1, %v3940_v45, %v3936_v32  ;;  %v3976_v55 = vsel %vm17421_vm11, %v3908_v24, %v3975_v3  ;;  %vm17423_vm3 = vmmov %vm17418_vm9  ;;  %vm17429_vm11 = vcmp.eq.s32.totalorder %v11880_v57, 1  ;;  %vm17450_vm2 = vnez %v17449_v50 }
 0x8a9   :  { %v3977_v52 = vsel %vm17422_vm6, %v3927_v6, %v3976_v55  ;;  %v3955_v18 = vsel %vm17423_vm3, %v3954_v42, %v3950_v51  ;;  %vm17424_vm4 = vmmov %vm17419_vm7  ;;  %vm17431_vm6 = vcmask 261120   ;;  %vm17433_vm3 = vcmask 130048   ;;  %v17454_v6 = vld [vmem:[#allocation28_spill] sm:$0xff]  ;;  %v17460_v42 = vld [vmem:[#allocation29_spill] sm:$0xff] }
 0x8aa   :  { %v3946_v11 = vsel %vm17424_vm4, %v3945_v49, %v3941_v46  ;;  %vm17425_vm9 = vmmov %vm17420_vm1  ;;  %vm17428_vm1 = vcmask 1047559   ;;  %vm17455_vm15 = vnez %v17454_v6  ;;  %vm17461_vm0 = vnez %v17460_v42  ;;  %v17463_v49 = vld [vmem:[#allocation16_spill] sm:$0xff] }
 0x8ab   :  { %v3978_v47 = vsel %vm17426_vm12, %v3946_v11, %v3977_v52  ;;  %vm17427_vm7 = vmmov %vm17424_vm4  ;;  %vm17436_vm4 = vnez %v17435_v30 }
 0x8ac   :  { %vm17439_vm12 = vmmov %vm17433_vm3 }
 0x8ad   :  { %vm17456_vm5 = vmmov %vm17433_vm3 }
 0x8ae   :  { %vm17462_vm14 = vmmov %vm17433_vm3 }
 0x8c5   :  { %v3530_v59 = vpop.xlane.xlu0 %3529 }
 0x8c6   :  { %v3596_v20 = vmax.f32 %v3530_v59, -3e+38  ;;  %v17457_v59 = vld [vmem:[#allocation26_spill] sm:$0xff] }
 0x8c8   :  { %v3959_v16 = vrot.slane %v3596_v20, %v10008_v22 }
 0x8ca   :  { %v3960_v41 = vsel %vm17425_vm9, %v3959_v16, %v3955_v18  ;;  %vm17438_vm9 = vnez %v17437_v48  ;;  %v17465_v18 = vld [vmem:[#allocation30_spill] sm:$0xff] }
 0x8cb   :  { %v3965_v54 = vsel %vm17427_vm7, %v3964_v62, %v3960_v41  ;;  %vm17440_vm7 = vmmov %vm17433_vm3  ;;  %v17468_v41 = vld [vmem:[#allocation19_spill] sm:$0xff] }
 0x8cc   :  { %v3979_v31 = vsel %vm17428_vm1, %v3965_v54, %v3978_v47  ;;  %vm17442_vm1 = vnez %v17441_v19 }
 0x8cd   :  { %v3983_v43 = vsel %vm17429_vm11, %v3979_v31, 0.0  ;;  %vm17443_vm11 = vmmov %vm17433_vm3  ;;  %v17471_v31 = vld [vmem:[#allocation31_spill] sm:$0xff] }
 0x8ce   :  { %v4066_v5 = vadd.f32 %v12187_v39, %v3983_v43 }
 0x8d0   :  { %v12722_v0 = vadd.f32 %v4066_v5, %v11899_v61 }
 0x8d2   :  { %17430 = vst [vmem:[#allocation58_spill] sm:$0xff] %v12722_v0  ;;  %v16568_v38 = vmax.f32 %v12722_v0, 0.0 }
 0x8d4   :  { %9582 = vmatmul.mubr.msk.f32.vlgmr.msra.gmra.mrb[12].mxu1 %vm17431_vm6, %v16568_v38  ;;  %vm17445_vm6 = vnez %v17444_v4 }
 0x8d5   :  { %9594 = vmatprep.mubr.msk.bf16.mxu1 %vm17181_vm8, %v17180_v40  ;;  %vm17451_vm8 = vmmov %vm17433_vm3 }
 0x911   :  { %v12730_v28 = vpop.trf.xlu0 }
 0x912   :  { %v4294_v63 = vsel %vm16992_vm10, %v12730_v28, -3e+38  ;;  %v4298_v13 = vsel %vm17073_vm13, %v12730_v28, -3e+38  ;;  %v4302_v58 = vsel %vm17442_vm1, %v12730_v28, -3e+38  ;;  %vm17473_vm1 = vmmov %vm17456_vm5 }
 0x913   :  { %v4358_v39 = vsel %vm17433_vm3, %v4294_v63, -inf  ;;  %v4370_v8 = vsel %vm17439_vm12, %v4298_v13, -inf  ;;  %v4382_v56 = vsel %vm17433_vm3, %v4302_v58, -inf  ;;  %vm17447_vm12 = vnez %v17446_v27 }
 0x914   :  { %4359 = vmax.xlane.f32.xlu1 %v4358_v39  ;;  %v4326_v26 = vsel %vm17447_vm12, %v12730_v28, -3e+38  ;;  %vm17472_vm12 = vnez %v17471_v31  ;;  %v4338_v39 = vsel %vm17436_vm4, %v12730_v28, -3e+38 }
 0x915   :  { %v12739_v53 = vpop.trf.xlu0  ;;  %v4454_v3 = vsel %vm17451_vm8, %v4326_v26, -inf  ;;  %vm17459_vm8 = vmmov %vm17433_vm3 }
 0x916   :  { %v4339_v35 = vsel %vm17436_vm4, %v12739_v53, -3e+38  ;;  %v4315_v36 = vsel %vm17438_vm9, %v12739_v53, -3e+38  ;;  %v4343_v15 = vsel %vm17445_vm6, %v12739_v53, -3e+38 }
 0x917   :  { %v4493_v25 = vsel %vm17440_vm7, %v4339_v35, -inf  ;;  %v4421_v1 = vsel %vm17443_vm11, %v4315_v36, -inf  ;;  %vm17448_vm7 = vmmov %vm17433_vm3  ;;  %v4319_v2 = vsel %vm17450_vm2, %v12739_v53, -3e+38  ;;  %vm17453_vm11 = vnez %v17452_v9 }
 0x918   :  { %4371 = vmax.xlane.f32.xlu1 %v4370_v8  ;;  %4494 = vmax.xlane.f32.xlu0 %v4493_v25  ;;  %v4505_v12 = vsel %vm17448_vm7, %v4343_v15, -inf  ;;  %v4330_v32 = vsel %vm17453_vm11, %v12730_v28, -3e+38  ;;  %v4433_v45 = vsel %vm17433_vm3, %v4319_v2, -inf  ;;  %v4347_v51 = vsel %vm17455_vm15, %v12739_v53, -3e+38 }
 0x919   :  { %v4466_v29 = vsel %vm17456_vm5, %v4330_v32, -inf  ;;  %vm17458_vm7 = vnez %v17457_v59  ;;  %v4517_v20 = vsel %vm17459_vm8, %v4347_v51, -inf  ;;  %v4323_v46 = vsel %vm17461_vm0, %v12739_v53, -3e+38  ;;  %v12797_v63 = vpop.trf.xlu0 }
 0x91a   :  { %v4306_v24 = vsel %vm17458_vm7, %v12730_v28, -3e+38  ;;  %vm17464_vm3 = vnez %v17463_v49  ;;  %v4445_v16 = vsel %vm17456_vm5, %v4323_v46, -inf  ;;  %vm17466_vm11 = vnez %v17465_v18  ;;  %vm17467_vm7 = vmmov %vm17456_vm5 }
 0x91b   :  { %v4394_v55 = vsel %vm17462_vm14, %v4306_v24, -inf  ;;  %v4334_v52 = vsel %vm17464_vm3, %v12730_v28, -3e+38  ;;  %v4351_v62 = vsel %vm17466_vm11, %v12739_v53, -3e+38  ;;  %vm17469_vm8 = vnez %v17468_v41  ;;  %vm17470_vm14 = vmmov %vm17456_vm5 }
 0x91c   :  { %4383 = vmax.xlane.f32.xlu1 %v4382_v56  ;;  %4422 = vmax.xlane.f32.xlu0 %v4421_v1  ;;  %v4478_v11 = vsel %vm17467_vm7, %v4334_v52, -inf  ;;  %v4310_v47 = vsel %vm17469_vm8, %v12730_v28, -3e+38  ;;  %v4529_v54 = vsel %vm17470_vm14, %v4351_v62, -inf  ;;  %v4355_v43 = vsel %vm17472_vm12, %v12739_v53, -3e+38  ;;  %vm17474_vm7 = vmmov %vm17473_vm1 }
 0x91d   :  { %v4406_v5 = vsel %vm17473_vm1, %v4310_v47, -inf  ;;  %v4541_v13 = vsel %vm17474_vm7, %v4355_v43, -inf  ;;  %v4336_v35 = vsel %vm17464_vm3, %v12797_v63, -3e+38  ;;  %vm17475_vm5 = vmmov %vm17473_vm1  ;;  %v4314_v8 = vsel %vm17438_vm9, %v12730_v28, -3e+38 }
 0x91e   :  { %v4490_v36 = vsel %vm17475_vm5, %v4338_v39, -inf  ;;  %v4484_v25 = vsel %vm17473_vm1, %v4336_v35, -inf  ;;  %v4312_v58 = vsel %vm17469_vm8, %v12797_v63, -3e+38  ;;  %vm17476_vm14 = vmmov %vm17473_vm1  ;;  %v4342_v15 = vsel %vm17445_vm6, %v12730_v28, -3e+38 }
 0x91f   :  { %v4418_v1 = vsel %vm17476_vm14, %v4314_v8, -inf  ;;  %vm17477_vm7 = vmmov %vm17473_vm1  ;;  %v4340_v26 = vsel %vm17436_vm4, %v12797_v63, -3e+38  ;;  %v4318_v2 = vsel %vm17450_vm2, %v12730_v28, -3e+38 }
 0x920   :  { %4455 = vmax.xlane.f32.xlu1 %v4454_v3  ;;  %4506 = vmax.xlane.f32.xlu0 %v4505_v12  ;;  %v4412_v56 = vsel %vm17477_vm7, %v4312_v58, -inf  ;;  %vm17478_vm5 = vmmov %vm17473_vm1  ;;  %v4496_v3 = vsel %vm17473_vm1, %v4340_v26, -inf  ;;  %v4316_v32 = vsel %vm17438_vm9, %v12797_v63, -3e+38  ;;  %v4346_v51 = vsel %vm17455_vm15, %v12730_v28, -3e+38 }
 0x921   :  { %v4502_v12 = vsel %vm17478_vm5, %v4342_v15, -inf  ;;  %vm17479_vm14 = vmmov %vm17473_vm1  ;;  %v4344_v24 = vsel %vm17445_vm6, %v12797_v63, -3e+38  ;;  %v4322_v46 = vsel %vm17461_vm0, %v12730_v28, -3e+38 }
 0x922   :  { %vm17480_vm7 = vmmov %vm17473_vm1  ;;  %v4320_v52 = vsel %vm17450_vm2, %v12797_v63, -3e+38  ;;  %v4350_v62 = vsel %vm17466_vm11, %v12730_v28, -3e+38  ;;  %v4348_v47 = vsel %vm17455_vm15, %v12797_v63, -3e+38 }
 0x923   :  { %vm17481_vm5 = vmmov %vm17473_vm1  ;;  %v4354_v43 = vsel %vm17472_vm12, %v12730_v28, -3e+38  ;;  %v4295_v39 = vsel %vm16992_vm10, %v12739_v53, -3e+38  ;;  %v4352_v28 = vsel %vm17466_vm11, %v12797_v63, -3e+38 }
 0x924   :  { %4467 = vmax.xlane.f32.xlu1 %v4466_v29  ;;  %4434 = vmax.xlane.f32.xlu0 %v4433_v45  ;;  %v4430_v45 = vsel %vm17479_vm14, %v4318_v2, -inf  ;;  %v4424_v29 = vsel %vm17480_vm7, %v4316_v32, -inf  ;;  %vm17482_vm14 = vmmov %vm17473_vm1  ;;  %v4299_v58 = vsel %vm17073_vm13, %v12739_v53, -3e+38 }
 0x925   :  { %vm17483_vm7 = vmmov %vm17473_vm1 }
 0x928   :  { %4395 = vmax.xlane.f32.xlu1 %v4394_v55  ;;  %4518 = vmax.xlane.f32.xlu0 %v4517_v20  ;;  %v4514_v20 = vsel %vm17481_vm5, %v4346_v51, -inf  ;;  %v4508_v55 = vsel %vm17473_vm1, %v4344_v24, -inf  ;;  %vm17484_vm5 = vmmov %vm17473_vm1 }
 0x92c   :  { %4479 = vmax.xlane.f32.xlu1 %v4478_v11  ;;  %4446 = vmax.xlane.f32.xlu0 %v4445_v16  ;;  %v4442_v16 = vsel %vm17482_vm14, %v4322_v46, -inf  ;;  %v4436_v11 = vsel %vm17483_vm7, %v4320_v52, -inf  ;;  %vm17485_vm14 = vmmov %vm17473_vm1 }
 0x92d   :  { %v4538_v35 = vsel %vm17485_vm14, %v4354_v43, -inf  ;;  %vm17486_vm7 = vmmov %vm17473_vm1 }
 0x92e   :  { %vm17488_vm14 = vmmov %vm17473_vm1 }
 0x930   :  { %4407 = vmax.xlane.f32.xlu1 %v4406_v5  ;;  %4530 = vmax.xlane.f32.xlu0 %v4529_v54  ;;  %v4526_v54 = vsel %vm17484_vm5, %v4350_v62, -inf  ;;  %v4520_v5 = vsel %vm17473_vm1, %v4348_v47, -inf  ;;  %vm17487_vm5 = vmmov %vm17473_vm1  ;;  %v4296_v47 = vsel %vm16992_vm10, %v12797_v63, -3e+38 }
 0x934   :  { %4491 = vmax.xlane.f32.xlu1 %v4490_v36  ;;  %4542 = vmax.xlane.f32.xlu0 %v4541_v13  ;;  %v4324_v13 = vsel %vm17461_vm0, %v12797_v63, -3e+38  ;;  %v4361_v36 = vsel %vm17486_vm7, %v4295_v39, -inf  ;;  %vm17489_vm7 = vnez %v17441_v19  ;;  %vm17491_vm0 = vmmov %vm17473_vm1 }
 0x935   :  { %v4448_v8 = vsel %vm17487_vm5, %v4324_v13, -inf  ;;  %v4303_v26 = vsel %vm17489_vm7, %v12739_v53, -3e+38  ;;  %vm17490_vm5 = vmmov %vm17473_vm1 }
 0x936   :  { %vm17494_vm15 = vmmov %vm17491_vm0 }
 0x937   :  { %vm17498_vm2 = vmmov %vm17491_vm0 }
 0x938   :  { %4419 = vmax.xlane.f32.xlu1 %v4418_v1  ;;  %4485 = vmax.xlane.f32.xlu0 %v4484_v25  ;;  %v12871_v25 = vpop.trf.xlu0  ;;  %v4532_v1 = vsel %vm17473_vm1, %v4352_v28, -inf  ;;  %vm17492_vm1 = vnez %v17446_v27 }
 0x939   :  { %v4297_v15 = vsel %vm16992_vm10, %v12871_v25, -3e+38  ;;  %v4353_v2 = vsel %vm17466_vm11, %v12871_v25, -3e+38  ;;  %v4327_v32 = vsel %vm17492_vm1, %v12739_v53, -3e+38  ;;  %vm17496_vm11 = vmmov %vm17491_vm0 }
 0x93a   :  { %v4357_v51 = vsel %vm17472_vm12, %v12871_v25, -3e+38 }
 0x93c   :  { %4503 = vmax.xlane.f32.xlu1 %v4502_v12  ;;  %4413 = vmax.xlane.f32.xlu0 %v4412_v56  ;;  %v4373_v56 = vsel %vm17488_vm14, %v4299_v58, -inf  ;;  %v4367_v12 = vsel %vm17490_vm5, %v4297_v15, -inf  ;;  %vm17493_vm14 = vmmov %vm17491_vm0  ;;  %vm17495_vm5 = vnez %v17452_v9  ;;  %v4356_v15 = vsel %vm17472_vm12, %v12797_v63, -3e+38 }
 0x93d   :  { %v4331_v24 = vsel %vm17495_vm5, %v12739_v53, -3e+38  ;;  %vm17517_vm12 = vnez %v17460_v42 }
 0x93e   :  { %v4469_v46 = vsel %vm17496_vm11, %v4331_v24, -inf  ;;  %vm17500_vm11 = vmmov %vm17491_vm0 }
 0x940   :  { %4431 = vmax.xlane.f32.xlu1 %v4430_v45  ;;  %4497 = vmax.xlane.f32.xlu0 %v4496_v3  ;;  %v4385_v3 = vsel %vm17491_vm0, %v4303_v26, -inf  ;;  %v4535_v45 = vsel %vm17493_vm14, %v4353_v2, -inf  ;;  %vm17497_vm14 = vnez %v17457_v59  ;;  %v4305_v2 = vsel %vm17489_vm7, %v12871_v25, -3e+38 }
 0x941   :  { %v4308_v58 = vsel %vm17497_vm14, %v12797_v63, -3e+38 }
 0x944   :  { %4515 = vmax.xlane.f32.xlu1 %v4514_v20  ;;  %4425 = vmax.xlane.f32.xlu0 %v4424_v29  ;;  %v4457_v29 = vsel %vm17494_vm15, %v4327_v32, -inf  ;;  %v4547_v20 = vsel %vm17491_vm0, %v4357_v51, -inf  ;;  %vm17499_vm15 = vmmov %vm17491_vm0 }
 0x948   :  { %4443 = vmax.xlane.f32.xlu1 %v4442_v16  ;;  %4509 = vmax.xlane.f32.xlu0 %v4508_v55  ;;  %v4307_v55 = vsel %vm17497_vm14, %v12739_v53, -3e+38  ;;  %v4335_v16 = vsel %vm17464_vm3, %v12739_v53, -3e+38 }
 0x949   :  { %v4397_v52 = vsel %vm17498_vm2, %v4307_v55, -inf  ;;  %v4481_v62 = vsel %vm17499_vm15, %v4335_v16, -inf  ;;  %vm17501_vm2 = vmmov %vm17491_vm0 }
 0x94a   :  { %v4364_v43 = vsel %vm17501_vm2, %v4296_v47, -inf  ;;  %vm17502_vm15 = vmmov %vm17491_vm0 }
 0x94b   :  { %vm17504_vm2 = vmmov %vm17491_vm0 }
 0x94c   :  { %4527 = vmax.xlane.f32.xlu1 %v4526_v54  ;;  %4437 = vmax.xlane.f32.xlu0 %v4436_v11  ;;  %v4311_v11 = vsel %vm17469_vm8, %v12739_v53, -3e+38  ;;  %v4304_v53 = vsel %vm17489_vm7, %v12797_v63, -3e+38  ;;  %vm17597_vm7 = vcmask 1042434  }
 0x94d   :  { %v4409_v54 = vsel %vm17500_vm11, %v4311_v11, -inf  ;;  %v4388_v13 = vsel %vm17502_vm15, %v4304_v53, -inf  ;;  %vm17503_vm11 = vmmov %vm17491_vm0 }
 0x94e   :  { %vm17505_vm15 = vmmov %vm17491_vm0 }
 0x94f   :  { %v4544_v26 = vsel %vm17505_vm15, %v4356_v15, -inf  ;;  %vm17508_vm15 = vmmov %vm17491_vm0 }
 0x950   :  { %4539 = vmax.xlane.f32.xlu1 %v4538_v35  ;;  %4521 = vmax.xlane.f32.xlu0 %v4520_v5  ;;  %v4300_v5 = vsel %vm17073_vm13, %v12797_v63, -3e+38  ;;  %v4328_v35 = vsel %vm17492_vm1, %v12797_v63, -3e+38 }
 0x951   :  { %v4376_v39 = vsel %vm17491_vm0, %v4300_v5, -inf }
 0x954   :  { %4362 = vmax.xlane.f32.xlu1 %v4361_v36  ;;  %4449 = vmax.xlane.f32.xlu0 %v4448_v8  ;;  %v4460_v36 = vsel %vm17503_vm11, %v4328_v35, -inf  ;;  %v4332_v8 = vsel %vm17495_vm5, %v12797_v63, -3e+38  ;;  %vm17506_vm11 = vmmov %vm17491_vm0  ;;  %v4329_v63 = vsel %vm17492_vm1, %v12871_v25, -3e+38 }
 0x955   :  { %v4472_v28 = vsel %vm17504_vm2, %v4332_v8, -inf  ;;  %vm17507_vm2 = vmmov %vm17491_vm0  ;;  %v4463_v32 = vsel %vm17491_vm0, %v4329_v63, -inf  ;;  %v4345_v35 = vsel %vm17445_vm6, %v12871_v25, -3e+38 }
 0x958   :  { %4374 = vmax.xlane.f32.xlu1 %v4373_v56  ;;  %4533 = vmax.xlane.f32.xlu0 %v4532_v1  ;;  %v4400_v1 = vsel %vm17491_vm0, %v4308_v58, -inf  ;;  %v4301_v56 = vsel %vm17073_vm13, %v12871_v25, -3e+38 }
 0x95c   :  { %4386 = vmax.xlane.f32.xlu1 %v4385_v3  ;;  %4368 = vmax.xlane.f32.xlu0 %v4367_v12  ;;  %v4379_v12 = vsel %vm17506_vm11, %v4301_v56, -inf  ;;  %v4391_v3 = vsel %vm17507_vm2, %v4305_v2, -inf  ;;  %vm17509_vm11 = vmmov %vm17491_vm0 }
 0x95d   :  { %vm17510_vm2 = vmmov %vm17491_vm0 }
 0x960   :  { %4458 = vmax.xlane.f32.xlu1 %v4457_v29  ;;  %4536 = vmax.xlane.f32.xlu0 %v4535_v45  ;;  %v4333_v45 = vsel %vm17495_vm5, %v12871_v25, -3e+38  ;;  %v4309_v29 = vsel %vm17497_vm14, %v12871_v25, -3e+38 }
 0x961   :  { %v4475_v51 = vsel %vm17508_vm15, %v4333_v45, -inf  ;;  %v4403_v24 = vsel %vm17509_vm11, %v4309_v29, -inf  ;;  %vm17511_vm15 = vmmov %vm17491_vm0 }
 0x962   :  { %vm17512_vm11 = vmmov %vm17491_vm0 }
 0x964   :  { %4470 = vmax.xlane.f32.xlu1 %v4469_v46  ;;  %4548 = vmax.xlane.f32.xlu0 %v4547_v20  ;;  %v4337_v20 = vsel %vm17464_vm3, %v12871_v25, -3e+38  ;;  %vm17547_vm3 = vcmask 130048  }
 0x965   :  { %v4487_v55 = vsel %vm17510_vm2, %v4337_v20, -inf  ;;  %vm17513_vm2 = vmmov %vm17491_vm0 }
 0x966   :  { %v4511_v8 = vsel %vm17513_vm2, %v4345_v35, -inf  ;;  %vm17518_vm6 = vmmov %vm17513_vm2 }
 0x968   :  { %4398 = vmax.xlane.f32.xlu1 %v4397_v52  ;;  %v4313_v52 = vsel %vm17469_vm8, %v12871_v25, -3e+38 }
 0x969   :  { %v4415_v11 = vsel %vm17491_vm0, %v4313_v52, -inf  ;;  %vm17514_vm0 = vnez %v17449_v50 }
 0x96c   :  { %4482 = vmax.xlane.f32.xlu1 %v4481_v62 }
 0x970   :  { %4410 = vmax.xlane.f32.xlu1 %v4409_v54  ;;  %v4341_v54 = vsel %vm17436_vm4, %v12871_v25, -3e+38 }
 0x971   :  { %v4499_v5 = vsel %vm17511_vm15, %v4341_v54, -inf  ;;  %vm17515_vm15 = vmmov %vm17513_vm2 }
 0x974   :  { %4365 = vmax.xlane.f32.xlu1 %v4364_v43 }
 0x978   :  { %4377 = vmax.xlane.f32.xlu1 %v4376_v39  ;;  %v4317_v39 = vsel %vm17438_vm9, %v12871_v25, -3e+38 }
 0x97c   :  { %4389 = vmax.xlane.f32.xlu1 %v4388_v13  ;;  %v4427_v13 = vsel %vm17512_vm11, %v4317_v39, -inf  ;;  %vm17516_vm11 = vnez %v17454_v6 }
 0x97d   :  { %v4349_v56 = vsel %vm17516_vm11, %v12871_v25, -3e+38  ;;  %vm17531_vm11 = vcmask 195712  }
 0x97e   :  { %v4523_v2 = vsel %vm17513_vm2, %v4349_v56, -inf }
 0x980   :  { %4461 = vmax.xlane.f32.xlu1 %v4460_v36 }
 0x984   :  { %4473 = vmax.xlane.f32.xlu1 %v4472_v28  ;;  %v4321_v28 = vsel %vm17514_vm0, %v12871_v25, -3e+38  ;;  %vm17548_vm0 = vcmask 261312  }
 0x985   :  { %v4439_v15 = vsel %vm17515_vm15, %v4321_v28, -inf }
 0x988   :  { %4401 = vmax.xlane.f32.xlu1 %v4400_v1 }
 0x98c   :  { %4545 = vmax.xlane.f32.xlu1 %v4544_v26 }
 0x990   :  { %4380 = vmax.xlane.f32.xlu1 %v4379_v12 }
 0x994   :  { %4392 = vmax.xlane.f32.xlu1 %v4391_v3  ;;  %v4325_v3 = vsel %vm17517_vm12, %v12871_v25, -3e+38 }
 0x998   :  { %4464 = vmax.xlane.f32.xlu1 %v4463_v32  ;;  %v4451_v32 = vsel %vm17518_vm6, %v4325_v3, -inf  ;;  %vm17527_vm6 = vcmask 130112  }
 0x999   :  { %vm17528_vm15 = vmmov %vm17527_vm6 }
 0x99a   :  { %vm17529_vm2 = vmmov %vm17527_vm6 }
 0x99b   :  { %vm17530_vm12 = vmmov %vm17529_vm2 }
 0x99c   :  { %4476 = vmax.xlane.f32.xlu1 %v4475_v51 }
 0x9a0   :  { %4404 = vmax.xlane.f32.xlu1 %v4403_v24 }
 0x9a1   :  { %v12965_v46 = vpop.xlane.xlu1 %4359 }
 0x9a2   :  { %v4550_v41 = vmax.f32 %v12965_v46, -3e+38 }
 0x9a4   :  { %4488 = vmax.xlane.f32.xlu1 %v4487_v55 }
 0x9a5   :  { %v12971_v16 = vpop.xlane.xlu1 %4371  ;;  %v12995_v58 = vpop.xlane.xlu0 %4494 }
 0x9a6   :  { %v4554_v7 = vmax.f32 %v12971_v16, -3e+38  ;;  %v4595_v61 = vmax.f32 %v12995_v58, -3e+38 }
 0x9a7   :  { %v9583_v62 = vpop.f32.mrb[12].mxu1 }
 0x9a8   :  { %v4240_v47 = vpop.f32.mrb[13].mxu1  ;;  %4416 = vmax.xlane.f32.xlu1 %v4415_v11  ;;  %v13032_v11 = vpop.f32.mrb[16].mxu0  ;;  %v13105_v46 = vrot.slane %v4554_v7, %v10004_v17 }
 0x9a9   :  { %v12977_v43 = vpop.xlane.xlu1 %4383  ;;  %5000 = vxpose.xlu0.b32.start [1/2] (short) (narrow) %v4240_v47, 32  ;;  %v13005_v12 = vpop.xlane.xlu0 %4422  ;;  %17519 = vst [vmem:[#allocation61_spill] sm:$0xff] %v13032_v11 }
 0x9aa   :  { %v9590_v54 = vpop.f32.mrb[17].mxu0  ;;  %v4558_v0 = vmax.f32 %v12977_v43, -3e+38  ;;  %v4571_v57 = vmax.f32 %v13005_v12, -3e+38  ;;  %v4894_v43 = vrot.slane %v4595_v61, %v10006_v21 }
 0x9ac   :  { %4500 = vmax.xlane.f32.xlu1 %v4499_v5  ;;  %v13112_v12 = vrot.slane %v4558_v0, %v10004_v17 }
 0x9ad   :  { %v12983_v53 = vpop.xlane.xlu1 %4455  ;;  %5001 = vxpose.xlu0.b32.end [2/2] (short) (narrow) %v9583_v62, 32  ;;  %v4507_v45 = vpop.xlane.xlu0 %4506 }
 0x9ae   :  { %v4582_v10 = vmax.f32 %v12983_v53, -3e+38  ;;  %v4599_v33 = vmax.f32 %v4507_v45, -3e+38  ;;  %v4780_v53 = vrot.slane %v4571_v57, %v10006_v21 }
 0x9b0   :  { %4428 = vmax.xlane.f32.xlu1 %v4427_v13  ;;  %v13040_v13 = vpop.f32.mrb[18].mxu0 }
 0x9b1   :  { %v12989_v36 = vpop.xlane.xlu1 %4467  ;;  %v13018_v24 = vpop.xlane.xlu0 %4434  ;;  %17520 = vst [vmem:[#allocation59_spill] sm:$0xff] %v13040_v13  ;;  %v13102_v13 = vrot.slane %v4550_v41, %v10004_v17  ;;  %v4913_v41 = vrot.slane %v4599_v33, %v10006_v21 }
 0x9b2   :  { %v9591_v35 = vpop.f32.mrb[19].mxu0  ;;  %v4586_v11 = vmax.f32 %v12989_v36, -3e+38  ;;  %v4575_v16 = vmax.f32 %v13018_v24, -3e+38  ;;  %v13117_v36 = vrot.slane %v4582_v10, %v10004_v17 }
 0x9b4   :  { %4512 = vmax.xlane.f32.xlu1 %v4511_v8  ;;  %v13125_v61 = vrot.slane %v4586_v11, %v10004_v17  ;;  %v4799_v10 = vrot.slane %v4575_v16, %v10006_v21 }
 0x9b5   :  { %v12997_v1 = vpop.xlane.xlu1 %4395  ;;  %v13022_v55 = vpop.xlane.xlu0 %4518 }
 0x9b6   :  { %v4562_v45 = vmax.f32 %v12997_v1, -3e+38  ;;  %v4603_v7 = vmax.f32 %v13022_v55, -3e+38 }
 0x9b8   :  { %4440 = vmax.xlane.f32.xlu1 %v4439_v15 }
 0x9b9   :  { %v13003_v26 = vpop.xlane.xlu1 %4479  ;;  %v13030_v25 = vpop.xlane.xlu0 %4446 }
 0x9ba   :  { %v4590_v24 = vmax.f32 %v13003_v26, -3e+38  ;;  %v4579_v0 = vmax.f32 %v13030_v25, -3e+38  ;;  %v13135_v26 = vrot.slane %v4562_v45, %v10004_v17 }
 0x9bc   :  { %4524 = vmax.xlane.f32.xlu1 %v4523_v2  ;;  %17524 = vst [vmem:[#allocation50_spill] sm:$0xff] %v13135_v26  ;;  %v4818_v45 = vrot.slane %v4579_v0, %v10006_v21 }
 0x9bd   :  { %v13011_v63 = vpop.xlane.xlu1 %4407  ;;  %v13036_v5 = vpop.xlane.xlu0 %4530 }
 0x9be   :  { %v4607_v11 = vmax.f32 %v13036_v5, -3e+38 }
 0x9c0   :  { %4452 = vmax.xlane.f32.xlu1 %v4451_v32 }
 0x9c1   :  { %v13014_v51 = vpop.xlane.xlu1 %4491  ;;  %v13044_v28 = vpop.xlane.xlu0 %4542 }
 0x9c2   :  { %v4594_v57 = vmax.f32 %v13014_v51, -3e+38  ;;  %v4932_v51 = vrot.slane %v4603_v7, %v10006_v21 }
 0x9c4   :  { %v4890_v5 = vrot.slane %v4594_v57, %v10004_v17 }
 0x9c5   :  { %v13016_v29 = vpop.xlane.xlu1 %4419 }
 0x9c6   :  { %v4570_v1 = vmax.f32 %v13016_v29, -3e+38  ;;  %v13142_v29 = vrot.slane %v4590_v24, %v10004_v17 }
 0x9c9   :  { %v13020_v20 = vpop.xlane.xlu1 %4503 }
 0x9ca   :  { %v4598_v33 = vmax.f32 %v13020_v20, -3e+38 }
 0x9cc   :  { %v4909_v7 = vrot.slane %v4598_v33, %v10004_v17 }
 0x9cd   :  { %v13024_v52 = vpop.xlane.xlu1 %4431 }
 0x9ce   :  { %v4574_v55 = vmax.f32 %v13024_v52, -3e+38 }
 0x9d1   :  { %v13026_v62 = vpop.xlane.xlu1 %4515  ;;  %5779 = vrot.lane.b32.xlu1 %v12195_v14, %s9864_s10  ;;  %v13048_v14 = vpop.xlane.xlu0 %4485 }
 0x9d2   :  { %v4602_v25 = vmax.f32 %v13026_v62, -3e+38  ;;  %v4592_v62 = vmax.f32 %v13048_v14, -3e+38 }
 0x9d4   :  { %v4928_v57 = vrot.slane %v4602_v25, %v10004_v17 }
 0x9d5   :  { %v13034_v47 = vpop.xlane.xlu1 %4443  ;;  %v13054_v3 = vpop.xlane.xlu0 %4413 }
 0x9d6   :  { %v4568_v24 = vmax.f32 %v13054_v3, -3e+38 }
 0x9d9   :  { %v13038_v39 = vpop.xlane.xlu1 %4527  ;;  %v13058_v54 = vpop.xlane.xlu0 %4497 }
 0x9da   :  { %v4606_v3 = vmax.f32 %v13038_v39, -3e+38 }
 0x9dd   :  { %v13042_v8 = vpop.xlane.xlu1 %4539  ;;  %v13064_v60 = vpop.xlane.xlu0 %4425 }
 0x9de   :  { %v4572_v20 = vmax.f32 %v13064_v60, -3e+38  ;;  %v4578_v60 = vmax.f32 %v13034_v47, -3e+38 }
 0x9e0   :  { %v4785_v14 = vrot.slane %v4572_v20, %v10008_v22  ;;  %v13180_v20 = vrot.slane %v4568_v24, %v10008_v22  ;;  %v4814_v39 = vrot.slane %v4578_v60, %v10004_v17  ;;  %v5832_v24 = vld [vmem:[#allocation2 + $0x40] sm:$0xff] }
 0x9e1   :  { %v13046_v15 = vpop.xlane.xlu1 %4362  ;;  %v13068_v18 = vpop.xlane.xlu0 %4509 }
 0x9e2   :  { %v4600_v33 = vmax.f32 %v13068_v18, -3e+38 }
 0x9e5   :  { %v13050_v56 = vpop.xlane.xlu1 %4374  ;;  %v13074_v6 = vpop.xlane.xlu0 %4437 }
 0x9e6   :  { %v4576_v25 = vmax.f32 %v13074_v6, -3e+38 }
 0x9e9   :  { %v13052_v2 = vpop.xlane.xlu1 %4386  ;;  %v13078_v50 = vpop.xlane.xlu0 %4521 }
 0x9ed   :  { %v13056_v32 = vpop.xlane.xlu1 %4458  ;;  %v13084_v27 = vpop.xlane.xlu0 %4449 }
 0x9f1   :  { %v13060_v38 = vpop.xlane.xlu1 %4470  ;;  %v13088_v48 = vpop.xlane.xlu0 %4533 }
 0x9f5   :  { %v13062_v35 = vpop.xlane.xlu1 %4398  ;;  %v13108_v58 = vpop.xlane.xlu0 %4368 }
 0x9f9   :  { %v13066_v31 = vpop.xlane.xlu1 %4482  ;;  %v13146_v16 = vpop.xlane.xlu0 %4536 }
 0x9fd   :  { %v13070_v42 = vpop.xlane.xlu1 %4410 }
 0xa01   :  { %v13072_v4 = vpop.xlane.xlu1 %4365 }
 0xa05   :  { %v13076_v49 = vpop.xlane.xlu1 %4377 }
 0xa09   :  { %v13080_v9 = vpop.xlane.xlu1 %4389 }
 0xa0d   :  { %v13082_v30 = vpop.xlane.xlu1 %4461 }
 0xa11   :  { %v13086_v59 = vpop.xlane.xlu1 %4473 }
 0xa12   :  { %17521 = vst [vmem:[#allocation62_spill] sm:$0xff] %v13086_v59  ;;  %v4596_v59 = vmax.f32 %v13058_v54, -3e+38  ;;  %v4776_v54 = vrot.slane %v4570_v1, %v10004_v17 }
 0xa14   :  { %v4899_v0 = vrot.slane %v4596_v59, %v10008_v22  ;;  %v13175_v59 = vrot.slane %v4592_v62, %v10008_v22 }
 0xa15   :  { %v13090_v19 = vpop.xlane.xlu1 %4401 }
 0xa16   :  { %17522 = vst [vmem:[#allocation60_spill] sm:$0xff] %v13090_v19  ;;  %v4566_v19 = vmax.f32 %v13011_v63, -3e+38  ;;  %v4611_v63 = vmax.f32 %v13044_v28, -3e+38  ;;  %v4795_v28 = vrot.slane %v4574_v55, %v10004_v17  ;;  %v13168_v55 = vpop.xlane.xlu0 %4548 }
 0xa18   :  { %v13159_v26 = vrot.slane %v4566_v19, %v10004_v17  ;;  %v4970_v1 = vrot.slane %v4611_v63, %v10006_v21  ;;  %v4895_v19 = vsel %vm17527_vm6, %v4894_v43, %v4890_v5  ;;  %v4914_v63 = vsel %vm17529_vm2, %v4913_v41, %v4909_v7  ;;  %vm17532_vm6 = vmmov %vm17529_vm2 }
 0xa19   :  { %v13098_v40 = vpop.xlane.xlu1 %4545  ;;  %v4800_v18 = vsel %vm17530_vm12, %v4799_v10, %v4795_v28  ;;  %v4933_v43 = vsel %vm17532_vm6, %v4932_v51, %v4928_v57  ;;  %v4604_v5 = vmax.f32 %v13078_v50, -3e+38  ;;  %v4918_v41 = vrot.slane %v4600_v33, %v10008_v22  ;;  %v5833_v28 = vld [vmem:[#allocation2 + $0x48] sm:$0xff] }
 0xa1a   :  { %17523 = vst [vmem:[#allocation51_spill] sm:$0xff] %v13098_v40  ;;  %v4551_v10 = vmax.f32 %v13046_v15, -3e+38  ;;  %v4804_v51 = vrot.slane %v4576_v25, %v10008_v22  ;;  %v4555_v50 = vmax.f32 %v13050_v56, -3e+38  ;;  %vm17534_vm12 = vnez %v17284_v44 }
 0xa1b   :  { %v4608_v15 = vmax.f32 %v13088_v48, -3e+38  ;;  %v4559_v57 = vmax.f32 %v13052_v2, -3e+38  ;;  %v4609_v56 = vmax.f32 %v13146_v16, -3e+38  ;;  %v13223_v25 = vpack.c.bf16 %v5833_v28, %v5832_v24 }
 0xa1c   :  { %v4685_v48 = vrot.slane %v4551_v10, %v10006_v21  ;;  %v4704_v16 = vrot.slane %v4555_v50, %v10006_v21 }
 0xa1d   :  { %v13122_v40 = vpop.xlane.xlu1 %4380  ;;  %v4961_v24 = vrot.slane %v4609_v56, %v10010_v23 }
 0xa21   :  { %v13148_v52 = vpop.xlane.xlu1 %4392 }
 0xa22   :  { %17525 = vst [vmem:[#allocation67_spill] sm:$0xff] %v13148_v52  ;;  %v4951_v52 = vrot.slane %v4607_v11, %v10006_v21  ;;  %v4781_v11 = vsel %vm17528_vm15, %v4780_v53, %v4776_v54  ;;  %v4610_v53 = vmax.f32 %v13042_v8, -3e+38  ;;  %vm17533_vm15 = vmmov %vm17531_vm11  ;;  %v4947_v54 = vrot.slane %v4606_v3, %v10004_v17 }
 0xa23   :  { %v13191_v6 = vsel %vm17533_vm15, %v4785_v14, %v4781_v11  ;;  %v4580_v8 = vmax.f32 %v13084_v27, -3e+38  ;;  %v4937_v3 = vrot.slane %v4604_v5, %v10008_v22  ;;  %v4583_v27 = vmax.f32 %v13056_v32, -3e+38  ;;  %vm17537_vm6 = vmmov %vm17533_vm15 }
 0xa24   :  { %v4966_v33 = vrot.slane %v4610_v53, %v10004_v17  ;;  %v4723_v53 = vrot.slane %v4559_v57, %v10006_v21  ;;  %v4553_v5 = vmax.f32 %v13108_v58, -3e+38  ;;  %v4591_v58 = vmax.f32 %v13066_v31, -3e+38 }
 0xa25   :  { %v13170_v47 = vpop.xlane.xlu1 %4464  ;;  %v4823_v32 = vrot.slane %v4580_v8, %v10008_v22  ;;  %v4837_v10 = vrot.slane %v4583_v27, %v10006_v21  ;;  %v4567_v8 = vmax.f32 %v13070_v42, -3e+38 }
 0xa26   :  { %17526 = vst [vmem:[#allocation68_spill] sm:$0xff] %v13170_v47  ;;  %v13185_v47 = vsel %vm17531_vm11, %v4899_v0, %v4895_v19  ;;  %vm17535_vm11 = vmmov %vm17529_vm2  ;;  %vm17536_vm2 = vcmask 130048   ;;  %v13215_v19 = vsel %vm17537_vm6, %v4918_v41, %v4914_v63  ;;  %v4695_v31 = vrot.slane %v4553_v5, %v10010_v23 }
 0xa27   :  { %v4819_v0 = vsel %vm17535_vm11, %v4818_v45, %v4814_v39  ;;  %vm17538_vm15 = vmmov %vm17535_vm11 }
 0xa28   :  { %v4952_v45 = vsel %vm17538_vm15, %v4951_v52, %v4947_v54  ;;  %vm17539_vm11 = vmmov %vm17537_vm6  ;;  %v4956_v52 = vrot.slane %v4608_v15, %v10008_v22 }
 0xa29   :  { %v13196_v62 = vpop.xlane.xlu1 %4476  ;;  %v13198_v7 = vpop.trf.xlu0  ;;  %v13226_v39 = vsel %vm17539_vm11, %v4804_v51, %v4800_v18  ;;  %vm17540_vm6 = vmmov %vm17538_vm15  ;;  %v4587_v51 = vmax.f32 %v13060_v38, -3e+38 }
 0xa2a   :  { %v5032_v60 = vsel %vm17534_vm12, %v13198_v7, -3e+38  ;;  %v13238_v54 = vsel %vm17540_vm6, %v4970_v1, %v4966_v33  ;;  %vm17541_vm15 = vmmov %vm17539_vm11 }
 0xa2b   :  { %v5096_v14 = vsel %vm17536_vm2, %v5032_v60, -inf  ;;  %v13241_v18 = vsel %vm17541_vm15, %v4937_v3, %v4933_v43  ;;  %vm17542_vm11 = vmmov %vm17540_vm6  ;;  %v4552_v60 = vmax.f32 %v13072_v4, -3e+38  ;;  %v4563_v4 = vmax.f32 %v13062_v35, -3e+38 }
 0xa2c   :  { %5097 = vmax.xlane.f32.xlu1 %v5096_v14  ;;  %v4686_v28 = vsel %vm17542_vm11, %v4685_v48, %v13102_v13  ;;  %v4613_v14 = vmax.f32 %v13168_v55, -3e+38  ;;  %v4856_v33 = vrot.slane %v4587_v51, %v10006_v21  ;;  %v4875_v3 = vrot.slane %v4591_v58, %v10006_v21  ;;  %v17551_v48 = vld [vmem:[#allocation40_spill] sm:$0xff] }
 0xa2d   :  { %v13219_v11 = vpop.xlane.xlu1 %4404  ;;  %v13221_v2 = vpop.trf.xlu0  ;;  %v4742_v5 = vrot.slane %v4563_v4, %v10006_v21  ;;  %v17560_v4 = vld [vmem:[#allocation60_spill] sm:$0xff] }
 0xa2e   :  { %v5033_v63 = vsel %vm17534_vm12, %v13221_v2, -3e+38 }
 0xa2f   :  { %v5099_v41 = vsel %vm17536_vm2, %v5033_v63, -inf  ;;  %vm17543_vm2 = vmmov %vm17540_vm6  ;;  %v4560_v63 = vmax.f32 %v13080_v9, -3e+38 }
 0xa30   :  { %5100 = vmax.xlane.f32.xlu0 %v5099_v41  ;;  %v4705_v43 = vsel %vm17543_vm2, %v4704_v16, %v13105_v46  ;;  %vm17544_vm6 = vmmov %vm17541_vm15  ;;  %v4838_v46 = vsel %vm17543_vm2, %v4837_v10, %v13117_v36  ;;  %v4690_v36 = vrot.slane %v4552_v60, %v10008_v22  ;;  %v4556_v16 = vmax.f32 %v13076_v49, -3e+38  ;;  %v17558_v60 = vld [vmem:[#allocation62_spill] sm:$0xff] }
 0xa31   :  { %v13250_v50 = vpop.xlane.xlu1 %4488  ;;  %v13252_v1 = vpop.trf.xlu0  ;;  %v13261_v13 = vsel %vm17544_vm6, %v4823_v32, %v4819_v0  ;;  %vm17545_vm15 = vmmov %vm17544_vm6  ;;  %vm17552_vm6 = vnez %v17551_v48  ;;  %v4584_v41 = vmax.f32 %v13082_v30, -3e+38  ;;  %v13302_v10 = vrot.slane %v4613_v14, %v10010_v23 }
 0xa32   :  { %v5034_v15 = vsel %vm17534_vm12, %v13252_v1, -3e+38  ;;  %v4957_v38 = vsel %vm17545_vm15, %v4956_v52, %v4952_v45  ;;  %vm17546_vm11 = vmmov %vm17543_vm2  ;;  %v5049_v32 = vsel %vm17552_vm6, %v13221_v2, -3e+38  ;;  %vm17553_vm15 = vcmask 130048  }
 0xa33   :  { %v4724_v42 = vsel %vm17546_vm11, %v4723_v53, %v13112_v12  ;;  %v5102_v57 = vsel %vm17547_vm3, %v5034_v15, -inf  ;;  %v13273_v0 = vsel %vm17548_vm0, %v4961_v24, %v4957_v38  ;;  %v4761_v12 = vrot.slane %v4567_v8, %v10006_v21  ;;  %vm17554_vm11 = vmmov %vm17553_vm15 }
 0xa34   :  { %5103 = vmax.xlane.f32.xlu1 %v5102_v57  ;;  %vm17549_vm3 = vnez %v17282_v34  ;;  %vm17550_vm0 = vnez %v17318_v37  ;;  %v4557_v24 = vmax.f32 %v13122_v40, -3e+38  ;;  %v4857_v49 = vsel %vm17543_vm2, %v4856_v33, %v13125_v61  ;;  %vm17557_vm5 = vmmov %vm17543_vm2  ;;  %v17561_v33 = vld [vmem:[#allocation50_spill] sm:$0xff] }
 0xa35   :  { %v13278_v27 = vpop.xlane.xlu1 %4416  ;;  %v13280_v56 = vpop.trf.xlu0  ;;  %v5036_v35 = vsel %vm17549_vm3, %v13198_v7, -3e+38  ;;  %v4762_v30 = vsel %vm17557_vm5, %v4761_v12, %v13159_v26  ;;  %v4588_v15 = vmax.f32 %v17558_v60, -3e+38  ;;  %v5037_v61 = vsel %vm17549_vm3, %v13221_v2, -3e+38 }
 0xa36   :  { %v5047_v55 = vsel %vm17550_vm0, %v13280_v56, -3e+38  ;;  %v5035_v45 = vsel %vm17534_vm12, %v13280_v56, -3e+38  ;;  %vm17555_vm12 = vmmov %vm17543_vm2  ;;  %v5108_v8 = vsel %vm17554_vm11, %v5036_v35, -inf  ;;  %vm17559_vm2 = vcmask 195712  }
 0xa37   :  { %v5141_v52 = vsel %vm17553_vm15, %v5047_v55, -inf  ;;  %v5105_v53 = vsel %vm17554_vm11, %v5035_v45, -inf  ;;  %v4876_v9 = vsel %vm17555_vm12, %v4875_v3, %v13142_v29  ;;  %vm17556_vm15 = vmmov %vm17554_vm11  ;;  %v5051_v40 = vsel %vm17552_vm6, %v13280_v56, -3e+38  ;;  %v17562_v35 = vld [vmem:[#allocation67_spill] sm:$0xff] }
 0xa38   :  { %5142 = vmax.xlane.f32.xlu0 %v5141_v52  ;;  %5106 = vmax.xlane.f32.xlu1 %v5105_v53  ;;  %v5147_v58 = vsel %vm17556_vm15, %v5049_v32, -inf  ;;  %v4691_v29 = vsel %vm17559_vm2, %v4690_v36, %v4686_v28  ;;  %v4709_v38 = vrot.slane %v4556_v16, %v10008_v22  ;;  %v4728_v57 = vrot.slane %v4560_v63, %v10008_v22  ;;  %vm17563_vm12 = vmmov %vm17559_vm2  ;;  %v17567_v53 = vld [vmem:[#allocation43_spill] sm:$0xff] }
 0xa39   :  { %v4501_v51 = vpop.xlane.xlu1 %4500  ;;  %v4564_v14 = vmax.f32 %v17560_v4, -3e+38  ;;  %v4743_v26 = vsel %vm17557_vm5, %v4742_v5, %v17561_v33  ;;  %v4842_v3 = vrot.slane %v4584_v41, %v10008_v22  ;;  %v4714_v12 = vrot.slane %v4557_v24, %v10010_v23  ;;  %vm17564_vm15 = vmmov %vm17559_vm2 }
 0xa3a   :  { %v4561_v55 = vmax.f32 %v17562_v35, -3e+38  ;;  %v4881_v28 = vsel %vm17563_vm12, %v13175_v59, %v4876_v9  ;;  %v13333_v36 = vsel %vm17564_vm15, %v13180_v20, %v4762_v30  ;;  %v5153_v32 = vsel %vm17554_vm11, %v5051_v40, -inf  ;;  %vm17565_vm2 = vmmov %vm17554_vm11  ;;  %v17570_v9 = vld [vmem:[#allocation51_spill] sm:$0xff] }
 0xa3b   :  { %v5111_v16 = vsel %vm17565_vm2, %v5037_v61, -inf  ;;  %vm17566_vm5 = vcmask 261312   ;;  %v4861_v52 = vrot.slane %v4588_v15, %v10008_v22  ;;  %vm17568_vm4 = vnez %v17567_v53  ;;  %vm17569_vm15 = vmmov %vm17563_vm12  ;;  %v17573_v15 = vld [vmem:[#allocation68_spill] sm:$0xff] }
 0xa3c   :  { %5148 = vmax.xlane.f32.xlu0 %v5147_v58  ;;  %5109 = vmax.xlane.f32.xlu1 %v5108_v8  ;;  %v4696_v63 = vsel %vm17566_vm5, %v4695_v31, %v4691_v29  ;;  %v5053_v5 = vsel %vm17568_vm4, %v13221_v2, -3e+38  ;;  %v5038_v59 = vsel %vm17549_vm3, %v13252_v1, -3e+38  ;;  %v4710_v20 = vsel %vm17563_vm12, %v4709_v38, %v4705_v43  ;;  %vm17571_vm11 = vmmov %vm17563_vm12 }
 0xa3d   :  { %v13335_v45 = vpop.xlane.xlu1 %4428  ;;  %v4729_v41 = vsel %vm17569_vm15, %v4728_v57, %v4724_v42  ;;  %v4747_v24 = vrot.slane %v4564_v14, %v10008_v22  ;;  %v4612_v58 = vmax.f32 %v17570_v9, -3e+38  ;;  %v4843_v31 = vsel %vm17571_vm11, %v4842_v3, %v4838_v46  ;;  %vm17572_vm2 = vmmov %vm17566_vm5 }
 0xa3e   :  { %v4715_v8 = vsel %vm17572_vm2, %v4714_v12, %v4710_v20  ;;  %v4733_v30 = vrot.slane %v4561_v55, %v10010_v23  ;;  %v4589_v60 = vmax.f32 %v13196_v62, -3e+38  ;;  %v4585_v40 = vmax.f32 %v17573_v15, -3e+38  ;;  %vm17576_vm15 = vmmov %vm17571_vm11  ;;  %v17579_v12 = vld [vmem:[#allocation41_spill] sm:$0xff] }
 0xa3f   :  { %v4593_v43 = vmax.f32 %v13250_v50, -3e+38  ;;  %vm17574_vm5 = vcmask 130048   ;;  %v4862_v38 = vsel %vm17576_vm15, %v4861_v52, %v4857_v49  ;;  %v4597_v46 = vmax.f32 %v4501_v51, -3e+38 }
 0xa40   :  { %5154 = vmax.xlane.f32.xlu0 %v5153_v32  ;;  %5112 = vmax.xlane.f32.xlu1 %v5111_v16  ;;  %v5159_v42 = vsel %vm17574_vm5, %v5053_v5, -inf  ;;  %vm17575_vm12 = vmmov %vm17574_vm5  ;;  %v5055_v57 = vsel %vm17568_vm4, %v13280_v56, -3e+38  ;;  %v5039_v62 = vsel %vm17549_vm3, %v13280_v56, -3e+38  ;;  %v4748_v4 = vsel %vm17571_vm11, %v4747_v24, %v4743_v26 }
 0xa41   :  { %v4513_v61 = vpop.xlane.xlu1 %4512  ;;  %v5114_v29 = vsel %vm17575_vm12, %v5038_v59, -inf  ;;  %v4975_v50 = vrot.slane %v4612_v58, %v10008_v22  ;;  %vm17577_vm2 = vcmask 1041409   ;;  %vm17578_vm5 = vcmask 261312   ;;  %v17583_v59 = vld [vmem:[#allocation39_spill] sm:$0xff] }
 0xa42   :  { %v4982_v14 = vsel %vm17577_vm2, %v4715_v8, %v4696_v63  ;;  %v4601_v33 = vmax.f32 %v4513_v61, -3e+38  ;;  %v4734_v3 = vsel %vm17578_vm5, %v4733_v30, %v4729_v41  ;;  %v4866_v49 = vrot.slane %v4589_v60, %v10010_v23  ;;  %v17588_v30 = vld [vmem:[#allocation14_spill] sm:$0xff] }
 0xa43   :  { %v4565_v51 = vmax.f32 %v13219_v11, -3e+38  ;;  %vm17580_vm12 = vnez %v17579_v12  ;;  %v4885_v55 = vrot.slane %v4593_v43, %v10010_v23  ;;  %v4569_v26 = vmax.f32 %v13278_v27, -3e+38 }
 0xa44   :  { %5160 = vmax.xlane.f32.xlu0 %v5159_v42  ;;  %5115 = vmax.xlane.f32.xlu1 %v5114_v29  ;;  %v5064_v35 = vsel %vm17580_vm12, %v13198_v7, -3e+38  ;;  %vm17581_vm15 = vcmask 130048   ;;  %v4847_v52 = vrot.slane %v4585_v40, %v10010_v23  ;;  %v4904_v5 = vrot.slane %v4597_v46, %v10010_v23 }
 0xa45   :  { %v4441_v32 = vpop.xlane.xlu1 %4440  ;;  %v5165_v16 = vsel %vm17581_vm15, %v5055_v57, -inf  ;;  %vm17582_vm11 = vmmov %vm17581_vm15  ;;  %v4573_v11 = vmax.f32 %v13335_v45, -3e+38  ;;  %vm17584_vm2 = vnez %v17583_v59  ;;  %vm17585_vm5 = vcmask 1042434  }
 0xa46   :  { %v5117_v63 = vsel %vm17582_vm11, %v5039_v62, -inf  ;;  %v5040_v20 = vsel %vm17584_vm2, %v13198_v7, -3e+38  ;;  %v4983_v41 = vsel %vm17585_vm5, %v4734_v3, %v4982_v14  ;;  %v4923_v24 = vrot.slane %v4601_v33, %v10010_v23  ;;  %vm17591_vm5 = vmmov %vm17582_vm11 }
 0xa47   :  { %v4577_v27 = vmax.f32 %v4441_v32, -3e+38  ;;  %vm17586_vm3 = vcmask 195712   ;;  %vm17587_vm15 = vcmask 261312   ;;  %v4752_v8 = vrot.slane %v4565_v51, %v10010_v23 }
 0xa48   :  { %v4976_v9 = vsel %vm17586_vm3, %v4975_v50, %v13238_v54  ;;  %v4867_v58 = vsel %vm17587_vm15, %v4866_v49, %v4862_v38  ;;  %5166 = vmax.xlane.f32.xlu0 %v5165_v16  ;;  %5118 = vmax.xlane.f32.xlu1 %v5117_v63  ;;  %v5192_v45 = vsel %vm17582_vm11, %v5064_v35, -inf  ;;  %vm17589_vm1 = vnez %v17588_v30  ;;  %vm17590_vm14 = vmmov %vm17587_vm15 }
 0xa49   :  { %v5068_v60 = vsel %vm17589_vm1, %v13198_v7, -3e+38  ;;  %v4886_v15 = vsel %vm17590_vm14, %v4885_v55, %v4881_v28  ;;  %v4771_v40 = vrot.slane %v4569_v26, %v10010_v23  ;;  %v4525_v43 = vpop.xlane.xlu1 %4524  ;;  %v5120_v61 = vsel %vm17591_vm5, %v5040_v20, -inf  ;;  %vm17592_vm3 = vmmov %vm17590_vm14 }
 0xa4a   :  { %v5041_v54 = vsel %vm17584_vm2, %v13221_v2, -3e+38  ;;  %v4848_v42 = vsel %vm17592_vm3, %v4847_v52, %v4843_v31  ;;  %vm17593_vm15 = vmmov %vm17592_vm3  ;;  %v4790_v38 = vrot.slane %v4573_v11, %v10010_v23  ;;  %v4605_v46 = vmax.f32 %v4525_v43, -3e+38  ;;  %v17609_v11 = vld [vmem:[#allocation15_spill] sm:$0xff] }
 0xa4b   :  { %v4905_v29 = vsel %vm17593_vm15, %v4904_v5, %v13185_v47  ;;  %vm17594_vm11 = vcmask 1041409   ;;  %vm17595_vm14 = vmmov %vm17592_vm3  ;;  %v4809_v62 = vrot.slane %v4577_v27, %v10010_v23  ;;  %v5204_v50 = vsel %vm17591_vm5, %v5068_v60, -inf  ;;  %v17620_v43 = vld [vmem:[#allocation59_spill] sm:$0xff] }
 0xa4c   :  { %v4989_v57 = vsel %vm17594_vm11, %v4867_v58, %v4848_v42  ;;  %v4924_v28 = vsel %vm17595_vm14, %v4923_v24, %v13215_v19  ;;  %vm17596_vm9 = vmmov %vm17592_vm3  ;;  %v4942_v31 = vrot.slane %v4605_v46, %v10010_v23  ;;  %5193 = vmax.xlane.f32.xlu0 %v5192_v45  ;;  %5121 = vmax.xlane.f32.xlu1 %v5120_v61  ;;  %vm17600_vm11 = vcmask 1043459   ;;  %v17617_v45 = vld [vmem:[#allocation35_spill] sm:$0xff]  ;;  %v17621_v42 = vld [vmem:[#allocation34_spill] sm:$0xff] }
 0xa4d   :  { %v4753_v14 = vsel %vm17596_vm9, %v4752_v8, %v4748_v4  ;;  %v4990_v33 = vsel %vm17597_vm7, %v4886_v15, %v4989_v57  ;;  %vm17598_vm3 = vmmov %vm17591_vm5  ;;  %v4453_v19 = vpop.xlane.xlu1 %4452  ;;  %v5066_v51 = vsel %vm17580_vm12, %v13252_v1, -3e+38  ;;  %v5042_v4 = vsel %vm17584_vm2, %v13252_v1, -3e+38  ;;  %v13462_v46 = vld [vmem:[%s16326_s5] sm:$0xff]  }
 0xa4e   :  { %v5123_v47 = vsel %vm17598_vm3, %v5041_v54, -inf  ;;  %vm17599_vm15 = vmmov %vm17596_vm9  ;;  %v4991_v49 = vsel %vm17600_vm11, %v4905_v29, %v4990_v33  ;;  %v4791_v35 = vsel %vm17596_vm9, %v4790_v38, %v13191_v6  ;;  %v4581_v26 = vmax.f32 %v4453_v19, -3e+38  ;;  %v17623_v29 = vld [vmem:[#allocation61_spill] sm:$0xff] }
 0xa4f   :  { %v4772_v3 = vsel %vm17599_vm15, %v4771_v40, %v13333_v36  ;;  %vm17601_vm7 = vmmov %vm17596_vm9  ;;  %vm17602_vm14 = vcmask 1044484   ;;  %v5043_v15 = vsel %vm17584_vm2, %v13280_v56, -3e+38 }
 0xa50   :  { %v4943_v55 = vsel %vm17601_vm7, %v4942_v31, %v13241_v18  ;;  %v4992_v36 = vsel %vm17602_vm14, %v4924_v28, %v4991_v49  ;;  %vm17603_vm5 = vmmov %vm17600_vm11  ;;  %vm17606_vm11 = vcmask 1045509   ;;  %v4828_v5 = vrot.slane %v4581_v26, %v10010_v23  ;;  %5205 = vmax.xlane.f32.xlu0 %v5204_v50  ;;  %5124 = vmax.xlane.f32.xlu1 %v5123_v47  ;;  %v17630_v47 = vld [vmem:[#allocation54_spill] sm:$0xff] }
 0xa51   :  { %v4984_v32 = vsel %vm17603_vm5, %v4753_v14, %v4983_v41  ;;  %vm17604_vm3 = vmmov %vm17601_vm7  ;;  %v4993_v52 = vsel %vm17606_vm11, %v4943_v55, %v4992_v36  ;;  %vm17608_vm7 = vcmask 1046534   ;;  %v5834_v41 = vld [vmem:[#allocation2 + $0x50] sm:$0xff]  ;;  %v5044_v50 = vsel %vm17550_vm0, %v13198_v7, -3e+38  ;;  %v17627_v14 = vld [vmem:[#allocation53_spill] sm:$0xff] }
 0xa52   :  { %v4810_v16 = vsel %vm17604_vm3, %v4809_v62, %v13226_v39  ;;  %vm17605_vm15 = vmmov %vm17604_vm3  ;;  %v4994_v18 = vsel %vm17608_vm7, %v13273_v0, %v4993_v52  ;;  %v5835_v39 = vld [vmem:[#allocation2 + $0x58] sm:$0xff]  ;;  %vm17612_vm3 = vcmask 1047559   ;;  %v5067_v62 = vsel %vm17580_vm12, %v13280_v56, -3e+38 }
 0xa53   :  { %v4981_v63 = vsel %vm17605_vm15, %v13302_v10, %v4976_v9  ;;  %vm17607_vm9 = vmmov %vm17602_vm14  ;;  %vm17610_vm14 = vnez %v17609_v11  ;;  %v5780_v10 = vpop.permute.xlu1 %5779  ;;  %vm17613_vm15 = vcmask 130048   ;;  %v9706_v54 = vpack.c.bf16 %v5835_v39, %v5834_v41 }
 0xa54   :  { %v4985_v6 = vsel %vm17607_vm9, %v4772_v3, %v4984_v32  ;;  %v5072_v20 = vsel %vm17610_vm14, %v13198_v7, -3e+38  ;;  %vm17611_vm5 = vmmov %vm17606_vm11  ;;  %v4995_v27 = vsel %vm17612_vm3, %v4981_v63, %v4994_v18  ;;  %v5198_v9 = vsel %vm17613_vm15, %v5066_v51, -inf  ;;  %9593 = vmatpush3.bf16.msra.mxu1 %v5780_v10 }
 0xa55   :  { %v4986_v24 = vsel %vm17611_vm5, %v4791_v35, %v4985_v6  ;;  %vm17614_vm11 = vmmov %vm17613_vm15  ;;  %vm17615_vm9 = vcmask 261312   ;;  %9703 = vmatprep.subr.bf16.mxu1 %v13223_v25  ;;  %5199 = vmax.xlane.f32.xlu0 %v5198_v9  ;;  %v17628_v33 = vmax.f32 %v17627_v14, 0.0  ;;  %v17631_v3 = vmax.f32 %v17630_v47, 0.0 }
 0xa56   :  { %v5126_v58 = vsel %vm17614_vm11, %v5042_v4, -inf  ;;  %v4829_v8 = vsel %vm17615_vm9, %v4828_v5, %v13261_v13  ;;  %vm17616_vm8 = vmmov %vm17608_vm7  ;;  %vm17618_vm7 = vcmp.eq.s32.totalorder %v17617_v45, 1  ;;  %v5074_v4 = vsel %vm17610_vm14, %v13252_v1, -3e+38 }
 0xa57   :  { %v4987_v0 = vsel %vm17616_vm8, %v4810_v16, %v4986_v24  ;;  %v4999_v60 = vsel %vm17618_vm7, %v4995_v27, 0.0  ;;  %vm17619_vm5 = vmmov %vm17612_vm3  ;;  %vm17622_vm3 = vcmp.eq.s32.totalorder %v17621_v42, 1  ;;  %5127 = vmax.xlane.f32.xlu1 %v5126_v58  ;;  %v5045_v35 = vsel %vm17550_vm0, %v13221_v2, -3e+38  ;;  %v17640_v16 = vld [vmem:[#allocation42_spill] sm:$0xff]  ;;  %v17646_v24 = vld [vmem:[#allocation44_spill] sm:$0xff] }
 0xa58   :  { %v4988_v40 = vsel %vm17619_vm5, %v4829_v8, %v4987_v0  ;;  %v5776_v61 = vadd.f32 %v17620_v43, %v4999_v60  ;;  %vm17624_vm8 = vmmov %vm17614_vm11  ;;  %vm17635_vm5 = vcmask 261120   ;;  %v17636_v26 = vmov 0.0  }
 0xa59   :  { %v4998_v13 = vsel %vm17622_vm3, %v4988_v40, 0.0  ;;  %9595 = vmatmul.mubr.msk.bf16.vlgmr.msra.gmra.mrb[16].mxu1 %vm17624_vm8, %v13462_v46  ;;  %vm17625_vm15 = vmmov %vm17624_vm8  ;;  %v5046_v52 = vsel %vm17550_vm0, %v13252_v1, -3e+38  ;;  %v5050_v27 = vsel %vm17552_vm6, %v13252_v1, -3e+38  ;;  %v17651_v40 = vld [vmem:[#allocation46_spill] sm:$0xff] }
 0xa5a   :  { %v5773_v38 = vadd.f32 %v17623_v29, %v4998_v13  ;;  %v5216_v57 = vsel %vm17625_vm15, %v5072_v20, -inf  ;;  %vm17626_vm11 = vmmov %vm17624_vm8  ;;  %9705 = vmatpush3.bf16.msra.mxu1 %v13223_v25  ;;  %v13481_v49 = vadd.f32 %v5776_v61, %v17631_v3  ;;  %v5048_v20 = vsel %vm17552_vm6, %v13198_v7, -3e+38  ;;  %v17655_v29 = vld [vmem:[#allocation45_spill] sm:$0xff] }
 0xa5b   :  { %v5129_v28 = vsel %vm17626_vm11, %v5043_v15, -inf  ;;  %9707 = vmatprep.subr.bf16.mxu1 %v9706_v54  ;;  %5217 = vmax.xlane.f32.xlu0 %v5216_v57  ;;  %vm17633_vm9 = vmmov %vm17624_vm8  ;;  %vm17641_vm11 = vnez %v17640_v16  ;;  %v5052_v0 = vsel %vm17568_vm4, %v13198_v7, -3e+38  ;;  %vm17652_vm0 = vnez %v17651_v40 }
 0xa5c   :  { %v13477_v31 = vadd.f32 %v5773_v38, %v17628_v33  ;;  %17632 = vst [vmem:[#allocation64_spill] sm:$0xff] %v13481_v49  ;;  %5130 = vmax.xlane.f32.xlu1 %v5129_v28  ;;  %v5201_v19 = vsel %vm17633_vm9, %v5067_v62, -inf  ;;  %vm17634_vm7 = vmmov %vm17624_vm8  ;;  %v16608_v55 = vmax.f32 %v13481_v49, 0.0  ;;  %v5077_v63 = vsel %vm17641_vm11, %v13221_v2, -3e+38 }
 0xa5d   :  { %v5132_v51 = vsel %vm17634_vm7, %v5044_v50, -inf  ;;  %vm17637_vm3 = vmmov %vm17635_vm5  ;;  %vm17642_vm9 = vmmov 0   ;;  %v5231_v5 = vsel %vm17634_vm7, %v5077_v63, -inf  ;;  %v5078_v18 = vsel %vm17641_vm11, %v13252_v1, -3e+38  ;;  %v17658_v50 = vld [vmem:[#allocation47_spill] sm:$0xff] }
 0xa5e   :  { %17629 = vst [vmem:[#allocation69_spill] sm:$0xff] %v13477_v31  ;;  %v16609_v25 = vmax.f32 %v13477_v31, 0.0  ;;  %9709 = vmatpush3.bf16.msra.mxu1 %v9706_v54  ;;  %vm17638_vm8 = vmmov %vm17634_vm7  ;;  %v5079_v8 = vsel %vm17641_vm11, %v13280_v56, -3e+38  ;;  %v5084_v43 = vsel %vm17652_vm0, %v13198_v7, -3e+38  ;;  %vm17656_vm2 = vnez %v17655_v29 }
 0xa5f   :  { %9620 = vmatprep.subr.bf16.mxu1 %v17636_v26  ;;  %5202 = vmax.xlane.f32.xlu0 %v5201_v19  ;;  %v5222_v36 = vsel %vm17638_vm8, %v5074_v4, -inf  ;;  %vm17639_vm15 = vmmov %vm17634_vm7  ;;  %v5054_v61 = vsel %vm17568_vm4, %v13252_v1, -3e+38  ;;  %v5058_v38 = vsel %vm17656_vm2, %v13252_v1, -3e+38  ;;  %vm17659_vm4 = vnez %v17658_v50 }
 0xa60   :  { %9606 = vmatprep.mubr.msk.f32.mxu1 %vm17635_vm5, %v16609_v25  ;;  %5133 = vmax.xlane.f32.xlu1 %v5132_v51  ;;  %v5135_v32 = vsel %vm17639_vm15, %v5045_v35, -inf  ;;  %vm17643_vm5 = vmmov %vm17634_vm7  ;;  %vm17647_vm15 = vnez %v17646_v24  ;;  %v5056_v57 = vsel %vm17656_vm2, %v13198_v7, -3e+38  ;;  %v5061_v14 = vsel %vm17659_vm4, %v13221_v2, -3e+38 }
 0xa61   :  { %9607 = vmatmul.mubr.msk.f32.vlgmr.msra.gmra.mrb[14].mxu1 %vm17637_vm3, %v16608_v55  ;;  %v5138_v6 = vsel %vm17643_vm5, %v5046_v52, -inf  ;;  %vm17644_vm3 = vmmov %vm17643_vm5  ;;  %v5081_v10 = vsel %vm17647_vm15, %v13221_v2, -3e+38  ;;  %v5065_v33 = vsel %vm17580_vm12, %v13221_v2, -3e+38 }
 0xa62   :  { %9624 = vmatprep.mubr.msk.bf16.mxu1 %vm17642_vm9, %v17636_v26  ;;  %v5234_v41 = vsel %vm17644_vm3, %v5078_v18, -inf  ;;  %vm17645_vm8 = vmmov %vm17644_vm3  ;;  %v5237_v60 = vsel %vm17644_vm3, %v5079_v8, -inf  ;;  %v5174_v28 = vsel %vm17644_vm3, %v5058_v38, -inf  ;;  %v5086_v19 = vsel %vm17652_vm0, %v13252_v1, -3e+38 }
 0xa63   :  { %5223 = vmax.xlane.f32.xlu0 %v5222_v36  ;;  %v5144_v39 = vsel %vm17645_vm8, %v5048_v20, -inf  ;;  %vm17648_vm7 = vmmov %vm17644_vm3  ;;  %v5069_v51 = vsel %vm17589_vm1, %v13221_v2, -3e+38  ;;  %v5258_v4 = vsel %vm17644_vm3, %v5086_v19, -inf  ;;  %v17663_v36 = vld [vmem:[#allocation48_spill] sm:$0xff] }
 0xa64   :  { %5136 = vmax.xlane.f32.xlu1 %v5135_v32  ;;  %v5243_v9 = vsel %vm17648_vm7, %v5081_v10, -inf  ;;  %vm17649_vm5 = vmmov %vm17644_vm3  ;;  %vm17664_vm12 = vnez %v17663_v36  ;;  %v5070_v63 = vsel %vm17589_vm1, %v13252_v1, -3e+38  ;;  %v5073_v18 = vsel %vm17610_vm14, %v13221_v2, -3e+38 }
 0xa65   :  { %v5150_v58 = vsel %vm17649_vm5, %v5050_v27, -inf  ;;  %vm17650_vm8 = vmmov %vm17644_vm3  ;;  %v5089_v32 = vsel %vm17664_vm12, %v13221_v2, -3e+38  ;;  %v5090_v10 = vsel %vm17664_vm12, %v13252_v1, -3e+38 }
 0xa66   :  { %v5156_v15 = vsel %vm17650_vm8, %v5052_v0, -inf  ;;  %vm17653_vm7 = vmmov %vm17644_vm3  ;;  %v5076_v0 = vsel %vm17641_vm11, %v13198_v7, -3e+38  ;;  %v5085_v19 = vsel %vm17652_vm0, %v13221_v2, -3e+38 }
 0xa67   :  { %5232 = vmax.xlane.f32.xlu0 %v5231_v5  ;;  %v5252_v54 = vsel %vm17653_vm7, %v5084_v43, -inf  ;;  %vm17654_vm5 = vmmov %vm17644_vm3  ;;  %v5091_v43 = vsel %vm17664_vm12, %v13280_v56, -3e+38 }
 0xa68   :  { %5139 = vmax.xlane.f32.xlu1 %v5138_v6  ;;  %v5162_v13 = vsel %vm17654_vm5, %v5054_v61, -inf  ;;  %vm17657_vm8 = vmmov %vm17644_vm3  ;;  %v5062_v6 = vsel %vm17659_vm4, %v13252_v1, -3e+38  ;;  %v5075_v61 = vsel %vm17610_vm14, %v13280_v56, -3e+38 }
 0xa69   :  { %v5168_v62 = vsel %vm17657_vm8, %v5056_v57, -inf  ;;  %vm17660_vm7 = vmmov %vm17644_vm3  ;;  %v5186_v20 = vsel %vm17644_vm3, %v5062_v6, -inf  ;;  %v5080_v57 = vsel %vm17647_vm15, %v13198_v7, -3e+38 }
 0xa6a   :  { %v5183_v47 = vsel %vm17660_vm7, %v5061_v14, -inf  ;;  %vm17661_vm5 = vmmov %vm17644_vm3  ;;  %v5057_v14 = vsel %vm17656_vm2, %v13221_v2, -3e+38 }
 0xa6b   :  { %5235 = vmax.xlane.f32.xlu0 %v5234_v41  ;;  %v5195_v3 = vsel %vm17661_vm5, %v5065_v33, -inf  ;;  %vm17662_vm8 = vmmov %vm17644_vm3  ;;  %v5071_v41 = vsel %vm17589_vm1, %v13280_v56, -3e+38 }
 0xa6c   :  { %5145 = vmax.xlane.f32.xlu1 %v5144_v39  ;;  %v5207_v35 = vsel %vm17662_vm8, %v5069_v51, -inf  ;;  %vm17665_vm7 = vmmov %vm17644_vm3 }
 0xa6d   :  { %v5267_v52 = vsel %vm17665_vm7, %v5089_v32, -inf  ;;  %vm17666_vm5 = vmmov %vm17644_vm3  ;;  %v5083_v32 = vsel %vm17647_vm15, %v13280_v56, -3e+38 }
 0xa6e   :  { %v5210_v5 = vsel %vm17666_vm5, %v5070_v63, -inf  ;;  %vm17667_vm8 = vmmov %vm17644_vm3 }
 0xa6f   :  { %5244 = vmax.xlane.f32.xlu0 %v5243_v9  ;;  %v5219_v39 = vsel %vm17667_vm8, %v5073_v18, -inf  ;;  %vm17668_vm7 = vmmov %vm17644_vm3  ;;  %v5087_v18 = vsel %vm17652_vm0, %v13280_v56, -3e+38 }
 0xa70   :  { %5151 = vmax.xlane.f32.xlu1 %v5150_v58  ;;  %v5213_v27 = vsel %vm17668_vm7, %v5071_v41, -inf  ;;  %vm17669_vm5 = vmmov %vm17644_vm3  ;;  %v17670_v58 = vld [vmem:[#allocation49_spill] sm:$0xff] }
 0xa71   :  { %v5270_v9 = vsel %vm17669_vm5, %v5090_v10, -inf  ;;  %vm17671_vm3 = vnez %v17670_v58  ;;  %vm17672_vm8 = vmmov %vm17669_vm5 }
 0xa72   :  { %v5093_v8 = vsel %vm17671_vm3, %v13221_v2, -3e+38  ;;  %vm17673_vm6 = vmmov %vm17669_vm5  ;;  %v5095_v38 = vsel %vm17671_vm3, %v13280_v56, -3e+38  ;;  %v5088_v2 = vsel %vm17664_vm12, %v13198_v7, -3e+38 }
 0xa73   :  { %5238 = vmax.xlane.f32.xlu0 %v5237_v60  ;;  %v5279_v60 = vsel %vm17672_vm8, %v5093_v8, -inf  ;;  %vm17674_vm7 = vmmov %vm17669_vm5  ;;  %v5092_v41 = vsel %vm17671_vm3, %v13198_v7, -3e+38  ;;  %vm17708_vm12 = vcmask 1042434  }
 0xa74   :  { %5157 = vmax.xlane.f32.xlu1 %v5156_v15  ;;  %v5228_v15 = vsel %vm17673_vm6, %v5076_v0, -inf  ;;  %vm17675_vm6 = vmmov %vm17669_vm5  ;;  %v5094_v0 = vsel %vm17671_vm3, %v13252_v1, -3e+38 }
 0xa75   :  { %vm17676_vm8 = vmmov %vm17669_vm5 }
 0xa77   :  { %5253 = vmax.xlane.f32.xlu0 %v5252_v54  ;;  %v5273_v54 = vsel %vm17674_vm7, %v5091_v43, -inf  ;;  %vm17677_vm7 = vmmov %vm17669_vm5 }
 0xa78   :  { %5163 = vmax.xlane.f32.xlu1 %v5162_v13  ;;  %v5225_v13 = vsel %vm17669_vm5, %v5075_v61, -inf  ;;  %v5171_v33 = vsel %vm17677_vm7, %v5057_v14, -inf  ;;  %vm17680_vm7 = vmmov %vm17669_vm5  ;;  %v5837_v14 = vld [vmem:[#allocation5 + $0x40] sm:$0xff] }
 0xa79   :  { %v5249_v63 = vsel %vm17680_vm7, %v5083_v32, -inf  ;;  %vm17683_vm7 = vmmov %vm17669_vm5 }
 0xa7b   :  { %5175 = vmax.xlane.f32.xlu0 %v5174_v28  ;;  %v5285_v28 = vsel %vm17675_vm6, %v5095_v38, -inf  ;;  %vm17678_vm6 = vmmov %vm17669_vm5 }
 0xa7c   :  { %5169 = vmax.xlane.f32.xlu1 %v5168_v62  ;;  %v5240_v62 = vsel %vm17676_vm8, %v5080_v57, -inf  ;;  %v5255_v51 = vsel %vm17678_vm6, %v5085_v19, -inf  ;;  %vm17679_vm8 = vmmov %vm17669_vm5  ;;  %v5840_v19 = vld [vmem:[#allocation5 + $0x58] sm:$0xff] }
 0xa7d   :  { %vm17681_vm6 = vmmov %vm17669_vm5 }
 0xa7f   :  { %5184 = vmax.xlane.f32.xlu0 %v5183_v47  ;;  %v5082_v47 = vsel %vm17647_vm15, %v13252_v1, -3e+38 }
 0xa80   :  { %5196 = vmax.xlane.f32.xlu1 %v5195_v3  ;;  %v5246_v3 = vsel %vm17669_vm5, %v5082_v47, -inf }
 0xa83   :  { %5259 = vmax.xlane.f32.xlu0 %v5258_v4  ;;  %v5060_v4 = vsel %vm17659_vm4, %v13198_v7, -3e+38 }
 0xa84   :  { %5208 = vmax.xlane.f32.xlu1 %v5207_v35  ;;  %v5180_v35 = vsel %vm17679_vm8, %v5060_v4, -inf  ;;  %vm17682_vm8 = vmmov %vm17669_vm5 }
 0xa87   :  { %5268 = vmax.xlane.f32.xlu0 %v5267_v52  ;;  %v5264_v52 = vsel %vm17669_vm5, %v5088_v2, -inf }
 0xa88   :  { %5211 = vmax.xlane.f32.xlu1 %v5210_v5  ;;  %v5059_v5 = vsel %vm17656_vm2, %v13280_v56, -3e+38 }
 0xa89   :  { %v5177_v6 = vsel %vm17681_vm6, %v5059_v5, -inf  ;;  %vm17684_vm6 = vmmov %vm17669_vm5 }
 0xa8a   :  { %v5282_v7 = vsel %vm17684_vm6, %v5094_v0, -inf }
 0xa8b   :  { %5187 = vmax.xlane.f32.xlu0 %v5186_v20  ;;  %v5261_v20 = vsel %vm17682_vm8, %v5087_v18, -inf  ;;  %vm17685_vm8 = vcmask 130112  }
 0xa8c   :  { %5220 = vmax.xlane.f32.xlu1 %v5219_v39  ;;  %v5276_v39 = vsel %vm17683_vm7, %v5092_v41, -inf  ;;  %vm17686_vm7 = vmmov %vm17685_vm8 }
 0xa8f   :  { %5271 = vmax.xlane.f32.xlu0 %v5270_v9 }
 0xa90   :  { %5214 = vmax.xlane.f32.xlu1 %v5213_v27  ;;  %v5063_v27 = vsel %vm17659_vm4, %v13280_v56, -3e+38 }
 0xa91   :  { %v5189_v9 = vsel %vm17669_vm5, %v5063_v27, -inf  ;;  %vm17687_vm5 = vcmask 195712  }
 0xa92   :  { %vm17688_vm6 = vmmov %vm17687_vm5 }
 0xa93   :  { %5280 = vmax.xlane.f32.xlu0 %v5279_v60 }
 0xa94   :  { %5229 = vmax.xlane.f32.xlu1 %v5228_v15 }
 0xa97   :  { %5274 = vmax.xlane.f32.xlu0 %v5273_v54 }
 0xa98   :  { %5226 = vmax.xlane.f32.xlu1 %v5225_v13 }
 0xa9b   :  { %5286 = vmax.xlane.f32.xlu0 %v5285_v28 }
 0xa9c   :  { %5241 = vmax.xlane.f32.xlu1 %v5240_v62 }
 0xaa0   :  { %5172 = vmax.xlane.f32.xlu1 %v5171_v33  ;;  %v5838_v33 = vld [vmem:[#allocation5 + $0x48] sm:$0xff] }
 0xaa1   :  { %v9710_v47 = vpack.c.bf16 %v5838_v33, %v5837_v14 }
 0xaa3   :  { %9711 = vmatprep.subr.bf16.mxu0 %v9710_v47 }
 0xaa4   :  { %5247 = vmax.xlane.f32.xlu1 %v5246_v3  ;;  %v5839_v3 = vld [vmem:[#allocation5 + $0x50] sm:$0xff]  ;;  %9713 = vmatpush3.bf16.msra.mxu0 %v9710_v47 }
 0xaa5   :  { %v9714_v4 = vpack.c.bf16 %v5840_v19, %v5839_v3 }
 0xaa7   :  { %9715 = vmatprep.subr.bf16.mxu0 %v9714_v4 }
 0xaa8   :  { %5256 = vmax.xlane.f32.xlu1 %v5255_v51  ;;  %9717 = vmatpush3.bf16.msra.mxu0 %v9714_v4 }
 0xaa9   :  { %9628 = vmatprep.subr.bf16.mxu0 %v17636_v26 }
 0xaac   :  { %5181 = vmax.xlane.f32.xlu1 %v5180_v35 }
 0xab0   :  { %5250 = vmax.xlane.f32.xlu1 %v5249_v63 }
 0xab4   :  { %5265 = vmax.xlane.f32.xlu1 %v5264_v52 }
 0xab8   :  { %5178 = vmax.xlane.f32.xlu1 %v5177_v6 }
 0xab9   :  { %v13652_v10 = vpop.xlane.xlu1 %5097 }
 0xaba   :  { %v5288_v50 = vmax.f32 %v13652_v10, -3e+38 }
 0xabc   :  { %5262 = vmax.xlane.f32.xlu1 %v5261_v20  ;;  %v5419_v24 = vrot.slane %v5288_v50, %v10004_v17 }
 0xabd   :  { %v13658_v8 = vpop.xlane.xlu0 %5100 }
 0xabe   :  { %v5289_v40 = vmax.f32 %v13658_v8, -3e+38 }
 0xac0   :  { %5277 = vmax.xlane.f32.xlu1 %v5276_v39  ;;  %v5423_v48 = vrot.slane %v5289_v40, %v10006_v21 }
 0xac1   :  { %v13663_v60 = vpop.xlane.xlu1 %5103 }
 0xac2   :  { %v5290_v53 = vmax.f32 %v13663_v60, -3e+38  ;;  %v5424_v40 = vsel %vm17685_vm8, %v5423_v48, %v5419_v24  ;;  %vm17689_vm8 = vmmov %vm17686_vm7 }
 0xac4   :  { %5190 = vmax.xlane.f32.xlu1 %v5189_v9 }
 0xac5   :  { %v13666_v15 = vpop.xlane.xlu1 %5106  ;;  %v13668_v43 = vpop.xlane.xlu0 %5142 }
 0xac6   :  { %v5291_v50 = vmax.f32 %v13666_v15, -3e+38 }
 0xac8   :  { %5283 = vmax.xlane.f32.xlu1 %v5282_v7  ;;  %v5433_v24 = vrot.slane %v5291_v50, %v10010_v23 }
 0xac9   :  { %v5110_v61 = vpop.xlane.xlu1 %5109  ;;  %v13670_v56 = vpop.xlane.xlu0 %5148 }
 0xaca   :  { %v5292_v12 = vmax.f32 %v5110_v61, -3e+38 }
 0xacc   :  { %v5438_v16 = vrot.slane %v5292_v12, %v10004_v17 }
 0xacd   :  { %v5113_v54 = vpop.xlane.xlu1 %5112  ;;  %v13672_v13 = vpop.xlane.xlu0 %5154 }
 0xace   :  { %v5293_v29 = vmax.f32 %v5113_v54, -3e+38  ;;  %v5428_v54 = vrot.slane %v5290_v53, %v10008_v22 }
 0xad0   :  { %v5442_v11 = vrot.slane %v5293_v29, %v10006_v21 }
 0xad1   :  { %v13674_v38 = vpop.xlane.xlu1 %5115  ;;  %v13676_v57 = vpop.xlane.xlu0 %5160 }
 0xad2   :  { %v5294_v10 = vmax.f32 %v13674_v38, -3e+38  ;;  %v5443_v12 = vsel %vm17686_vm7, %v5442_v11, %v5438_v16  ;;  %v5429_v16 = vsel %vm17687_vm5, %v5428_v54, %v5424_v40  ;;  %vm17690_vm7 = vcmask 261312  }
 0xad3   :  { %v5434_v40 = vsel %vm17690_vm7, %v5433_v24, %v5429_v16  ;;  %vm17691_vm5 = vmmov %vm17690_vm7  ;;  %vm17692_vm7 = vcmask 1041409  }
 0xad4   :  { %v5447_v29 = vrot.slane %v5294_v10, %v10008_v22  ;;  %v5305_v10 = vmax.f32 %v13670_v56, -3e+38  ;;  %v5307_v56 = vmax.f32 %v13672_v13, -3e+38 }
 0xad5   :  { %v13678_v1 = vpop.xlane.xlu1 %5118  ;;  %v13680_v28 = vpop.xlane.xlu0 %5166 }
 0xad6   :  { %v5295_v60 = vmax.f32 %v13678_v1, -3e+38 }
 0xad9   :  { %v13682_v62 = vpop.xlane.xlu1 %5121  ;;  %v13684_v51 = vpop.xlane.xlu0 %5193 }
 0xada   :  { %v5296_v8 = vmax.f32 %v13682_v62, -3e+38 }
 0xadc   :  { %v5457_v62 = vrot.slane %v5296_v8, %v10004_v17  ;;  %v5448_v8 = vsel %vm17688_vm6, %v5447_v29, %v5443_v12  ;;  %v5309_v12 = vmax.f32 %v13676_v57, -3e+38 }
 0xadd   :  { %v5125_v35 = vpop.xlane.xlu1 %5124  ;;  %v13688_v63 = vpop.xlane.xlu0 %5205 }
 0xade   :  { %v5297_v61 = vmax.f32 %v5125_v35, -3e+38 }
 0xae0   :  { %v5461_v53 = vrot.slane %v5297_v61, %v10006_v21 }
 0xae2   :  { %v13693_v52 = vpop.xlane.xlu0 %5199 }
 0xae4   :  { %v13686_v32 = vpop.xlane.xlu1 %5127 }
 0xae5   :  { %v5298_v38 = vmax.f32 %v13686_v32, -3e+38 }
 0xae8   :  { %v13699_v18 = vpop.xlane.xlu0 %5217 }
 0xae9   :  { %v13691_v2 = vpop.xlane.xlu1 %5130 }
 0xaea   :  { %v5299_v32 = vmax.f32 %v13691_v2, -3e+38  ;;  %v5303_v2 = vmax.f32 %v13668_v43, -3e+38 }
 0xaec   :  { %v13703_v41 = vpop.xlane.xlu0 %5202  ;;  %v5471_v29 = vrot.slane %v5299_v32, %v10010_v23  ;;  %v5490_v32 = vrot.slane %v5303_v2, %v10010_v23 }
 0xaed   :  { %v13695_v5 = vpop.xlane.xlu1 %5133 }
 0xaee   :  { %v5300_v15 = vmax.f32 %v13695_v5, -3e+38  ;;  %v5466_v5 = vrot.slane %v5298_v38, %v10008_v22 }
 0xaf0   :  { %v13709_v9 = vpop.xlane.xlu0 %5223  ;;  %v5476_v54 = vrot.slane %v5300_v15, %v10004_v17 }
 0xaf1   :  { %v13697_v6 = vpop.xlane.xlu1 %5136 }
 0xaf2   :  { %v5301_v1 = vmax.f32 %v13697_v6, -3e+38 }
 0xaf4   :  { %v13713_v7 = vpop.xlane.xlu0 %5232  ;;  %v5480_v50 = vrot.slane %v5301_v1, %v10006_v21  ;;  %v5499_v1 = vrot.slane %v5305_v10, %v10006_v21 }
 0xaf5   :  { %v13701_v20 = vpop.xlane.xlu1 %5139 }
 0xaf6   :  { %v5302_v6 = vmax.f32 %v13701_v20, -3e+38  ;;  %v5481_v16 = vsel %vm17689_vm8, %v5480_v50, %v5476_v54  ;;  %v5324_v54 = vmax.f32 %v13688_v63, -3e+38 }
 0xaf8   :  { %v13719_v47 = vpop.xlane.xlu0 %5235  ;;  %v5485_v15 = vrot.slane %v5302_v6, %v10008_v22 }
 0xaf9   :  { %v13705_v39 = vpop.xlane.xlu1 %5145 }
 0xafa   :  { %v5486_v50 = vsel %vm17688_vm6, %v5485_v15, %v5481_v16  ;;  %v5334_v15 = vmax.f32 %v13719_v47, -3e+38 }
 0xafc   :  { %v13723_v19 = vpop.xlane.xlu0 %5244 }
 0xafd   :  { %v13707_v27 = vpop.xlane.xlu1 %5151 }
 0xb00   :  { %v13729_v25 = vpop.xlane.xlu0 %5238 }
 0xb01   :  { %v13711_v0 = vpop.xlane.xlu1 %5157 }
 0xb02   :  { %v5308_v43 = vmax.f32 %v13711_v0, -3e+38  ;;  %v5311_v0 = vmax.f32 %v13680_v28, -3e+38 }
 0xb04   :  { %v13733_v45 = vpop.xlane.xlu0 %5253  ;;  %v5514_v2 = vrot.slane %v5308_v43, %v10004_v17  ;;  %v5337_v43 = vmax.f32 %v13723_v19, -3e+38  ;;  %v5335_v19 = vmax.f32 %v13729_v25, -3e+38 }
 0xb05   :  { %v13715_v14 = vpop.xlane.xlu1 %5163 }
 0xb08   :  { %v13739_v37 = vpop.xlane.xlu0 %5175 }
 0xb09   :  { %v13717_v33 = vpop.xlane.xlu1 %5169 }
 0xb0c   :  { %v13747_v34 = vpop.xlane.xlu0 %5184 }
 0xb0d   :  { %v13721_v3 = vpop.xlane.xlu1 %5196 }
 0xb0e   :  { %v5321_v63 = vmax.f32 %v13721_v3, -3e+38 }
 0xb10   :  { %v13771_v35 = vpop.xlane.xlu0 %5259 }
 0xb11   :  { %v13725_v4 = vpop.xlane.xlu1 %5208 }
 0xb14   :  { %v13795_v38 = vpop.xlane.xlu0 %5268 }
 0xb15   :  { %v13727_v55 = vpop.xlane.xlu1 %5211 }
 0xb19   :  { %v13731_v49 = vpop.xlane.xlu1 %5220 }
 0xb1d   :  { %v13735_v58 = vpop.xlane.xlu1 %5214 }
 0xb21   :  { %v13737_v36 = vpop.xlane.xlu1 %5229 }
 0xb25   :  { %v13743_v59 = vpop.xlane.xlu1 %5226 }
 0xb29   :  { %v13753_v30 = vpop.xlane.xlu1 %5241 }
 0xb2c   :  { %v13759_v44 = vpop.f32.mrb[16].mxu1 }
 0xb2d   :  { %v9596_v31 = vpop.f32.mrb[17].mxu1  ;;  %v13765_v42 = vpop.xlane.xlu1 %5172 }
 0xb2e   :  { %v13773_v48 = vpop.f32.mrb[18].mxu1  ;;  %v5452_v31 = vrot.slane %v5295_v60, %v10010_v23  ;;  %v5304_v60 = vmax.f32 %v13705_v39, -3e+38  ;;  %v5306_v39 = vmax.f32 %v13707_v27, -3e+38  ;;  %v5509_v27 = vrot.slane %v5307_v56, %v10010_v23 }
 0xb2f   :  { %v9597_v11 = vpop.f32.mrb[19].mxu1  ;;  %v5328_v56 = vmax.f32 %v13699_v18, -3e+38  ;;  %v5491_v18 = vsel %vm17691_vm5, %v5490_v32, %v5486_v50  ;;  %v5326_v50 = vmax.f32 %v13727_v55, -3e+38  ;;  %v13878_v55 = vrot.slane %v5335_v19, %v10010_v23 }
 0xb30   :  { %v5462_v11 = vsel %vm17689_vm8, %v5461_v53, %v5457_v62  ;;  %v5453_v20 = vsel %vm17691_vm5, %v5452_v31, %v5448_v8  ;;  %v5495_v24 = vrot.slane %v5304_v60, %v10004_v17  ;;  %v5320_v8 = vmax.f32 %v13684_v51, -3e+38 }
 0xb31   :  { %v13783_v61 = vpop.xlane.xlu1 %5247  ;;  %v5467_v53 = vsel %vm17688_vm6, %v5466_v5, %v5462_v11  ;;  %v5518_v5 = vrot.slane %v5309_v12, %v10006_v21  ;;  %v5720_v6 = vsel %vm17692_vm7, %v5453_v20, %v5434_v40  ;;  %v5310_v11 = vmax.f32 %v13715_v14, -3e+38  ;;  %v13828_v40 = vpop.xlane.xlu0 %5187 }
 0xb32   :  { %v5472_v10 = vsel %vm17691_vm5, %v5471_v29, %v5467_v53  ;;  %v5504_v60 = vrot.slane %v5306_v39, %v10008_v22  ;;  %v5322_v51 = vmax.f32 %v13693_v52, -3e+38  ;;  %v5500_v14 = vsel %vm17689_vm8, %v5499_v1, %v5495_v24 }
 0xb33   :  { %v5528_v12 = vrot.slane %v5311_v0, %v10010_v23  ;;  %v5571_v20 = vrot.slane %v5320_v8, %v10004_v17  ;;  %v5323_v29 = vmax.f32 %v13703_v41, -3e+38  ;;  %vm17693_vm7 = vcmask 1042434  }
 0xb34   :  { %v9608_v62 = vpop.f32.mrb[14].mxu1  ;;  %v5721_v52 = vsel %vm17693_vm7, %v5472_v10, %v5720_v6  ;;  %v5333_v53 = vmax.f32 %v13713_v7, -3e+38  ;;  %v5523_v3 = vrot.slane %v5310_v11, %v10008_v22  ;;  %v5505_v39 = vsel %vm17688_vm6, %v5504_v60, %v5500_v14 }
 0xb35   :  { %v13801_v13 = vpop.xlane.xlu1 %5256  ;;  %6012 = vrot.lane.b32.xlu1 %v9608_v62, %s9859_s28  ;;  %v5913_v57 = vpop.f32.mrb[15].mxu1  ;;  %v5590_v41 = vrot.slane %v5324_v54, %v10004_v17  ;;  %v5609_v16 = vrot.slane %v5328_v56, %v10004_v17  ;;  %v5575_v7 = vrot.slane %v5321_v63, %v10006_v21  ;;  %v5585_v24 = vrot.slane %v5323_v29, %v10010_v23 }
 0xb36   :  { %v6003_v31 = vpack.c.bf16 %v9608_v62, %v5913_v57  ;;  %6010 = vrot.lane.b32.xlu0 %v5913_v57, %s9859_s28  ;;  %v5330_v62 = vmax.f32 %v13709_v9, -3e+38  ;;  %v5519_v57 = vsel %vm17689_vm8, %v5518_v5, %v5514_v2  ;;  %v5580_v9 = vrot.slane %v5322_v51, %v10008_v22  ;;  %v5272_v6 = vpop.xlane.xlu0 %5271 }
 0xb37   :  { %vm17694_vm7 = vcmask 1043459   ;;  %v5510_v32 = vsel %vm17691_vm5, %v5509_v27, %v5505_v39  ;;  %v5524_v0 = vsel %vm17688_vm6, %v5523_v3, %v5519_v57  ;;  %v5340_v8 = vmax.f32 %v13733_v45, -3e+38 }
 0xb38   :  { %9621 = vmatpush3.bf16.msra.mxu1 %v6003_v31  ;;  %v13851_v47 = vrot.slane %v5330_v62, %v10008_v22  ;;  %v5325_v5 = vmax.f32 %v13725_v4, -3e+38  ;;  %v5632_v10 = vrot.slane %v5333_v53, %v10006_v21  ;;  %v13861_v11 = vrot.slane %v5334_v15, %v10008_v22 }
 0xb39   :  { %v13820_v28 = vpop.xlane.xlu1 %5181  ;;  %6005 = vrot.lane.b32.xlu1 %v6003_v31, %s9860_s9  ;;  %9622 = vmatprep.subr.bf16.mxu1 %v17636_v26  ;;  %v13864_v54 = vrot.slane %v5337_v43, %v10006_v21  ;;  %v5312_v27 = vmax.f32 %v13717_v33, -3e+38  ;;  %v5314_v60 = vmax.f32 %v13739_v37, -3e+38  ;;  %v5576_v45 = vsel %vm17689_vm8, %v5575_v7, %v5571_v20 }
 0xb3a   :  { %7533 = vrot.lane.b32.xlu0 %v6003_v31, %s9864_s10  ;;  %v5722_v31 = vsel %vm17694_vm7, %v5491_v18, %v5721_v52  ;;  %v5329_v4 = vmax.f32 %v13731_v49, -3e+38  ;;  %vm17695_vm7 = vcmask 1044484   ;;  %v5529_v51 = vsel %vm17691_vm5, %v5528_v12, %v5524_v0  ;;  %v13890_v18 = vpop.xlane.xlu0 %5280 }
 0xb3b   :  { %v5723_v2 = vsel %vm17695_vm7, %v5510_v32, %v5722_v31  ;;  %v5317_v56 = vmax.f32 %v13747_v34, -3e+38  ;;  %v5342_v14 = vmax.f32 %v13771_v35, -3e+38  ;;  %v5666_v63 = vrot.slane %v5340_v8, %v10004_v17 }
 0xb3c   :  { %v5594_v33 = vrot.slane %v5325_v5, %v10006_v21  ;;  %v5327_v37 = vmax.f32 %v13735_v58, -3e+38  ;;  %v5581_v20 = vsel %vm17688_vm6, %v5580_v9, %v5576_v45  ;;  %v5599_v49 = vrot.slane %v5326_v50, %v10008_v22 }
 0xb3d   :  { %v13843_v1 = vpop.xlane.xlu1 %5250  ;;  %v5345_v29 = vmax.f32 %v13795_v38, -3e+38  ;;  %v5332_v12 = vmax.f32 %v13737_v36, -3e+38  ;;  %v5533_v35 = vrot.slane %v5312_v27, %v10004_v17  ;;  %v5542_v62 = vrot.slane %v5314_v60, %v10008_v22 }
 0xb3e   :  { %v5613_v52 = vrot.slane %v5329_v4, %v10006_v21  ;;  %vm17696_vm8 = vcmask 1045509   ;;  %v5556_v58 = vrot.slane %v5317_v56, %v10006_v21  ;;  %v5675_v3 = vrot.slane %v5342_v14, %v10008_v22 }
 0xb3f   :  { %v13893_v53 = vsel %vm17696_vm8, %v5529_v51, %v5723_v2  ;;  %v5318_v38 = vmax.f32 %v13828_v40, -3e+38  ;;  %v5313_v36 = vmax.f32 %v13765_v42, -3e+38  ;;  %vm17697_vm7 = vcmask 130112  }
 0xb40   :  { %v5595_v15 = vsel %vm17697_vm7, %v5594_v33, %v5590_v41  ;;  %v5586_v39 = vsel %vm17691_vm5, %v5585_v24, %v5581_v20  ;;  %v5604_v43 = vrot.slane %v5327_v37, %v10010_v23  ;;  %v5331_v57 = vmax.f32 %v13743_v59, -3e+38  ;;  %vm17698_vm8 = vmmov %vm17697_vm7 }
 0xb41   :  { %v13867_v25 = vpop.xlane.xlu1 %5265  ;;  %v5600_v9 = vsel %vm17688_vm6, %v5599_v49, %v5595_v15  ;;  %v5689_v7 = vrot.slane %v5345_v29, %v10006_v21  ;;  %v5628_v31 = vrot.slane %v5332_v12, %v10004_v17  ;;  %v5341_v19 = vmax.f32 %v13801_v13, -3e+38  ;;  %vm17699_vm7 = vmmov %vm17691_vm5  ;;  %v5275_v13 = vpop.xlane.xlu0 %5274 }
 0xb42   :  { %v5614_v40 = vsel %vm17698_vm8, %v5613_v52, %v5609_v16  ;;  %v5346_v42 = vmax.f32 %v5272_v6, -3e+38  ;;  %v5336_v41 = vmax.f32 %v13753_v30, -3e+38  ;;  %v5316_v24 = vmax.f32 %v13820_v28, -3e+38  ;;  %vm17700_vm5 = vmmov %vm17698_vm8 }
 0xb43   :  { %v5561_v0 = vrot.slane %v5318_v38, %v10008_v22  ;;  %v5537_v59 = vrot.slane %v5313_v36, %v10006_v21  ;;  %v5338_v8 = vmax.f32 %v13783_v61, -3e+38  ;;  %v5605_v50 = vsel %vm17699_vm7, %v5604_v43, %v5600_v9  ;;  %vm17702_vm7 = vmmov %vm17700_vm5 }
 0xb44   :  { %v5623_v27 = vrot.slane %v5331_v57, %v10010_v23  ;;  %v5339_v60 = vmax.f32 %v13843_v1, -3e+38  ;;  %v5344_v16 = vmax.f32 %v13867_v25, -3e+38  ;;  %v5633_v30 = vsel %vm17700_vm5, %v5632_v10, %v5628_v31  ;;  %vm17703_vm5 = vmmov %vm17688_vm6 }
 0xb45   :  { %v5179_v34 = vpop.xlane.xlu1 %5178  ;;  %v5619_v28 = vsel %vm17688_vm6, %v13851_v47, %v5614_v40  ;;  %v5670_v6 = vrot.slane %v5341_v19, %v10006_v21  ;;  %v5694_v61 = vrot.slane %v5346_v42, %v10008_v22  ;;  %v5349_v2 = vmax.f32 %v13890_v18, -3e+38  ;;  %vm17705_vm3 = vmmov %vm17702_vm7  ;;  %v5287_v18 = vpop.xlane.xlu0 %5286 }
 0xb46   :  { %v5315_v5 = vmax.f32 %v5179_v34, -3e+38  ;;  %v5647_v51 = vrot.slane %v5336_v41, %v10004_v17  ;;  %v5552_v56 = vrot.slane %v5316_v24, %v10004_v17  ;;  %vm17701_vm8 = vcmask 1041409   ;;  %vm17709_vm4 = vmmov %vm17703_vm5 }
 0xb47   :  { %v5727_v1 = vsel %vm17701_vm8, %v5605_v50, %v5586_v39  ;;  %v5538_v25 = vsel %vm17702_vm7, %v5537_v59, %v5533_v35  ;;  %v5656_v10 = vrot.slane %v5338_v8, %v10008_v22  ;;  %v5638_v14 = vsel %vm17703_vm5, %v13861_v11, %v5633_v30  ;;  %vm17706_vm8 = vmmov %vm17705_vm3 }
 0xb48   :  { %v5547_v47 = vrot.slane %v5315_v5, %v10010_v23  ;;  %vm17704_vm6 = vcmask 261312   ;;  %v5661_v37 = vrot.slane %v5339_v60, %v10010_v23  ;;  %v5685_v20 = vrot.slane %v5344_v16, %v10004_v17  ;;  %vm17707_vm7 = vmmov %vm17705_vm3 }
 0xb49   :  { %v5263_v32 = vpop.xlane.xlu1 %5262  ;;  %v5624_v33 = vsel %vm17704_vm6, %v5623_v27, %v5619_v28  ;;  %v5347_v49 = vmax.f32 %v5275_v13, -3e+38  ;;  %v5671_v29 = vsel %vm17705_vm3, %v5670_v6, %v5666_v63  ;;  %v5652_v52 = vsel %vm17706_vm8, %v13864_v54, %v5647_v51  ;;  %vm17710_vm3 = vmmov %vm17704_vm6  ;;  %v17722_v27 = vld [vmem:[#allocation56_spill] sm:$0xff] }
 0xb4a   :  { %v5343_v45 = vmax.f32 %v5263_v32, -3e+38  ;;  %v5557_v38 = vsel %vm17707_vm7, %v5556_v58, %v5552_v56  ;;  %v5543_v11 = vsel %vm17703_vm5, %v5542_v62, %v5538_v25  ;;  %v5643_v15 = vsel %vm17704_vm6, %v13878_v55, %v5638_v14  ;;  %vm17711_vm0 = vmmov %vm17710_vm3  ;;  %v17733_v56 = vld [vmem:[#allocation52_spill] sm:$0xff] }
 0xb4b   :  { %v5728_v39 = vsel %vm17708_vm12, %v5624_v33, %v5727_v1  ;;  %v5657_v63 = vsel %vm17709_vm4, %v5656_v10, %v5652_v52  ;;  %v5548_v43 = vsel %vm17710_vm3, %v5547_v47, %v5543_v11  ;;  %vm17712_vm2 = vmmov %vm17707_vm7  ;;  %v5351_v31 = vmax.f32 %v5287_v18, -3e+38  ;;  %v17736_v10 = vld [vmem:[#allocation58_spill] sm:$0xff] }
 0xb4c   :  { %v5680_v12 = vrot.slane %v5343_v45, %v10010_v23  ;;  %v5662_v57 = vsel %vm17711_vm0, %v5661_v37, %v5657_v63  ;;  %v5690_v9 = vsel %vm17712_vm2, %v5689_v7, %v5685_v20  ;;  %vm17713_vm8 = vmmov %vm17709_vm4  ;;  %vm17716_vm12 = vcmask 1043459  }
 0xb4d   :  { %v5278_v4 = vpop.xlane.xlu1 %5277  ;;  %v5676_v54 = vsel %vm17713_vm8, %v5675_v3, %v5671_v29  ;;  %vm17714_vm7 = vmmov %vm17711_vm0  ;;  %v5729_v40 = vsel %vm17716_vm12, %v5643_v15, %v5728_v39  ;;  %v5708_v3 = vrot.slane %v5349_v2, %v10006_v21  ;;  %vm17718_vm2 = vcmask 1044484   ;;  %v9755_v29 = vld [vmem:[%s16323_s2] sm:$0xff]  }
 0xb4e   :  { %v5348_v34 = vmax.f32 %v5278_v4, -3e+38  ;;  %v5681_v62 = vsel %vm17714_vm7, %v5680_v12, %v5676_v54  ;;  %vm17715_vm5 = vmmov %vm17709_vm4  ;;  %vm17717_vm4 = vcmask 1046534   ;;  %v5730_v24 = vsel %vm17718_vm2, %v5662_v57, %v5729_v40  ;;  %v17729_v4 = vld [vmem:[#allocation57_spill] sm:$0xff]  ;;  %v17748_v39 = vld [vmem:[#allocation20_spill] sm:$0xff] }
 0xb4f   :  { %v5562_v55 = vsel %vm17715_vm5, %v5561_v0, %v5557_v38  ;;  %v5725_v42 = vsel %vm17717_vm4, %v5548_v43, %v13893_v53  ;;  %vm17719_vm6 = vmmov %vm17715_vm5  ;;  %vm17720_vm3 = vcmask 1047559   ;;  %v5699_v5 = vrot.slane %v5347_v49, %v10010_v23  ;;  %v17752_v57 = vld [vmem:[#allocation23_spill] sm:$0xff]  ;;  %v17754_v54 = vld [vmem:[#allocation26_spill] sm:$0xff] }
 0xb50   :  { %v5704_v19 = vrot.slane %v5348_v34, %v10004_v17  ;;  %v5695_v59 = vsel %vm17719_vm6, %v5694_v61, %v5690_v9  ;;  %vm17721_vm8 = vcmask 1045509   ;;  %vm17723_vm7 = vcmp.eq.s32.totalorder %v17722_v27, 1  ;;  %vm17725_vm12 = vmmov %vm17711_vm0 }
 0xb51   :  { %v5191_v35 = vpop.xlane.xlu1 %5190  ;;  %v5731_v0 = vsel %vm17721_vm8, %v5681_v62, %v5730_v24  ;;  %v5718_v13 = vrot.slane %v5351_v31, %v10010_v23  ;;  %vm17724_vm5 = vcmask 130112   ;;  %v5700_v30 = vsel %vm17725_vm12, %v5699_v5, %v5695_v59  ;;  %vm17726_vm4 = vmmov %vm17719_vm6  ;;  %v17764_v24 = vld [vmem:[#allocation24_spill] sm:$0xff] }
 0xb52   :  { %v5319_v36 = vmax.f32 %v5191_v35, -3e+38  ;;  %v5709_v60 = vsel %vm17724_vm5, %v5708_v3, %v5704_v19  ;;  %vm17728_vm2 = vmmov %vm17725_vm12  ;;  %v17730_v61 = vmax.f32 %v17729_v4, 0.0  ;;  %vm17735_vm8 = vcmask 261120   ;;  %v17758_v19 = vld [vmem:[#allocation22_spill] sm:$0xff] }
 0xb53   :  { %vm17732_vm6 = vmmov %vm17720_vm3  ;;  %v17737_v47 = vmax.f32 %v17736_v10, 0.0  ;;  %vm17741_vm12 = vcmask 130048  }
 0xb54   :  { %v5566_v58 = vrot.slane %v5319_v36, %v10010_v23  ;;  %v17746_v36 = vld [vmem:[#allocation19_spill] sm:$0xff] }
 0xb55   :  { %v5284_v32 = vpop.xlane.xlu1 %5283 }
 0xb56   :  { %v5567_v41 = vsel %vm17711_vm0, %v5566_v58, %v5562_v55  ;;  %v5350_v7 = vmax.f32 %v5284_v32, -3e+38  ;;  %vm17727_vm0 = vcmask 1046534   ;;  %v17760_v32 = vld [vmem:[#allocation21_spill] sm:$0xff] }
 0xb57   :  { %v5726_v8 = vsel %vm17720_vm3, %v5567_v41, %v5725_v42  ;;  %v5732_v6 = vsel %vm17727_vm0, %v5700_v30, %v5731_v0  ;;  %vm17734_vm3 = vcmp.eq.s32.totalorder %v17733_v56, 1 }
 0xb58   :  { %v5713_v50 = vrot.slane %v5350_v7, %v10008_v22  ;;  %v5736_v53 = vsel %vm17723_vm7, %v5726_v8, 0.0  ;;  %vm17739_vm7 = vmmov %vm17735_vm8  ;;  %v17766_v8 = vld [vmem:[#allocation27_spill] sm:$0xff] }
 0xb59   :  { %v5817_v16 = vadd.f32 %v13759_v44, %v5736_v53  ;;  %vm17740_vm5 = vmmov %vm17739_vm7  ;;  %v17770_v53 = vld [vmem:[#allocation16_spill] sm:$0xff] }
 0xb5a   :  { %v5714_v28 = vsel %vm17726_vm4, %v5713_v50, %v5709_v60  ;;  %vm17744_vm4 = vmmov %vm17741_vm12  ;;  %v17772_v60 = vld [vmem:[#allocation28_spill] sm:$0xff] }
 0xb5b   :  { %v5719_v45 = vsel %vm17728_vm2, %v5718_v13, %v5714_v28  ;;  %v13974_v2 = vadd.f32 %v5817_v16, %v17730_v61  ;;  %vm17745_vm0 = vmmov %vm17744_vm4  ;;  %vm17747_vm2 = vnez %v17746_v36  ;;  %v17778_v61 = vld [vmem:[#allocation29_spill] sm:$0xff] }
 0xb5c   :  { %v5733_v51 = vsel %vm17732_vm6, %v5719_v45, %v5732_v6  ;;  %vm17749_vm6 = vnez %v17748_v39  ;;  %v17776_v45 = vld [vmem:[#allocation25_spill] sm:$0xff] }
 0xb5d   :  { %17731 = vst [vmem:[#allocation71_spill] sm:$0xff] %v13974_v2  ;;  %v5737_v1 = vsel %vm17734_vm3, %v5733_v51, 0.0  ;;  %v16647_v25 = vmax.f32 %v13974_v2, 0.0  ;;  %vm17750_vm3 = vmmov %vm17745_vm0 }
 0xb5e   :  { %v5820_v44 = vadd.f32 %v13773_v48, %v5737_v1 }
 0xb5f   :  { %9617 = vmatprep.mubr.msk.f32.mxu0 %vm17735_vm8, %v16647_v25  ;;  %vm17751_vm8 = vmmov %vm17745_vm0 }
 0xb60   :  { %v13986_v14 = vadd.f32 %v5820_v44, %v17737_v47  ;;  %v17782_v47 = vld [vmem:[#allocation30_spill] sm:$0xff] }
 0xb62   :  { %17738 = vst [vmem:[#allocation79_spill] sm:$0xff] %v13986_v14  ;;  %v16646_v33 = vmax.f32 %v13986_v14, 0.0 }
 0xb64   :  { %9618 = vmatmul.mubr.msk.f32.vlgmr.msra.gmra.mrb[14].mxu0 %vm17739_vm7, %v16646_v33  ;;  %vm17753_vm7 = vnez %v17752_v57 }
 0xb65   :  { %9630 = vmatprep.mubr.msk.bf16.mxu0 %vm17642_vm9, %v17636_v26 }
 0xba7   :  { %v6013_v37 = vpop.permute.xlu1 %6012 }
 0xba8   :  { %v6011_v20 = vpop.permute.xlu0 %6010 }
 0xba9   :  { %6016 = vxpose.xlu1.b32.start [1/2] (short) (narrow) %v6011_v20, 32 }
 0xbab   :  { %v6006_v48 = vpop.permute.xlu1 %6005 }
 0xbac   :  { %v7534_v49 = vpop.permute.xlu0 %7533  ;;  %9623 = vmatpush3.bf16.msra.mxu1 %v6006_v48 }
 0xbad   :  { %9629 = vmatpush3.bf16.msra.mxu0 %v7534_v49  ;;  %6017 = vxpose.xlu1.b32.end [2/2] (short) (narrow) %v6013_v37, 32 }
 0xbaf   :  { %9625 = vmatmul.mubr.msk.bf16.vlgmr.msra.gmra.mrb[20].mxu1 %vm17740_vm5, %v9755_v29  ;;  %vm17755_vm5 = vnez %v17754_v54  ;;  %v17786_v29 = vld [vmem:[#allocation31_spill] sm:$0xff] }
 0xbb0   :  { %9631 = vmatmul.mubr.msk.bf16.vlgmr.msra.gmra.mrb[20].mxu0 %vm17741_vm12, %v13462_v46  ;;  %vm17756_vm12 = vmmov %vm17745_vm0 }
 0xc29   :  { %v6032_v12 = vpop.trf.xlu1 }
 0xc2a   :  { %v6052_v35 = vsel %vm17073_vm13, %v6032_v12, -3e+38  ;;  %v6048_v18 = vsel %vm16992_vm10, %v6032_v12, -3e+38  ;;  %v6064_v15 = vsel %vm17747_vm2, %v6032_v12, -3e+38 }
 0xc2b   :  { %v6124_v38 = vsel %vm17744_vm4, %v6052_v35, -inf  ;;  %v6112_v11 = vsel %vm17745_vm0, %v6048_v18, -inf  ;;  %v6056_v63 = vsel %vm17749_vm6, %v6032_v12, -3e+38  ;;  %v6160_v46 = vsel %vm17750_vm3, %v6064_v15, -inf  ;;  %vm17757_vm4 = vmmov %vm17745_vm0 }
 0xc2c   :  { %6125 = vmax.xlane.f32.xlu1 %v6124_v38  ;;  %6113 = vmax.xlane.f32.xlu0 %v6112_v11  ;;  %v6136_v43 = vsel %vm17751_vm8, %v6056_v63, -inf  ;;  %v6068_v9 = vsel %vm17753_vm7, %v6032_v12, -3e+38  ;;  %v6060_v58 = vsel %vm17755_vm5, %v6032_v12, -3e+38  ;;  %vm17759_vm0 = vnez %v17758_v19  ;;  %vm17762_vm8 = vmmov %vm17757_vm4 }
 0xc2d   :  { %v6172_v31 = vsel %vm17756_vm12, %v6068_v9, -inf  ;;  %v6148_v62 = vsel %vm17757_vm4, %v6060_v58, -inf  ;;  %v6080_v55 = vsel %vm17759_vm0, %v6032_v12, -3e+38  ;;  %vm17761_vm3 = vnez %v17760_v32  ;;  %vm17763_vm9 = vmmov %vm17757_vm4  ;;  %v14040_v6 = vpop.trf.xlu1 }
 0xc2e   :  { %v6092_v40 = vsel %vm17761_vm3, %v6032_v12, -3e+38  ;;  %v6208_v41 = vsel %vm17762_vm8, %v6080_v55, -inf  ;;  %vm17765_vm12 = vnez %v17764_v24  ;;  %vm17767_vm4 = vnez %v17766_v8  ;;  %vm17768_vm15 = vmmov %vm17762_vm8 }
 0xc2f   :  { %v6244_v7 = vsel %vm17763_vm9, %v6092_v40, -inf  ;;  %v6084_v59 = vsel %vm17765_vm12, %v6032_v12, -3e+38  ;;  %v6072_v5 = vsel %vm17767_vm4, %v6032_v12, -3e+38  ;;  %vm17769_vm11 = vmmov %vm17762_vm8  ;;  %vm17771_vm8 = vnez %v17770_v53 }
 0xc30   :  { %6161 = vmax.xlane.f32.xlu1 %v6160_v46  ;;  %6137 = vmax.xlane.f32.xlu0 %v6136_v43  ;;  %v6220_v0 = vsel %vm17768_vm15, %v6084_v59, -inf  ;;  %v6184_v50 = vsel %vm17769_vm11, %v6072_v5, -inf  ;;  %v6088_v13 = vsel %vm17771_vm8, %v6032_v12, -3e+38  ;;  %vm17773_vm9 = vnez %v17772_v60  ;;  %vm17774_vm14 = vmmov %vm17769_vm11 }
 0xc31   :  { %v6100_v16 = vsel %vm17773_vm9, %v6032_v12, -3e+38  ;;  %v6232_v30 = vsel %vm17774_vm14, %v6088_v13, -inf  ;;  %vm17775_vm1 = vmmov %vm17769_vm11  ;;  %vm17777_vm15 = vnez %v17776_v45  ;;  %vm17779_vm11 = vnez %v17778_v61 }
 0xc32   :  { %v6268_v28 = vsel %vm17775_vm1, %v6100_v16, -inf  ;;  %v6096_v4 = vsel %vm17777_vm15, %v6032_v12, -3e+38  ;;  %v6076_v51 = vsel %vm17779_vm11, %v6032_v12, -3e+38  ;;  %vm17780_vm7 = vmmov %vm17775_vm1 }
 0xc33   :  { %v6061_v1 = vsel %vm17755_vm5, %v14040_v6, -3e+38  ;;  %v6256_v44 = vsel %vm17780_vm7, %v6096_v4, -inf  ;;  %vm17781_vm8 = vmmov %vm17775_vm1  ;;  %vm17783_vm1 = vnez %v17782_v47  ;;  %v6065_v48 = vsel %vm17747_vm2, %v14040_v6, -3e+38 }
 0xc34   :  { %6173 = vmax.xlane.f32.xlu1 %v6172_v31  ;;  %6149 = vmax.xlane.f32.xlu0 %v6148_v62  ;;  %v6196_v10 = vsel %vm17781_vm8, %v6076_v51, -inf  ;;  %v6104_v37 = vsel %vm17783_vm1, %v6032_v12, -3e+38  ;;  %vm17784_vm14 = vmmov %vm17780_vm7  ;;  %vm17787_vm5 = vnez %v17786_v29  ;;  %v6163_v18 = vsel %vm17780_vm7, %v6065_v48, -inf }
 0xc35   :  { %v6151_v20 = vsel %vm17784_vm14, %v6061_v1, -inf  ;;  %vm17785_vm15 = vmmov %vm17780_vm7  ;;  %v6108_v35 = vsel %vm17787_vm5, %v6032_v12, -3e+38  ;;  %v6081_v38 = vsel %vm17759_vm0, %v14040_v6, -3e+38  ;;  %v14110_v1 = vpop.trf.xlu1 }
 0xc36   :  { %v6280_v49 = vsel %vm17785_vm15, %v6104_v37, -inf  ;;  %v6049_v11 = vsel %vm16992_vm10, %v14040_v6, -3e+38  ;;  %vm17788_vm8 = vmmov %vm17780_vm7  ;;  %v6093_v12 = vsel %vm17761_vm3, %v14040_v6, -3e+38 }
 0xc37   :  { %v14022_v42 = vpop.f32.mrb[14].mxu0  ;;  %v6292_v15 = vsel %vm17788_vm8, %v6108_v35, -inf  ;;  %vm17789_vm15 = vmmov %vm17780_vm7  ;;  %v6053_v43 = vsel %vm17073_vm13, %v14040_v6, -3e+38  ;;  %v6247_v9 = vsel %vm17780_vm7, %v6093_v12, -inf }
 0xc38   :  { %6209 = vmax.xlane.f32.xlu1 %v6208_v41  ;;  %6245 = vmax.xlane.f32.xlu0 %v6244_v7  ;;  %v14026_v3 = vpop.f32.mrb[15].mxu0  ;;  %v6211_v63 = vsel %vm17789_vm15, %v6081_v38, -inf  ;;  %vm17790_vm14 = vmmov %vm17780_vm7  ;;  %v6073_v31 = vsel %vm17767_vm4, %v14040_v6, -3e+38  ;;  %v6057_v62 = vsel %vm17749_vm6, %v14040_v6, -3e+38 }
 0xc39   :  { %v6115_v46 = vsel %vm17790_vm14, %v6049_v11, -inf  ;;  %vm17791_vm0 = vmmov %vm17780_vm7  ;;  %v6101_v41 = vsel %vm17773_vm9, %v14040_v6, -3e+38  ;;  %v6085_v7 = vsel %vm17765_vm12, %v14040_v6, -3e+38  ;;  %vm17795_vm7 = vnez %v17770_v53 }
 0xc3a   :  { %v6127_v58 = vsel %vm17791_vm0, %v6053_v43, -inf  ;;  %vm17792_vm8 = vmmov %vm17791_vm0  ;;  %v6271_v59 = vsel %vm17791_vm0, %v6101_v41, -inf  ;;  %v6054_v38 = vsel %vm17073_vm13, %v14110_v1, -3e+38 }
 0xc3b   :  { %v6187_v55 = vsel %vm17792_vm8, %v6073_v31, -inf  ;;  %vm17793_vm15 = vmmov %vm17791_vm0 }
 0xc3c   :  { %6221 = vmax.xlane.f32.xlu1 %v6220_v0  ;;  %6185 = vmax.xlane.f32.xlu0 %v6184_v50  ;;  %v6139_v40 = vsel %vm17793_vm15, %v6057_v62, -inf  ;;  %vm17794_vm14 = vmmov %vm17791_vm0  ;;  %v6077_v0 = vsel %vm17779_vm11, %v14040_v6, -3e+38  ;;  %v6089_v50 = vsel %vm17795_vm7, %v14040_v6, -3e+38 }
 0xc3d   :  { %v6223_v5 = vsel %vm17794_vm14, %v6085_v7, -inf  ;;  %vm17796_vm8 = vmmov %vm17791_vm0 }
 0xc3e   :  { %v6199_v13 = vsel %vm17796_vm8, %v6077_v0, -inf  ;;  %vm17797_vm15 = vmmov %vm17791_vm0  ;;  %vm17798_vm0 = vnez %v17752_v57  ;;  %v6110_v0 = vsel %vm17787_vm5, %v14110_v1, -3e+38 }
 0xc3f   :  { %v6235_v16 = vsel %vm17797_vm15, %v6089_v50, -inf  ;;  %vm17799_vm14 = vmmov %vm17796_vm8  ;;  %vm17802_vm15 = vnez %v17754_v54 }
 0xc40   :  { %6233 = vmax.xlane.f32.xlu1 %v6232_v30  ;;  %6269 = vmax.xlane.f32.xlu0 %v6268_v28  ;;  %v6105_v30 = vsel %vm17783_vm1, %v14040_v6, -3e+38  ;;  %v6069_v28 = vsel %vm17798_vm0, %v14040_v6, -3e+38  ;;  %vm17800_vm11 = vmmov %vm17796_vm8  ;;  %vm17801_vm8 = vnez %v17776_v45  ;;  %v6062_v37 = vsel %vm17802_vm15, %v14110_v1, -3e+38 }
 0xc41   :  { %v6283_v4 = vsel %vm17799_vm14, %v6105_v30, -inf  ;;  %v6175_v51 = vsel %vm17800_vm11, %v6069_v28, -inf  ;;  %vm17803_vm14 = vmmov %vm17800_vm11  ;;  %v6074_v30 = vsel %vm17767_vm4, %v14110_v1, -3e+38 }
 0xc42   :  { %vm17804_vm1 = vmmov %vm17800_vm11 }
 0xc43   :  { %v6154_v35 = vsel %vm17804_vm1, %v6062_v37, -inf  ;;  %vm17805_vm9 = vmmov %vm17804_vm1 }
 0xc44   :  { %6257 = vmax.xlane.f32.xlu1 %v6256_v44  ;;  %6197 = vmax.xlane.f32.xlu0 %v6196_v10  ;;  %v6109_v44 = vsel %vm17787_vm5, %v14040_v6, -3e+38  ;;  %v6097_v10 = vsel %vm17801_vm8, %v14040_v6, -3e+38  ;;  %v6066_v6 = vsel %vm17747_vm2, %v14110_v1, -3e+38  ;;  %vm17806_vm15 = vmmov %vm17804_vm1  ;;  %vm17816_vm5 = vnez %v17772_v60 }
 0xc45   :  { %v6295_v48 = vsel %vm17800_vm11, %v6109_v44, -inf  ;;  %v6166_v11 = vsel %vm17806_vm15, %v6066_v6, -inf  ;;  %vm17807_vm11 = vmmov %vm17804_vm1  ;;  %vm17808_vm1 = vnez %v17758_v19 }
 0xc46   :  { %vm17810_vm15 = vmmov %vm17805_vm9 }
 0xc48   :  { %6281 = vmax.xlane.f32.xlu0 %v6280_v49  ;;  %6152 = vmax.xlane.f32.xlu1 %v6151_v20  ;;  %v6050_v20 = vsel %vm16992_vm10, %v14110_v1, -3e+38  ;;  %v6259_v49 = vsel %vm17803_vm14, %v6097_v10, -inf  ;;  %vm17809_vm14 = vmmov %vm17805_vm9 }
 0xc4c   :  { %6293 = vmax.xlane.f32.xlu0 %v6292_v15  ;;  %6164 = vmax.xlane.f32.xlu1 %v6163_v18  ;;  %v6118_v18 = vsel %vm17805_vm9, %v6050_v20, -inf  ;;  %v6130_v15 = vsel %vm17807_vm11, %v6054_v38, -inf  ;;  %vm17811_vm11 = vmmov %vm17805_vm9 }
 0xc50   :  { %6212 = vmax.xlane.f32.xlu1 %v6211_v63  ;;  %6116 = vmax.xlane.f32.xlu0 %v6115_v46  ;;  %v6082_v63 = vsel %vm17808_vm1, %v14110_v1, -3e+38  ;;  %v6058_v46 = vsel %vm17749_vm6, %v14110_v1, -3e+38 }
 0xc51   :  { %v6214_v12 = vsel %vm17805_vm9, %v6082_v63, -inf  ;;  %v6142_v43 = vsel %vm17809_vm14, %v6058_v46, -inf  ;;  %vm17812_vm14 = vmmov %vm17805_vm9 }
 0xc54   :  { %6248 = vmax.xlane.f32.xlu1 %v6247_v9  ;;  %6128 = vmax.xlane.f32.xlu0 %v6127_v58  ;;  %v6090_v9 = vsel %vm17795_vm7, %v14110_v1, -3e+38  ;;  %v6086_v58 = vsel %vm17765_vm12, %v14110_v1, -3e+38 }
 0xc55   :  { %v6238_v31 = vsel %vm17810_vm15, %v6090_v9, -inf  ;;  %v6226_v62 = vsel %vm17811_vm11, %v6086_v58, -inf  ;;  %vm17813_vm15 = vmmov %vm17805_vm9 }
 0xc56   :  { %vm17814_vm11 = vmmov %vm17805_vm9 }
 0xc58   :  { %6188 = vmax.xlane.f32.xlu1 %v6187_v55  ;;  %6140 = vmax.xlane.f32.xlu0 %v6139_v40  ;;  %v6070_v55 = vsel %vm17798_vm0, %v14110_v1, -3e+38  ;;  %v6094_v40 = vsel %vm17761_vm3, %v14110_v1, -3e+38 }
 0xc59   :  { %v6178_v41 = vsel %vm17805_vm9, %v6070_v55, -inf  ;;  %v6250_v7 = vsel %vm17812_vm14, %v6094_v40, -inf  ;;  %vm17815_vm14 = vmmov %vm17805_vm9 }
 0xc5c   :  { %6272 = vmax.xlane.f32.xlu1 %v6271_v59  ;;  %6224 = vmax.xlane.f32.xlu0 %v6223_v5  ;;  %v14160_v59 = vpop.trf.xlu1  ;;  %v6098_v5 = vsel %vm17801_vm8, %v14110_v1, -3e+38 }
 0xc5d   :  { %v6051_v50 = vsel %vm16992_vm10, %v14160_v59, -3e+38  ;;  %v6055_v44 = vsel %vm17073_vm13, %v14160_v59, -3e+38  ;;  %v6087_v63 = vsel %vm17765_vm12, %v14160_v59, -3e+38 }
 0xc5e   :  { %v6121_v28 = vsel %vm17805_vm9, %v6051_v50, -inf  ;;  %v6103_v50 = vsel %vm17816_vm5, %v14160_v59, -3e+38 }
 0xc60   :  { %6200 = vmax.xlane.f32.xlu1 %v6199_v13  ;;  %6236 = vmax.xlane.f32.xlu0 %v6235_v16  ;;  %v6262_v13 = vsel %vm17813_vm15, %v6098_v5, -inf  ;;  %v6298_v16 = vsel %vm17814_vm11, %v6110_v0, -inf  ;;  %vm17817_vm15 = vmmov %vm17805_vm9  ;;  %v6075_v5 = vsel %vm17767_vm4, %v14160_v59, -3e+38 }
 0xc61   :  { %vm17818_vm11 = vmmov %vm17805_vm9  ;;  %vm17819_vm9 = vnez %v17778_v61 }
 0xc62   :  { %v6133_v37 = vsel %vm17818_vm11, %v6055_v44, -inf  ;;  %v6078_v20 = vsel %vm17819_vm9, %v14110_v1, -3e+38  ;;  %vm17821_vm10 = vmmov %vm17818_vm11 }
 0xc63   :  { %vm17824_vm13 = vmmov %vm17821_vm10 }
 0xc64   :  { %6284 = vmax.xlane.f32.xlu1 %v6283_v4  ;;  %6176 = vmax.xlane.f32.xlu0 %v6175_v51  ;;  %v6190_v4 = vsel %vm17815_vm14, %v6074_v30, -inf  ;;  %v6102_v51 = vsel %vm17816_vm5, %v14110_v1, -3e+38  ;;  %vm17820_vm14 = vmmov %vm17818_vm11  ;;  %vm17823_vm11 = vnez %v17754_v54 }
 0xc65   :  { %v6274_v10 = vsel %vm17817_vm15, %v6102_v51, -inf  ;;  %vm17822_vm15 = vnez %v17782_v47  ;;  %v6063_v6 = vsel %vm17823_vm11, %v14160_v59, -3e+38  ;;  %vm17825_vm9 = vmmov %vm17821_vm10 }
 0xc66   :  { %v6193_v0 = vsel %vm17825_vm9, %v6075_v5, -inf }
 0xc68   :  { %6296 = vmax.xlane.f32.xlu1 %v6295_v48  ;;  %6260 = vmax.xlane.f32.xlu0 %v6259_v49  ;;  %v6059_v48 = vsel %vm17749_vm6, %v14160_v59, -3e+38  ;;  %v6202_v49 = vsel %vm17820_vm14, %v6078_v20, -inf  ;;  %vm17827_vm14 = vmmov %vm17825_vm9 }
 0xc69   :  { %v6229_v46 = vsel %vm17827_vm14, %v6087_v63, -inf  ;;  %vm17830_vm14 = vmmov %vm17825_vm9 }
 0xc6c   :  { %6155 = vmax.xlane.f32.xlu1 %v6154_v35  ;;  %6119 = vmax.xlane.f32.xlu0 %v6118_v18  ;;  %v6145_v35 = vsel %vm17821_vm10, %v6059_v48, -inf  ;;  %v6106_v18 = vsel %vm17822_vm15, %v14110_v1, -3e+38  ;;  %vm17826_vm10 = vmmov %vm17825_vm9 }
 0xc6d   :  { %v6286_v38 = vsel %vm17824_vm13, %v6106_v18, -inf  ;;  %vm17828_vm13 = vmmov %vm17825_vm9 }
 0xc70   :  { %6167 = vmax.xlane.f32.xlu1 %v6166_v11  ;;  %6131 = vmax.xlane.f32.xlu0 %v6130_v15  ;;  %v6157_v11 = vsel %vm17825_vm9, %v6063_v6, -inf  ;;  %v6067_v15 = vsel %vm17747_vm2, %v14160_v59, -3e+38 }
 0xc71   :  { %v6169_v1 = vsel %vm17826_vm10, %v6067_v15, -inf  ;;  %vm17829_vm10 = vmmov %vm17825_vm9 }
 0xc74   :  { %6215 = vmax.xlane.f32.xlu1 %v6214_v12  ;;  %6143 = vmax.xlane.f32.xlu0 %v6142_v43  ;;  %v6083_v12 = vsel %vm17808_vm1, %v14160_v59, -3e+38  ;;  %v6095_v43 = vsel %vm17761_vm3, %v14160_v59, -3e+38  ;;  %vm17857_vm3 = vcmask 130112  }
 0xc75   :  { %v6217_v9 = vsel %vm17828_vm13, %v6083_v12, -inf  ;;  %v6253_v58 = vsel %vm17825_vm9, %v6095_v43, -inf  ;;  %vm17831_vm13 = vmmov %vm17825_vm9 }
 0xc78   :  { %6239 = vmax.xlane.f32.xlu1 %v6238_v31  ;;  %6227 = vmax.xlane.f32.xlu0 %v6226_v62  ;;  %v6091_v31 = vsel %vm17795_vm7, %v14160_v59, -3e+38  ;;  %v6071_v62 = vsel %vm17798_vm0, %v14160_v59, -3e+38 }
 0xc79   :  { %v6241_v55 = vsel %vm17829_vm10, %v6091_v31, -inf  ;;  %v6181_v40 = vsel %vm17830_vm14, %v6071_v62, -inf  ;;  %vm17832_vm10 = vmmov %vm17825_vm9  ;;  %vm17833_vm14 = vnez %v17778_v61 }
 0xc7c   :  { %6179 = vmax.xlane.f32.xlu1 %v6178_v41  ;;  %6251 = vmax.xlane.f32.xlu0 %v6250_v7  ;;  %v6099_v41 = vsel %vm17801_vm8, %v14160_v59, -3e+38 }
 0xc7d   :  { %v6265_v7 = vsel %vm17831_vm13, %v6099_v41, -inf  ;;  %vm17834_vm13 = vmmov %vm17825_vm9  ;;  %vm17845_vm9 = vcmask 130112  }
 0xc7e   :  { %vm17848_vm5 = vmmov %vm17845_vm9 }
 0xc80   :  { %6263 = vmax.xlane.f32.xlu1 %v6262_v13  ;;  %6299 = vmax.xlane.f32.xlu0 %v6298_v16  ;;  %v6277_v13 = vsel %vm17832_vm10, %v6103_v50, -inf  ;;  %v6079_v16 = vsel %vm17833_vm14, %v14160_v59, -3e+38  ;;  %vm17846_vm10 = vmmov %vm17845_vm9 }
 0xc81   :  { %v6205_v30 = vsel %vm17834_vm13, %v6079_v16, -inf  ;;  %vm17847_vm13 = vmmov %vm17845_vm9 }
 0xc84   :  { %6191 = vmax.xlane.f32.xlu1 %v6190_v4  ;;  %6122 = vmax.xlane.f32.xlu0 %v6121_v28 }
 0xc88   :  { %6275 = vmax.xlane.f32.xlu1 %v6274_v10  ;;  %6134 = vmax.xlane.f32.xlu0 %v6133_v37  ;;  %v14250_v10 = vpop.f32.mrb[20].mxu1 }
 0xc89   :  { %v9626_v48 = vpop.f32.mrb[21].mxu1 }
 0xc8c   :  { %6203 = vmax.xlane.f32.xlu1 %v6202_v49  ;;  %6146 = vmax.xlane.f32.xlu0 %v6145_v35 }
 0xc90   :  { %6287 = vmax.xlane.f32.xlu1 %v6286_v38  ;;  %6158 = vmax.xlane.f32.xlu0 %v6157_v11 }
 0xc94   :  { %6170 = vmax.xlane.f32.xlu1 %v6169_v1  ;;  %6230 = vmax.xlane.f32.xlu0 %v6229_v46 }
 0xc98   :  { %6218 = vmax.xlane.f32.xlu1 %v6217_v9  ;;  %6254 = vmax.xlane.f32.xlu0 %v6253_v58 }
 0xc9c   :  { %6242 = vmax.xlane.f32.xlu1 %v6241_v55  ;;  %6182 = vmax.xlane.f32.xlu0 %v6181_v40 }
 0xca0   :  { %6266 = vmax.xlane.f32.xlu0 %v6265_v7 }
 0xca4   :  { %6194 = vmax.xlane.f32.xlu0 %v6193_v0 }
 0xca8   :  { %6278 = vmax.xlane.f32.xlu0 %v6277_v13 }
 0xcac   :  { %6206 = vmax.xlane.f32.xlu0 %v6205_v30 }
 0xcb9   :  { %v14242_v28 = vpop.xlane.xlu0 %6113  ;;  %v14244_v4 = vpop.xlane.xlu1 %6125 }
 0xcba   :  { %v6304_v56 = vmax.f32 %v14242_v28, -3e+38  ;;  %v6308_v27 = vmax.f32 %v14244_v4, -3e+38 }
 0xcbd   :  { %v14246_v51 = vpop.xlane.xlu0 %6137  ;;  %v14248_v44 = vpop.xlane.xlu1 %6161 }
 0xcc1   :  { %v14252_v37 = vpop.xlane.xlu0 %6149  ;;  %v14254_v20 = vpop.xlane.xlu1 %6173 }
 0xcc5   :  { %v14256_v49 = vpop.xlane.xlu0 %6245  ;;  %v14258_v35 = vpop.xlane.xlu1 %6209 }
 0xcc9   :  { %v14260_v18 = vpop.xlane.xlu0 %6185  ;;  %v14262_v6 = vpop.xlane.xlu1 %6221 }
 0xccd   :  { %v14264_v38 = vpop.xlane.xlu0 %6269  ;;  %v14266_v11 = vpop.xlane.xlu1 %6233 }
 0xcd1   :  { %v14268_v15 = vpop.xlane.xlu0 %6197  ;;  %v14270_v63 = vpop.xlane.xlu1 %6257 }
 0xcd2   :  { %v6332_v28 = vmax.f32 %v14268_v15, -3e+38 }
 0xcd5   :  { %v14272_v1 = vpop.xlane.xlu0 %6281  ;;  %v6153_v46 = vpop.xlane.xlu1 %6152 }
 0xcd6   :  { %v6317_v2 = vmax.f32 %v6153_v46, -3e+38 }
 0xcd8   :  { %v6496_v4 = vrot.slane %v6317_v2, %v10006_v21 }
 0xcd9   :  { %v14274_v12 = vpop.xlane.xlu0 %6293  ;;  %v6165_v43 = vpop.xlane.xlu1 %6164  ;;  %6754 = vxpose.xlu0.b32.start [1/2] (short) (narrow) %v14026_v3, 32 }
 0xcdd   :  { %v6117_v9 = vpop.xlane.xlu0 %6116  ;;  %v14277_v58 = vpop.xlane.xlu1 %6212  ;;  %6755 = vxpose.xlu0.b32.end [2/2] (short) (narrow) %v14022_v42, 32 }
 0xce1   :  { %v6129_v31 = vpop.xlane.xlu0 %6128  ;;  %v14280_v62 = vpop.xlane.xlu1 %6248 }
 0xce5   :  { %v6141_v55 = vpop.xlane.xlu0 %6140  ;;  %v6189_v40 = vpop.xlane.xlu1 %6188 }
 0xce6   :  { %v6329_v46 = vmax.f32 %v6189_v40, -3e+38 }
 0xce9   :  { %v14282_v41 = vpop.xlane.xlu0 %6224  ;;  %v14284_v7 = vpop.xlane.xlu1 %6272 }
 0xced   :  { %v14286_v5 = vpop.xlane.xlu0 %6236  ;;  %v14288_v0 = vpop.xlane.xlu1 %6200 }
 0xcf1   :  { %v14290_v50 = vpop.xlane.xlu0 %6176  ;;  %v14292_v3 = vpop.xlane.xlu1 %6284 }
 0xcf2   :  { %17835 = vst [vmem:[#allocation72_spill] sm:$0xff] %v14292_v3  ;;  %v6320_v3 = vmax.f32 %v14248_v44, -3e+38  ;;  %v6454_v44 = vrot.slane %v6308_v27, %v10004_v17  ;;  %v6553_v27 = vrot.slane %v6329_v46, %v10006_v21 }
 0xcf4   :  { %v6511_v2 = vrot.slane %v6320_v3, %v10004_v17 }
 0xcf5   :  { %v14294_v13 = vpop.xlane.xlu0 %6260  ;;  %v14296_v42 = vpop.xlane.xlu1 %6296 }
 0xcf6   :  { %17836 = vst [vmem:[#allocation80_spill] sm:$0xff] %v14294_v13  ;;  %17837 = vst [vmem:[#allocation78_spill] sm:$0xff] %v14296_v42  ;;  %v6305_v42 = vmax.f32 %v6117_v9, -3e+38  ;;  %v6316_v13 = vmax.f32 %v14252_v37, -3e+38 }
 0xcf9   :  { %v14298_v16 = vpop.xlane.xlu0 %6119  ;;  %v14300_v30 = vpop.xlane.xlu1 %6155 }
 0xcfd   :  { %v14302_v48 = vpop.xlane.xlu0 %6131  ;;  %v14304_v33 = vpop.xlane.xlu1 %6167 }
 0xcfe   :  { %v6310_v3 = vmax.f32 %v14302_v48, -3e+38 }
 0xd01   :  { %v14306_v25 = vpop.xlane.xlu0 %6143  ;;  %v14308_v60 = vpop.xlane.xlu1 %6215 }
 0xd05   :  { %v14310_v45 = vpop.xlane.xlu0 %6227  ;;  %v14312_v32 = vpop.xlane.xlu1 %6239 }
 0xd06   :  { %17838 = vst [vmem:[#allocation65_spill] sm:$0xff] %v14310_v45  ;;  %17839 = vst [vmem:[#allocation88_spill] sm:$0xff] %v14312_v32  ;;  %v6313_v32 = vmax.f32 %v6141_v55, -3e+38  ;;  %v6328_v45 = vmax.f32 %v14260_v18, -3e+38 }
 0xd08   :  { %v6477_v40 = vrot.slane %v6313_v32, %v10006_v21 }
 0xd09   :  { %v14314_v53 = vpop.xlane.xlu0 %6251  ;;  %v14316_v24 = vpop.xlane.xlu1 %6179 }
 0xd0a   :  { %17840 = vst [vmem:[#allocation66_spill] sm:$0xff] %v14314_v53  ;;  %v6312_v53 = vmax.f32 %v14246_v51, -3e+38  ;;  %v6439_v51 = vrot.slane %v6305_v42, %v10006_v21  ;;  %v14363_v42 = vrot.slane %v6332_v28, %v10004_v17  ;;  %v6314_v28 = vmax.f32 %v14306_v25, -3e+38 }
 0xd0c   :  { %v6473_v15 = vrot.slane %v6312_v53, %v10004_v17  ;;  %v6333_v53 = vmax.f32 %v14288_v0, -3e+38 }
 0xd0d   :  { %v14318_v19 = vpop.xlane.xlu0 %6299  ;;  %v14320_v61 = vpop.xlane.xlu1 %6263 }
 0xd0e   :  { %17841 = vst [vmem:[#allocation84_spill] sm:$0xff] %v14318_v19  ;;  %17842 = vst [vmem:[#allocation74_spill] sm:$0xff] %v14320_v61  ;;  %v6321_v19 = vmax.f32 %v6165_v43, -3e+38  ;;  %v6572_v25 = vrot.slane %v6333_v53, %v10006_v21 }
 0xd10   :  { %v6515_v9 = vrot.slane %v6321_v19, %v10006_v21  ;;  %v6549_v19 = vrot.slane %v6328_v45, %v10004_v17  ;;  %v6325_v45 = vmax.f32 %v14290_v50, -3e+38 }
 0xd11   :  { %v14322_v8 = vpop.xlane.xlu0 %6122  ;;  %v14326_v36 = vpop.xlane.xlu1 %6191 }
 0xd15   :  { %v14324_v57 = vpop.xlane.xlu0 %6134  ;;  %v14330_v39 = vpop.xlane.xlu1 %6275 }
 0xd16   :  { %17843 = vst [vmem:[#allocation76_spill] sm:$0xff] %v14330_v39  ;;  %v6309_v39 = vmax.f32 %v6129_v31, -3e+38  ;;  %v6435_v31 = vrot.slane %v6304_v56, %v10004_v17 }
 0xd18   :  { %v6458_v18 = vrot.slane %v6309_v39, %v10006_v21  ;;  %v6440_v39 = vsel %vm17847_vm13, %v6439_v51, %v6435_v31  ;;  %v6318_v51 = vmax.f32 %v14300_v30, -3e+38  ;;  %v6322_v31 = vmax.f32 %v14304_v33, -3e+38 }
 0xd19   :  { %v14328_v54 = vpop.xlane.xlu0 %6146  ;;  %v14336_v14 = vpop.xlane.xlu1 %6203  ;;  %v6482_v30 = vrot.slane %v6314_v28, %v10008_v22 }
 0xd1a   :  { %v6459_v32 = vsel %vm17848_vm5, %v6458_v18, %v6454_v44  ;;  %v6315_v0 = vmax.f32 %v14328_v54, -3e+38  ;;  %v6307_v44 = vmax.f32 %v14322_v8, -3e+38  ;;  %v6326_v18 = vmax.f32 %v14316_v24, -3e+38 }
 0xd1b   :  { %v6330_v54 = vmax.f32 %v14326_v36, -3e+38  ;;  %v6501_v8 = vrot.slane %v6318_v51, %v10008_v22  ;;  %v6520_v24 = vrot.slane %v6322_v31, %v10008_v22 }
 0xd1c   :  { %v6449_v53 = vrot.slane %v6307_v44, %v10010_v23  ;;  %v6539_v28 = vrot.slane %v6326_v18, %v10008_v22 }
 0xd1d   :  { %v14332_v34 = vpop.xlane.xlu0 %6158  ;;  %v14349_v43 = vpop.xlane.xlu1 %6287 }
 0xd1e   :  { %v6319_v50 = vmax.f32 %v14332_v34, -3e+38  ;;  %v6487_v34 = vrot.slane %v6315_v0, %v10010_v23 }
 0xd21   :  { %v14334_v52 = vpop.xlane.xlu0 %6230 }
 0xd22   :  { %17844 = vst [vmem:[#allocation92_spill] sm:$0xff] %v14334_v52  ;;  %v6324_v52 = vmax.f32 %v14254_v20, -3e+38  ;;  %v6492_v20 = vrot.slane %v6316_v13, %v10004_v17  ;;  %v6516_v13 = vsel %vm17846_vm10, %v6515_v9, %v6511_v2  ;;  %v6306_v9 = vmax.f32 %v14298_v16, -3e+38  ;;  %vm17850_vm10 = vmmov %vm17848_vm5 }
 0xd23   :  { %v6554_v48 = vsel %vm17850_vm10, %v6553_v27, %v6549_v19  ;;  %v6534_v27 = vrot.slane %v6325_v45, %v10006_v21  ;;  %v6558_v45 = vrot.slane %v6330_v54, %v10008_v22 }
 0xd24   :  { %v6530_v55 = vrot.slane %v6324_v52, %v10004_v17  ;;  %v6497_v56 = vsel %vm17845_vm9, %v6496_v4, %v6492_v20  ;;  %v6311_v4 = vmax.f32 %v14324_v57, -3e+38  ;;  %v6171_v20 = vpop.xlane.xlu1 %6170  ;;  %vm17849_vm9 = vmmov %vm17848_vm5  ;;  %v6463_v57 = vrot.slane %v6310_v3, %v10008_v22 }
 0xd25   :  { %v14340_v61 = vpop.xlane.xlu0 %6254  ;;  %v6478_v46 = vsel %vm17849_vm9, %v6477_v40, %v6473_v15  ;;  %v6323_v15 = vmax.f32 %v6171_v20, -3e+38  ;;  %v6444_v33 = vrot.slane %v6306_v9, %v10008_v22  ;;  %v6506_v3 = vrot.slane %v6319_v50, %v10010_v23 }
 0xd26   :  { %v6468_v2 = vrot.slane %v6311_v4, %v10010_v23  ;;  %vm17851_vm5 = vcmask 195712   ;;  %vm17853_vm9 = vcmask 261312   ;;  %v6535_v50 = vsel %vm17857_vm3, %v6534_v27, %v6530_v55 }
 0xd27   :  { %v6464_v36 = vsel %vm17851_vm5, %v6463_v57, %v6459_v32  ;;  %v6525_v4 = vrot.slane %v6323_v15, %v10010_v23  ;;  %vm17852_vm13 = vmmov %vm17851_vm5 }
 0xd28   :  { %v6483_v9 = vsel %vm17852_vm13, %v6482_v30, %v6478_v46  ;;  %v6469_v51 = vsel %vm17853_vm9, %v6468_v2, %v6464_v36  ;;  %vm17854_vm10 = vmmov %vm17851_vm5  ;;  %v17876_v36 = vld [vmem:[#allocation34_spill] sm:$0xff] }
 0xd29   :  { %v6183_v37 = vpop.xlane.xlu0 %6182  ;;  %v6445_v31 = vsel %vm17854_vm10, %v6444_v33, %v6440_v39  ;;  %vm17855_vm8 = vmmov %vm17851_vm5 }
 0xd2a   :  { %v6327_v40 = vmax.f32 %v6183_v37, -3e+38  ;;  %v6334_v37 = vmax.f32 %v14336_v14, -3e+38  ;;  %v6502_v32 = vsel %vm17855_vm8, %v6501_v8, %v6497_v56  ;;  %vm17856_vm5 = vmmov %vm17853_vm9  ;;  %vm17862_vm9 = vcmask 1041409  }
 0xd2b   :  { %v6488_v44 = vsel %vm17856_vm5, %v6487_v34, %v6483_v9  ;;  %vm17858_vm7 = vmmov %vm17855_vm8 }
 0xd2c   :  { %v6544_v0 = vrot.slane %v6327_v40, %v10010_v23  ;;  %v6521_v57 = vsel %vm17858_vm7, %v6520_v24, %v6516_v13  ;;  %vm17859_vm12 = vmmov %vm17856_vm5  ;;  %v6577_v39 = vrot.slane %v6334_v37, %v10008_v22 }
 0xd2d   :  { %v14371_v52 = vpop.xlane.xlu0 %6266  ;;  %v6450_v46 = vsel %vm17859_vm12, %v6449_v53, %v6445_v31  ;;  %vm17860_vm13 = vmmov %vm17856_vm5 }
 0xd2e   :  { %v6507_v18 = vsel %vm17860_vm13, %v6506_v3, %v6502_v32  ;;  %vm17861_vm1 = vmmov %vm17858_vm7  ;;  %vm17867_vm7 = vcmask 1043459   ;;  %vm17870_vm13 = vcmask 1044484   ;;  %v17885_v32 = vld [vmem:[#allocation14_spill] sm:$0xff] }
 0xd2f   :  { %v6540_v15 = vsel %vm17861_vm1, %v6539_v28, %v6535_v50  ;;  %vm17863_vm10 = vmmov %vm17856_vm5  ;;  %vm17865_vm5 = vcmask 1042434  }
 0xd30   :  { %v6526_v56 = vsel %vm17863_vm10, %v6525_v4, %v6521_v57  ;;  %vm17864_vm8 = vmmov %vm17861_vm1  ;;  %vm17869_vm1 = vcmask 130112  }
 0xd31   :  { %v6195_v16 = vpop.xlane.xlu0 %6194  ;;  %v6559_v54 = vsel %vm17864_vm8, %v6558_v45, %v6554_v48  ;;  %vm17866_vm3 = vmmov %vm17863_vm10  ;;  %v6573_v8 = vsel %vm17869_vm1, %v6572_v25, %v14363_v42  ;;  %vm17872_vm10 = vcmask 1045509   ;;  %v17878_v42 = vld [vmem:[#allocation69_spill] sm:$0xff] }
 0xd32   :  { %v6331_v19 = vmax.f32 %v6195_v16, -3e+38  ;;  %v6736_v16 = vsel %vm17862_vm9, %v6469_v51, %v6450_v46  ;;  %v6545_v55 = vsel %vm17866_vm3, %v6544_v0, %v6540_v15  ;;  %vm17868_vm12 = vmmov %vm17866_vm3  ;;  %v17879_v25 = vmax.f32 %v17878_v42, 0.0  ;;  %v17882_v51 = vld [vmem:[#allocation37_spill] sm:$0xff] }
 0xd33   :  { %v6737_v2 = vsel %vm17865_vm5, %v6488_v44, %v6736_v16  ;;  %vm17871_vm9 = vmmov %vm17864_vm8  ;;  %vm17874_vm5 = vcmask 1046534   ;;  %vm17883_vm1 = vnez %v17882_v51  ;;  %v17979_v51 = vld [vmem:[#allocation88_spill] sm:$0xff] }
 0xd34   :  { %v6563_v14 = vrot.slane %v6331_v19, %v10010_v23  ;;  %v6738_v40 = vsel %vm17867_vm7, %v6507_v18, %v6737_v2  ;;  %v6578_v27 = vsel %vm17871_vm9, %v6577_v39, %v6573_v8  ;;  %vm17873_vm8 = vmmov %vm17866_vm3  ;;  %vm17875_vm3 = vcmask 1047559   ;;  %v17889_v18 = vld [vmem:[#allocation15_spill] sm:$0xff] }
 0xd35   :  { %v14402_v20 = vpop.xlane.xlu0 %6278  ;;  %v6739_v19 = vsel %vm17870_vm13, %v6526_v56, %v6738_v40  ;;  %vm17877_vm7 = vcmp.eq.s32.totalorder %v17876_v36, 1  ;;  %vm17884_vm13 = vcmask 130048   ;;  %vm17886_vm9 = vnez %v17885_v32 }
 0xd36   :  { %v6564_v33 = vsel %vm17868_vm12, %v6563_v14, %v6559_v54  ;;  %v6740_v48 = vsel %vm17872_vm10, %v6545_v55, %v6739_v19  ;;  %vm17881_vm12 = vcmask 261120   ;;  %vm17887_vm10 = vmmov %vm17884_vm13 }
 0xd37   :  { %v6741_v53 = vsel %vm17874_vm5, %v6564_v33, %v6740_v48  ;;  %vm17890_vm5 = vnez %v17889_v18  ;;  %v17897_v33 = vld [vmem:[#allocation40_spill] sm:$0xff] }
 0xd39   :  { %v6207_v30 = vpop.xlane.xlu0 %6206 }
 0xd3a   :  { %v6335_v13 = vmax.f32 %v6207_v30, -3e+38  ;;  %v17893_v30 = vld [vmem:[#allocation42_spill] sm:$0xff] }
 0xd3c   :  { %v6582_v34 = vrot.slane %v6335_v13, %v10010_v23 }
 0xd3e   :  { %v6583_v24 = vsel %vm17873_vm8, %v6582_v34, %v6578_v27  ;;  %vm17888_vm8 = vmmov %vm17887_vm10  ;;  %v17899_v34 = vld [vmem:[#allocation33_spill] sm:$0xff] }
 0xd3f   :  { %v6742_v3 = vsel %vm17875_vm3, %v6583_v24, %v6741_v53  ;;  %vm17891_vm3 = vmmov %vm17888_vm8  ;;  %v17902_v24 = vld [vmem:[#allocation43_spill] sm:$0xff] }
 0xd40   :  { %v6752_v28 = vsel %vm17877_vm7, %v6742_v3, 0.0  ;;  %vm17892_vm7 = vmmov %vm17891_vm3 }
 0xd41   :  { %v7527_v37 = vadd.f32 %v14250_v10, %v6752_v28  ;;  %vm17901_vm14 = vmmov %vm17892_vm7 }
 0xd42   :  { %vm17905_vm4 = vmmov %vm17892_vm7 }
 0xd43   :  { %v14439_v4 = vadd.f32 %v7527_v37, %v17879_v25 }
 0xd45   :  { %17880 = vst [vmem:[#allocation70_spill] sm:$0xff] %v14439_v4  ;;  %v16681_v9 = vmax.f32 %v14439_v4, 0.0 }
 0xd47   :  { %9642 = vmatprep.mubr.msk.f32.mxu0 %vm17881_vm12, %v16681_v9  ;;  %vm17894_vm12 = vnez %v17893_v30 }
 0xd59   :  { %v14445_v45 = vpop.trf.xlu0 }
 0xd5a   :  { %v6786_v0 = vsel %vm17883_vm1, %v14445_v45, -3e+38 }
 0xd5b   :  { %v6850_v31 = vsel %vm17884_vm13, %v6786_v0, -inf  ;;  %vm17895_vm13 = vmmov %vm17891_vm3 }
 0xd5c   :  { %6851 = vmax.xlane.f32.xlu1 %v6850_v31 }
 0xd5d   :  { %v14451_v10 = vpop.trf.xlu0 }
 0xd5e   :  { %v6823_v44 = vsel %vm17886_vm9, %v14451_v10, -3e+38  ;;  %v6787_v14 = vsel %vm17883_vm1, %v14451_v10, -3e+38  ;;  %v6831_v54 = vsel %vm17894_vm12, %v14451_v10, -3e+38 }
 0xd5f   :  { %v6961_v50 = vsel %vm17887_vm10, %v6823_v44, -inf  ;;  %v6853_v57 = vsel %vm17888_vm8, %v6787_v14, -inf  ;;  %v6985_v13 = vsel %vm17895_vm13, %v6831_v54, -inf  ;;  %vm17896_vm10 = vmmov %vm17891_vm3  ;;  %vm17898_vm8 = vnez %v17897_v33  ;;  %v17908_v44 = vld [vmem:[#allocation44_spill] sm:$0xff]  ;;  %v17978_v33 = vld [vmem:[#allocation65_spill] sm:$0xff] }
 0xd60   :  { %6962 = vmax.xlane.f32.xlu0 %v6961_v50  ;;  %6854 = vmax.xlane.f32.xlu1 %v6853_v57  ;;  %vm17903_vm13 = vnez %v17902_v24  ;;  %v17910_v50 = vld [vmem:[#allocation39_spill] sm:$0xff]  ;;  %v6336_v24 = vmax.f32 %v14258_v35, -3e+38 }
 0xd61   :  { %v14461_v46 = vpop.trf.xlu0  ;;  %v6807_v53 = vsel %vm17903_vm13, %v14451_v10, -3e+38 }
 0xd62   :  { %v6828_v15 = vsel %vm17890_vm5, %v14461_v46, -3e+38  ;;  %v6788_v16 = vsel %vm17883_vm1, %v14461_v46, -3e+38  ;;  %v6804_v8 = vsel %vm17898_vm8, %v14461_v46, -3e+38 }
 0xd63   :  { %v6976_v39 = vsel %vm17891_vm3, %v6828_v15, -inf  ;;  %v6856_v56 = vsel %vm17892_vm7, %v6788_v16, -inf  ;;  %vm17900_vm3 = vnez %v17899_v34  ;;  %v6904_v27 = vsel %vm17892_vm7, %v6804_v8, -inf  ;;  %v17918_v8 = vld [vmem:[#allocation41_spill] sm:$0xff] }
 0xd64   :  { %6977 = vmax.xlane.f32.xlu0 %v6976_v39  ;;  %6857 = vmax.xlane.f32.xlu1 %v6856_v56  ;;  %v6790_v19 = vsel %vm17900_vm3, %v14445_v45, -3e+38  ;;  %v6791_v3 = vsel %vm17900_vm3, %v14451_v10, -3e+38  ;;  %v6832_v42 = vsel %vm17894_vm12, %v14461_v46, -3e+38 }
 0xd65   :  { %v14474_v2 = vpop.trf.xlu0  ;;  %v6862_v48 = vsel %vm17901_vm14, %v6790_v19, -inf  ;;  %v6865_v37 = vsel %vm17905_vm4, %v6791_v3, -inf  ;;  %v6792_v25 = vsel %vm17900_vm3, %v14461_v46, -3e+38  ;;  %vm17906_vm14 = vmmov %vm17905_vm4  ;;  %v6808_v39 = vsel %vm17903_vm13, %v14461_v46, -3e+38 }
 0xd66   :  { %v6789_v55 = vsel %vm17883_vm1, %v14474_v2, -3e+38  ;;  %v6988_v0 = vsel %vm17906_vm14, %v6832_v42, -inf  ;;  %v17924_v42 = vld [vmem:[#allocation46_spill] sm:$0xff] }
 0xd67   :  { %v6859_v40 = vsel %vm17896_vm10, %v6789_v55, -inf  ;;  %vm17904_vm10 = vmmov %vm17892_vm7 }
 0xd68   :  { %6986 = vmax.xlane.f32.xlu0 %v6985_v13  ;;  %6860 = vmax.xlane.f32.xlu1 %v6859_v40  ;;  %v6913_v28 = vsel %vm17904_vm10, %v6807_v53, -inf  ;;  %vm17907_vm7 = vmmov %vm17905_vm4  ;;  %vm17909_vm10 = vnez %v17908_v44  ;;  %vm17911_vm4 = vnez %v17910_v50  ;;  %v17916_v13 = vld [vmem:[#allocation45_spill] sm:$0xff]  ;;  %v6349_v44 = vmax.f32 %v14280_v62, -3e+38 }
 0xd69   :  { %v6868_v31 = vsel %vm17907_vm7, %v6792_v25, -inf  ;;  %v6835_v14 = vsel %vm17909_vm10, %v14451_v10, -3e+38  ;;  %v6794_v57 = vsel %vm17911_vm4, %v14445_v45, -3e+38  ;;  %vm17912_vm0 = vmmov %vm17907_vm7  ;;  %v7594_v50 = vld [vmem:[#allocation5 + $0x78] sm:$0xff] }
 0xd6a   :  { %v6997_v15 = vsel %vm17912_vm0, %v6835_v14, -inf  ;;  %vm17913_vm2 = vmmov %vm17912_vm0  ;;  %v6795_v56 = vsel %vm17911_vm4, %v14451_v10, -3e+38  ;;  %v6836_v53 = vsel %vm17909_vm10, %v14461_v46, -3e+38 }
 0xd6b   :  { %v6874_v16 = vsel %vm17913_vm2, %v6794_v57, -inf  ;;  %vm17914_vm14 = vmmov %vm17912_vm0  ;;  %vm17919_vm2 = vnez %v17918_v8  ;;  %v6337_v8 = vmax.f32 %v14277_v58, -3e+38  ;;  %v6352_v58 = vmax.f32 %v14270_v63, -3e+38 }
 0xd6c   :  { %6905 = vmax.xlane.f32.xlu0 %v6904_v27  ;;  %6863 = vmax.xlane.f32.xlu1 %v6862_v48  ;;  %v6916_v54 = vsel %vm17914_vm14, %v6808_v39, -inf  ;;  %vm17915_vm7 = vmmov %vm17912_vm0  ;;  %vm17917_vm0 = vnez %v17916_v13  ;;  %v6818_v19 = vsel %vm17919_vm2, %v14445_v45, -3e+38  ;;  %v6819_v3 = vsel %vm17919_vm2, %v14451_v10, -3e+38 }
 0xd6d   :  { %v6877_v55 = vsel %vm17915_vm7, %v6795_v56, -inf  ;;  %v6811_v40 = vsel %vm17917_vm0, %v14451_v10, -3e+38  ;;  %vm17920_vm11 = vmmov %vm17915_vm7  ;;  %v6812_v57 = vsel %vm17917_vm0, %v14461_v46, -3e+38  ;;  %v17929_v56 = vld [vmem:[#allocation47_spill] sm:$0xff] }
 0xd6e   :  { %v6925_v27 = vsel %vm17920_vm11, %v6811_v40, -inf  ;;  %vm17921_vm6 = vmmov %vm17915_vm7  ;;  %vm17925_vm11 = vnez %v17924_v42  ;;  %v6360_v62 = vmax.f32 %v14272_v1, -3e+38 }
 0xd6f   :  { %v6946_v48 = vsel %vm17921_vm6, %v6818_v19, -inf  ;;  %vm17922_vm14 = vmmov %vm17921_vm6  ;;  %v6839_v25 = vsel %vm17925_vm11, %v14451_v10, -3e+38 }
 0xd70   :  { %6914 = vmax.xlane.f32.xlu0 %v6913_v28  ;;  %6866 = vmax.xlane.f32.xlu1 %v6865_v37  ;;  %v7000_v28 = vsel %vm17922_vm14, %v6836_v53, -inf  ;;  %vm17923_vm7 = vmmov %vm17921_vm6 }
 0xd71   :  { %v6949_v37 = vsel %vm17923_vm7, %v6819_v3, -inf  ;;  %vm17926_vm1 = vmmov %vm17921_vm6 }
 0xd72   :  { %vm17927_vm14 = vmmov %vm17926_vm1 }
 0xd73   :  { %vm17928_vm7 = vmmov %vm17926_vm1 }
 0xd74   :  { %6989 = vmax.xlane.f32.xlu0 %v6988_v0  ;;  %6869 = vmax.xlane.f32.xlu1 %v6868_v31  ;;  %v6822_v0 = vsel %vm17886_vm9, %v14445_v45, -3e+38  ;;  %v7009_v31 = vsel %vm17921_vm6, %v6839_v25, -inf  ;;  %vm17930_vm6 = vnez %v17929_v56  ;;  %vm17931_vm0 = vmmov %vm17926_vm1 }
 0xd75   :  { %v6958_v14 = vsel %vm17926_vm1, %v6822_v0, -inf }
 0xd78   :  { %6998 = vmax.xlane.f32.xlu0 %v6997_v15  ;;  %6875 = vmax.xlane.f32.xlu1 %v6874_v16  ;;  %v6793_v15 = vsel %vm17900_vm3, %v14474_v2, -3e+38  ;;  %v6928_v16 = vsel %vm17927_vm14, %v6812_v57, -inf  ;;  %vm17935_vm3 = vmmov %vm17931_vm0  ;;  %v6816_v57 = vsel %vm17930_vm6, %v14461_v46, -3e+38 }
 0xd79   :  { %v6871_v39 = vsel %vm17928_vm7, %v6793_v15, -inf  ;;  %vm17934_vm7 = vmmov %vm17931_vm0  ;;  %v6820_v15 = vsel %vm17919_vm2, %v14461_v46, -3e+38 }
 0xd7c   :  { %6917 = vmax.xlane.f32.xlu0 %v6916_v54  ;;  %6878 = vmax.xlane.f32.xlu1 %v6877_v55  ;;  %v6815_v54 = vsel %vm17930_vm6, %v14451_v10, -3e+38  ;;  %v6796_v55 = vsel %vm17911_vm4, %v14461_v46, -3e+38  ;;  %vm17945_vm6 = vmmov %vm17931_vm0 }
 0xd7d   :  { %v6937_v40 = vsel %vm17926_vm1, %v6815_v54, -inf  ;;  %v6880_v19 = vsel %vm17931_vm0, %v6796_v55, -inf  ;;  %v6824_v55 = vsel %vm17886_vm9, %v14461_v46, -3e+38 }
 0xd80   :  { %6926 = vmax.xlane.f32.xlu0 %v6925_v27  ;;  %6947 = vmax.xlane.f32.xlu1 %v6946_v48  ;;  %v6840_v27 = vsel %vm17925_vm11, %v14461_v46, -3e+38  ;;  %v17932_v48 = vld [vmem:[#allocation32_spill] sm:$0xff]  ;;  %vm17938_vm11 = vmmov %vm17931_vm0 }
 0xd81   :  { %vm17933_vm14 = vnez %v17932_v48  ;;  %v7012_v3 = vsel %vm17934_vm7, %v6840_v27, -inf  ;;  %vm17940_vm7 = vmmov %vm17931_vm0  ;;  %v17942_v27 = vld [vmem:[#allocation49_spill] sm:$0xff]  ;;  %v7591_v48 = vld [vmem:[#allocation5 + $0x60] sm:$0xff] }
 0xd82   :  { %v6798_v53 = vsel %vm17933_vm14, %v14445_v45, -3e+38  ;;  %v6799_v0 = vsel %vm17933_vm14, %v14451_v10, -3e+38 }
 0xd84   :  { %7001 = vmax.xlane.f32.xlu0 %v7000_v28  ;;  %6950 = vmax.xlane.f32.xlu1 %v6949_v37  ;;  %v6886_v28 = vsel %vm17935_vm3, %v6798_v53, -inf  ;;  %v17936_v37 = vld [vmem:[#allocation48_spill] sm:$0xff]  ;;  %vm17939_vm3 = vmmov %vm17931_vm0 }
 0xd85   :  { %vm17937_vm1 = vnez %v17936_v37 }
 0xd86   :  { %v6843_v25 = vsel %vm17937_vm1, %v14451_v10, -3e+38  ;;  %v6844_v54 = vsel %vm17937_vm1, %v14461_v46, -3e+38 }
 0xd88   :  { %7010 = vmax.xlane.f32.xlu0 %v7009_v31  ;;  %6959 = vmax.xlane.f32.xlu1 %v6958_v14  ;;  %v7021_v31 = vsel %vm17931_vm0, %v6843_v25, -inf  ;;  %v6889_v14 = vsel %vm17938_vm11, %v6799_v0, -inf  ;;  %vm17941_vm11 = vmmov %vm17931_vm0  ;;  %v6845_v0 = vsel %vm17937_vm1, %v14474_v2, -3e+38 }
 0xd8c   :  { %6929 = vmax.xlane.f32.xlu0 %v6928_v16  ;;  %6872 = vmax.xlane.f32.xlu1 %v6871_v39  ;;  %v6940_v16 = vsel %vm17939_vm3, %v6816_v57, -inf  ;;  %v6952_v39 = vsel %vm17940_vm7, %v6820_v15, -inf  ;;  %vm17943_vm3 = vnez %v17942_v27  ;;  %vm17944_vm7 = vmmov %vm17931_vm0 }
 0xd8d   :  { %v6847_v53 = vsel %vm17943_vm3, %v14451_v10, -3e+38  ;;  %v6849_v15 = vsel %vm17943_vm3, %v14474_v2, -3e+38 }
 0xd90   :  { %6938 = vmax.xlane.f32.xlu0 %v6937_v40  ;;  %6881 = vmax.xlane.f32.xlu1 %v6880_v19  ;;  %v7024_v40 = vsel %vm17941_vm11, %v6844_v54, -inf  ;;  %v6964_v19 = vsel %vm17931_vm0, %v6824_v55, -inf  ;;  %vm17946_vm11 = vmmov %vm17931_vm0  ;;  %v6800_v55 = vsel %vm17933_vm14, %v14461_v46, -3e+38 }
 0xd94   :  { %7013 = vmax.xlane.f32.xlu0 %v7012_v3  ;;  %6887 = vmax.xlane.f32.xlu1 %v6886_v28  ;;  %v6826_v3 = vsel %vm17890_vm5, %v14445_v45, -3e+38  ;;  %v7033_v28 = vsel %vm17944_vm7, %v6847_v53, -inf  ;;  %vm17948_vm7 = vmmov %vm17931_vm0 }
 0xd95   :  { %v6970_v25 = vsel %vm17945_vm6, %v6826_v3, -inf  ;;  %vm17947_vm6 = vmmov %vm17931_vm0 }
 0xd98   :  { %7022 = vmax.xlane.f32.xlu0 %v7021_v31  ;;  %6890 = vmax.xlane.f32.xlu1 %v6889_v14  ;;  %v6827_v31 = vsel %vm17890_vm5, %v14451_v10, -3e+38  ;;  %v7027_v14 = vsel %vm17946_vm11, %v6845_v0, -inf  ;;  %vm17949_vm11 = vmmov %vm17931_vm0 }
 0xd99   :  { %v6973_v57 = vsel %vm17931_vm0, %v6827_v31, -inf  ;;  %v6803_v31 = vsel %vm17898_vm8, %v14451_v10, -3e+38  ;;  %v6830_v10 = vsel %vm17894_vm12, %v14445_v45, -3e+38 }
 0xd9c   :  { %6941 = vmax.xlane.f32.xlu0 %v6940_v16  ;;  %6953 = vmax.xlane.f32.xlu1 %v6952_v39  ;;  %v6797_v16 = vsel %vm17911_vm4, %v14474_v2, -3e+38  ;;  %v7039_v39 = vsel %vm17947_vm6, %v6849_v15, -inf  ;;  %vm17950_vm6 = vnez %v17786_v29  ;;  %v6825_v15 = vsel %vm17886_vm9, %v14474_v2, -3e+38 }
 0xd9d   :  { %v6883_v54 = vsel %vm17948_vm7, %v6797_v16, -inf  ;;  %v6111_v3 = vsel %vm17950_vm6, %v14160_v59, -3e+38  ;;  %vm17951_vm7 = vmmov %vm17931_vm0 }
 0xda0   :  { %7025 = vmax.xlane.f32.xlu0 %v7024_v40  ;;  %6965 = vmax.xlane.f32.xlu1 %v6964_v19  ;;  %v6892_v40 = vsel %vm17949_vm11, %v6800_v55, -inf  ;;  %v6107_v19 = vsel %vm17822_vm15, %v14160_v59, -3e+38  ;;  %vm17952_vm11 = vmmov %vm17931_vm0  ;;  %v6821_v59 = vsel %vm17919_vm2, %v14474_v2, -3e+38  ;;  %v7586_v55 = vld [vmem:[#allocation2 + $0x60] sm:$0xff] }
 0xda1   :  { %v6289_v53 = vsel %vm17931_vm0, %v6107_v19, -inf  ;;  %v14652_v19 = vpop.f32.mrb[22].mxu1 }
 0xda4   :  { %7034 = vmax.xlane.f32.xlu0 %v7033_v28  ;;  %6971 = vmax.xlane.f32.xlu1 %v6970_v25  ;;  %v6301_v28 = vsel %vm17951_vm7, %v6111_v3, -inf  ;;  %v6802_v25 = vsel %vm17898_vm8, %v14445_v45, -3e+38  ;;  %vm17953_vm7 = vmmov %vm17931_vm0  ;;  %v9627_v3 = vpop.f32.mrb[23].mxu1 }
 0xda5   :  { %v6898_v0 = vsel %vm17952_vm11, %v6802_v25, -inf  ;;  %vm17954_vm11 = vmmov %vm17931_vm0  ;;  %v6806_v25 = vsel %vm17903_vm13, %v14445_v45, -3e+38  ;;  %v6833_v3 = vsel %vm17894_vm12, %v14474_v2, -3e+38 }
 0xda6   :  { %v6967_v16 = vsel %vm17954_vm11, %v6825_v15, -inf  ;;  %vm17956_vm11 = vmmov %vm17931_vm0 }
 0xda8   :  { %7028 = vmax.xlane.f32.xlu0 %v7027_v14  ;;  %6974 = vmax.xlane.f32.xlu1 %v6973_v57  ;;  %v6901_v14 = vsel %vm17931_vm0, %v6803_v31, -inf  ;;  %v6955_v57 = vsel %vm17953_vm7, %v6821_v59, -inf  ;;  %vm17955_vm7 = vmmov %vm17931_vm0  ;;  %v7589_v31 = vld [vmem:[#allocation2 + $0x78] sm:$0xff] }
 0xdac   :  { %7040 = vmax.xlane.f32.xlu0 %v7039_v39  ;;  %6884 = vmax.xlane.f32.xlu1 %v6883_v54  ;;  %v6982_v39 = vsel %vm17931_vm0, %v6830_v10, -inf  ;;  %v6801_v54 = vsel %vm17933_vm14, %v14474_v2, -3e+38 }
 0xdb0   :  { %6893 = vmax.xlane.f32.xlu1 %v6892_v40  ;;  %v7587_v40 = vld [vmem:[#allocation2 + $0x68] sm:$0xff] }
 0xdb4   :  { %6290 = vmax.xlane.f32.xlu1 %v6289_v53  ;;  %v9718_v53 = vpack.c.bf16 %v7587_v40, %v7586_v55 }
 0xdb6   :  { %9719 = vmatprep.subr.bf16.mxu0 %v9718_v53 }
 0xdb7   :  { %9721 = vmatpush3.bf16.msra.mxu0 %v9718_v53 }
 0xdb8   :  { %6302 = vmax.xlane.f32.xlu1 %v6301_v28  ;;  %v6895_v28 = vsel %vm17955_vm7, %v6801_v54, -inf  ;;  %vm17957_vm7 = vmmov %vm17931_vm0  ;;  %v14671_v54 = vpop.xlane.xlu1 %6218 }
 0xdb9   :  { %vm17960_vm6 = vmmov %vm17957_vm7 }
 0xdba   :  { %vm17963_vm15 = vmmov %vm17960_vm6 }
 0xdbb   :  { %vm17965_vm12 = vmmov %vm17960_vm6 }
 0xdbc   :  { %6899 = vmax.xlane.f32.xlu1 %v6898_v0  ;;  %v7588_v0 = vld [vmem:[#allocation2 + $0x70] sm:$0xff] }
 0xdbd   :  { %v9722_v59 = vpack.c.bf16 %v7589_v31, %v7588_v0 }
 0xdbf   :  { %9723 = vmatprep.subr.bf16.mxu0 %v9722_v59 }
 0xdc0   :  { %6902 = vmax.xlane.f32.xlu1 %v6901_v14  ;;  %v6910_v14 = vsel %vm17956_vm11, %v6806_v25, -inf  ;;  %9725 = vmatpush3.bf16.msra.mxu0 %v9722_v59  ;;  %vm17958_vm11 = vmmov %vm17931_vm0  ;;  %v6809_v59 = vsel %vm17903_vm13, %v14474_v2, -3e+38 }
 0xdc1   :  { %9656 = vmatprep.subr.bf16.mxu0 %v17636_v26 }
 0xdc4   :  { %6956 = vmax.xlane.f32.xlu1 %v6955_v57  ;;  %v6829_v57 = vsel %vm17890_vm5, %v14474_v2, -3e+38 }
 0xdc5   :  { %v6979_v15 = vsel %vm17931_vm0, %v6829_v57, -inf  ;;  %vm17959_vm0 = vnez %v17916_v13  ;;  %v7593_v13 = vld [vmem:[#allocation5 + $0x70] sm:$0xff] }
 0xdc6   :  { %v6810_v40 = vsel %vm17959_vm0, %v14445_v45, -3e+38 }
 0xdc7   :  { %v6922_v53 = vsel %vm17960_vm6, %v6810_v40, -inf }
 0xdc8   :  { %6968 = vmax.xlane.f32.xlu1 %v6967_v16  ;;  %v6834_v16 = vsel %vm17909_vm10, %v14445_v45, -3e+38 }
 0xdc9   :  { %v6994_v10 = vsel %vm17957_vm7, %v6834_v16, -inf  ;;  %vm17961_vm7 = vmmov %vm17960_vm6 }
 0xdca   :  { %v6991_v25 = vsel %vm17961_vm7, %v6833_v3, -inf  ;;  %vm17964_vm7 = vnez %v17929_v56  ;;  %v6842_v3 = vsel %vm17937_vm1, %v14445_v45, -3e+38  ;;  %v7592_v56 = vld [vmem:[#allocation5 + $0x68] sm:$0xff] }
 0xdcb   :  { %v6814_v16 = vsel %vm17964_vm7, %v14445_v45, -3e+38  ;;  %v9726_v18 = vpack.c.bf16 %v7592_v56, %v7591_v48 }
 0xdcc   :  { %6983 = vmax.xlane.f32.xlu1 %v6982_v39  ;;  %v6805_v39 = vsel %vm17898_vm8, %v14474_v2, -3e+38 }
 0xdcd   :  { %v6907_v55 = vsel %vm17958_vm11, %v6805_v39, -inf  ;;  %vm17962_vm11 = vnez %v17924_v42  ;;  %v6934_v39 = vsel %vm17965_vm12, %v6814_v16, -inf  ;;  %vm17967_vm12 = vmmov %vm17960_vm6  ;;  %v9730_v42 = vpack.c.bf16 %v7594_v50, %v7593_v13  ;;  %9727 = vmatprep.subr.bf16.mxu1 %v9726_v18 }
 0xdce   :  { %v6838_v0 = vsel %vm17962_vm11, %v14445_v45, -3e+38  ;;  %v6841_v16 = vsel %vm17962_vm11, %v14474_v2, -3e+38  ;;  %9729 = vmatpush3.bf16.msra.mxu1 %v9726_v18  ;;  %v6356_v50 = vmax.f32 %v14264_v38, -3e+38 }
 0xdcf   :  { %9731 = vmatprep.subr.bf16.mxu1 %v9730_v42  ;;  %v6341_v13 = vmax.f32 %v14282_v41, -3e+38  ;;  %v6345_v18 = vmax.f32 %v14286_v5, -3e+38  ;;  %v6364_v38 = vmax.f32 %v14274_v12, -3e+38  ;;  %v6591_v41 = vrot.slane %v6337_v8, %v10006_v21 }
 0xdd0   :  { %6896 = vmax.xlane.f32.xlu1 %v6895_v28  ;;  %v14681_v28 = vpop.xlane.xlu1 %6242  ;;  %v6648_v5 = vrot.slane %v6349_v44, %v10006_v21  ;;  %v6342_v12 = vmax.f32 %v17978_v33, -3e+38  ;;  %v6346_v8 = vmax.f32 %v17979_v51, -3e+38  ;;  %v6663_v44 = vrot.slane %v6352_v58, %v10004_v17 }
 0xdd1   :  { %v6629_v63 = vrot.slane %v6345_v18, %v10006_v21  ;;  %v14811_v18 = vrot.slane %v6364_v38, %v10004_v17  ;;  %v6347_v33 = vmax.f32 %v14681_v28, -3e+38 }
 0xdd2   :  { %9733 = vmatpush3.bf16.msra.mxu1 %v9730_v42 }
 0xdd3   :  { %9664 = vmatprep.subr.bf16.mxu1 %v17636_v26 }
 0xdd4   :  { %6911 = vmax.xlane.f32.xlu1 %v6910_v14  ;;  %v7006_v14 = vsel %vm17963_vm15, %v6838_v0, -inf  ;;  %vm17966_vm15 = vmmov %vm17960_vm6  ;;  %v7018_v0 = vsel %vm17960_vm6, %v6842_v3, -inf }
 0xdd8   :  { %6980 = vmax.xlane.f32.xlu1 %v6979_v15  ;;  %v6919_v15 = vsel %vm17960_vm6, %v6809_v59, -inf }
 0xddc   :  { %6995 = vmax.xlane.f32.xlu1 %v6994_v10 }
 0xde0   :  { %6908 = vmax.xlane.f32.xlu1 %v6907_v55  ;;  %v6837_v55 = vsel %vm17909_vm10, %v14474_v2, -3e+38 }
 0xde4   :  { %6923 = vmax.xlane.f32.xlu1 %v6922_v53  ;;  %v7003_v53 = vsel %vm17966_vm15, %v6837_v55, -inf  ;;  %vm17968_vm15 = vmmov %vm17960_vm6 }
 0xde5   :  { %v7015_v55 = vsel %vm17968_vm15, %v6841_v16, -inf  ;;  %v6848_v16 = vsel %vm17943_vm3, %v14461_v46, -3e+38  ;;  %vm17970_vm15 = vmmov %vm17960_vm6 }
 0xde8   :  { %6992 = vmax.xlane.f32.xlu1 %v6991_v25 }
 0xde9   :  { %v14687_v31 = vpop.xlane.xlu1 %6851 }
 0xdec   :  { %7007 = vmax.xlane.f32.xlu1 %v7006_v14  ;;  %v6813_v14 = vsel %vm17959_vm0, %v14474_v2, -3e+38 }
 0xded   :  { %v14693_v57 = vpop.xlane.xlu1 %6854  ;;  %v14748_v4 = vpop.xlane.xlu0 %6962 }
 0xdf0   :  { %6920 = vmax.xlane.f32.xlu1 %v6919_v15  ;;  %v6931_v15 = vsel %vm17967_vm12, %v6813_v14, -inf  ;;  %v6817_v14 = vsel %vm17964_vm7, %v14474_v2, -3e+38  ;;  %vm17969_vm12 = vmmov %vm17960_vm6  ;;  %vm18003_vm7 = vcmask 1041409  }
 0xdf1   :  { %v14699_v10 = vpop.xlane.xlu1 %6857  ;;  %v6943_v9 = vsel %vm17969_vm12, %v6817_v14, -inf  ;;  %v14756_v14 = vpop.f32.mrb[20].mxu0 }
 0xdf2   :  { %17971 = vst [vmem:[#allocation85_spill] sm:$0xff] %v14756_v14  ;;  %v9632_v29 = vpop.f32.mrb[21].mxu0  ;;  %v17980_v14 = vld [vmem:[#allocation72_spill] sm:$0xff] }
 0xdf3   :  { %v6348_v29 = vmax.f32 %v14256_v49, -3e+38  ;;  %v6344_v49 = vmax.f32 %v14266_v11, -3e+38  ;;  %v6682_v11 = vrot.slane %v6356_v50, %v10004_v17  ;;  %v6701_v50 = vrot.slane %v6360_v62, %v10004_v17 }
 0xdf4   :  { %6935 = vmax.xlane.f32.xlu1 %v6934_v39 }
 0xdf5   :  { %v14705_v40 = vpop.xlane.xlu1 %6860  ;;  %v6644_v35 = vrot.slane %v6348_v29, %v10004_v17  ;;  %v6610_v29 = vrot.slane %v6341_v13, %v10006_v21  ;;  %v6625_v1 = vrot.slane %v6344_v49, %v10004_v17  ;;  %v6361_v13 = vmax.f32 %v17980_v14, -3e+38  ;;  %v17986_v14 = vld [vmem:[#allocation92_spill] sm:$0xff] }
 0xdf7   :  { %v6705_v28 = vrot.slane %v6361_v13, %v10006_v21 }
 0xdf8   :  { %7004 = vmax.xlane.f32.xlu1 %v7003_v53  ;;  %v6846_v53 = vsel %vm17943_vm3, %v14445_v45, -3e+38  ;;  %v7036_v45 = vsel %vm17970_vm15, %v6848_v16, -inf }
 0xdf9   :  { %v14711_v25 = vpop.xlane.xlu1 %6863 }
 0xdfc   :  { %7019 = vmax.xlane.f32.xlu1 %v7018_v0  ;;  %v7030_v0 = vsel %vm17960_vm6, %v6846_v53, -inf  ;;  %vm17981_vm6 = vcmask 130112  }
 0xdfd   :  { %v14717_v59 = vpop.xlane.xlu1 %6866  ;;  %vm17982_vm12 = vmmov %vm17981_vm6 }
 0xdfe   :  { %vm17984_vm15 = vmmov %vm17981_vm6 }
 0xdff   :  { %vm17985_vm3 = vmmov %vm17981_vm6 }
 0xe00   :  { %6932 = vmax.xlane.f32.xlu1 %v6931_v15  ;;  %v6630_v62 = vsel %vm17985_vm3, %v6629_v63, %v6625_v1  ;;  %v6362_v1 = vmax.f32 %v14349_v43, -3e+38  ;;  %vm17993_vm3 = vcmask 195712  }
 0xe01   :  { %v14723_v39 = vpop.xlane.xlu1 %6869 }
 0xe04   :  { %7016 = vmax.xlane.f32.xlu1 %v7015_v55 }
 0xe05   :  { %v14729_v3 = vpop.xlane.xlu1 %6875 }
 0xe08   :  { %7031 = vmax.xlane.f32.xlu1 %v7030_v0 }
 0xe09   :  { %v14735_v15 = vpop.xlane.xlu1 %6878 }
 0xe0c   :  { %6944 = vmax.xlane.f32.xlu1 %v6943_v9  ;;  %v14754_v9 = vpop.xlane.xlu0 %6977 }
 0xe0d   :  { %v14741_v55 = vpop.xlane.xlu1 %6947 }
 0xe10   :  { %7037 = vmax.xlane.f32.xlu1 %v7036_v45  ;;  %v14760_v47 = vpop.xlane.xlu0 %6986  ;;  %v14764_v45 = vpop.f32.mrb[22].mxu0 }
 0xe11   :  { %v14744_v53 = vpop.xlane.xlu1 %6950  ;;  %17973 = vst [vmem:[#allocation81_spill] sm:$0xff] %v14764_v45  ;;  %v9633_v27 = vpop.f32.mrb[23].mxu0 }
 0xe12   :  { %v6340_v27 = vmax.f32 %v14262_v6, -3e+38  ;;  %v6587_v6 = vrot.slane %v6336_v24, %v10004_v17  ;;  %v6357_v24 = vmax.f32 %v14284_v7, -3e+38  ;;  %v6339_v7 = vmax.f32 %v14671_v54, -3e+38 }
 0xe13   :  { %v17987_v54 = vld [vmem:[#allocation80_spill] sm:$0xff] }
 0xe14   :  { %v14768_v37 = vpop.xlane.xlu0 %6905  ;;  %v6606_v48 = vrot.slane %v6340_v27, %v10004_v17  ;;  %v6338_v27 = vmax.f32 %v14308_v60, -3e+38  ;;  %v6592_v49 = vsel %vm17981_vm6, %v6591_v41, %v6587_v6  ;;  %v6649_v60 = vsel %vm17982_vm12, %v6648_v5, %v6644_v35  ;;  %v17988_v41 = vld [vmem:[#allocation66_spill] sm:$0xff]  ;;  %vm17994_vm6 = vmmov %vm17993_vm3 }
 0xe15   :  { %v14746_v0 = vpop.xlane.xlu1 %6959  ;;  %v6686_v58 = vrot.slane %v6357_v24, %v10006_v21  ;;  %v6615_v6 = vrot.slane %v6342_v12, %v10008_v22  ;;  %v6634_v35 = vrot.slane %v6346_v8, %v10008_v22  ;;  %v6350_v5 = vmax.f32 %v17988_v41, -3e+38  ;;  %v17990_v24 = vld [vmem:[#allocation76_spill] sm:$0xff]  ;;  %v17992_v8 = vld [vmem:[#allocation78_spill] sm:$0xff]  ;;  %vm17995_vm12 = vmmov %vm17993_vm3 }
 0xe16   :  { %v6596_v38 = vrot.slane %v6338_v27, %v10008_v22  ;;  %v6358_v63 = vmax.f32 %v17990_v24, -3e+38  ;;  %v6355_v27 = vmax.f32 %v14371_v52, -3e+38  ;;  %v6365_v13 = vmax.f32 %v17992_v8, -3e+38 }
 0xe17   :  { %v6635_v52 = vsel %vm17995_vm12, %v6634_v35, %v6630_v62 }
 0xe18   :  { %v14777_v34 = vpop.xlane.xlu0 %6914  ;;  %v6597_v43 = vsel %vm17993_vm3, %v6596_v38, %v6592_v49  ;;  %v6677_v49 = vrot.slane %v6355_v27, %v10010_v23 }
 0xe19   :  { %v14750_v2 = vpop.xlane.xlu1 %6872 }
 0xe1c   :  { %v14804_v45 = vpop.xlane.xlu0 %6989 }
 0xe1d   :  { %v14752_v36 = vpop.xlane.xlu1 %6881 }
 0xe21   :  { %v14758_v46 = vpop.xlane.xlu1 %6887 }
 0xe22   :  { %17972 = vst [vmem:[#allocation75_spill] sm:$0xff] %v14758_v46  ;;  %v17996_v46 = vld [vmem:[#allocation84_spill] sm:$0xff] }
 0xe25   :  { %v14762_v16 = vpop.xlane.xlu1 %6890 }
 0xe29   :  { %v14766_v30 = vpop.xlane.xlu1 %6953 }
 0xe2a   :  { %17974 = vst [vmem:[#allocation89_spill] sm:$0xff] %v14766_v30  ;;  %v6653_v30 = vrot.slane %v6350_v5, %v10008_v22 }
 0xe2d   :  { %v14770_v32 = vpop.xlane.xlu1 %6965 }
 0xe2e   :  { %17975 = vst [vmem:[#allocation93_spill] sm:$0xff] %v14770_v32  ;;  %v6353_v32 = vmax.f32 %v17987_v54, -3e+38  ;;  %v14834_v54 = vpop.xlane.xlu0 %6998 }
 0xe30   :  { %v6667_v24 = vrot.slane %v6353_v32, %v10006_v21 }
 0xe31   :  { %v14779_v56 = vpop.xlane.xlu1 %6971 }
 0xe32   :  { %17976 = vst [vmem:[#allocation99_spill] sm:$0xff] %v14779_v56  ;;  %v6611_v56 = vsel %vm17984_vm15, %v6610_v29, %v6606_v48  ;;  %v6601_v29 = vrot.slane %v6339_v7, %v10010_v23  ;;  %v6359_v7 = vmax.f32 %v14402_v20, -3e+38  ;;  %vm17997_vm15 = vcmask 261312  }
 0xe33   :  { %v6710_v20 = vrot.slane %v6362_v1, %v10008_v22  ;;  %vm17998_vm14 = vmmov %vm17997_vm15  ;;  %v6724_v1 = vrot.slane %v6365_v13, %v10006_v21 }
 0xe34   :  { %vm17999_vm3 = vmmov %vm17998_vm14 }
 0xe35   :  { %v14794_v42 = vpop.xlane.xlu1 %6974 }
 0xe36   :  { %17977 = vst [vmem:[#allocation96_spill] sm:$0xff] %v14794_v42  ;;  %v6343_v42 = vmax.f32 %v17986_v14, -3e+38  ;;  %v6639_v14 = vrot.slane %v6347_v33, %v10010_v23  ;;  %v6616_v33 = vsel %vm17994_vm6, %v6615_v6, %v6611_v56  ;;  %v6696_v6 = vrot.slane %v6359_v7, %v10010_v23 }
 0xe37   :  { %vm18000_vm6 = vcmask 130112  }
 0xe38   :  { %v6620_v41 = vrot.slane %v6343_v42, %v10010_v23  ;;  %v6602_v42 = vsel %vm17997_vm15, %v6601_v29, %v6597_v43  ;;  %v6640_v32 = vsel %vm17998_vm14, %v6639_v14, %v6635_v52  ;;  %v6687_v35 = vsel %vm18000_vm6, %v6686_v58, %v6682_v11  ;;  %vm18001_vm12 = vmmov %vm18000_vm6 }
 0xe39   :  { %v14816_v51 = vpop.xlane.xlu1 %6884  ;;  %v6706_v5 = vsel %vm18001_vm12, %v6705_v28, %v6701_v50  ;;  %vm18002_vm15 = vmmov %vm18000_vm6  ;;  %vm18004_vm14 = vcmask 195712   ;;  %vm18008_vm12 = vcmask 261312  }
 0xe3a   :  { %17983 = vst [vmem:[#allocation82_spill] sm:$0xff] %v14816_v51  ;;  %v17989_v51 = vld [vmem:[#allocation74_spill] sm:$0xff]  ;;  %v6621_v56 = vsel %vm17999_vm3, %v6620_v41, %v6616_v33  ;;  %vm18005_vm3 = vcmask 1042434   ;;  %vm18006_vm1 = vmmov %vm18004_vm14 }
 0xe3b   :  { %v6354_v48 = vmax.f32 %v17989_v51, -3e+38  ;;  %v6351_v51 = vmax.f32 %v14340_v61, -3e+38  ;;  %v6691_v61 = vrot.slane %v6358_v63, %v10008_v22  ;;  %v6743_v29 = vsel %vm18003_vm7, %v6621_v56, %v6602_v42  ;;  %v14861_v63 = vpop.xlane.xlu0 %6917  ;;  %vm18007_vm6 = vmmov %vm18006_vm1 }
 0xe3c   :  { %v6744_v27 = vsel %vm18005_vm3, %v6640_v32, %v6743_v29  ;;  %vm18009_vm7 = vmmov %vm18006_vm1  ;;  %vm18013_vm3 = vcmask 1043459  }
 0xe3d   :  { %v14836_v12 = vpop.xlane.xlu1 %6893  ;;  %v6672_v8 = vrot.slane %v6354_v48, %v10008_v22  ;;  %v6658_v62 = vrot.slane %v6351_v51, %v10010_v23  ;;  %v6668_v48 = vsel %vm18002_vm15, %v6667_v24, %v6663_v44  ;;  %v6654_v51 = vsel %vm18006_vm1, %v6653_v30, %v6649_v60  ;;  %vm18010_vm15 = vmmov %vm18008_vm12 }
 0xe3e   :  { %17991 = vst [vmem:[#allocation83_spill] sm:$0xff] %v14836_v12  ;;  %v6366_v12 = vmax.f32 %v17996_v46, -3e+38  ;;  %v6692_v50 = vsel %vm18007_vm6, %v6691_v61, %v6687_v35  ;;  %v6711_v28 = vsel %vm18009_vm7, %v6710_v20, %v6706_v5  ;;  %vm18011_vm5 = vmmov %vm18008_vm12  ;;  %vm18014_vm1 = vcmask 130112  }
 0xe3f   :  { %v6673_v14 = vsel %vm18004_vm14, %v6672_v8, %v6668_v48  ;;  %v6659_v7 = vsel %vm18010_vm15, %v6658_v62, %v6654_v51  ;;  %v6697_v13 = vsel %vm18011_vm5, %v6696_v6, %v6692_v50  ;;  %vm18012_vm14 = vmmov %vm18011_vm5  ;;  %v6725_v30 = vsel %vm18014_vm1, %v6724_v1, %v14811_v18  ;;  %v14880_v52 = vpop.xlane.xlu0 %6926 }
 0xe40   :  { %v6729_v11 = vrot.slane %v6366_v12, %v10008_v22  ;;  %v6678_v44 = vsel %vm18008_vm12, %v6677_v49, %v6673_v14  ;;  %v6745_v33 = vsel %vm18013_vm3, %v6659_v7, %v6744_v27  ;;  %vm18015_vm6 = vcmask 1044484   ;;  %vm18016_vm12 = vmmov %vm18009_vm7 }
 0xe41   :  { %v6291_v38 = vpop.xlane.xlu1 %6290  ;;  %v6746_v12 = vsel %vm18015_vm6, %v6678_v44, %v6745_v33  ;;  %vm18017_vm7 = vcmask 1045509   ;;  %vm18018_vm15 = vcmask 1046534   ;;  %vm18025_vm1 = vcmask 261120  }
 0xe42   :  { %v6363_v46 = vmax.f32 %v6291_v38, -3e+38  ;;  %v6730_v42 = vsel %vm18016_vm12, %v6729_v11, %v6725_v30  ;;  %v6747_v61 = vsel %vm18017_vm7, %v6697_v13, %v6746_v12  ;;  %v18020_v38 = vld [vmem:[#allocation35_spill] sm:$0xff]  ;;  %vm18026_vm6 = vmmov 0  }
 0xe43   :  { %vm18021_vm3 = vcmp.eq.s32.totalorder %v18020_v38, 1  ;;  %v14894_v6 = vpop.xlane.xlu0 %7001  ;;  %v7043_v13 = vmax.f32 %v14693_v57, -3e+38  ;;  %v7045_v33 = vmax.f32 %v14705_v40, -3e+38  ;;  %vm18027_vm12 = vcmask 130112  }
 0xe44   :  { %v6715_v41 = vrot.slane %v6363_v46, %v10010_v23  ;;  %v18022_v46 = vld [vmem:[#allocation64_spill] sm:$0xff]  ;;  %v7084_v57 = vmax.f32 %v14754_v9, -3e+38  ;;  %v7047_v40 = vmax.f32 %v14717_v59, -3e+38  ;;  %vm18028_vm7 = vcmask 195712  }
 0xe45   :  { %v6303_v58 = vpop.xlane.xlu1 %6302  ;;  %v18023_v35 = vmax.f32 %v18022_v46, 0.0 }
 0xe46   :  { %v6367_v24 = vmax.f32 %v6303_v58, -3e+38  ;;  %v6716_v43 = vsel %vm18012_vm14, %v6715_v41, %v6711_v28  ;;  %vm18019_vm14 = vcmask 1047559   ;;  %v14959_v59 = vrot.slane %v7084_v57, %v10008_v22 }
 0xe47   :  { %v6748_v32 = vsel %vm18018_vm15, %v6716_v43, %v6747_v61  ;;  %v7044_v43 = vmax.f32 %v14699_v10, -3e+38  ;;  %v7087_v10 = vmax.f32 %v14760_v47, -3e+38  ;;  %v7051_v47 = vmax.f32 %v14735_v15, -3e+38  ;;  %vm18029_vm15 = vmmov %vm18027_vm12 }
 0xe48   :  { %v6734_v60 = vrot.slane %v6367_v24, %v10010_v23  ;;  %v7042_v24 = vmax.f32 %v14687_v31, -3e+38  ;;  %v7187_v31 = vrot.slane %v7045_v33, %v10010_v23 }
 0xe49   :  { %v14882_v8 = vpop.xlane.xlu1 %6899  ;;  %v7182_v61 = vrot.slane %v7044_v43, %v10008_v22  ;;  %v7050_v43 = vmax.f32 %v14729_v3, -3e+38  ;;  %v7215_v3 = vrot.slane %v7051_v47, %v10006_v21 }
 0xe4a   :  { %v6735_v20 = vsel %vm18011_vm5, %v6734_v60, %v6730_v42  ;;  %v7177_v60 = vrot.slane %v7043_v13, %v10006_v21  ;;  %v7173_v12 = vrot.slane %v7042_v24, %v10004_v17  ;;  %v7079_v42 = vmax.f32 %v14748_v4, -3e+38 }
 0xe4b   :  { %v6749_v49 = vsel %vm18019_vm14, %v6735_v20, %v6748_v32  ;;  %v7046_v32 = vmax.f32 %v14711_v25, -3e+38  ;;  %v7060_v4 = vmax.f32 %v14768_v37, -3e+38  ;;  %v14963_v13 = vrot.slane %v7087_v10, %v10006_v21  ;;  %vm18030_vm14 = vmmov %vm18028_vm7 }
 0xe4c   :  { %v6753_v18 = vsel %vm18021_vm3, %v6749_v49, 0.0  ;;  %v7348_v46 = vrot.slane %v7079_v42, %v10006_v21  ;;  %v7196_v37 = vrot.slane %v7047_v40, %v10006_v21  ;;  %v7088_v24 = vmax.f32 %v14804_v45, -3e+38  ;;  %vm18031_vm3 = vmmov %vm18027_vm12 }
 0xe4d   :  { %v7530_v56 = vadd.f32 %v14652_v19, %v6753_v18  ;;  %v14892_v62 = vpop.xlane.xlu1 %6902  ;;  %v14908_v19 = vpop.xlane.xlu0 %7010  ;;  %v7178_v18 = vsel %vm18027_vm12, %v7177_v60, %v7173_v12  ;;  %v14975_v60 = vrot.slane %v7060_v4, %v10008_v22  ;;  %v7091_v42 = vmax.f32 %v14834_v54, -3e+38  ;;  %vm18034_vm12 = vmmov %vm18031_vm3 }
 0xe4e   :  { %v7183_v9 = vsel %vm18028_vm7, %v7182_v61, %v7178_v18  ;;  %v7075_v61 = vmax.f32 %v14744_v53, -3e+38  ;;  %v7078_v45 = vmax.f32 %v14746_v0, -3e+38  ;;  %v7074_v10 = vmax.f32 %v14741_v55, -3e+38  ;;  %vm18036_vm7 = vmmov %vm18031_vm3 }
 0xe4f   :  { %v14898_v5 = vadd.f32 %v7530_v56, %v18023_v35  ;;  %v7048_v56 = vmax.f32 %v14723_v39, -3e+38  ;;  %v7063_v35 = vmax.f32 %v14777_v34, -3e+38  ;;  %v7188_v25 = vsel %vm18011_vm5, %v7187_v31, %v7183_v9 }
 0xe50   :  { %v7192_v39 = vrot.slane %v7046_v32, %v10004_v17  ;;  %v7049_v34 = vmax.f32 %v14750_v2, -3e+38  ;;  %v7064_v2 = vmax.f32 %v14861_v63, -3e+38  ;;  %v7067_v40 = vmax.f32 %v14880_v52, -3e+38 }
 0xe51   :  { %18024 = vst [vmem:[#allocation90_spill] sm:$0xff] %v14898_v5  ;;  %v16706_v48 = vmax.f32 %v14898_v5, 0.0  ;;  %v14901_v29 = vpop.xlane.xlu1 %6956  ;;  %v14914_v27 = vpop.xlane.xlu0 %6929  ;;  %v7201_v12 = vrot.slane %v7048_v56, %v10008_v22  ;;  %v14981_v57 = vrot.slane %v7063_v35, %v10006_v21  ;;  %v7092_v32 = vmax.f32 %v14894_v6, -3e+38 }
 0xe52   :  { %v7197_v31 = vsel %vm18029_vm15, %v7196_v37, %v7192_v39  ;;  %v14991_v54 = vrot.slane %v7088_v24, %v10008_v22  ;;  %v7211_v53 = vrot.slane %v7050_v43, %v10004_v17  ;;  %v7206_v18 = vrot.slane %v7049_v34, %v10010_v23  ;;  %vm18041_vm15 = vmmov %vm18030_vm14 }
 0xe53   :  { %9643 = vmatmul.mubr.msk.f32.vlgmr.msra.gmra.mrb[24].mxu0 %vm18025_vm1, %v16706_v48  ;;  %v7052_v4 = vmax.f32 %v14752_v36, -3e+38  ;;  %v7202_v0 = vsel %vm18030_vm14, %v7201_v12, %v7197_v31  ;;  %v15000_v56 = vrot.slane %v7091_v42, %v10006_v21  ;;  %v7329_v55 = vrot.slane %v7075_v61, %v10006_v21  ;;  %vm18032_vm1 = vmmov %vm18011_vm5  ;;  %v18033_v42 = vld [vmem:[#allocation75_spill] sm:$0xff]  ;;  %v18035_v31 = vld [vmem:[#allocation89_spill] sm:$0xff] }
 0xe54   :  { %9660 = vmatprep.mubr.msk.bf16.mxu0 %vm18026_vm6, %v17636_v26  ;;  %v7095_v52 = vmax.f32 %v14908_v19, -3e+38  ;;  %v7216_v6 = vsel %vm18031_vm3, %v7215_v3, %v7211_v53  ;;  %v15006_v9 = vrot.slane %v7064_v2, %v10008_v22  ;;  %v7344_v35 = vrot.slane %v7078_v45, %v10004_v17  ;;  %vm18043_vm14 = vmmov %vm18031_vm3 }
 0xe55   :  { %v14910_v1 = vpop.xlane.xlu1 %6968  ;;  %v14918_v51 = vpop.xlane.xlu0 %6938  ;;  %v7068_v36 = vmax.f32 %v14914_v27, -3e+38  ;;  %v7325_v37 = vrot.slane %v7074_v10, %v10004_v17  ;;  %v15014_v39 = vrot.slane %v7067_v40, %v10006_v21  ;;  %v15017_v24 = vrot.slane %v7092_v32, %v10008_v22  ;;  %v18037_v32 = vld [vmem:[#allocation93_spill] sm:$0xff]  ;;  %vm18045_vm3 = vmmov %vm18041_vm15 }
 0xe56   :  { %v7055_v19 = vmax.f32 %v14762_v16, -3e+38  ;;  %v7207_v43 = vsel %vm18032_vm1, %v7206_v18, %v7202_v0  ;;  %v7220_v34 = vrot.slane %v7052_v4, %v10008_v22  ;;  %v7071_v12 = vmax.f32 %v14918_v51, -3e+38  ;;  %v18039_v0 = vld [vmem:[#allocation96_spill] sm:$0xff]  ;;  %vm18046_vm1 = vmmov %vm18045_vm3 }
 0xe57   :  { %v7054_v27 = vmax.f32 %v18033_v42, -3e+38  ;;  %v7330_v3 = vsel %vm18034_vm12, %v7329_v55, %v7325_v37  ;;  %v15028_v2 = vrot.slane %v7095_v52, %v10006_v21  ;;  %v7076_v10 = vmax.f32 %v18035_v31, -3e+38  ;;  %v18040_v52 = vld [vmem:[#allocation82_spill] sm:$0xff]  ;;  %v18042_v31 = vld [vmem:[#allocation99_spill] sm:$0xff]  ;;  %vm18047_vm12 = vmmov %vm18036_vm7 }
 0xe58   :  { %v7349_v16 = vsel %vm18036_vm7, %v7348_v46, %v7344_v35  ;;  %v15034_v40 = vrot.slane %v7068_v36, %v10008_v22  ;;  %v7080_v53 = vmax.f32 %v18037_v32, -3e+38  ;;  %vm18038_vm5 = vcmask 1041409  }
 0xe59   :  { %v14912_v14 = vpop.xlane.xlu1 %6983  ;;  %v14924_v44 = vpop.xlane.xlu0 %7013  ;;  %v7474_v18 = vsel %vm18038_vm5, %v7207_v43, %v7188_v25  ;;  %v7234_v4 = vrot.slane %v7055_v19, %v10006_v21  ;;  %v7083_v55 = vmax.f32 %v18039_v0, -3e+38  ;;  %v7053_v37 = vmax.f32 %v18040_v52, -3e+38  ;;  %vm18049_vm5 = vmmov %vm18047_vm12 }
 0xe5a   :  { %v7096_v45 = vmax.f32 %v14924_v44, -3e+38  ;;  %v7221_v44 = vsel %vm18041_vm15, %v7220_v34, %v7216_v6  ;;  %v15044_v42 = vrot.slane %v7071_v12, %v10006_v21  ;;  %v7230_v46 = vrot.slane %v7054_v27, %v10004_v17 }
 0xe5b   :  { %v7334_v19 = vrot.slane %v7076_v10, %v10008_v22  ;;  %v7082_v6 = vmax.f32 %v18042_v31, -3e+38  ;;  %v7353_v12 = vrot.slane %v7080_v53, %v10008_v22  ;;  %v7225_v0 = vrot.slane %v7053_v37, %v10010_v23  ;;  %v18044_v10 = vld [vmem:[#allocation83_spill] sm:$0xff] }
 0xe5c   :  { %v15053_v25 = vrot.slane %v7096_v45, %v10008_v22  ;;  %v7235_v32 = vsel %vm18043_vm14, %v7234_v4, %v7230_v46  ;;  %v7367_v45 = vrot.slane %v7083_v55, %v10006_v21  ;;  %v7056_v52 = vmax.f32 %v18044_v10, -3e+38  ;;  %vm18051_vm14 = vmmov %vm18046_vm1 }
 0xe5d   :  { %v14916_v41 = vpop.xlane.xlu1 %6896  ;;  %v14928_v28 = vpop.xlane.xlu0 %7022  ;;  %v7077_v31 = vmax.f32 %v14901_v29, -3e+38  ;;  %v7086_v53 = vmax.f32 %v14912_v14, -3e+38  ;;  %v7363_v4 = vrot.slane %v7082_v6, %v10004_v17  ;;  %v7354_v37 = vsel %vm18046_vm1, %v7353_v12, %v7349_v16 }
 0xe5e   :  { %v7099_v51 = vmax.f32 %v14928_v28, -3e+38  ;;  %v7059_v28 = vmax.f32 %v14892_v62, -3e+38  ;;  %v7058_v62 = vmax.f32 %v14882_v8, -3e+38  ;;  %v7335_v8 = vsel %vm18045_vm3, %v7334_v19, %v7330_v3  ;;  %vm18052_vm3 = vmmov %vm18046_vm1 }
 0xe5f   :  { %v7057_v55 = vmax.f32 %v14916_v41, -3e+38  ;;  %vm18048_vm7 = vcmask 261312   ;;  %v7339_v16 = vrot.slane %v7077_v31, %v10010_v23  ;;  %v7382_v12 = vrot.slane %v7086_v53, %v10004_v17 }
 0xe60   :  { %v15059_v34 = vrot.slane %v7099_v51, %v10006_v21  ;;  %v7081_v51 = vmax.f32 %v14910_v1, -3e+38  ;;  %v7249_v1 = vrot.slane %v7058_v62, %v10004_v17  ;;  %v7226_v19 = vsel %vm18048_vm7, %v7225_v0, %v7221_v44 }
 0xe61   :  { %v14920_v11 = vpop.xlane.xlu1 %6911  ;;  %v14942_v20 = vpop.xlane.xlu0 %6941  ;;  %v7244_v10 = vrot.slane %v7057_v55, %v10010_v23  ;;  %vm18050_vm15 = vcmask 1042434   ;;  %v7387_v55 = vsel %vm18049_vm5, %v14963_v13, %v7382_v12 }
 0xe62   :  { %v7072_v43 = vmax.f32 %v14942_v20, -3e+38  ;;  %v7253_v20 = vrot.slane %v7059_v28, %v10006_v21  ;;  %v7062_v14 = vmax.f32 %v14920_v11, -3e+38  ;;  %v7368_v28 = vsel %vm18047_vm12, %v7367_v45, %v7363_v4  ;;  %vm18053_vm12 = vmmov %vm18048_vm7 }
 0xe63   :  { %v7358_v6 = vrot.slane %v7081_v51, %v10010_v23  ;;  %v7475_v44 = vsel %vm18050_vm15, %v7226_v19, %v7474_v18  ;;  %vm18054_vm15 = vmmov %vm18048_vm7 }
 0xe64   :  { %v7254_v41 = vsel %vm18049_vm5, %v7253_v20, %v7249_v1  ;;  %v7268_v0 = vrot.slane %v7062_v14, %v10004_v17 }
 0xe65   :  { %v14922_v50 = vpop.xlane.xlu1 %6980  ;;  %v14970_v33 = vpop.xlane.xlu0 %7025  ;;  %v7259_v4 = vsel %vm18046_vm1, %v14975_v60, %v7254_v41  ;;  %v7359_v18 = vsel %vm18048_vm7, %v7358_v6, %v7354_v37 }
 0xe66   :  { %v7100_v27 = vmax.f32 %v14970_v33, -3e+38  ;;  %v15076_v33 = vrot.slane %v7072_v43, %v10008_v22  ;;  %v7239_v43 = vrot.slane %v7056_v52, %v10008_v22  ;;  %v7085_v45 = vmax.f32 %v14922_v50, -3e+38 }
 0xe67   :  { %v7373_v52 = vsel %vm18051_vm14, %v14959_v59, %v7368_v28  ;;  %v7340_v50 = vsel %vm18053_vm12, %v7339_v16, %v7335_v8  ;;  %vm18055_vm14 = vmmov %vm18049_vm5  ;;  %vm18057_vm12 = vcmask 1043459  }
 0xe68   :  { %v15082_v46 = vrot.slane %v7100_v27, %v10008_v22  ;;  %v7240_v31 = vsel %vm18052_vm3, %v7239_v43, %v7235_v32  ;;  %v7377_v32 = vrot.slane %v7085_v45, %v10010_v23  ;;  %v7273_v60 = vsel %vm18055_vm14, %v14981_v57, %v7268_v0  ;;  %vm18059_vm14 = vmmov %vm18049_vm5 }
 0xe69   :  { %v14926_v58 = vpop.xlane.xlu1 %6995  ;;  %v15010_v47 = vpop.xlane.xlu0 %7034  ;;  %vm18056_vm3 = vcmask 1041409  }
 0xe6a   :  { %v7103_v3 = vmax.f32 %v15010_v47, -3e+38  ;;  %v7090_v51 = vmax.f32 %v14926_v58, -3e+38  ;;  %v7378_v16 = vsel %vm18048_vm7, %v7377_v32, %v7373_v52 }
 0xe6c   :  { %v7401_v13 = vrot.slane %v7090_v51, %v10004_v17 }
 0xe6d   :  { %v14930_v7 = vpop.xlane.xlu1 %6908  ;;  %v15047_v35 = vpop.xlane.xlu0 %7028 }
 0xe6e   :  { %v7101_v62 = vmax.f32 %v15047_v35, -3e+38  ;;  %v7061_v53 = vmax.f32 %v14930_v7, -3e+38 }
 0xe71   :  { %v14936_v30 = vpop.xlane.xlu1 %6923  ;;  %v15084_v29 = vpop.xlane.xlu0 %7040 }
 0xe72   :  { %v7105_v11 = vmax.f32 %v15084_v29, -3e+38  ;;  %v7066_v20 = vmax.f32 %v14936_v30, -3e+38  ;;  %v7245_v30 = vsel %vm18054_vm15, %v7244_v10, %v7240_v31  ;;  %vm18058_vm15 = vmmov %vm18046_vm1  ;;  %v7406_v10 = vsel %vm18059_vm14, %v15000_v56, %v7401_v13 }
 0xe74   :  { %v7287_v8 = vrot.slane %v7066_v20, %v10004_v17  ;;  %v7472_v47 = vrot.slane %v7105_v11, %v10010_v23  ;;  %v18089_v11 = vld [vmem:[#allocation52_spill] sm:$0xff] }
 0xe75   :  { %v14949_v49 = vpop.xlane.xlu1 %6992 }
 0xe76   :  { %v7089_v37 = vmax.f32 %v14949_v49, -3e+38  ;;  %v7476_v49 = vsel %vm18057_vm12, %v7245_v30, %v7475_v44  ;;  %vm18062_vm12 = vmmov %vm18049_vm5 }
 0xe79   :  { %v14972_v15 = vpop.xlane.xlu1 %7007 }
 0xe7a   :  { %v7094_v59 = vmax.f32 %v14972_v15, -3e+38  ;;  %v7263_v15 = vrot.slane %v7061_v53, %v10010_v23 }
 0xe7c   :  { %v7420_v57 = vrot.slane %v7094_v59, %v10004_v17 }
 0xe7d   :  { %v14996_v63 = vpop.xlane.xlu1 %6920 }
 0xe7e   :  { %v7065_v58 = vmax.f32 %v14996_v63, -3e+38  ;;  %v7481_v63 = vsel %vm18056_vm3, %v7359_v18, %v7340_v50  ;;  %vm18060_vm3 = vmmov %vm18048_vm7 }
 0xe7f   :  { %v7264_v45 = vsel %vm18060_vm3, %v7263_v15, %v7259_v4  ;;  %vm18063_vm7 = vmmov %vm18060_vm3  ;;  %v7453_v15 = vrot.slane %v7101_v62, %v10010_v23  ;;  %v18083_v62 = vld [vmem:[#allocation71_spill] sm:$0xff] }
 0xe80   :  { %v7282_v6 = vrot.slane %v7065_v58, %v10010_v23  ;;  %vm18064_vm14 = vmmov %vm18060_vm3 }
 0xe81   :  { %v15024_v61 = vpop.xlane.xlu1 %6935  ;;  %vm18065_vm3 = vmmov %vm18058_vm15 }
 0xe82   :  { %v7070_v7 = vmax.f32 %v15024_v61, -3e+38  ;;  %v7392_v61 = vsel %vm18046_vm1, %v14991_v54, %v7387_v55  ;;  %v7278_v54 = vsel %vm18058_vm15, %v15006_v9, %v7273_v60  ;;  %vm18061_vm1 = vcmask 1042434  }
 0xe83   :  { %v7482_v52 = vsel %vm18061_vm1, %v7378_v16, %v7481_v63  ;;  %v7283_v51 = vsel %vm18063_vm7, %v7282_v6, %v7278_v54  ;;  %v7411_v18 = vsel %vm18065_vm3, %v15017_v24, %v7406_v10  ;;  %vm18066_vm1 = vmmov %vm18063_vm7 }
 0xe84   :  { %v7306_v12 = vrot.slane %v7070_v7, %v10004_v17  ;;  %vm18068_vm0 = vmmov %vm18066_vm1 }
 0xe85   :  { %v15050_v36 = vpop.xlane.xlu1 %7004  ;;  %vm18069_vm7 = vmmov %vm18049_vm5 }
 0xe86   :  { %v7093_v28 = vmax.f32 %v15050_v36, -3e+38  ;;  %v7396_v36 = vrot.slane %v7089_v37, %v10010_v23  ;;  %v7311_v56 = vsel %vm18049_vm5, %v15044_v42, %v7306_v12 }
 0xe88   :  { %v7415_v44 = vrot.slane %v7093_v28, %v10010_v23  ;;  %v7397_v50 = vsel %vm18064_vm14, %v7396_v36, %v7392_v61  ;;  %vm18072_vm14 = vmmov %vm18065_vm3  ;;  %v18091_v36 = vld [vmem:[#allocation81_spill] sm:$0xff] }
 0xe89   :  { %v15072_v48 = vpop.xlane.xlu1 %7019  ;;  %v7316_v24 = vsel %vm18072_vm14, %v15076_v33, %v7311_v56  ;;  %v9756_v56 = vld [vmem:[%s16326_s5] sm:$0xff]  }
 0xe8a   :  { %v7098_v19 = vmax.f32 %v15072_v48, -3e+38  ;;  %v7292_v48 = vsel %vm18049_vm5, %v15014_v39, %v7287_v8  ;;  %v7425_v39 = vsel %vm18062_vm12, %v15028_v2, %v7420_v57  ;;  %vm18067_vm12 = vcmask 1044484   ;;  %vm18070_vm5 = vmmov %vm18065_vm3 }
 0xe8b   :  { %v7297_v4 = vsel %vm18058_vm15, %v15034_v40, %v7292_v48  ;;  %v7477_v55 = vsel %vm18067_vm12, %v7264_v45, %v7476_v49  ;;  %v7416_v59 = vsel %vm18068_vm0, %v7415_v44, %v7411_v18  ;;  %v7430_v42 = vsel %vm18070_vm5, %v15053_v25, %v7425_v39  ;;  %vm18071_vm15 = vmmov %vm18068_vm0 }
 0xe8c   :  { %v7439_v0 = vrot.slane %v7098_v19, %v10004_v17  ;;  %vm18073_vm3 = vcmask 1045509   ;;  %vm18075_vm12 = vcmask 1046534   ;;  %v7462_v25 = vrot.slane %v7103_v3, %v10006_v21  ;;  %v18078_v19 = vld [vmem:[#allocation56_spill] sm:$0xff] }
 0xe8d   :  { %v6933_v27 = vpop.xlane.xlu1 %6932  ;;  %v7478_v7 = vsel %vm18073_vm3, %v7283_v51, %v7477_v55  ;;  %vm18079_vm14 = vcmp.eq.s32.totalorder %v18078_v19, 1 }
 0xe8e   :  { %v7069_v14 = vmax.f32 %v6933_v27, -3e+38 }
 0xe90   :  { %v7301_v27 = vrot.slane %v7069_v14, %v10010_v23 }
 0xe91   :  { %v7017_v1 = vpop.xlane.xlu1 %7016 }
 0xe92   :  { %v7097_v43 = vmax.f32 %v7017_v1, -3e+38  ;;  %v7302_v2 = vsel %vm18066_vm1, %v7301_v27, %v7297_v4  ;;  %v7444_v1 = vsel %vm18069_vm7, %v15059_v34, %v7439_v0  ;;  %vm18074_vm1 = vcmask 1043459   ;;  %v18093_v27 = vld [vmem:[#allocation79_spill] sm:$0xff] }
 0xe93   :  { %v7483_v60 = vsel %vm18074_vm1, %v7397_v50, %v7482_v52  ;;  %v7479_v37 = vsel %vm18075_vm12, %v7302_v2, %v7478_v7  ;;  %vm18076_vm7 = vcmask 1047559   ;;  %v7449_v13 = vsel %vm18070_vm5, %v15082_v46, %v7444_v1  ;;  %v18081_v46 = vld [vmem:[#allocation85_spill] sm:$0xff]  ;;  %vm18082_vm12 = vmmov %vm18070_vm5  ;;  %v18100_v50 = vld [vmem:[#allocation40_spill] sm:$0xff] }
 0xe94   :  { %v7434_v20 = vrot.slane %v7097_v43, %v10010_v23  ;;  %vm18080_vm1 = vcmask 130112   ;;  %v7454_v43 = vsel %vm18068_vm0, %v7453_v15, %v7449_v13  ;;  %vm18087_vm5 = vcmask 1046534   ;;  %v18109_v7 = vld [vmem:[#allocation43_spill] sm:$0xff]  ;;  %v18113_v13 = vld [vmem:[#allocation46_spill] sm:$0xff] }
 0xe95   :  { %v7032_v41 = vpop.xlane.xlu1 %7031  ;;  %v18094_v10 = vmax.f32 %v18093_v27, 0.0  ;;  %v18129_v27 = vld [vmem:[#allocation32_spill] sm:$0xff] }
 0xe96   :  { %v7102_v31 = vmax.f32 %v7032_v41, -3e+38  ;;  %v7435_v40 = vsel %vm18071_vm15, %v7434_v20, %v7430_v42  ;;  %vm18077_vm15 = vcmask 1044484   ;;  %v18084_v41 = vmax.f32 %v18083_v62, 0.0  ;;  %v18105_v42 = vld [vmem:[#allocation44_spill] sm:$0xff] }
 0xe97   :  { %v7484_v33 = vsel %vm18077_vm15, %v7416_v59, %v7483_v60  ;;  %vm18088_vm15 = vcmask 1047559   ;;  %v18103_v59 = vld [vmem:[#allocation33_spill] sm:$0xff] }
 0xe98   :  { %v7458_v32 = vrot.slane %v7102_v31, %v10004_v17  ;;  %v7485_v61 = vsel %vm18073_vm3, %v7435_v40, %v7484_v33  ;;  %vm18092_vm3 = vcmask 261120  }
 0xe99   :  { %v6945_v9 = vpop.xlane.xlu1 %6944  ;;  %v7486_v6 = vsel %vm18087_vm5, %v7454_v43, %v7485_v61  ;;  %vm18104_vm5 = vnez %v18103_v59 }
 0xe9a   :  { %v7073_v53 = vmax.f32 %v6945_v9, -3e+38  ;;  %v7463_v3 = vsel %vm18080_vm1, %v7462_v25, %v7458_v32  ;;  %vm18096_vm1 = vmmov %vm18092_vm3  ;;  %v18112_v25 = vld [vmem:[#allocation14_spill] sm:$0xff] }
 0xe9c   :  { %v7320_v30 = vrot.slane %v7073_v53, %v10010_v23  ;;  %v18098_v53 = vld [vmem:[#allocation37_spill] sm:$0xff] }
 0xe9d   :  { %v7038_v58 = vpop.xlane.xlu1 %7037 }
 0xe9e   :  { %v7104_v8 = vmax.f32 %v7038_v58, -3e+38  ;;  %v7321_v34 = vsel %vm18068_vm0, %v7320_v30, %v7316_v24 }
 0xe9f   :  { %v7480_v14 = vsel %vm18076_vm7, %v7321_v34, %v7479_v37  ;;  %vm18086_vm7 = vmmov %vm18068_vm0  ;;  %vm18099_vm0 = vnez %v18098_v53 }
 0xea0   :  { %v7467_v28 = vrot.slane %v7104_v8, %v10008_v22  ;;  %v7490_v63 = vsel %vm18079_vm14, %v7480_v14, 0.0  ;;  %vm18090_vm14 = vcmp.eq.s32.totalorder %v18089_v11, 1 }
 0xea1   :  { %v7571_v57 = vadd.f32 %v18081_v46, %v7490_v63 }
 0xea2   :  { %v7468_v35 = vsel %vm18082_vm12, %v7467_v28, %v7463_v3 }
 0xea3   :  { %v15197_v49 = vadd.f32 %v7571_v57, %v18084_v41  ;;  %v7473_v16 = vsel %vm18086_vm7, %v7472_v47, %v7468_v35  ;;  %v18117_v47 = vld [vmem:[#allocation45_spill] sm:$0xff]  ;;  %v18121_v35 = vld [vmem:[#allocation15_spill] sm:$0xff]  ;;  %v18123_v41 = vld [vmem:[#allocation48_spill] sm:$0xff] }
 0xea4   :  { %v7487_v12 = vsel %vm18088_vm15, %v7473_v16, %v7486_v6  ;;  %v18125_v6 = vld [vmem:[#allocation47_spill] sm:$0xff] }
 0xea5   :  { %18085 = vst [vmem:[#allocation94_spill] sm:$0xff] %v15197_v49  ;;  %v16717_v29 = vmax.f32 %v15197_v49, 0.0  ;;  %v7491_v48 = vsel %vm18090_vm14, %v7487_v12, 0.0 }
 0xea6   :  { %v7574_v54 = vadd.f32 %v18091_v36, %v7491_v48 }
 0xea7   :  { %9653 = vmatprep.mubr.msk.f32.mxu1 %vm18092_vm3, %v16717_v29  ;;  %v18197_v29 = vld [vmem:[#allocation18_spill] sm:$0xff] }
 0xea8   :  { %v15211_v45 = vadd.f32 %v7574_v54, %v18094_v10 }
 0xeaa   :  { %18095 = vst [vmem:[#allocation87_spill] sm:$0xff] %v15211_v45  ;;  %v16716_v44 = vmax.f32 %v15211_v45, 0.0 }
 0xeac   :  { %9654 = vmatmul.mubr.msk.f32.vlgmr.msra.gmra.mrb[24].mxu1 %vm18096_vm1, %v16716_v44 }
 0xead   :  { %9666 = vmatprep.mubr.msk.bf16.mxu1 %vm18026_vm6, %v17636_v26  ;;  %vm18097_vm6 = vcmask 130048  }
 0xeae   :  { %vm18101_vm12 = vmmov %vm18097_vm6 }
 0xeaf   :  { %vm18102_vm7 = vmmov %vm18097_vm6 }
 0xeb0   :  { %vm18106_vm15 = vmmov %vm18097_vm6 }
 0xeb1   :  { %vm18107_vm14 = vmmov %vm18097_vm6 }
 0xeb2   :  { %vm18110_vm3 = vmmov %vm18097_vm6 }
 0xeb3   :  { %vm18111_vm1 = vmmov %vm18110_vm3 }
 0xf26   :  { %v9644_v0 = vpop.f32.mrb[24].mxu0 }
 0xf27   :  { %v7667_v52 = vpop.f32.mrb[25].mxu0 }
 0xf28   :  { %v7757_v39 = vpack.c.bf16 %v9644_v0, %v7667_v52  ;;  %7764 = vrot.lane.b32.xlu0 %v7667_v52, %s9859_s28 }
 0xf2a   :  { %9657 = vmatpush3.bf16.msra.mxu0 %v7757_v39 }
 0xf2b   :  { %9658 = vmatprep.subr.bf16.mxu0 %v17636_v26 }
 0xf2c   :  { %9287 = vrot.lane.b32.xlu0 %v7757_v39, %s9864_s10  ;;  %s9866_s10 = smov [#allocation8]  }
 0xf2d   :  { %s9364_s26 = sshll.u32 %s9866_s10, 4  ;;  %s9365_s26 = int_to_ptr.vmem [resolvable:$true] %s9364_s26 }
 0xf7f   :  { %v9655_v20 = vpop.f32.mrb[24].mxu1 }
 0xf80   :  { %v7748_v31 = vpop.f32.mrb[25].mxu1 }
 0xf81   :  { %8508 = vxpose.xlu1.b32.start [1/2] (short) (narrow) %v7748_v31, 32  ;;  %v18135_v31 = vld [vmem:[#allocation49_spill] sm:$0xff] }
 0xf85   :  { %8509 = vxpose.xlu1.b32.end [2/2] (short) (narrow) %v9655_v20, 32 }
 0xf9a   :  { %v15222_v9 = vpop.permute.xlu0 %7764 }
 0xf9e   :  { %v9288_v51 = vpop.permute.xlu0 %9287 }
 0xf9f   :  { %9665 = vmatpush3.bf16.msra.mxu1 %v9288_v51 }
 0xfa2   :  { %9667 = vmatmul.mubr.msk.bf16.vlgmr.msra.gmra.mrb[28].mxu1 %vm18097_vm6, %v9756_v56  ;;  %vm18114_vm6 = vmmov %vm18111_vm1 }
 0xfab   :  { %7766 = vrot.lane.b32.xlu1 %v9644_v0, %s9859_s28 }
 0xfaf   :  { %7759 = vrot.lane.b32.xlu1 %v7757_v39, %s9860_s9  ;;  %v18133_v39 = vld [vmem:[#allocation42_spill] sm:$0xff] }
0x1001   :  { %v15230_v26 = vpop.trf.xlu1 }
0x1002   :  { %v8540_v4 = vsel %vm18099_vm0, %v15230_v26, -3e+38  ;;  %v8556_v18 = vsel %vm17898_vm8, %v15230_v26, -3e+38  ;;  %v8544_v1 = vsel %vm18104_vm5, %v15230_v26, -3e+38 }
0x1003   :  { %v8604_v2 = vsel %vm18101_vm12, %v8540_v4, -inf  ;;  %v8652_v55 = vsel %vm18102_vm7, %v8556_v18, -inf  ;;  %v8588_v30 = vsel %vm17909_vm10, %v15230_v26, -3e+38  ;;  %v8616_v40 = vsel %vm18106_vm15, %v8544_v1, -inf  ;;  %vm18115_vm12 = vmmov %vm18111_vm1 }
0x1004   :  { %8605 = vmax.xlane.f32.xlu0 %v8604_v2  ;;  %8653 = vmax.xlane.f32.xlu1 %v8652_v55  ;;  %v8748_v32 = vsel %vm18107_vm14, %v8588_v30, -inf  ;;  %v8572_v24 = vsel %vm17919_vm2, %v15230_v26, -3e+38  ;;  %v8560_v60 = vsel %vm17903_vm13, %v15230_v26, -3e+38  ;;  %vm18118_vm7 = vnez %v18117_v47  ;;  %vm18119_vm15 = vmmov %vm18111_vm1 }
0x1005   :  { %v8700_v8 = vsel %vm18110_vm3, %v8572_v24, -inf  ;;  %v8664_v34 = vsel %vm18111_vm1, %v8560_v60, -inf  ;;  %v15256_v37 = vpop.trf.xlu1  ;;  %v8576_v14 = vsel %vm17886_vm9, %v15230_v26, -3e+38  ;;  %v8592_v33 = vsel %vm17962_vm11, %v15230_v26, -3e+38  ;;  %vm18120_vm14 = vmmov %vm18111_vm1 }
0x1006   :  { %v8712_v15 = vsel %vm18114_vm6, %v8576_v14, -inf  ;;  %v8760_v28 = vsel %vm18115_vm12, %v8592_v33, -inf  ;;  %v8548_v61 = vsel %vm17911_vm4, %v15230_v26, -3e+38  ;;  %v8564_v3 = vsel %vm18118_vm7, %v15230_v26, -3e+38  ;;  %vm18127_vm11 = vmmov %vm18115_vm12 }
0x1007   :  { %v8628_v57 = vsel %vm18119_vm15, %v8548_v61, -inf  ;;  %v8676_v43 = vsel %vm18120_vm14, %v8564_v3, -inf  ;;  %vm18122_vm3 = vnez %v18121_v35  ;;  %vm18124_vm1 = vnez %v18123_v41  ;;  %vm18131_vm14 = vmmov %vm18127_vm11  ;;  %v9757_v60 = vld [vmem:[%s16323_s2] sm:$0xff]   ;;  %s9865_s2 = smov [#allocation7]  }
0x1008   :  { %8617 = vmax.xlane.f32.xlu0 %v8616_v40  ;;  %8749 = vmax.xlane.f32.xlu1 %v8748_v32  ;;  %v8580_v62 = vsel %vm18122_vm3, %v15230_v26, -3e+38  ;;  %v8596_v16 = vsel %vm18124_vm1, %v15230_v26, -3e+38  ;;  %vm18126_vm6 = vnez %v18125_v6  ;;  %vm18130_vm15 = vnez %v18129_v27  ;;  %vm18132_vm13 = vmmov %vm18127_vm11  ;;  %s9352_s9 = sshll.u32 %s9865_s2, 4  ;;  %s9353_s9 = int_to_ptr.vmem [resolvable:$true] %s9352_s9 }
0x1009   :  { %v15272_v46 = vpop.trf.xlu1  ;;  %v8569_v12 = vsel %vm18126_vm6, %v15256_v37, -3e+38  ;;  %v8724_v48 = vsel %vm18115_vm12, %v8580_v62, -inf  ;;  %v8772_v36 = vsel %vm18127_vm11, %v8596_v16, -inf  ;;  %v8552_v10 = vsel %vm18130_vm15, %v15230_v26, -3e+38  ;;  %vm18139_vm8 = vmmov %vm18115_vm12  ;;  %p9807_p3 = scmp.lt.s32.totalorder %s9353_s9, %s9353_s9 }
0x100a   :  { %v8691_v0 = vsel %vm18131_vm14, %v8569_v12, -inf  ;;  %v8640_v52 = vsel %vm18132_vm13, %v8552_v10, -inf  ;;  %vm18134_vm10 = vnez %v18133_v39  ;;  %vm18136_vm11 = vnez %v18135_v31  ;;  %vm18137_vm14 = vmmov %vm18115_vm12  ;;  %s9802_s16 = scalar_lea.vmem %s9353_s9, 256 }
0x100b   :  { %v8584_v20 = vsel %vm18134_vm10, %v15230_v26, -3e+38  ;;  %v8601_v51 = vsel %vm18136_vm11, %v15256_v37, -3e+38  ;;  %v8578_v4 = vsel %vm17886_vm9, %v15272_v46, -3e+38  ;;  %vm18138_vm13 = vmmov %vm18115_vm12  ;;  %p9803_p2 = scmp.ne.s32.totalorder %s9353_s9, %s9802_s16  ;;  %p9808_p4 = scmp.lt.s32.totalorder %s9802_s16, %s9802_s16 }
0x100c   :  { %8701 = vmax.xlane.f32.xlu0 %v8700_v8  ;;  %8665 = vmax.xlane.f32.xlu1 %v8664_v34  ;;  %v8736_v18 = vsel %vm18115_vm12, %v8584_v20, -inf  ;;  %v8787_v2 = vsel %vm18137_vm14, %v8601_v51, -inf  ;;  %v8568_v55 = vsel %vm18126_vm6, %v15230_v26, -3e+38  ;;  %v8718_v30 = vsel %vm18138_vm13, %v8578_v4, -inf  ;;  %vm18141_vm14 = vmmov %vm18139_vm8 }
0x100d   :  { %v15287_v54 = vpop.trf.xlu1  ;;  %v8688_v40 = vsel %vm18139_vm8, %v8568_v55, -inf  ;;  %v8600_v32 = vsel %vm18136_vm11, %v15230_v26, -3e+38  ;;  %v8566_v24 = vsel %vm18118_vm7, %v15272_v46, -3e+38  ;;  %vm18140_vm12 = vcmask 261120   ;;  %vm18142_vm13 = vmmov %vm18139_vm8  ;;  %p9809_p5 = por %p9808_p4, %p9807_p3 }
0x100e   :  { %18128 = vst [vmem:[#allocation97_spill] sm:$0xff] %v15287_v54  ;;  %v8784_v8 = vsel %vm18141_vm14, %v8600_v32, -inf  ;;  %v8682_v34 = vsel %vm18142_vm13, %v8566_v24, -inf  ;;  %v8541_v26 = vsel %vm18099_vm0, %v15256_v37, -3e+38  ;;  %vm18143_vm7 = vmmov %vm18139_vm8 }
0x100f   :  { %v8598_v14 = vsel %vm18124_vm1, %v15272_v46, -3e+38  ;;  %v8607_v33 = vsel %vm18139_vm8, %v8541_v26, -inf  ;;  %v8570_v61 = vsel %vm18126_vm6, %v15272_v46, -3e+38  ;;  %vm18145_vm14 = vmmov %vm18143_vm7  ;;  %p9810_p6 = pnand %p9809_p5, %p9803_p2 }
0x1010   :  { %8713 = vmax.xlane.f32.xlu0 %v8712_v15  ;;  %8761 = vmax.xlane.f32.xlu1 %v8760_v28  ;;  %v8778_v15 = vsel %vm18143_vm7, %v8598_v14, -inf  ;;  %v8545_v28 = vsel %vm18104_vm5, %v15256_v37, -3e+38  ;;  %v8602_v62 = vsel %vm18136_vm11, %v15272_v46, -3e+38  ;;  %vm18146_vm13 = vmmov %vm18143_vm7 }
0x1011   :  { %v8551_v16 = vsel %vm17911_vm4, %v15287_v54, -3e+38  ;;  %vm18147_vm8 = vmmov %vm18143_vm7  ;;  %v8583_v20 = vsel %vm18122_vm3, %v15287_v54, -3e+38  ;;  %v8586_v63 = vsel %vm18134_vm10, %v15272_v46, -3e+38 }
0x1012   :  { %v8637_v10 = vsel %vm18147_vm8, %v8551_v16, -inf  ;;  %v8733_v4 = vsel %vm18143_vm7, %v8583_v20, -inf  ;;  %vm18151_vm8 = vmmov %vm18143_vm7  ;;  %v8546_v20 = vsel %vm18104_vm5, %v15272_v46, -3e+38 }
0x1013   :  { %vm18158_vm11 = vmmov %vm18151_vm8 }
0x1014   :  { %8629 = vmax.xlane.f32.xlu0 %v8628_v57  ;;  %8677 = vmax.xlane.f32.xlu1 %v8676_v43  ;;  %v8694_v57 = vsel %vm18145_vm14, %v8570_v61, -inf  ;;  %v8573_v43 = vsel %vm17919_vm2, %v15256_v37, -3e+38  ;;  %vm18149_vm14 = vmmov %vm18143_vm7 }
0x1015   :  { %v8703_v12 = vsel %vm18143_vm7, %v8573_v43, -inf  ;;  %vm18161_vm6 = vmmov %vm18158_vm11 }
0x1018   :  { %8725 = vmax.xlane.f32.xlu0 %v8724_v48  ;;  %8773 = vmax.xlane.f32.xlu1 %v8772_v36  ;;  %v8790_v48 = vsel %vm18146_vm13, %v8602_v62, -inf  ;;  %v8577_v36 = vsel %vm17886_vm9, %v15256_v37, -3e+38  ;;  %vm18150_vm13 = vmmov %vm18143_vm7  ;;  %vm18164_vm9 = vnez %v18117_v47 }
0x101c   :  { %8641 = vmax.xlane.f32.xlu0 %v8640_v52  ;;  %8692 = vmax.xlane.f32.xlu1 %v8691_v0  ;;  %v8549_v52 = vsel %vm17911_vm4, %v15256_v37, -3e+38 }
0x101d   :  { %v15300_v56 = vpop.permute.xlu1 %7766  ;;  %v8631_v51 = vsel %vm18149_vm14, %v8549_v52, -inf  ;;  %vm18153_vm14 = vmmov %vm18143_vm7 }
0x1020   :  { %8737 = vmax.xlane.f32.xlu0 %v8736_v18  ;;  %8788 = vmax.xlane.f32.xlu1 %v8787_v2  ;;  %v8581_v18 = vsel %vm18122_vm3, %v15256_v37, -3e+38  ;;  %v8555_v2 = vsel %vm18130_vm15, %v15287_v54, -3e+38 }
0x1021   :  { %v7760_v1 = vpop.permute.xlu1 %7759  ;;  %v8727_v55 = vsel %vm18150_vm13, %v8581_v18, -inf  ;;  %vm18155_vm13 = vmmov %vm18151_vm8  ;;  %v8550_v18 = vsel %vm17911_vm4, %v15272_v46, -3e+38 }
0x1022   :  { %9659 = vmatpush3.bf16.msra.mxu0 %v7760_v1  ;;  %v8649_v1 = vsel %vm18151_vm8, %v8555_v2, -inf  ;;  %vm18170_vm4 = vmmov %vm18161_vm6 }
0x1024   :  { %8689 = vmax.xlane.f32.xlu0 %v8688_v40  ;;  %8719 = vmax.xlane.f32.xlu1 %v8718_v30  ;;  %v8553_v30 = vsel %vm18130_vm15, %v15256_v37, -3e+38  ;;  %v8587_v40 = vsel %vm18134_vm10, %v15287_v54, -3e+38 }
0x1025   :  { %9661 = vmatmul.mubr.msk.bf16.vlgmr.msra.gmra.mrb[28].mxu0 %vm18140_vm12, %v9757_v60  ;;  %vm18144_vm12 = vmmov %vm18143_vm7  ;;  %v8745_v24 = vsel %vm18153_vm14, %v8587_v40, -inf  ;;  %v8585_v60 = vsel %vm18134_vm10, %v15256_v37, -3e+38 }
0x1026   :  { %v8619_v3 = vsel %vm18144_vm12, %v8545_v28, -inf  ;;  %vm18148_vm12 = vmmov %vm18143_vm7 }
0x1027   :  { %v8715_v0 = vsel %vm18148_vm12, %v8577_v36, -inf  ;;  %vm18152_vm12 = vmmov %vm18143_vm7  ;;  %vm18154_vm7 = vnez %v18100_v50  ;;  %v8597_v36 = vsel %vm18124_vm1, %v15256_v37, -3e+38 }
0x1028   :  { %8785 = vmax.xlane.f32.xlu0 %v8784_v8  ;;  %8683 = vmax.xlane.f32.xlu1 %v8682_v34  ;;  %v8643_v32 = vsel %vm18152_vm12, %v8553_v30, -inf  ;;  %v8559_v8 = vsel %vm18154_vm7, %v15287_v54, -3e+38  ;;  %v8739_v34 = vsel %vm18155_vm13, %v8585_v60, -inf  ;;  %v8557_v14 = vsel %vm18154_vm7, %v15256_v37, -3e+38  ;;  %vm18157_vm14 = vmmov %vm18151_vm8 }
0x1029   :  { %v8661_v26 = vsel %vm18151_vm8, %v8559_v8, -inf  ;;  %vm18156_vm12 = vnez %v18105_v42  ;;  %vm18159_vm13 = vmmov %vm18151_vm8  ;;  %vm18160_vm8 = vnez %v18109_v7  ;;  %v8554_v30 = vsel %vm18130_vm15, %v15272_v46, -3e+38 }
0x102a   :  { %v8589_v61 = vsel %vm18156_vm12, %v15256_v37, -3e+38  ;;  %v8646_v40 = vsel %vm18161_vm6, %v8554_v30, -inf  ;;  %v8558_v35 = vsel %vm18154_vm7, %v15272_v46, -3e+38 }
0x102b   :  { %v8590_v27 = vsel %vm18156_vm12, %v15272_v46, -3e+38  ;;  %v8562_v60 = vsel %vm18160_vm8, %v15272_v46, -3e+38  ;;  %v8543_v42 = vsel %vm18099_vm0, %v15287_v54, -3e+38 }
0x102c   :  { %8608 = vmax.xlane.f32.xlu0 %v8607_v33  ;;  %8779 = vmax.xlane.f32.xlu1 %v8778_v15  ;;  %v8591_v33 = vsel %vm18156_vm12, %v15287_v54, -3e+38  ;;  %v8655_v15 = vsel %vm18157_vm14, %v8557_v14, -inf  ;;  %vm18162_vm14 = vnez %v18113_v13  ;;  %v8563_v58 = vsel %vm18160_vm8, %v15287_v54, -3e+38 }
0x102d   :  { %v8757_v28 = vsel %vm18158_vm11, %v8591_v33, -inf  ;;  %v8593_v62 = vsel %vm18162_vm14, %v15256_v37, -3e+38  ;;  %vm18163_vm11 = vmmov %vm18161_vm6  ;;  %v8575_v33 = vsel %vm17919_vm2, %v15287_v54, -3e+38 }
0x102e   :  { %v8763_v16 = vsel %vm18163_vm11, %v8593_v62, -inf  ;;  %vm18166_vm11 = vmmov %vm18161_vm6  ;;  %v8567_v7 = vsel %vm18164_vm9, %v15287_v54, -3e+38  ;;  %v8599_v13 = vsel %vm18124_vm1, %v15287_v54, -3e+38  ;;  %vm18185_vm1 = vcmask 195712  }
0x1030   :  { %8620 = vmax.xlane.f32.xlu0 %v8619_v3  ;;  %8695 = vmax.xlane.f32.xlu1 %v8694_v57  ;;  %v8751_v3 = vsel %vm18159_vm13, %v8589_v61, -inf  ;;  %v8561_v57 = vsel %vm18160_vm8, %v15256_v37, -3e+38  ;;  %vm18165_vm13 = vmmov %vm18161_vm6 }
0x1031   :  { %v8667_v43 = vsel %vm18161_vm6, %v8561_v57, -inf }
0x1034   :  { %8704 = vmax.xlane.f32.xlu0 %v8703_v12  ;;  %8791 = vmax.xlane.f32.xlu1 %v8790_v48  ;;  %v8565_v12 = vsel %vm18164_vm9, %v15256_v37, -3e+38  ;;  %v8574_v37 = vsel %vm17919_vm2, %v15272_v46, -3e+38  ;;  %vm18184_vm9 = vcmask 130112  }
0x1035   :  { %v8679_v48 = vsel %vm18165_vm13, %v8565_v12, -inf  ;;  %vm18167_vm13 = vmmov %vm18161_vm6 }
0x1038   :  { %8716 = vmax.xlane.f32.xlu0 %v8715_v0  ;;  %8638 = vmax.xlane.f32.xlu1 %v8637_v10  ;;  %v8775_v10 = vsel %vm18161_vm6, %v8597_v36, -inf  ;;  %v8542_v0 = vsel %vm18099_vm0, %v15272_v46, -3e+38 }
0x1039   :  { %v8610_v52 = vsel %vm18166_vm11, %v8542_v0, -inf  ;;  %vm18168_vm11 = vmmov %vm18161_vm6 }
0x103a   :  { %v8634_v2 = vsel %vm18168_vm11, %v8550_v18, -inf }
0x103c   :  { %8632 = vmax.xlane.f32.xlu0 %v8631_v51  ;;  %8734 = vmax.xlane.f32.xlu1 %v8733_v4  ;;  %v8622_v51 = vsel %vm18167_vm13, %v8546_v20, -inf  ;;  %v8706_v4 = vsel %vm18161_vm6, %v8574_v37, -inf  ;;  %vm18169_vm13 = vmmov %vm18161_vm6 }
0x1040   :  { %8728 = vmax.xlane.f32.xlu0 %v8727_v55  ;;  %8650 = vmax.xlane.f32.xlu1 %v8649_v1  ;;  %v8582_v55 = vsel %vm18122_vm3, %v15272_v46, -3e+38  ;;  %vm18171_vm3 = vmmov %vm18170_vm4 }
0x1041   :  { %v8730_v1 = vsel %vm18169_vm13, %v8582_v55, -inf  ;;  %vm18172_vm15 = vmmov %vm18171_vm3 }
0x1042   :  { %v8754_v39 = vsel %vm18172_vm15, %v8590_v27, -inf  ;;  %vm18173_vm10 = vmmov %vm18171_vm3 }
0x1043   :  { %v8670_v50 = vsel %vm18173_vm10, %v8562_v60, -inf  ;;  %vm18174_vm7 = vmmov %vm18171_vm3 }
0x1044   :  { %8644 = vmax.xlane.f32.xlu0 %v8643_v32  ;;  %8746 = vmax.xlane.f32.xlu1 %v8745_v24  ;;  %v8742_v32 = vsel %vm18170_vm4, %v8586_v63, -inf  ;;  %v8658_v24 = vsel %vm18171_vm3, %v8558_v35, -inf  ;;  %vm18175_vm12 = vmmov %vm18171_vm3 }
0x1045   :  { %vm18176_vm11 = vmmov %vm18171_vm3 }
0x1046   :  { %vm18177_vm0 = vmmov %vm18171_vm3 }
0x1047   :  { %vm18179_vm13 = vmmov %vm18177_vm0 }
0x1048   :  { %8740 = vmax.xlane.f32.xlu0 %v8739_v34  ;;  %8662 = vmax.xlane.f32.xlu1 %v8661_v26  ;;  %v8547_v34 = vsel %vm18104_vm5, %v15287_v54, -3e+38  ;;  %vm18178_vm5 = vnez %v18112_v25  ;;  %vm18180_vm2 = vmmov %vm18177_vm0  ;;  %v8595_v25 = vsel %vm18162_vm14, %v15287_v54, -3e+38 }
0x1049   :  { %v8579_v59 = vsel %vm18178_vm5, %v15287_v54, -3e+38  ;;  %vm18181_vm6 = vmmov %vm18177_vm0  ;;  %vm18198_vm5 = vnez %v18197_v29 }
0x104a   :  { %v8721_v57 = vsel %vm18179_vm13, %v8579_v59, -inf  ;;  %v8769_v36 = vsel %vm18181_vm6, %v8595_v25, -inf  ;;  %vm18182_vm8 = vmmov %vm18177_vm0 }
0x104b   :  { %vm18187_vm4 = vmmov %vm18184_vm9 }
0x104c   :  { %8656 = vmax.xlane.f32.xlu0 %v8655_v15  ;;  %8758 = vmax.xlane.f32.xlu1 %v8757_v28  ;;  %v8709_v28 = vsel %vm18177_vm0, %v8575_v33, -inf  ;;  %vm18188_vm3 = vmmov %vm18185_vm1 }
0x104d   :  { %vm18190_vm15 = vmmov %vm18187_vm4 }
0x104e   :  { %vm18191_vm10 = vmmov %vm18185_vm1 }
0x104f   :  { %vm18199_vm13 = vmmov %vm18177_vm0 }
0x1050   :  { %8752 = vmax.xlane.f32.xlu0 %v8751_v3 }
0x1054   :  { %8668 = vmax.xlane.f32.xlu0 %v8667_v43 }
0x1058   :  { %8764 = vmax.xlane.f32.xlu0 %v8763_v16  ;;  %v8673_v16 = vsel %vm18180_vm2, %v8563_v58, -inf  ;;  %vm18200_vm2 = vmmov %vm18177_vm0 }
0x105c   :  { %8680 = vmax.xlane.f32.xlu0 %v8679_v48 }
0x1060   :  { %8776 = vmax.xlane.f32.xlu0 %v8775_v10 }
0x1064   :  { %8611 = vmax.xlane.f32.xlu0 %v8610_v52  ;;  %v8685_v52 = vsel %vm18182_vm8, %v8567_v7, -inf  ;;  %vm18203_vm8 = vmmov %vm18177_vm0 }
0x1068   :  { %8623 = vmax.xlane.f32.xlu0 %v8622_v51 }
0x106c   :  { %8707 = vmax.xlane.f32.xlu0 %v8706_v4 }
0x1070   :  { %8635 = vmax.xlane.f32.xlu0 %v8634_v2 }
0x1074   :  { %8731 = vmax.xlane.f32.xlu0 %v8730_v1 }
0x1078   :  { %8647 = vmax.xlane.f32.xlu0 %v8646_v40 }
0x107c   :  { %8743 = vmax.xlane.f32.xlu0 %v8742_v32 }
0x107f   :  { %7770 = vxpose.xlu1.b32.start [1/2] (short) (narrow) %v15222_v9, 32  ;;  %v8594_v9 = vsel %vm18162_vm14, %v15272_v46, -3e+38  ;;  %v8625_v46 = vsel %vm18176_vm11, %v8547_v34, -inf  ;;  %vm18183_vm14 = vmmov %vm18177_vm0 }
0x1080   :  { %8659 = vmax.xlane.f32.xlu0 %v8658_v24  ;;  %v8766_v8 = vsel %vm18174_vm7, %v8594_v9, -inf  ;;  %v8781_v37 = vsel %vm18183_vm14, %v8599_v13, -inf  ;;  %vm18196_vm11 = vmmov %vm18177_vm0 }
0x1081   :  { %vm18204_vm14 = vmmov %vm18187_vm4 }
0x1083   :  { %7771 = vxpose.xlu1.b32.end [2/2] (short) (narrow) %v15300_v56, 32  ;;  %v8613_v56 = vsel %vm18175_vm12, %v8543_v42, -inf }
0x1084   :  { %8755 = vmax.xlane.f32.xlu0 %v8754_v39 }
0x1088   :  { %8671 = vmax.xlane.f32.xlu0 %v8670_v50 }
0x108c   :  { %8767 = vmax.xlane.f32.xlu0 %v8766_v8 }
0x1090   :  { %8614 = vmax.xlane.f32.xlu0 %v8613_v56 }
0x1091   :  { %v15469_v26 = vpop.xlane.xlu0 %8605  ;;  %v15471_v14 = vpop.xlane.xlu1 %8653 }
0x1092   :  { %v8812_v31 = vmax.f32 %v15471_v14, -3e+38 }
0x1094   :  { %8626 = vmax.xlane.f32.xlu0 %v8625_v46 }
0x1095   :  { %v15477_v53 = vpop.xlane.xlu0 %8617  ;;  %v15479_v15 = vpop.xlane.xlu1 %8749 }
0x1098   :  { %8710 = vmax.xlane.f32.xlu0 %v8709_v28 }
0x1099   :  { %v15485_v61 = vpop.xlane.xlu0 %8701  ;;  %v15487_v3 = vpop.xlane.xlu1 %8665 }
0x109c   :  { %8722 = vmax.xlane.f32.xlu0 %v8721_v57 }
0x109d   :  { %v15493_v43 = vpop.xlane.xlu0 %8713  ;;  %v15495_v62 = vpop.xlane.xlu1 %8761 }
0x10a0   :  { %8674 = vmax.xlane.f32.xlu0 %v8673_v16 }
0x10a1   :  { %v15501_v12 = vpop.xlane.xlu0 %8629  ;;  %v15503_v48 = vpop.xlane.xlu1 %8677 }
0x10a4   :  { %8770 = vmax.xlane.f32.xlu0 %v8769_v36 }
0x10a5   :  { %v15509_v10 = vpop.xlane.xlu0 %8725  ;;  %v8774_v0 = vpop.xlane.xlu1 %8773 }
0x10a8   :  { %8686 = vmax.xlane.f32.xlu0 %v8685_v52 }
0x10a9   :  { %v15515_v20 = vpop.xlane.xlu0 %8641  ;;  %v8693_v51 = vpop.xlane.xlu1 %8692 }
0x10aa   :  { %v8825_v63 = vmax.f32 %v8693_v51, -3e+38  ;;  %v8808_v11 = vmax.f32 %v15515_v20, -3e+38  ;;  %v8796_v20 = vmax.f32 %v15469_v26, -3e+38 }
0x10ac   :  { %8782 = vmax.xlane.f32.xlu0 %v8781_v37  ;;  %v9064_v60 = vrot.slane %v8825_v63, %v10006_v21  ;;  %v8984_v6 = vrot.slane %v8808_v11, %v10004_v17 }
0x10ad   :  { %v15518_v4 = vpop.xlane.xlu0 %8737  ;;  %v8789_v47 = vpop.xlane.xlu1 %8788 }
0x10ae   :  { %v8857_v50 = vmax.f32 %v8789_v47, -3e+38 }
0x10b0   :  { %v9216_v28 = vrot.slane %v8857_v50, %v10006_v21 }
0x10b1   :  { %v8690_v18 = vpop.xlane.xlu0 %8689  ;;  %v15520_v2 = vpop.xlane.xlu1 %8719 }
0x10b2   :  { %v8824_v30 = vmax.f32 %v8690_v18, -3e+38 }
0x10b4   :  { %v9060_v32 = vrot.slane %v8824_v30, %v10004_v17 }
0x10b5   :  { %v8786_v55 = vpop.xlane.xlu0 %8785  ;;  %v15522_v1 = vpop.xlane.xlu1 %8683 }
0x10b6   :  { %v8856_v35 = vmax.f32 %v8786_v55, -3e+38  ;;  %v9065_v8 = vsel %vm18184_vm9, %v9064_v60, %v9060_v32  ;;  %v8852_v32 = vmax.f32 %v8774_v0, -3e+38  ;;  %vm18205_vm9 = vmmov %vm18177_vm0 }
0x10b8   :  { %v9212_v42 = vrot.slane %v8856_v35, %v10004_v17  ;;  %v9193_v50 = vrot.slane %v8852_v32, %v10004_v17 }
0x10b9   :  { %v15524_v40 = vpop.xlane.xlu0 %8608  ;;  %v8780_v41 = vpop.xlane.xlu1 %8779 }
0x10ba   :  { %v9217_v57 = vsel %vm18187_vm4, %v9216_v28, %v9212_v42  ;;  %v8854_v35 = vmax.f32 %v8780_v41, -3e+38 }
0x10bd   :  { %v15527_v24 = vpop.xlane.xlu0 %8620  ;;  %v8696_v27 = vpop.xlane.xlu1 %8695 }
0x10be   :  { %v8826_v39 = vmax.f32 %v8696_v27, -3e+38 }
0x10c0   :  { %v9069_v9 = vrot.slane %v8826_v39, %v10008_v22 }
0x10c1   :  { %v15533_v56 = vpop.xlane.xlu0 %8704  ;;  %v8792_v34 = vpop.xlane.xlu1 %8791 }
0x10c2   :  { %v8858_v46 = vmax.f32 %v8792_v34, -3e+38  ;;  %v15536_v33 = vsel %vm18185_vm1, %v9069_v9, %v9065_v8  ;;  %v9202_v8 = vrot.slane %v8854_v35, %v10008_v22  ;;  %v18192_v35 = vld [vmem:[#allocation30_spill] sm:$0xff] }
0x10c3   :  { %18186 = vst [vmem:[#allocation91_spill] sm:$0xff] %v15536_v33  ;;  %vm18193_vm7 = vnez %v18192_v35 }
0x10c4   :  { %v9221_v59 = vrot.slane %v8858_v46, %v10008_v22 }
0x10c5   :  { %v15541_v58 = vpop.xlane.xlu0 %8716  ;;  %v15552_v51 = vpop.xlane.xlu1 %8638 }
0x10c6   :  { %v15544_v16 = vsel %vm18188_vm3, %v9221_v59, %v9217_v57  ;;  %vm18208_vm3 = vcmask 261312  }
0x10c7   :  { %18189 = vst [vmem:[#allocation95_spill] sm:$0xff] %v15544_v16 }
0x10c9   :  { %v15546_v25 = vpop.xlane.xlu0 %8632  ;;  %v15558_v18 = vpop.xlane.xlu1 %8734 }
0x10cd   :  { %v15548_v36 = vpop.xlane.xlu0 %8728  ;;  %v8651_v30 = vpop.xlane.xlu1 %8650 }
0x10ce   :  { %v8811_v16 = vmax.f32 %v8651_v30, -3e+38  ;;  %v18201_v30 = vld [vmem:[#allocation20_spill] sm:$0xff] }
0x10cf   :  { %vm18202_vm6 = vnez %v18201_v30 }
0x10d1   :  { %v8645_v7 = vpop.xlane.xlu0 %8644  ;;  %v8747_v60 = vpop.xlane.xlu1 %8746 }
0x10d5   :  { %v8741_v52 = vpop.xlane.xlu0 %8740  ;;  %v15573_v28 = vpop.xlane.xlu1 %8662 }
0x10d9   :  { %v15550_v13 = vpop.xlane.xlu0 %8656  ;;  %v15579_v59 = vpop.xlane.xlu1 %8758 }
0x10da   :  { %v8813_v14 = vmax.f32 %v15550_v13, -3e+38 }
0x10dd   :  { %v15554_v37 = vpop.xlane.xlu0 %8752 }
0x10e1   :  { %v15556_v47 = vpop.xlane.xlu0 %8668 }
0x10e5   :  { %v15560_v55 = vpop.xlane.xlu0 %8764 }
0x10e9   :  { %v15562_v63 = vpop.xlane.xlu0 %8680 }
0x10ed   :  { %v8777_v27 = vpop.xlane.xlu0 %8776 }
0x10ee   :  { %v8853_v39 = vmax.f32 %v8777_v27, -3e+38 }
0x10f0   :  { %v9197_v9 = vrot.slane %v8853_v39, %v10006_v21  ;;  %v18194_v39 = vld [vmem:[#allocation17_spill] sm:$0xff] }
0x10f1   :  { %v15567_v42 = vpop.xlane.xlu0 %8611  ;;  %vm18195_vm12 = vnez %v18194_v39 }
0x10f2   :  { %v9198_v34 = vsel %vm18190_vm15, %v9197_v9, %v9193_v50  ;;  %v8809_v9 = vmax.f32 %v8645_v7, -3e+38  ;;  %vm18209_vm15 = vmmov %vm18177_vm0 }
0x10f3   :  { %v15571_v46 = vsel %vm18191_vm10, %v9202_v8, %v9198_v34  ;;  %vm18210_vm10 = vmmov %vm18204_vm14 }
0x10f5   :  { %v15575_v0 = vpop.xlane.xlu0 %8623 }
0x10f9   :  { %v15577_v41 = vpop.xlane.xlu0 %8707 }
0x10fd   :  { %v15581_v57 = vpop.xlane.xlu0 %8635 }
0x10ff   :  { %v15583_v32 = vpop.trf.xlu1 }
0x1100   :  { %v7858_v27 = vsel %vm18193_vm7, %v15583_v32, -3e+38  ;;  %v7802_v50 = vsel %vm18195_vm12, %v15583_v32, -3e+38  ;;  %v7806_v45 = vsel %vm18198_vm5, %v15583_v32, -3e+38 }
0x1101   :  { %v15591_v8 = vpop.xlane.xlu0 %8731  ;;  %v8034_v34 = vsel %vm18196_vm11, %v7858_v27, -inf  ;;  %v7866_v44 = vsel %vm18177_vm0, %v7802_v50, -inf  ;;  %v8988_v50 = vrot.slane %v8809_v9, %v10006_v21  ;;  %v7878_v38 = vsel %vm18199_vm13, %v7806_v45, -inf  ;;  %vm18211_vm11 = vmmov %vm18177_vm0 }
0x1102   :  { %8035 = vmax.xlane.f32.xlu1 %v8034_v34  ;;  %7867 = vmax.xlane.f32.xlu0 %v7866_v44  ;;  %v8841_v44 = vmax.f32 %v8741_v52, -3e+38  ;;  %v7810_v33 = vsel %vm18202_vm6, %v15583_v32, -3e+38  ;;  %v8840_v52 = vmax.f32 %v15518_v4, -3e+38  ;;  %v8998_v45 = vrot.slane %v8811_v16, %v10010_v23  ;;  %vm18212_vm0 = vmmov %vm18185_vm1 }
0x1103   :  { %v15599_v5 = vpop.trf.xlu1  ;;  %v7890_v4 = vsel %vm18205_vm9, %v7810_v33, -inf  ;;  %vm18217_vm9 = vmmov %vm18203_vm8 }
0x1104   :  { %v7803_v7 = vsel %vm18195_vm12, %v15599_v5, -3e+38  ;;  %v7807_v27 = vsel %vm18198_vm5, %v15599_v5, -3e+38 }
0x1105   :  { %v8648_v34 = vpop.xlane.xlu0 %8647  ;;  %v7869_v49 = vsel %vm18200_vm2, %v7803_v7, -inf  ;;  %v7881_v9 = vsel %vm18203_vm8, %v7807_v27, -inf  ;;  %v8843_v7 = vmax.f32 %v8747_v60, -3e+38  ;;  %v15628_v27 = vrot.slane %v8796_v20, %v10004_v17  ;;  %vm18215_vm2 = vmmov %vm18208_vm3 }
0x1106   :  { %v8810_v19 = vmax.f32 %v8648_v34, -3e+38  ;;  %7879 = vmax.xlane.f32.xlu0 %v7878_v38  ;;  %7870 = vmax.xlane.f32.xlu1 %v7869_v49  ;;  %v7811_v38 = vsel %vm18202_vm6, %v15599_v5, -3e+38  ;;  %v8989_v49 = vsel %vm18204_vm14, %v8988_v50, %v8984_v6  ;;  %v9140_v34 = vrot.slane %v8841_v44, %v10006_v21  ;;  %vm18216_vm14 = vmmov %vm18210_vm10 }
0x1107   :  { %v8800_v6 = vmax.f32 %v15477_v53, -3e+38  ;;  %v9136_v50 = vrot.slane %v8840_v52, %v10004_v17  ;;  %v7893_v33 = vsel %vm18209_vm15, %v7811_v38, -inf  ;;  %v9150_v44 = vrot.slane %v8843_v7, %v10010_v23  ;;  %vm18221_vm15 = vmmov %vm18215_vm2 }
0x1108   :  { %v8993_v26 = vrot.slane %v8810_v19, %v10008_v22  ;;  %v18206_v19 = vld [vmem:[#allocation26_spill] sm:$0xff]  ;;  %v8815_v20 = vmax.f32 %v15573_v28, -3e+38  ;;  %v9007_v53 = vrot.slane %v8813_v14, %v10006_v21  ;;  %v8845_v52 = vmax.f32 %v15554_v37, -3e+38 }
0x1109   :  { %v8744_v11 = vpop.xlane.xlu0 %8743  ;;  %vm18207_vm4 = vnez %v18206_v19  ;;  %v8844_v38 = vmax.f32 %v15479_v15, -3e+38  ;;  %v8828_v14 = vmax.f32 %v15485_v61, -3e+38  ;;  %v15662_v15 = vrot.slane %v8800_v6, %v10004_v17 }
0x110a   :  { %v8994_v16 = vsel %vm18185_vm1, %v8993_v26, %v8989_v49  ;;  %v8842_v60 = vmax.f32 %v8744_v11, -3e+38  ;;  %7891 = vmax.xlane.f32.xlu0 %v7890_v4  ;;  %7882 = vmax.xlane.f32.xlu1 %v7881_v9  ;;  %v7814_v54 = vsel %vm18207_vm4, %v15583_v32, -3e+38  ;;  %v7815_v9 = vsel %vm18207_vm4, %v15599_v5, -3e+38  ;;  %vm18218_vm1 = vmmov %vm18212_vm0 }
0x110b   :  { %v15637_v13 = vsel %vm18208_vm3, %v8998_v45, %v8994_v16  ;;  %v9141_v49 = vsel %vm18210_vm10, %v9140_v34, %v9136_v50  ;;  %v7902_v11 = vsel %vm18211_vm11, %v7814_v54, -inf  ;;  %v18213_v4 = vld [vmem:[#allocation19_spill] sm:$0xff]  ;;  %v9003_v34 = vrot.slane %v8812_v31, %v10004_v17  ;;  %vm18222_vm10 = vmmov %vm18203_vm8 }
0x110c   :  { %v9145_v26 = vrot.slane %v8842_v60, %v10008_v22  ;;  %vm18214_vm13 = vnez %v18213_v4  ;;  %v7905_v54 = vsel %vm18203_vm8, %v7815_v9, -inf  ;;  %v9017_v60 = vrot.slane %v8815_v20, %v10010_v23  ;;  %vm18223_vm11 = vmmov %vm18216_vm14 }
0x110d   :  { %v8660_v45 = vpop.xlane.xlu0 %8659  ;;  %v7818_v16 = vsel %vm18214_vm13, %v15583_v32, -3e+38  ;;  %v9008_v31 = vsel %vm18216_vm14, %v9007_v53, %v9003_v34  ;;  %v8847_v61 = vmax.f32 %v15579_v59, -3e+38  ;;  %v9155_v6 = vrot.slane %v8844_v38, %v10004_v17  ;;  %vm18228_vm14 = vmmov %vm18221_vm15 }
0x110e   :  { %v9146_v7 = vsel %vm18212_vm0, %v9145_v26, %v9141_v49  ;;  %v8814_v28 = vmax.f32 %v8660_v45, -3e+38  ;;  %7903 = vmax.xlane.f32.xlu0 %v7902_v11  ;;  %7894 = vmax.xlane.f32.xlu1 %v7893_v33  ;;  %v7819_v33 = vsel %vm18214_vm13, %v15599_v5, -3e+38  ;;  %v7914_v9 = vsel %vm18217_vm9, %v7818_v16, -inf  ;;  %v18219_v45 = vld [vmem:[#allocation23_spill] sm:$0xff]  ;;  %vm18224_vm0 = vmmov %vm18203_vm8 }
0x110f   :  { %v15658_v37 = vsel %vm18215_vm2, %v9150_v44, %v9146_v7  ;;  %v9159_v44 = vrot.slane %v8845_v52, %v10006_v21  ;;  %vm18220_vm3 = vnez %v18219_v45  ;;  %v9079_v53 = vrot.slane %v8828_v14, %v10004_v17  ;;  %vm18225_vm2 = vmmov %vm18218_vm1 }
0x1110   :  { %v9012_v50 = vrot.slane %v8814_v28, %v10008_v22  ;;  %v7822_v11 = vsel %vm18220_vm3, %v15583_v32, -3e+38  ;;  %v8816_v59 = vmax.f32 %v15487_v3, -3e+38  ;;  %v7917_v7 = vsel %vm18222_vm10, %v7819_v33, -inf  ;;  %vm18229_vm9 = vmmov %vm18224_vm0 }
0x1111   :  { %v8756_v26 = vpop.xlane.xlu0 %8755  ;;  %v8832_v38 = vmax.f32 %v15493_v43, -3e+38  ;;  %v8848_v28 = vmax.f32 %v15495_v62, -3e+38  ;;  %v8804_v16 = vmax.f32 %v15501_v12, -3e+38  ;;  %v9160_v14 = vsel %vm18223_vm11, %v9159_v44, %v9155_v6  ;;  %vm18233_vm10 = vmmov %vm18223_vm11 }
0x1112   :  { %v9013_v49 = vsel %vm18218_vm1, %v9012_v50, %v9008_v31  ;;  %v8846_v20 = vmax.f32 %v8756_v26, -3e+38  ;;  %7915 = vmax.xlane.f32.xlu0 %v7914_v9  ;;  %7906 = vmax.xlane.f32.xlu1 %v7905_v54  ;;  %v8797_v54 = vmax.f32 %v15524_v40, -3e+38  ;;  %v9169_v50 = vrot.slane %v8847_v61, %v10010_v23  ;;  %v18226_v62 = vld [vmem:[#allocation27_spill] sm:$0xff]  ;;  %vm18230_vm1 = vmmov %vm18224_vm0 }
0x1113   :  { %v15681_v52 = vsel %vm18221_vm15, %v9017_v60, %v9013_v49  ;;  %v7926_v60 = vsel %vm18224_vm0, %v7822_v11, -inf  ;;  %v8833_v33 = vmax.f32 %v15541_v58, -3e+38  ;;  %vm18227_vm8 = vnez %v18226_v62  ;;  %vm18234_vm11 = vmmov %vm18224_vm0 }
0x1114   :  { %v9164_v34 = vrot.slane %v8846_v20, %v10008_v22  ;;  %v7826_v12 = vsel %vm18227_vm8, %v15583_v32, -3e+38  ;;  %v7823_v40 = vsel %vm18220_vm3, %v15599_v5, -3e+38  ;;  %v15703_v31 = vrot.slane %v8816_v59, %v10004_v17 }
0x1115   :  { %v15691_v3 = vpop.xlane.xlu0 %8671  ;;  %v8836_v61 = vmax.f32 %v15509_v10, -3e+38  ;;  %v8801_v44 = vmax.f32 %v15527_v24, -3e+38  ;;  %v9098_v26 = vrot.slane %v8832_v38, %v10004_v17  ;;  %v15712_v9 = vrot.slane %v8848_v28, %v10004_v17 }
0x1116   :  { %v9165_v43 = vsel %vm18225_vm2, %v9164_v34, %v9160_v14  ;;  %7927 = vmax.xlane.f32.xlu0 %v7926_v60  ;;  %7918 = vmax.xlane.f32.xlu1 %v7917_v7  ;;  %v8834_v6 = vmax.f32 %v15520_v2, -3e+38  ;;  %v8829_v49 = vmax.f32 %v15533_v56, -3e+38  ;;  %v8820_v20 = vmax.f32 %v15503_v48, -3e+38  ;;  %vm18235_vm2 = vmmov %vm18233_vm10 }
0x1117   :  { %v15708_v58 = vsel %vm18228_vm14, %v9169_v50, %v9165_v43  ;;  %v8931_v11 = vrot.slane %v8797_v54, %v10006_v21  ;;  %v7938_v10 = vsel %vm18229_vm9, %v7826_v12, -inf  ;;  %v7929_v24 = vsel %vm18230_vm1, %v7823_v40, -inf  ;;  %v18231_v2 = vld [vmem:[#allocation29_spill] sm:$0xff]  ;;  %vm18238_vm9 = vmmov %vm18235_vm2 }
0x1118   :  { %v8965_v7 = vrot.slane %v8804_v16, %v10004_v17  ;;  %v9102_v38 = vrot.slane %v8833_v33, %v10006_v21  ;;  %vm18232_vm15 = vnez %v18231_v2  ;;  %v7827_v28 = vsel %vm18227_vm8, %v15599_v5, -3e+38  ;;  %vm18239_vm1 = vmmov %vm18235_vm2 }
0x1119   :  { %v15718_v59 = vpop.xlane.xlu0 %8767  ;;  %v7830_v56 = vsel %vm18232_vm15, %v15583_v32, -3e+38  ;;  %v15731_v34 = vrot.slane %v8836_v61, %v10004_v17  ;;  %v8950_v54 = vrot.slane %v8801_v44, %v10006_v21  ;;  %v8805_v50 = vmax.f32 %v15546_v25, -3e+38 }
0x111a   :  { %7939 = vmax.xlane.f32.xlu0 %v7938_v10  ;;  %7930 = vmax.xlane.f32.xlu1 %v7929_v24  ;;  %v8798_v16 = vmax.f32 %v15567_v42, -3e+38  ;;  %v9107_v14 = vrot.slane %v8834_v6, %v10008_v22  ;;  %v9083_v60 = vrot.slane %v8829_v49, %v10006_v21  ;;  %v8807_v33 = vmax.f32 %v15552_v51, -3e+38  ;;  %v18236_v6 = vld [vmem:[#allocation22_spill] sm:$0xff] }
0x111b   :  { %v8806_v43 = vmax.f32 %v15581_v57, -3e+38  ;;  %v8932_v12 = vsel %vm18233_vm10, %v8931_v11, %v15628_v27  ;;  %v8802_v40 = vmax.f32 %v15575_v0, -3e+38  ;;  %v7950_v44 = vsel %vm18234_vm11, %v7830_v56, -inf  ;;  %vm18240_vm10 = vmmov %vm18224_vm0 }
0x111c   :  { %v7941_v25 = vsel %vm18224_vm0, %v7827_v28, -inf  ;;  %v9103_v42 = vsel %vm18235_vm2, %v9102_v38, %v9098_v26  ;;  %vm18237_vm14 = vnez %v18236_v6  ;;  %v7831_v57 = vsel %vm18232_vm15, %v15599_v5, -3e+38  ;;  %vm18241_vm11 = vmmov %vm18224_vm0 }
0x111d   :  { %v8615_v61 = vpop.xlane.xlu0 %8614  ;;  %v7834_v51 = vsel %vm18237_vm14, %v15583_v32, -3e+38  ;;  %v8951_v0 = vsel %vm18238_vm9, %v8950_v54, %v15662_v15  ;;  %v8969_v27 = vrot.slane %v8805_v50, %v10006_v21  ;;  %v8837_v49 = vmax.f32 %v15548_v36, -3e+38  ;;  %vm18245_vm9 = vmmov %vm18239_vm1 }
0x111e   :  { %v8799_v10 = vmax.f32 %v8615_v61, -3e+38  ;;  %7951 = vmax.xlane.f32.xlu0 %v7950_v44  ;;  %7942 = vmax.xlane.f32.xlu1 %v7941_v25  ;;  %v8936_v26 = vrot.slane %v8798_v16, %v10008_v22  ;;  %v9084_v11 = vsel %vm18239_vm1, %v9083_v60, %v9079_v53  ;;  %v8979_v24 = vrot.slane %v8807_v33, %v10010_v23  ;;  %v18243_v53 = vld [vmem:[#allocation24_spill] sm:$0xff] }
0x111f   :  { %v8839_v38 = vmax.f32 %v15558_v18, -3e+38  ;;  %v8974_v56 = vrot.slane %v8806_v43, %v10008_v22  ;;  %v8955_v28 = vrot.slane %v8802_v40, %v10008_v22  ;;  %v7962_v44 = vsel %vm18240_vm10, %v7834_v51, -inf }
0x1120   :  { %v7953_v15 = vsel %vm18241_vm11, %v7831_v57, -inf  ;;  %vm18242_vm0 = vcmask 195712   ;;  %v8941_v36 = vrot.slane %v8799_v10, %v10010_v23  ;;  %vm18244_vm2 = vnez %v18243_v53 }
0x1121   :  { %v8627_v61 = vpop.xlane.xlu0 %8626  ;;  %v9108_v54 = vsel %vm18242_vm0, %v9107_v14, %v9103_v42  ;;  %v7838_v18 = vsel %vm18244_vm2, %v15583_v32, -3e+38  ;;  %v7835_v16 = vsel %vm18237_vm14, %v15599_v5, -3e+38  ;;  %v8970_v60 = vsel %vm18245_vm9, %v8969_v27, %v8965_v7  ;;  %vm18246_vm1 = vmmov %vm18242_vm0  ;;  %v18251_v27 = vld [vmem:[#allocation16_spill] sm:$0xff] }
0x1122   :  { %v8803_v50 = vmax.f32 %v8627_v61, -3e+38  ;;  %7963 = vmax.xlane.f32.xlu0 %v7962_v44  ;;  %7954 = vmax.xlane.f32.xlu1 %v7953_v15  ;;  %v9121_v33 = vrot.slane %v8837_v49, %v10006_v21  ;;  %v8817_v43 = vmax.f32 %v15556_v47, -3e+38  ;;  %v8937_v14 = vsel %vm18246_vm1, %v8936_v26, %v8932_v12  ;;  %vm18247_vm10 = vmmov %vm18242_vm0 }
0x1123   :  { %v8830_v40 = vmax.f32 %v15577_v41, -3e+38  ;;  %v8975_v25 = vsel %vm18247_vm10, %v8974_v56, %v8970_v60  ;;  %v8838_v42 = vmax.f32 %v15591_v8, -3e+38  ;;  %vm18248_vm11 = vmmov %vm18242_vm0  ;;  %vm18249_vm0 = vcmask 130048  }
0x1124   :  { %v8960_v10 = vrot.slane %v8803_v50, %v10010_v23  ;;  %v8956_v51 = vsel %vm18248_vm11, %v8955_v28, %v8951_v0  ;;  %v7974_v61 = vsel %vm18249_vm0, %v7838_v18, -inf  ;;  %vm18250_vm9 = vmmov %vm18249_vm0  ;;  %vm18252_vm14 = vnez %v18251_v27 }
0x1125   :  { %v8711_v57 = vpop.xlane.xlu0 %8710  ;;  %v7965_v7 = vsel %vm18250_vm9, %v7835_v16, -inf  ;;  %v7842_v47 = vsel %vm18252_vm14, %v15583_v32, -3e+38  ;;  %vm18253_vm1 = vcmask 261312   ;;  %v7839_v8 = vsel %vm18244_vm2, %v15599_v5, -3e+38  ;;  %vm18258_vm9 = vmmov %vm18249_vm0 }
0x1126   :  { %v8942_v12 = vsel %vm18253_vm1, %v8941_v36, %v8937_v14  ;;  %vm18254_vm15 = vmmov %vm18253_vm1  ;;  %v8831_v49 = vmax.f32 %v8711_v57, -3e+38  ;;  %7975 = vmax.xlane.f32.xlu0 %v7974_v61  ;;  %7966 = vmax.xlane.f32.xlu1 %v7965_v7  ;;  %v9131_v0 = vrot.slane %v8839_v38, %v10010_v23  ;;  %v9026_v26 = vrot.slane %v8817_v43, %v10006_v21  ;;  %v18259_v38 = vld [vmem:[#allocation21_spill] sm:$0xff] }
0x1127   :  { %v8961_v41 = vsel %vm18254_vm15, %v8960_v10, %v8956_v51  ;;  %vm18255_vm10 = vmmov %vm18253_vm1  ;;  %vm18256_vm11 = vcmask 1041409   ;;  %v9088_v44 = vrot.slane %v8830_v40, %v10008_v22  ;;  %v9126_v15 = vrot.slane %v8838_v42, %v10008_v22 }
0x1128   :  { %v8980_v56 = vsel %vm18255_vm10, %v8979_v24, %v8975_v25  ;;  %v9228_v28 = vsel %vm18256_vm11, %v8961_v41, %v8942_v12  ;;  %vm18257_vm15 = vcmask 1042434   ;;  %v7986_v50 = vsel %vm18249_vm0, %v7842_v47, -inf }
0x1129   :  { %v9229_v36 = vsel %vm18257_vm15, %v8980_v56, %v9228_v28  ;;  %v8818_v18 = vmax.f32 %v15691_v3, -3e+38  ;;  %v8723_v16 = vpop.xlane.xlu0 %8722  ;;  %v7977_v60 = vsel %vm18258_vm9, %v7839_v8, -inf  ;;  %vm18260_vm1 = vnez %v18259_v38 }
0x112a   :  { %v7846_v43 = vsel %vm18260_vm1, %v15583_v32, -3e+38  ;;  %vm18261_vm10 = vcmask 1043459   ;;  %vm18262_vm11 = vcmask 130112   ;;  %v9093_v40 = vrot.slane %v8831_v49, %v10010_v23  ;;  %7987 = vmax.xlane.f32.xlu0 %v7986_v50  ;;  %7978 = vmax.xlane.f32.xlu1 %v7977_v60 }
0x112b   :  { %v9230_v24 = vsel %vm18261_vm10, %v15637_v13, %v9229_v36  ;;  %v9122_v14 = vsel %vm18262_vm11, %v9121_v33, %v15731_v34  ;;  %v8835_v25 = vmax.f32 %v8723_v16, -3e+38  ;;  %v7843_v3 = vsel %vm18252_vm14, %v15599_v5, -3e+38  ;;  %vm18263_vm15 = vmmov %vm18262_vm11 }
0x112c   :  { %v9027_v42 = vsel %vm18263_vm15, %v9026_v26, %v15703_v31  ;;  %v8849_v10 = vmax.f32 %v15560_v55, -3e+38  ;;  %v8821_v51 = vmax.f32 %v15562_v63, -3e+38  ;;  %vm18264_vm0 = vcmask 1044484   ;;  %v18269_v63 = vld [vmem:[#allocation25_spill] sm:$0xff] }
0x112d   :  { %v9231_v13 = vsel %vm18264_vm0, %v15681_v52, %v9230_v24  ;;  %vm18265_vm9 = vcmask 195712   ;;  %v9112_v57 = vrot.slane %v8835_v25, %v10010_v23  ;;  %vm18267_vm11 = vcmask 130048   ;;  %v8675_v31 = vpop.xlane.xlu0 %8674 }
0x112e   :  { %v9089_v34 = vsel %vm18265_vm9, %v9088_v44, %v9084_v11  ;;  %vm18266_vm10 = vmmov %vm18265_vm9  ;;  %v7998_v61 = vsel %vm18267_vm11, %v7846_v43, -inf  ;;  %v9031_v7 = vrot.slane %v8818_v18, %v10008_v22  ;;  %v8850_v47 = vmax.f32 %v15718_v59, -3e+38 }
0x112f   :  { %v9127_v33 = vsel %vm18266_vm10, %v9126_v15, %v9122_v14  ;;  %vm18268_vm15 = vmmov %vm18267_vm11  ;;  %vm18270_vm14 = vnez %v18269_v63  ;;  %vm18271_vm0 = vcmask 261312   ;;  %v8819_v41 = vmax.f32 %v8675_v31, -3e+38  ;;  %7999 = vmax.xlane.f32.xlu0 %v7998_v61  ;;  %v18277_v15 = vld [vmem:[#allocation28_spill] sm:$0xff] }
0x1130   :  { %v7989_v55 = vsel %vm18268_vm15, %v7843_v3, -inf  ;;  %v7850_v12 = vsel %vm18270_vm14, %v15583_v32, -3e+38  ;;  %v9094_v52 = vsel %vm18271_vm0, %v9093_v40, %v9089_v34  ;;  %vm18272_vm9 = vmmov %vm18271_vm0  ;;  %v7847_v49 = vsel %vm18260_vm1, %v15599_v5, -3e+38 }
0x1131   :  { %v9113_v11 = vsel %vm18272_vm9, %v9112_v57, %v9108_v54  ;;  %7990 = vmax.xlane.f32.xlu1 %v7989_v55  ;;  %v9178_v59 = vrot.slane %v8849_v10, %v10006_v21  ;;  %v9045_v8 = vrot.slane %v8821_v51, %v10006_v21  ;;  %vm18273_vm10 = vmmov %vm18271_vm0  ;;  %vm18274_vm11 = vcmask 1041409   ;;  %v8771_v16 = vpop.xlane.xlu0 %8770 }
0x1132   :  { %v9132_v26 = vsel %vm18273_vm10, %v9131_v0, %v9127_v33  ;;  %v9235_v56 = vsel %vm18274_vm11, %v9113_v11, %v9094_v52  ;;  %vm18275_vm15 = vcmask 1042434   ;;  %v9036_v44 = vrot.slane %v8819_v41, %v10010_v23  ;;  %v15878_v52 = vpop.trf.xlu1 }
0x1133   :  { %v9236_v28 = vsel %vm18275_vm15, %v9132_v26, %v9235_v56  ;;  %vm18276_vm0 = vcmask 130048   ;;  %vm18278_vm9 = vnez %v18277_v15  ;;  %vm18279_vm2 = vcmask 195712   ;;  %v18338_v15 = vld [vmem:[#allocation49_spill] sm:$0xff] }
0x1134   :  { %v8010_v54 = vsel %vm18276_vm0, %v7850_v12, -inf  ;;  %v7854_v36 = vsel %vm18278_vm9, %v15583_v32, -3e+38  ;;  %v9032_v50 = vsel %vm18279_vm2, %v9031_v7, %v9027_v42  ;;  %v9183_v18 = vrot.slane %v8850_v47, %v10008_v22  ;;  %vm18280_vm1 = vmmov %vm18276_vm0 }
0x1135   :  { %v8001_v60 = vsel %vm18280_vm1, %v7847_v49, -inf  ;;  %vm18281_vm10 = vcmask 1043459   ;;  %vm18282_vm11 = vcmask 261312   ;;  %v8851_v24 = vmax.f32 %v8771_v16, -3e+38  ;;  %8011 = vmax.xlane.f32.xlu0 %v8010_v54  ;;  %v8687_v33 = vpop.xlane.xlu0 %8686 }
0x1136   :  { %v9237_v0 = vsel %vm18281_vm10, %v15658_v37, %v9236_v28  ;;  %v9037_v43 = vsel %vm18282_vm11, %v9036_v44, %v9032_v50  ;;  %8002 = vmax.xlane.f32.xlu1 %v8001_v60  ;;  %v7851_v14 = vsel %vm18270_vm14, %v15599_v5, -3e+38  ;;  %vm18283_vm15 = vcmask 1044484   ;;  %v15907_v16 = vpop.trf.xlu1 }
0x1137   :  { %v9238_v40 = vsel %vm18283_vm15, %v15708_v58, %v9237_v0  ;;  %v9041_v25 = vrot.slane %v8820_v20, %v10004_v17  ;;  %v8822_v3 = vmax.f32 %v15522_v1, -3e+38  ;;  %vm18284_vm2 = vcmask 1045509   ;;  %v18291_v1 = vld [vmem:[#allocation31_spill] sm:$0xff] }
0x1138   :  { %v9232_v37 = vsel %vm18284_vm2, %v9037_v43, %v9231_v13  ;;  %vm18285_vm1 = vcmask 130112   ;;  %v9188_v10 = vrot.slane %v8851_v24, %v10010_v23  ;;  %vm18287_vm10 = vcmask 195712  }
0x1139   :  { %v9179_v42 = vsel %vm18285_vm1, %v9178_v59, %v15712_v9  ;;  %vm18286_vm0 = vmmov %vm18285_vm1  ;;  %vm18288_vm11 = vcmask 130048   ;;  %vm18290_vm14 = vcmask 261312   ;;  %v8823_v20 = vmax.f32 %v8687_v33, -3e+38  ;;  %v8783_v31 = vpop.xlane.xlu0 %8782 }
0x113a   :  { %v9046_v51 = vsel %vm18286_vm0, %v9045_v8, %v9041_v25  ;;  %v9184_v34 = vsel %vm18287_vm10, %v9183_v18, %v9179_v42  ;;  %v8022_v58 = vsel %vm18288_vm11, %v7854_v36, -inf  ;;  %vm18289_vm15 = vmmov %vm18288_vm11  ;;  %vm18292_vm2 = vnez %v18291_v1 }
0x113b   :  { %v8013_v57 = vsel %vm18289_vm15, %v7851_v14, -inf  ;;  %v9189_v48 = vsel %vm18290_vm14, %v9188_v10, %v9184_v34  ;;  %8023 = vmax.xlane.f32.xlu0 %v8022_v58  ;;  %v7862_v9 = vsel %vm18292_vm2, %v15583_v32, -3e+38  ;;  %v7855_v13 = vsel %vm18278_vm9, %v15599_v5, -3e+38  ;;  %vm18294_vm0 = vmmov %vm18288_vm11 }
0x113c   :  { %8014 = vmax.xlane.f32.xlu1 %v8013_v57  ;;  %v9050_v61 = vrot.slane %v8822_v3, %v10008_v22  ;;  %vm18293_vm1 = vcmask 1045509   ;;  %v9055_v47 = vrot.slane %v8823_v20, %v10010_v23  ;;  %v8046_v55 = vsel %vm18294_vm0, %v7862_v9, -inf  ;;  %vm18295_vm14 = vmmov %vm18294_vm0 }
0x113d   :  { %v9239_v7 = vsel %vm18293_vm1, %v9189_v48, %v9238_v40  ;;  %v8025_v12 = vsel %vm18295_vm14, %v7855_v13, -inf  ;;  %v8855_v32 = vmax.f32 %v8783_v31, -3e+38  ;;  %v7859_v41 = vsel %vm18193_vm7, %v15599_v5, -3e+38  ;;  %vm18298_vm1 = vmmov %vm18294_vm0 }
0x113e   :  { %v9051_v11 = vsel %vm18287_vm10, %v9050_v61, %v9046_v51  ;;  %v7863_v49 = vsel %vm18292_vm2, %v15599_v5, -3e+38  ;;  %vm18296_vm11 = vcmask 261312   ;;  %vm18297_vm15 = vcmask 1046534   ;;  %vm18300_vm10 = vmmov %vm18294_vm0 }
0x113f   :  { %8047 = vmax.xlane.f32.xlu0 %v8046_v55  ;;  %v9056_v59 = vsel %vm18296_vm11, %v9055_v47, %v9051_v11  ;;  %v9207_v26 = vrot.slane %v8855_v32, %v10010_v23  ;;  %v7860_v56 = vsel %vm18193_vm7, %v15878_v52, -3e+38  ;;  %v7804_v28 = vsel %vm18195_vm12, %v15878_v52, -3e+38  ;;  %vm18299_vm14 = vmmov %vm18296_vm11 }
0x1140   :  { %8026 = vmax.xlane.f32.xlu1 %v8025_v12  ;;  %v15889_v8 = vsel %vm18297_vm15, %v9056_v59, %v9232_v37  ;;  %v8037_v44 = vsel %vm18298_vm1, %v7859_v41, -inf  ;;  %v8049_v54 = vsel %vm18294_vm0, %v7863_v49, -inf  ;;  %v8040_v36 = vsel %vm18300_vm10, %v7860_v56, -inf  ;;  %vm18301_vm11 = vmmov %vm18294_vm0 }
0x1141   :  { %v9208_v5 = vsel %vm18299_vm14, %v9207_v26, %v15571_v46  ;;  %v7872_v50 = vsel %vm18301_vm11, %v7804_v28, -inf  ;;  %v7864_v60 = vsel %vm18292_vm2, %v15878_v52, -3e+38  ;;  %v7808_v0 = vsel %vm18198_vm5, %v15878_v52, -3e+38  ;;  %vm18302_vm1 = vmmov %vm18294_vm0 }
0x1142   :  { %v15905_v18 = vsel %vm18297_vm15, %v9208_v5, %v9239_v7  ;;  %v7809_v46 = vsel %vm18198_vm5, %v15907_v16, -3e+38  ;;  %v8052_v43 = vsel %vm18302_vm1, %v7864_v60, -inf  ;;  %v7884_v24 = vsel %vm18294_vm0, %v7808_v0, -inf  ;;  %vm18303_vm14 = vmmov %vm18294_vm0 }
0x1143   :  { %8038 = vmax.xlane.f32.xlu0 %v8037_v44  ;;  %v7812_v14 = vsel %vm18202_vm6, %v15878_v52, -3e+38  ;;  %v7887_v40 = vsel %vm18303_vm14, %v7809_v46, -inf  ;;  %v7813_v25 = vsel %vm18202_vm6, %v15907_v16, -3e+38  ;;  %vm18304_vm10 = vmmov %vm18294_vm0  ;;  %vm18312_vm14 = vnez %v18231_v2  ;;  %v18332_v46 = vld [vmem:[#allocation47_spill] sm:$0xff] }
0x1144   :  { %8050 = vmax.xlane.f32.xlu1 %v8049_v54  ;;  %v7896_v3 = vsel %vm18304_vm10, %v7812_v14, -inf  ;;  %v7816_v29 = vsel %vm18207_vm4, %v15878_v52, -3e+38  ;;  %vm18305_vm5 = vmmov %vm18294_vm0  ;;  %v7817_v42 = vsel %vm18207_vm4, %v15907_v16, -3e+38 }
0x1145   :  { %v7899_v37 = vsel %vm18305_vm5, %v7813_v25, -inf  ;;  %vm18306_vm11 = vmmov %vm18294_vm0  ;;  %v7820_v30 = vsel %vm18214_vm13, %v15878_v52, -3e+38  ;;  %v7821_v34 = vsel %vm18214_vm13, %v15907_v16, -3e+38  ;;  %vm18315_vm5 = vnez %v18236_v6 }
0x1146   :  { %v7908_v10 = vsel %vm18306_vm11, %v7816_v29, -inf  ;;  %vm18307_vm6 = vmmov %vm18294_vm0  ;;  %v7824_v19 = vsel %vm18220_vm3, %v15878_v52, -3e+38  ;;  %v7825_v57 = vsel %vm18220_vm3, %v15907_v16, -3e+38 }
0x1147   :  { %7873 = vmax.xlane.f32.xlu0 %v7872_v50  ;;  %v7911_v51 = vsel %vm18307_vm6, %v7817_v42, -inf  ;;  %vm18308_vm15 = vmmov %vm18294_vm0  ;;  %v7828_v4 = vsel %vm18227_vm8, %v15878_v52, -3e+38  ;;  %v7832_v13 = vsel %vm18312_vm14, %v15878_v52, -3e+38 }
0x1148   :  { %8041 = vmax.xlane.f32.xlu1 %v8040_v36  ;;  %v7920_v33 = vsel %vm18308_vm15, %v7820_v30, -inf  ;;  %vm18309_vm4 = vmmov %vm18294_vm0  ;;  %v7944_v9 = vsel %vm18294_vm0, %v7828_v4, -inf  ;;  %v7829_v45 = vsel %vm18227_vm8, %v15907_v16, -3e+38  ;;  %v7836_v47 = vsel %vm18315_vm5, %v15878_v52, -3e+38 }
0x1149   :  { %v7923_v58 = vsel %vm18309_vm4, %v7821_v34, -inf  ;;  %vm18310_vm1 = vmmov %vm18294_vm0  ;;  %v7833_v31 = vsel %vm18312_vm14, %v15907_v16, -3e+38  ;;  %vm18318_vm8 = vnez %v18243_v53  ;;  %v7837_v11 = vsel %vm18315_vm5, %v15907_v16, -3e+38  ;;  %v16039_v30 = vpop.f32.mrb[28].mxu1 }
0x114a   :  { %v7932_v48 = vsel %vm18310_vm1, %v7824_v19, -inf  ;;  %vm18311_vm13 = vmmov %vm18294_vm0  ;;  %v7840_v62 = vsel %vm18318_vm8, %v15878_v52, -3e+38  ;;  %vm18321_vm1 = vnez %v18251_v27  ;;  %v7841_v49 = vsel %vm18318_vm8, %v15907_v16, -3e+38 }
0x114b   :  { %7885 = vmax.xlane.f32.xlu0 %v7884_v24  ;;  %v7935_v20 = vsel %vm18311_vm13, %v7825_v57, -inf  ;;  %vm18313_vm3 = vmmov %vm18294_vm0  ;;  %v7844_v2 = vsel %vm18321_vm1, %v15878_v52, -3e+38  ;;  %v7983_v26 = vsel %vm18294_vm0, %v7841_v49, -inf  ;;  %vm18323_vm14 = vnez %v18259_v38  ;;  %v18331_v38 = vld [vmem:[#allocation97_spill] sm:$0xff] }
0x114c   :  { %8053 = vmax.xlane.f32.xlu1 %v8052_v43  ;;  %v7956_v61 = vsel %vm18313_vm3, %v7832_v13, -inf  ;;  %vm18314_vm10 = vmmov %vm18294_vm0  ;;  %v7848_v6 = vsel %vm18323_vm14, %v15878_v52, -3e+38  ;;  %v7845_v56 = vsel %vm18321_vm1, %v15907_v16, -3e+38  ;;  %vm18326_vm5 = vnez %v18269_v63  ;;  %v16046_v13 = vpop.f32.mrb[28].mxu0 }
0x114d   :  { %v7947_v7 = vsel %vm18314_vm10, %v7829_v45, -inf  ;;  %vm18316_vm11 = vmmov %vm18294_vm0  ;;  %v7852_v53 = vsel %vm18326_vm5, %v15878_v52, -3e+38  ;;  %v7849_v54 = vsel %vm18323_vm14, %v15907_v16, -3e+38  ;;  %v9662_v45 = vpop.f32.mrb[29].mxu0 }
0x114e   :  { %v7968_v55 = vsel %vm18316_vm11, %v7836_v47, -inf  ;;  %vm18317_vm6 = vmmov %vm18294_vm0  ;;  %v7856_v27 = vsel %vm18278_vm9, %v15878_v52, -3e+38  ;;  %v7853_v50 = vsel %vm18326_vm5, %v15907_v16, -3e+38 }
0x114f   :  { %7897 = vmax.xlane.f32.xlu0 %v7896_v3  ;;  %v7959_v12 = vsel %vm18317_vm6, %v7833_v31, -inf  ;;  %vm18319_vm15 = vmmov %vm18294_vm0  ;;  %v7805_v24 = vsel %vm18195_vm12, %v15907_v16, -3e+38  ;;  %v7857_v63 = vsel %vm18278_vm9, %v15907_v16, -3e+38  ;;  %vm18339_vm9 = vnez %v18338_v15 }
0x1150   :  { %7888 = vmax.xlane.f32.xlu1 %v7887_v40  ;;  %v7980_v32 = vsel %vm18319_vm15, %v7840_v62, -inf  ;;  %vm18320_vm4 = vmmov %vm18294_vm0  ;;  %v8031_v40 = vsel %vm18294_vm0, %v7857_v63, -inf  ;;  %v7861_v25 = vsel %vm18193_vm7, %v15907_v16, -3e+38  ;;  %v7865_v3 = vsel %vm18292_vm2, %v15907_v16, -3e+38 }
0x1151   :  { %v7971_v41 = vsel %vm18320_vm4, %v7837_v11, -inf  ;;  %vm18322_vm13 = vmmov %vm18294_vm0  ;;  %vm18333_vm4 = vnez %v18332_v46  ;;  %vm18341_vm7 = vcmask 130112   ;;  %v16053_v11 = vpop.f32.mrb[30].mxu0 }
0x1152   :  { %v7992_v59 = vsel %vm18322_vm13, %v7844_v2, -inf  ;;  %vm18324_vm3 = vmmov %vm18294_vm0  ;;  %v8571_v43 = vsel %vm18333_vm4, %v18331_v38, -3e+38  ;;  %v9663_v49 = vpop.f32.mrb[31].mxu0 }
0x1153   :  { %7909 = vmax.xlane.f32.xlu0 %v7908_v10  ;;  %v8004_v28 = vsel %vm18324_vm3, %v7848_v6, -inf  ;;  %vm18325_vm10 = vmmov %vm18294_vm0 }
0x1154   :  { %7900 = vmax.xlane.f32.xlu1 %v7899_v37  ;;  %v7995_v44 = vsel %vm18325_vm10, %v7845_v56, -inf  ;;  %vm18327_vm11 = vmmov %vm18294_vm0  ;;  %v8603_v37 = vsel %vm18339_vm9, %v18331_v38, -3e+38 }
0x1155   :  { %v8016_v5 = vsel %vm18327_vm11, %v7852_v53, -inf  ;;  %vm18328_vm6 = vmmov %vm18294_vm0 }
0x1156   :  { %v8007_v36 = vsel %vm18328_vm6, %v7849_v54, -inf  ;;  %vm18329_vm8 = vmmov %vm18294_vm0 }
0x1157   :  { %7921 = vmax.xlane.f32.xlu0 %v7920_v33  ;;  %v8028_v60 = vsel %vm18329_vm8, %v7856_v27, -inf  ;;  %vm18330_vm15 = vmmov %vm18294_vm0 }
0x1158   :  { %7912 = vmax.xlane.f32.xlu1 %v7911_v51  ;;  %v8019_v0 = vsel %vm18330_vm15, %v7853_v50, -inf  ;;  %vm18334_vm1 = vmmov %vm18294_vm0  ;;  %v9668_v51 = vpop.f32.mrb[29].mxu1 }
0x1159   :  { %v8697_v52 = vsel %vm18334_vm1, %v8571_v43, -inf  ;;  %vm18335_vm13 = vmmov %vm18294_vm0  ;;  %v16065_v50 = vpop.f32.mrb[30].mxu1 }
0x115a   :  { %v7875_v14 = vsel %vm18335_vm13, %v7805_v24, -inf  ;;  %vm18336_vm14 = vmmov %vm18294_vm0 }
0x115b   :  { %7933 = vmax.xlane.f32.xlu0 %v7932_v48  ;;  %v8043_v39 = vsel %vm18336_vm14, %v7861_v25, -inf  ;;  %vm18337_vm12 = vmmov %vm18294_vm0 }
0x115c   :  { %7924 = vmax.xlane.f32.xlu1 %v7923_v58  ;;  %v8055_v29 = vsel %vm18337_vm12, %v7865_v3, -inf  ;;  %vm18340_vm3 = vmmov %vm18294_vm0 }
0x115d   :  { %v8793_v42 = vsel %vm18340_vm3, %v8603_v37, -inf  ;;  %vm18342_vm2 = vmmov %vm18341_vm7 }
0x115e   :  { %vm18343_vm10 = vmmov %vm18342_vm2 }
0x115f   :  { %7945 = vmax.xlane.f32.xlu0 %v7944_v9  ;;  %vm18344_vm5 = vmmov %vm18342_vm2 }
0x1160   :  { %7936 = vmax.xlane.f32.xlu1 %v7935_v20  ;;  %vm18345_vm11 = vmmov %vm18342_vm2 }
0x1161   :  { %vm18346_vm6 = vmmov %vm18342_vm2 }
0x1162   :  { %vm18347_vm8 = vmmov %vm18342_vm2 }
0x1163   :  { %7957 = vmax.xlane.f32.xlu0 %v7956_v61  ;;  %vm18348_vm15 = vmmov %vm18342_vm2 }
0x1164   :  { %7948 = vmax.xlane.f32.xlu1 %v7947_v7  ;;  %vm18349_vm4 = vmmov %vm18342_vm2 }
0x1165   :  { %vm18350_vm1 = vmmov %vm18342_vm2 }
0x1166   :  { %vm18351_vm13 = vmmov %vm18350_vm1 }
0x1167   :  { %7969 = vmax.xlane.f32.xlu0 %v7968_v55  ;;  %vm18352_vm0 = vmmov %vm18350_vm1 }
0x1168   :  { %7960 = vmax.xlane.f32.xlu1 %v7959_v12  ;;  %vm18353_vm14 = vmmov %vm18352_vm0 }
0x1169   :  { %vm18354_vm12 = vmmov %vm18352_vm0 }
0x116a   :  { %vm18355_vm9 = vmmov %vm18352_vm0 }
0x116b   :  { %7981 = vmax.xlane.f32.xlu0 %v7980_v32  ;;  %vm18356_vm3 = vmmov %vm18352_vm0 }
0x116c   :  { %7972 = vmax.xlane.f32.xlu1 %v7971_v41 }
0x116f   :  { %7993 = vmax.xlane.f32.xlu0 %v7992_v59 }
0x1170   :  { %7984 = vmax.xlane.f32.xlu1 %v7983_v26 }
0x1173   :  { %8005 = vmax.xlane.f32.xlu0 %v8004_v28 }
0x1174   :  { %7996 = vmax.xlane.f32.xlu1 %v7995_v44 }
0x1177   :  { %8017 = vmax.xlane.f32.xlu0 %v8016_v5 }
0x1178   :  { %8008 = vmax.xlane.f32.xlu1 %v8007_v36 }
0x117b   :  { %8029 = vmax.xlane.f32.xlu0 %v8028_v60  ;;  %v9669_v60 = vpop.f32.mrb[31].mxu1 }
0x117c   :  { %8020 = vmax.xlane.f32.xlu1 %v8019_v0 }
0x117f   :  { %7876 = vmax.xlane.f32.xlu0 %v7875_v14 }
0x1180   :  { %8698 = vmax.xlane.f32.xlu1 %v8697_v52 }
0x1183   :  { %8032 = vmax.xlane.f32.xlu0 %v8031_v40 }
0x1187   :  { %8044 = vmax.xlane.f32.xlu0 %v8043_v39 }
0x118b   :  { %8056 = vmax.xlane.f32.xlu0 %v8055_v29 }
0x118f   :  { %8794 = vmax.xlane.f32.xlu0 %v8793_v42  ;;  %v7868_v10 = vpop.xlane.xlu0 %7867  ;;  %v16037_v35 = vpop.xlane.xlu1 %8035 }
0x1190   :  { %v8058_v34 = vmax.f32 %v7868_v10, -3e+38 }
0x1192   :  { %v8189_v19 = vrot.slane %v8058_v34, %v10004_v17 }
0x1193   :  { %v7880_v33 = vpop.xlane.xlu0 %7879  ;;  %v7871_v1 = vpop.xlane.xlu1 %7870 }
0x1194   :  { %v8059_v16 = vmax.f32 %v7871_v1, -3e+38  ;;  %v8062_v58 = vmax.f32 %v7880_v33, -3e+38 }
0x1196   :  { %v8193_v57 = vrot.slane %v8059_v16, %v10006_v21  ;;  %v8208_v61 = vrot.slane %v8062_v58, %v10004_v17 }
0x1197   :  { %v7892_v48 = vpop.xlane.xlu0 %7891  ;;  %v7883_v4 = vpop.xlane.xlu1 %7882 }
0x1198   :  { %v16044_v20 = vsel %vm18341_vm7, %v8193_v57, %v8189_v19  ;;  %v8063_v9 = vmax.f32 %v7883_v4, -3e+38  ;;  %v8066_v7 = vmax.f32 %v7892_v48, -3e+38  ;;  %vm18357_vm7 = vcmask 195712  }
0x119a   :  { %v8212_v47 = vrot.slane %v8063_v9, %v10006_v21  ;;  %v8227_v32 = vrot.slane %v8066_v7, %v10004_v17 }
0x119b   :  { %v7904_v31 = vpop.xlane.xlu0 %7903  ;;  %v7895_v55 = vpop.xlane.xlu1 %7894 }
0x119c   :  { %v16051_v12 = vsel %vm18342_vm2, %v8212_v47, %v8208_v61  ;;  %v8067_v62 = vmax.f32 %v7895_v55, -3e+38  ;;  %v8070_v41 = vmax.f32 %v7904_v31, -3e+38  ;;  %vm18358_vm2 = vmmov %vm18357_vm7 }
0x119e   :  { %v8231_v2 = vrot.slane %v8067_v62, %v10006_v21  ;;  %v8246_v28 = vrot.slane %v8070_v41, %v10004_v17 }
0x119f   :  { %v7916_v59 = vpop.xlane.xlu0 %7915  ;;  %v7907_v26 = vpop.xlane.xlu1 %7906 }
0x11a0   :  { %v16058_v6 = vsel %vm18343_vm10, %v8231_v2, %v8227_v32  ;;  %v8071_v56 = vmax.f32 %v7907_v26, -3e+38  ;;  %v8074_v44 = vmax.f32 %v7916_v59, -3e+38  ;;  %vm18359_vm10 = vmmov %vm18358_vm2 }
0x11a2   :  { %v8250_v53 = vrot.slane %v8071_v56, %v10006_v21  ;;  %v8265_v0 = vrot.slane %v8074_v44, %v10004_v17 }
0x11a3   :  { %v7928_v54 = vpop.xlane.xlu0 %7927  ;;  %v7919_v5 = vpop.xlane.xlu1 %7918 }
0x11a4   :  { %v16063_v36 = vsel %vm18344_vm5, %v8250_v53, %v8246_v28  ;;  %v8075_v27 = vmax.f32 %v7919_v5, -3e+38  ;;  %v8078_v38 = vmax.f32 %v7928_v54, -3e+38  ;;  %vm18360_vm5 = vcmask 261312  }
0x11a6   :  { %v8269_v46 = vrot.slane %v8075_v27, %v10006_v21  ;;  %v8284_v63 = vrot.slane %v8078_v38, %v10004_v17 }
0x11a7   :  { %v7940_v43 = vpop.xlane.xlu0 %7939  ;;  %v7931_v24 = vpop.xlane.xlu1 %7930 }
0x11a8   :  { %v16070_v52 = vsel %vm18345_vm11, %v8269_v46, %v8265_v0  ;;  %v8079_v14 = vmax.f32 %v7931_v24, -3e+38  ;;  %v8082_v40 = vmax.f32 %v7940_v43, -3e+38  ;;  %vm18361_vm11 = vmmov %vm18360_vm5 }
0x11aa   :  { %v8288_v25 = vrot.slane %v8079_v14, %v10006_v21  ;;  %v8303_v37 = vrot.slane %v8082_v40, %v10004_v17 }
0x11ab   :  { %v7952_v39 = vpop.xlane.xlu0 %7951  ;;  %v7943_v3 = vpop.xlane.xlu1 %7942 }
0x11ac   :  { %v16075_v29 = vsel %vm18346_vm6, %v8288_v25, %v8284_v63  ;;  %v8083_v15 = vmax.f32 %v7943_v3, -3e+38  ;;  %v8086_v42 = vmax.f32 %v7952_v39, -3e+38  ;;  %vm18362_vm6 = vcmask 1041409  }
0x11ae   :  { %v8307_v10 = vrot.slane %v8083_v15, %v10006_v21  ;;  %v8322_v16 = vrot.slane %v8086_v42, %v10004_v17 }
0x11af   :  { %v7964_v51 = vpop.xlane.xlu0 %7963  ;;  %v7955_v34 = vpop.xlane.xlu1 %7954 }
0x11b0   :  { %v16080_v33 = vsel %vm18347_vm8, %v8307_v10, %v8303_v37  ;;  %v8087_v1 = vmax.f32 %v7955_v34, -3e+38  ;;  %v8090_v19 = vmax.f32 %v7964_v51, -3e+38  ;;  %v8114_v10 = vmax.f32 %v16037_v35, -3e+38  ;;  %vm18363_vm8 = vmmov %vm18358_vm2 }
0x11b2   :  { %v8326_v58 = vrot.slane %v8087_v1, %v10006_v21  ;;  %v8341_v45 = vrot.slane %v8090_v19, %v10004_v17 }
0x11b3   :  { %v7976_v57 = vpop.xlane.xlu0 %7975  ;;  %v7967_v48 = vpop.xlane.xlu1 %7966 }
0x11b4   :  { %v16085_v4 = vsel %vm18348_vm15, %v8326_v58, %v8322_v16  ;;  %v8091_v9 = vmax.f32 %v7967_v48, -3e+38  ;;  %v8094_v61 = vmax.f32 %v7976_v57, -3e+38  ;;  %vm18364_vm15 = vmmov %vm18358_vm2 }
0x11b6   :  { %v8345_v7 = vrot.slane %v8091_v9, %v10006_v21  ;;  %v8360_v32 = vrot.slane %v8094_v61, %v10004_v17  ;;  %v8455_v9 = vrot.slane %v8114_v10, %v10004_v17 }
0x11b7   :  { %v7988_v47 = vpop.xlane.xlu0 %7987  ;;  %v7979_v31 = vpop.xlane.xlu1 %7978 }
0x11b8   :  { %v16090_v55 = vsel %vm18349_vm4, %v8345_v7, %v8341_v45  ;;  %v8095_v62 = vmax.f32 %v7979_v31, -3e+38  ;;  %v8098_v41 = vmax.f32 %v7988_v47, -3e+38  ;;  %vm18365_vm4 = vmmov %vm18360_vm5 }
0x11ba   :  { %v8364_v2 = vrot.slane %v8095_v62, %v10006_v21  ;;  %v8379_v28 = vrot.slane %v8098_v41, %v10004_v17 }
0x11bc   :  { %v8000_v49 = vpop.xlane.xlu0 %7999  ;;  %v16095_v26 = vsel %vm18350_vm1, %v8364_v2, %v8360_v32  ;;  %vm18366_vm1 = vcmask 1042434  }
0x11bd   :  { %v8102_v44 = vmax.f32 %v8000_v49, -3e+38 }
0x11be   :  { %v7991_v59 = vpop.xlane.xlu1 %7990 }
0x11bf   :  { %v8099_v56 = vmax.f32 %v7991_v59, -3e+38  ;;  %v8398_v0 = vrot.slane %v8102_v44, %v10004_v17 }
0x11c1   :  { %v8383_v53 = vrot.slane %v8099_v56, %v10006_v21 }
0x11c2   :  { %v8012_v54 = vpop.xlane.xlu0 %8011 }
0x11c3   :  { %v8003_v5 = vpop.xlane.xlu1 %8002  ;;  %v16100_v27 = vsel %vm18351_vm13, %v8383_v53, %v8379_v28  ;;  %v8106_v38 = vmax.f32 %v8012_v54, -3e+38  ;;  %vm18367_vm13 = vmmov %vm18358_vm2 }
0x11c4   :  { %v8103_v60 = vmax.f32 %v8003_v5, -3e+38 }
0x11c5   :  { %v8417_v40 = vrot.slane %v8106_v38, %v10004_v17 }
0x11c6   :  { %v8402_v46 = vrot.slane %v8103_v60, %v10006_v21 }
0x11c8   :  { %v8024_v43 = vpop.xlane.xlu0 %8023  ;;  %v16105_v14 = vsel %vm18352_vm0, %v8402_v46, %v8398_v0  ;;  %vm18368_vm0 = vmmov %vm18358_vm2 }
0x11c9   :  { %v8015_v24 = vpop.xlane.xlu1 %8014  ;;  %v8110_v25 = vmax.f32 %v8024_v43, -3e+38 }
0x11ca   :  { %v8107_v63 = vmax.f32 %v8015_v24, -3e+38 }
0x11cb   :  { %v8436_v51 = vrot.slane %v8110_v25, %v10004_v17 }
0x11cc   :  { %v8421_v39 = vrot.slane %v8107_v63, %v10006_v21  ;;  %v8048_v3 = vpop.xlane.xlu0 %8047 }
0x11cd   :  { %v8027_v15 = vpop.xlane.xlu1 %8026  ;;  %v8118_v34 = vmax.f32 %v8048_v3, -3e+38 }
0x11ce   :  { %v16110_v37 = vsel %vm18353_vm14, %v8421_v39, %v8417_v40  ;;  %v8111_v42 = vmax.f32 %v8027_v15, -3e+38  ;;  %vm18369_vm14 = vmmov %vm18368_vm0 }
0x11cf   :  { %v8474_v45 = vrot.slane %v8118_v34, %v10004_v17 }
0x11d0   :  { %v8440_v1 = vrot.slane %v8111_v42, %v10006_v21  ;;  %v8039_v16 = vpop.xlane.xlu0 %8038 }
0x11d1   :  { %v8051_v19 = vpop.xlane.xlu1 %8050  ;;  %v8115_v57 = vmax.f32 %v8039_v16, -3e+38 }
0x11d2   :  { %v16116_v58 = vsel %vm18354_vm12, %v8440_v1, %v8436_v51  ;;  %v8119_v48 = vmax.f32 %v8051_v19, -3e+38  ;;  %vm18370_vm12 = vmmov %vm18365_vm4 }
0x11d3   :  { %v8459_v61 = vrot.slane %v8115_v57, %v10006_v21 }
0x11d4   :  { %v8478_v35 = vrot.slane %v8119_v48, %v10006_v21  ;;  %v7874_v7 = vpop.xlane.xlu0 %7873 }
0x11d5   :  { %v8042_v47 = vpop.xlane.xlu1 %8041  ;;  %v8460_v31 = vsel %vm18355_vm9, %v8459_v61, %v8455_v9  ;;  %v8060_v15 = vmax.f32 %v7874_v7, -3e+38  ;;  %vm18371_vm9 = vmmov %vm18365_vm4 }
0x11d6   :  { %v16124_v62 = vsel %vm18356_vm3, %v8478_v35, %v8474_v45  ;;  %v8116_v32 = vmax.f32 %v8042_v47, -3e+38  ;;  %vm18372_vm3 = vmmov %vm18368_vm0 }
0x11d7   :  { %v8198_v57 = vrot.slane %v8060_v15, %v10008_v22 }
0x11d8   :  { %v8464_v41 = vrot.slane %v8116_v32, %v10008_v22  ;;  %v7886_v2 = vpop.xlane.xlu0 %7885 }
0x11d9   :  { %v16127_v49 = vpop.xlane.xlu1 %8053  ;;  %v8064_v48 = vmax.f32 %v7886_v2, -3e+38 }
0x11da   :  { %v16130_v59 = vsel %vm18357_vm7, %v8464_v41, %v8460_v31  ;;  %vm18373_vm7 = vcmask 1043459  }
0x11dc   :  { %v7898_v17 = vpop.xlane.xlu0 %7897 }
0x11dd   :  { %v7889_v56 = vpop.xlane.xlu1 %7888  ;;  %v8068_v9 = vmax.f32 %v7898_v17, -3e+38 }
0x11de   :  { %v8065_v61 = vmax.f32 %v7889_v56, -3e+38  ;;  %v16165_v56 = vsel %vm18363_vm8, %v8198_v57, %v16044_v20 }
0x11e0   :  { %v7910_v28 = vpop.xlane.xlu0 %7909 }
0x11e1   :  { %v7901_v21 = vpop.xlane.xlu1 %7900  ;;  %v8072_v17 = vmax.f32 %v7910_v28, -3e+38 }
0x11e4   :  { %v16132_v44 = vpop.xlane.xlu0 %7921 }
0x11e5   :  { %v16134_v53 = vpop.xlane.xlu1 %7912 }
0x11e6   :  { %v8073_v57 = vmax.f32 %v16134_v53, -3e+38 }
0x11e8   :  { %v16136_v54 = vpop.xlane.xlu0 %7933 }
0x11e9   :  { %v16138_v5 = vpop.xlane.xlu1 %7924 }
0x11ec   :  { %v16140_v60 = vpop.xlane.xlu0 %7945 }
0x11ed   :  { %v16142_v0 = vpop.xlane.xlu1 %7936 }
0x11f0   :  { %v16144_v38 = vpop.xlane.xlu0 %7957 }
0x11f1   :  { %v16146_v46 = vpop.xlane.xlu1 %7948 }
0x11f4   :  { %v7970_v43 = vpop.xlane.xlu0 %7969 }
0x11f5   :  { %v16148_v24 = vpop.xlane.xlu1 %7960  ;;  %v8092_v63 = vmax.f32 %v7970_v43, -3e+38 }
0x11f7   :  { %v8350_v42 = vrot.slane %v8092_v63, %v10008_v22 }
0x11f8   :  { %v7982_v40 = vpop.xlane.xlu0 %7981 }
0x11f9   :  { %v7973_v25 = vpop.xlane.xlu1 %7972  ;;  %v8096_v39 = vmax.f32 %v7982_v40, -3e+38  ;;  %v8351_v35 = vsel %vm18358_vm2, %v8350_v42, %v16090_v55  ;;  %v8069_v55 = vmax.f32 %v7901_v21, -3e+38  ;;  %v8120_v21 = vmax.f32 %v16127_v49, -3e+38  ;;  %vm18374_vm2 = vmmov %vm18365_vm4 }
0x11fa   :  { %v8093_v3 = vmax.f32 %v7973_v25, -3e+38  ;;  %v8217_v25 = vrot.slane %v8064_v48, %v10008_v22  ;;  %v8080_v48 = vmax.f32 %v16136_v54, -3e+38  ;;  %vm18379_vm8 = vmmov %vm18374_vm2 }
0x11fb   :  { %v8369_v10 = vrot.slane %v8096_v39, %v10008_v22  ;;  %v8236_v39 = vrot.slane %v8068_v9, %v10008_v22 }
0x11fc   :  { %v7994_v51 = vpop.xlane.xlu0 %7993  ;;  %v8355_v1 = vrot.slane %v8093_v3, %v10010_v23 }
0x11fd   :  { %v7985_v34 = vpop.xlane.xlu1 %7984  ;;  %v8100_v16 = vmax.f32 %v7994_v51, -3e+38  ;;  %v8370_v7 = vsel %vm18359_vm10, %v8369_v10, %v16095_v26  ;;  %v8222_v10 = vrot.slane %v8065_v61, %v10010_v23  ;;  %v8077_v61 = vmax.f32 %v16138_v5, -3e+38  ;;  %vm18375_vm10 = vmmov %vm18368_vm0 }
0x11fe   :  { %v8097_v19 = vmax.f32 %v7985_v34, -3e+38  ;;  %v8356_v41 = vsel %vm18360_vm5, %v8355_v1, %v8351_v35  ;;  %v8255_v1 = vrot.slane %v8072_v17, %v10008_v22  ;;  %vm18376_vm5 = vmmov %vm18374_vm2 }
0x11ff   :  { %v8388_v47 = vrot.slane %v8100_v16, %v10008_v22  ;;  %v8076_v16 = vmax.f32 %v16132_v44, -3e+38  ;;  %v8279_v17 = vrot.slane %v8077_v61, %v10010_v23 }
0x1200   :  { %v8374_v45 = vrot.slane %v8097_v19, %v10010_v23  ;;  %v8006_v31 = vpop.xlane.xlu0 %8005 }
0x1201   :  { %v7997_v32 = vpop.xlane.xlu1 %7996  ;;  %v8104_v63 = vmax.f32 %v8006_v31, -3e+38  ;;  %v8389_v3 = vsel %vm18364_vm15, %v8388_v47, %v16100_v27  ;;  %v8241_v27 = vrot.slane %v8069_v55, %v10010_v23  ;;  %v8237_v31 = vsel %vm18369_vm14, %v8236_v39, %v16058_v6  ;;  %vm18380_vm15 = vmmov %vm18368_vm0 }
0x1202   :  { %v8375_v43 = vsel %vm18361_vm11, %v8374_v45, %v8370_v7  ;;  %v8101_v2 = vmax.f32 %v7997_v32, -3e+38  ;;  %v8218_v45 = vsel %vm18367_vm13, %v8217_v25, %v16051_v12  ;;  %v8256_v12 = vsel %vm18372_vm3, %v8255_v1, %v16063_v36  ;;  %vm18377_vm11 = vmmov %vm18368_vm0 }
0x1203   :  { %v8497_v40 = vsel %vm18362_vm6, %v8375_v43, %v8356_v41  ;;  %v8407_v15 = vrot.slane %v8104_v63, %v10008_v22  ;;  %v8223_v53 = vsel %vm18370_vm12, %v8222_v10, %v8218_v45  ;;  %v8274_v5 = vrot.slane %v8076_v16, %v10008_v22 }
0x1204   :  { %v8393_v26 = vrot.slane %v8101_v2, %v10010_v23  ;;  %v8018_v42 = vpop.xlane.xlu0 %8017  ;;  %v8084_v41 = vmax.f32 %v16140_v60, -3e+38  ;;  %v8242_v43 = vsel %vm18374_vm2, %v8241_v27, %v8237_v31  ;;  %v8260_v63 = vrot.slane %v8073_v57, %v10010_v23  ;;  %v18383_v57 = vld [vmem:[#allocation91_spill] sm:$0xff] }
0x1205   :  { %v8009_v28 = vpop.xlane.xlu1 %8008  ;;  %v8108_v20 = vmax.f32 %v8018_v42, -3e+38  ;;  %v8408_v35 = vsel %vm18368_vm0, %v8407_v15, %v16105_v14  ;;  %v8293_v6 = vrot.slane %v8080_v48, %v10008_v22  ;;  %v8085_v25 = vmax.f32 %v16146_v46, -3e+38 }
0x1206   :  { %v8394_v51 = vsel %vm18365_vm4, %v8393_v26, %v8389_v3  ;;  %v8105_v34 = vmax.f32 %v8009_v28, -3e+38  ;;  %v8275_v42 = vsel %vm18377_vm11, %v8274_v5, %v16070_v52  ;;  %v8312_v28 = vrot.slane %v8084_v41, %v10008_v22  ;;  %vm18381_vm4 = vmmov %vm18374_vm2 }
0x1207   :  { %v8498_v19 = vsel %vm18366_vm1, %v8394_v51, %v8497_v40  ;;  %v8426_v44 = vrot.slane %v8108_v20, %v10008_v22  ;;  %v8081_v40 = vmax.f32 %v16142_v0, -3e+38  ;;  %v8088_v10 = vmax.f32 %v16144_v38, -3e+38  ;;  %vm18382_vm1 = vmmov %vm18374_vm2 }
0x1208   :  { %v8412_v9 = vrot.slane %v8105_v34, %v10010_v23  ;;  %v8030_v7 = vpop.xlane.xlu0 %8029  ;;  %vm18378_vm6 = vcmask 1044484   ;;  %v8089_v51 = vmax.f32 %v16148_v24, -3e+38  ;;  %v8294_v34 = vsel %vm18380_vm15, %v8293_v6, %v16075_v29  ;;  %vm18384_vm13 = vmmov %vm18382_vm1 }
0x1209   :  { %v8021_v47 = vpop.xlane.xlu1 %8020  ;;  %v8427_v36 = vsel %vm18375_vm10, %v8426_v44, %v16110_v37  ;;  %v8112_v55 = vmax.f32 %v8030_v7, -3e+38  ;;  %v8261_v37 = vsel %vm18379_vm8, %v8260_v63, %v8256_v12  ;;  %v8280_v1 = vsel %vm18381_vm4, %v8279_v17, %v8275_v42  ;;  %v18388_v7 = vld [vmem:[#allocation56_spill] sm:$0xff]  ;;  %vm18391_vm2 = vmmov %vm18368_vm0 }
0x120a   :  { %v8413_v54 = vsel %vm18371_vm9, %v8412_v9, %v8408_v35  ;;  %v8109_v32 = vmax.f32 %v8021_v47, -3e+38  ;;  %v8298_v52 = vrot.slane %v8081_v40, %v10010_v23  ;;  %v8313_v9 = vsel %vm18368_vm0, %v8312_v28, %v16080_v33  ;;  %vm18394_vm11 = vmmov %vm18382_vm1 }
0x120b   :  { %v8499_v14 = vsel %vm18373_vm7, %v8413_v54, %v8498_v19  ;;  %v8445_v16 = vrot.slane %v8112_v55, %v10008_v22  ;;  %v8317_v19 = vrot.slane %v8085_v25, %v10010_v23  ;;  %v8331_v29 = vrot.slane %v8088_v10, %v10008_v22  ;;  %vm18390_vm7 = vmmov %vm18382_vm1 }
0x120c   :  { %v8431_v2 = vrot.slane %v8109_v32, %v10010_v23  ;;  %v7877_v26 = vpop.xlane.xlu0 %7876  ;;  %vm18385_vm14 = vcmask 1041409   ;;  %vm18386_vm12 = vcmask 1047559   ;;  %v8336_v35 = vrot.slane %v8089_v51, %v10010_v23  ;;  %vm18397_vm8 = vmmov %vm18368_vm0 }
0x120d   :  { %v8699_v60 = vpop.xlane.xlu1 %8698  ;;  %v8061_v3 = vmax.f32 %v7877_v26, -3e+38  ;;  %vm18387_vm9 = vcmask 1042434   ;;  %vm18389_vm3 = vcmp.eq.s32.totalorder %v18388_v7, 1  ;;  %v8299_v31 = vsel %vm18390_vm7, %v8298_v52, %v8294_v34  ;;  %vm18401_vm0 = vmmov %vm18386_vm12  ;;  %v18412_v34 = vld [vmem:[#allocation35_spill] sm:$0xff] }
0x120e   :  { %v8432_v39 = vsel %vm18376_vm5, %v8431_v2, %v8427_v36  ;;  %v8827_v15 = vmax.f32 %v8699_v60, -3e+38  ;;  %v8446_v33 = vsel %vm18391_vm2, %v8445_v16, %v16116_v58  ;;  %vm18392_vm10 = vcmask 1043459   ;;  %vm18393_vm5 = vmmov %vm18382_vm1 }
0x120f   :  { %v8500_v0 = vsel %vm18378_vm6, %v8432_v39, %v8499_v14  ;;  %v8203_v20 = vrot.slane %v8061_v3, %v10010_v23  ;;  %v8318_v5 = vsel %vm18394_vm11, %v8317_v19, %v8313_v9  ;;  %v18395_v14 = vld [vmem:[#allocation94_spill] sm:$0xff]  ;;  %v8332_v6 = vsel %vm18397_vm8, %v8331_v29, %v16085_v4  ;;  %vm18409_vm7 = vmmov %vm18391_vm2 }
0x1210   :  { %v9074_v46 = vrot.slane %v8827_v15, %v10010_v23  ;;  %v8033_v38 = vpop.xlane.xlu0 %8032  ;;  %vm18398_vm15 = vcmask 1045509   ;;  %v8337_v17 = vsel %vm18382_vm1, %v8336_v35, %v8332_v6  ;;  %v8483_v36 = vrot.slane %v8120_v21, %v10008_v22  ;;  %v18402_v4 = vld [vmem:[#allocation34_spill] sm:$0xff]  ;;  %vm18410_vm2 = vmmov %vm18382_vm1 }
0x1211   :  { %v8204_v27 = vsel %vm18382_vm1, %v8203_v20, %v16165_v56  ;;  %v8113_v24 = vmax.f32 %v8033_v38, -3e+38  ;;  %vm18399_vm4 = vmmov %vm18398_vm15  ;;  %v18407_v22 = vld [vmem:[#allocation70_spill] sm:$0xff]  ;;  %v18414_v38 = vld [vmem:[#allocation95_spill] sm:$0xff] }
0x1212   :  { %v9075_v48 = vsel %vm18384_vm13, %v9074_v46, %v18383_v57  ;;  %v8490_v45 = vsel %vm18385_vm14, %v8223_v53, %v8204_v27  ;;  %vm18400_vm13 = vcmask 1046534   ;;  %vm18403_vm14 = vcmp.eq.s32.totalorder %v18402_v4, 1  ;;  %vm18415_vm11 = vmmov %vm18382_vm1 }
0x1213   :  { %v9234_v61 = vsel %vm18386_vm12, %v9075_v48, %v15889_v8  ;;  %v8491_v44 = vsel %vm18387_vm9, %v8242_v43, %v8490_v45  ;;  %v8450_v56 = vrot.slane %v8113_v24, %v10010_v23  ;;  %v18396_v43 = vmax.f32 %v18395_v14, 0.0  ;;  %vm18404_vm12 = vmmov %vm18382_vm1  ;;  %v18420_v48 = vld [vmem:[#allocation52_spill] sm:$0xff]  ;;  %v18422_v45 = vld [vmem:[#allocation87_spill] sm:$0xff] }
0x1214   :  { %v9244_v47 = vsel %vm18389_vm3, %v9234_v61, 0.0  ;;  %v8045_v53 = vpop.xlane.xlu0 %8044  ;;  %v8492_v32 = vsel %vm18392_vm10, %v8261_v37, %v8491_v44  ;;  %vm18405_vm9 = vmmov %vm18400_vm13  ;;  %vm18406_vm3 = vcmask 261120   ;;  %v18408_v49 = vmax.f32 %v18407_v22, 0.0 }
0x1215   :  { %v9325_v54 = vadd.f32 %v16039_v30, %v9244_v47  ;;  %v8451_v8 = vsel %vm18393_vm5, %v8450_v56, %v8446_v33  ;;  %v8117_v12 = vmax.f32 %v8045_v53, -3e+38  ;;  %v8493_v41 = vsel %vm18378_vm6, %v8280_v1, %v8492_v32  ;;  %vm18411_vm10 = vmmov %vm18401_vm0 }
0x1216   :  { %v8494_v58 = vsel %vm18398_vm15, %v8299_v31, %v8493_v41  ;;  %v8501_v30 = vsel %vm18399_vm4, %v8451_v8, %v8500_v0  ;;  %v8484_v37 = vsel %vm18409_vm7, %v8483_v36, %v16124_v62  ;;  %vm18413_vm5 = vcmp.eq.s32.totalorder %v18412_v34, 1  ;;  %vm18416_vm6 = vmmov %vm18406_vm3  ;;  %v18417_v62 = vld [vmem:[#allocation90_spill] sm:$0xff] }
0x1217   :  { %v9335_v63 = vadd.f32 %v9325_v54, %v18396_v43  ;;  %v8469_v2 = vrot.slane %v8117_v12, %v10010_v23  ;;  %v8495_v40 = vsel %vm18400_vm13, %v8318_v5, %v8494_v58  ;;  %v18418_v27 = vmax.f32 %v18417_v62, 0.0  ;;  %vm18419_vm8 = vmmov %vm18401_vm0 }
0x1218   :  { %v8057_v26 = vpop.xlane.xlu0 %8056  ;;  %v8496_v60 = vsel %vm18401_vm0, %v8337_v17, %v8495_v40  ;;  %vm18421_vm15 = vcmp.eq.s32.totalorder %v18420_v48, 1  ;;  %v18423_v61 = vmax.f32 %v18422_v45, 0.0  ;;  %vm18424_vm4 = vmmov %vm18406_vm3 }
0x1219   :  { %v9337_v55 = vmax.f32 %v9335_v63, 0.0  ;;  %v8121_v25 = vmax.f32 %v8057_v26, -3e+38  ;;  %v8506_v39 = vsel %vm18403_vm14, %v8496_v60, 0.0  ;;  %v8470_v3 = vsel %vm18404_vm12, %v8469_v2, %v16130_v59 }
0x121a   :  { %v9281_v42 = vadd.f32 %v16046_v13, %v8506_v39  ;;  %v8502_v28 = vsel %vm18405_vm9, %v8470_v3, %v8501_v30 }
0x121b   :  { %v9343_v15 = vmax.f32 %v9337_v55, 0.0  ;;  %v8488_v10 = vrot.slane %v8121_v25, %v10010_v23 }
0x121c   :  { %v9331_v21 = vadd.f32 %v9281_v42, %v18408_v49  ;;  %v8795_v0 = vpop.xlane.xlu0 %8794 }
0x121d   :  { %9345 = vst.msk [vmem:[#allocation8] sm:$0xff] %vm18406_vm3, %v9343_v15  ;;  %v8859_v51 = vmax.f32 %v8795_v0, -3e+38  ;;  %v8489_v20 = vsel %vm18410_vm2, %v8488_v10, %v8484_v37 }
0x121e   :  { %v9333_v59 = vmax.f32 %v9331_v21, 0.0  ;;  %v8503_v46 = vsel %vm18411_vm10, %v8489_v20, %v8502_v28 }
0x121f   :  { %v9226_v13 = vrot.slane %v8859_v51, %v10010_v23  ;;  %v8507_v1 = vsel %vm18413_vm5, %v8503_v46, 0.0 }
0x1220   :  { %v9339_v52 = vmax.f32 %v9333_v59, 0.0  ;;  %v9284_v16 = vadd.f32 %v16053_v11, %v8507_v1 }
0x1221   :  { %v9227_v19 = vsel %vm18415_vm11, %v9226_v13, %v18414_v38 }
0x1222   :  { %9341 = vst.msk [vmem:[#allocation7] sm:$0xff] %vm18416_vm6, %v9339_v52  ;;  %v9332_v24 = vadd.f32 %v9284_v16, %v18418_v27  ;;  %v9241_v57 = vsel %vm18419_vm8, %v9227_v19, %v15905_v18 }
0x1223   :  { %v9245_v23 = vsel %vm18421_vm15, %v9241_v57, 0.0 }
0x1224   :  { %v9334_v9 = vmax.f32 %v9332_v24, 0.0  ;;  %v9328_v29 = vadd.f32 %v16065_v50, %v9245_v23 }
0x1226   :  { %v9340_v11 = vmax.f32 %v9334_v9, 0.0  ;;  %v9336_v35 = vadd.f32 %v9328_v29, %v18423_v61 }
0x1228   :  { %9342 = vst.msk [vmem:[#allocation7 + $0x8] sm:$0xff] %vm18424_vm4, %v9340_v11  ;;  %v9338_v44 = vmax.f32 %v9336_v35, 0.0 }
0x1229   :  { %9813 = shalt.err (!%p9810_p6)
}
0x122a   :  { %s9814_s20 = scalar_lea.hbm %s16333_s12, 256 }
0x122b   :  { %p9815_p7 = scmp.ne.s32.totalorder %s16333_s12, %s9814_s20  ;;  %p9818_p8 = scmp.lt.u32.totalorder %s9814_s20, %s16333_s12 }
0x122d   :  { %p9820_p9 = pnand %p9818_p8, %p9815_p7 }
0x122f   :  { %9823 = shalt.err (!%p9820_p9)
}
0x1230   :  { %9358 = dma.vmem_to_hbm [thread:$0]  %s9353_s9, 256, %s16333_s12, [#allocation4], %s9855_s18, %s9855_s18, %s9856_s19   ;;  %v9344_v18 = vmax.f32 %v9338_v44, 0.0  ;;  %vm18425_vm1 = vmmov %vm18406_vm3 }
0x1231   :  { %s9824_s23 = scalar_lea.vmem %s9365_s26, 256  ;;  %p9829_p11 = scmp.lt.s32.totalorder %s9365_s26, %s9365_s26 }
0x1232   :  { %9346 = vst.msk [vmem:[#allocation8 + $0x8] sm:$0xff] %vm18425_vm1, %v9344_v18  ;;  %p9825_p10 = scmp.ne.s32.totalorder %s9365_s26, %s9824_s23  ;;  %p9830_p12 = scmp.lt.s32.totalorder %s9824_s23, %s9824_s23 }
0x1234   :  { %p9831_p13 = por %p9830_p12, %p9829_p11 }
0x1236   :  { %p9832_p0 = pnand %p9831_p13, %p9825_p10 }
0x1238   :  { %9835 = shalt.err (!%p9832_p0)
}
0x1239   :  { %s9836_s0 = scalar_lea.hbm %s16334_s13, 256 }
0x123a   :  { %p9837_p1 = scmp.ne.s32.totalorder %s16334_s13, %s9836_s0  ;;  %p9840_p2 = scmp.lt.u32.totalorder %s9836_s0, %s16334_s13 }
0x123c   :  { %p9842_p3 = pnand %p9840_p2, %p9837_p1 }
0x123e   :  { %9845 = shalt.err (!%p9842_p3)
}
0x123f   :  { %9370 = dma.vmem_to_hbm [thread:$0]  %s9365_s26, 256, %s16334_s13, [#allocation9], %s9855_s18, %s9855_s18, %s9856_s19  }
0x1240   :  { %9850 = dma.done.wait [#allocation4], 256  }
0x1241   :  { %9851 = vsyncadd [#allocation4], 4294967040 }
0x1242   :  { %9852 = dma.done.wait [#allocation9], 256  }
0x1243   :  { %9853 = vsyncadd [#allocation9], 4294967040 }
0x1244   :  { %9377 = vsyncpa [#allocation3], 1 }
0x1245   :  { %9378 = vsyncpa [#allocation6], 1 }
0x1246   :  { %9379 = vsyncpa [#allocation4], 1 }
0x1247   :  { %9380 = vsyncpa [#allocation9], 1 }

</bundles_post_ra>
